<compile_context>
chip_gen: v7x
topology: tpu7x:2x2x1
jax: 0.10.0
libtpu: 0.0.40
codegen_flags: <defaults>
</compile_context>

<pallas_src>
import jax
import jax.numpy as jnp
import numpy as np
from jax import lax
from jax.experimental import pallas as pl
from jax.experimental.pallas import tpu as pltpu


_BN_EPS = 1e-5


# ----------------------------------------------------------------------------
# helpers
# ----------------------------------------------------------------------------
def _round_up(x, m):
    return ((x + m - 1) // m) * m


def _fold_bn(p):
    """Fold BatchNorm into a per-channel (scale, bias) affine."""
    scale = p["gamma"] / jnp.sqrt(p["var"] + _BN_EPS)
    bias = p["beta"] - p["mean"] * scale
    return scale, bias


def _choose_tm(m, max_tm=2048):
    """Large M tile to amortize per-grid-step overhead, but keep >=2 steps so
    both TensorCores of a megacore get work."""
    m8 = _round_up(max(m, 8), 8)
    if m8 <= 2 * max_tm:
        return _round_up((m8 + 1) // 2, 8)
    return max_tm


# ----------------------------------------------------------------------------
# Kernel 1: im2col GEMM + bias + ReLU (used for conv_7x7)
# ----------------------------------------------------------------------------
def _gemm_bias_relu_kernel(p_ref, w_ref, b_ref, o_ref):
    acc = jnp.dot(p_ref[...], w_ref[...], preferred_element_type=jnp.float32)
    o_ref[...] = jnp.maximum(acc + b_ref[...], 0.0).astype(o_ref.dtype)


def gemm_bias_relu(patches, w, bias, *, out_dtype=jnp.bfloat16, max_tm=2048):
    """[M, K] bf16 @ [K, Cout] bf16 (BN scale folded in) + bias, ReLU."""
    M, K = patches.shape
    Cout = w.shape[1]
    tm = _choose_tm(M, max_tm)
    Mp = _round_up(M, tm)
    if Mp != M:
        patches = jnp.pad(patches, ((0, Mp - M), (0, 0)))

    out = pl.pallas_call(
        _gemm_bias_relu_kernel,
        out_shape=jax.ShapeDtypeStruct((Mp, Cout), out_dtype),
        grid_spec=pltpu.PrefetchScalarGridSpec(
            num_scalar_prefetch=0,
            grid=(Mp // tm,),
            in_specs=[
                pl.BlockSpec((tm, K), lambda i: (i, 0)),     # streamed patch tile
                pl.BlockSpec((K, Cout), lambda i: (0, 0)),   # resident folded weight
                pl.BlockSpec((1, Cout), lambda i: (0, 0)),   # resident folded bias
            ],
            out_specs=pl.BlockSpec((tm, Cout), lambda i: (i, 0)),
        ),
        compiler_params=pltpu.CompilerParams(
            dimension_semantics=("parallel",),
            vmem_limit_bytes=32 * 1024 * 1024,
        ),
    )(patches, w, bias)
    return out[:M]


def _im2col(x_nhwc, kh, kw, stride, pad):
    N, H, W, C = x_nhwc.shape
    xp = jnp.pad(x_nhwc, ((0, 0), (pad, pad), (pad, pad), (0, 0)))
    OH = (H + 2 * pad - kh) // stride + 1
    OW = (W + 2 * pad - kw) // stride + 1
    cols = []
    for i in range(kh):
        for j in range(kw):
            cols.append(xp[:, i:i + stride * OH:stride, j:j + stride * OW:stride, :])
    patches = jnp.concatenate(cols, axis=-1)               # [N, OH, OW, kh*kw*C]
    return patches.reshape(N * OH * OW, kh * kw * C), OH, OW


def conv7x7_im2col(x_nhwc, p):
    """conv_7x7 (k=7, s=2, p=3) + BN + ReLU via an im2col GEMM Pallas kernel."""
    N = x_nhwc.shape[0]
    Cout, Cin, KH, KW = p["w"].shape
    scale, bias = _fold_bn(p)
    # weight -> [KH*KW*Cin, Cout] matching (kh, kw, cin) patch ordering, BN folded
    w = (jnp.transpose(p["w"], (2, 3, 1, 0)).reshape(KH * KW * Cin, Cout)
         * scale[None, :])

    patches, OH, OW = _im2col(x_nhwc.astype(jnp.bfloat16), KH, KW, 2, 3)
    K = patches.shape[1]
    Kp = _round_up(K, 16)                                  # bf16 sublane packing
    if Kp != K:
        patches = jnp.pad(patches, ((0, 0), (0, Kp - K)))
        w = jnp.pad(w, ((0, Kp - K), (0, 0)))

    out = gemm_bias_relu(
        patches, w.astype(jnp.bfloat16),
        bias.reshape(1, Cout).astype(jnp.float32))
    return out.reshape(N, OH, OW, Cout)


# ----------------------------------------------------------------------------
# Kernel 2: direct 3x3 stride-2 conv + BN + ReLU, multi-row tiles,
#           optional fused 1x1 (+BN+ReLU) epilogue
# ----------------------------------------------------------------------------
def _make_direct3x3_kernel(KH, KW, TH, OW, fuse_1x1):
    n_rows = 2 * KH  # W-even-phase refs for kh=0..KH-1, then W-odd-phase refs

    def kernel(*args):
        rows = args[:n_rows]
        if fuse_1x1:
            w_ref, b_ref, w2_ref, b2_ref, o_ref = args[n_rows:]
        else:
            w_ref, b_ref, o_ref = args[n_rows:]

        for r in range(TH):                                   # unrolled row loop
            acc = jnp.zeros((OW, w_ref.shape[-1]), jnp.float32)
            for kh in range(KH):
                for kw in range(KW):
                    src = rows[kh] if kw % 2 == 0 else rows[KH + kh]
                    a = src[0, r, kw // 2:kw // 2 + OW, :]    # [OW, Cin], unstrided
                    acc = acc + jnp.dot(a, w_ref[kh * KW + kw],
                                        preferred_element_type=jnp.float32)
            h = jnp.maximum(acc + b_ref[...], 0.0)

            if fuse_1x1:
                acc2 = jnp.dot(h.astype(w2_ref.dtype), w2_ref[...],
                               preferred_element_type=jnp.float32)
                h = jnp.maximum(acc2 + b2_ref[...], 0.0)

            o_ref[0, r, :, :] = h.astype(o_ref.dtype)

    return kernel


def _choose_th(OH, OW, Cin, c_final, *, max_rows=8, budget=8 << 20):
    """Output rows per grid step: big enough to amortize grid overhead while
    keeping the double-buffered row operands + output tiles inside VMEM."""
    th = min(OH, max_rows)
    while th > 1:
        vbytes = (6 * 2 * th * (OW + 1) * Cin * 2      # 6 row operands, 2 buffers, bf16
                  + 2 * th * OW * c_final * 2)         # output tiles, 2 buffers, bf16
        if vbytes <= budget:
            break
        th -= 1
    return max(th, 1)


def conv3x3_s2_direct(x_nhwc, p, p_1x1=None, *, out_dtype=jnp.bfloat16):
    """conv 3x3 / stride 2 / pad 1 + BN + ReLU without HBM im2col patches.

    The padded input is split once (in the wrapper) into H-phase row sources
    (one per kh) and W-phase columns, so every stride-2 tap reads a plain
    non-overlapping Blocked window of TH rows per grid step.  If `p_1x1` is
    given, conv_1x1 + BN + ReLU is fused into the epilogue.
    """
    KH = KW = 3
    N, H, W, Cin = x_nhwc.shape
    Cout = p["w"].shape[0]
    OH = (H + 2 - KH) // 2 + 1
    OW = (W + 2 - KW) // 2 + 1

    scale, bias = _fold_bn(p)
    w = (jnp.transpose(p["w"], (2, 3, 1, 0)).reshape(KH * KW, Cin, Cout)
         * scale[None, None, :]).astype(jnp.bfloat16)
    bias = bias.reshape(1, Cout).astype(jnp.float32)

    c_final = Cout
    fuse = p_1x1 is not None
    if fuse:
        C2 = p_1x1["w"].shape[0]
        scale2, bias2 = _fold_bn(p_1x1)
        w2 = (jnp.transpose(p_1x1["w"], (2, 3, 1, 0)).reshape(Cout, C2)
              * scale2[None, :]).astype(jnp.bfloat16)
        bias2 = bias2.reshape(1, C2).astype(jnp.float32)
        c_final = C2

    TH = _choose_th(OH, OW, Cin, c_final)
    GH = -(-OH // TH)              # grid steps along OH
    R = GH * TH                    # padded output-row count

    xp = jnp.pad(x_nhwc.astype(jnp.bfloat16), ((0, 0), (1, 1), (1, 1), (0, 0)))
    # H sources: output row oh uses padded rows 2*oh + kh, kh = 0, 1, 2
    h_srcs = [xp[:, 0::2], xp[:, 1::2], xp[:, 2::2]]

    def pad_rows(a):
        r = a.shape[1]
        return a if r >= R else jnp.pad(a, ((0, 0), (0, R - r), (0, 0), (0, 0)))

    row_ops, row_specs = [], []
    for wph in (0, 1):                         # W-even phase taps, then W-odd
        for kh in range(KH):
            arr = pad_rows(h_srcs[kh][:, :, wph::2, :])
            Wph = arr.shape[2]
            row_ops.append(arr)
            row_specs.append(pl.BlockSpec((1, TH, Wph, Cin),
                                          lambda n, t: (n, t, 0, 0)))

    operands = row_ops + [w, bias]
    in_specs = row_specs + [
        pl.BlockSpec((KH * KW, Cin, Cout), lambda n, t: (0, 0, 0)),
        pl.BlockSpec((1, Cout), lambda n, t: (0, 0)),
    ]
    if fuse:
        operands += [w2, bias2]
        in_specs += [
            pl.BlockSpec((Cout, c_final), lambda n, t: (0, 0)),
            pl.BlockSpec((1, c_final), lambda n, t: (0, 0)),
        ]

    kernel = _make_direct3x3_kernel(KH, KW, TH, OW, fuse)
    out = pl.pallas_call(
        kernel,
        out_shape=jax.ShapeDtypeStruct((N, R, OW, c_final), out_dtype),
        grid_spec=pltpu.PrefetchScalarGridSpec(
            num_scalar_prefetch=0,
            grid=(N, GH),
            in_specs=in_specs,
            out_specs=pl.BlockSpec((1, TH, OW, c_final),
                                   lambda n, t: (n, t, 0, 0)),
        ),
        compiler_params=pltpu.CompilerParams(
            dimension_semantics=("parallel", "parallel"),
            vmem_limit_bytes=32 * 1024 * 1024,
        ),
    )(*operands)
    return out[:, :OH]


# ----------------------------------------------------------------------------
# SpatialPath forward (NCHW in/out, matching PyTorch)
# ----------------------------------------------------------------------------
@jax.jit
def spatial_path_forward(x_nchw, params):
    x = jnp.transpose(x_nchw, (0, 2, 3, 1))                     # NCHW -> NHWC
    x = conv7x7_im2col(x, params["conv_7x7"])                   # [N,H/2,W/2,64] bf16
    x = conv3x3_s2_direct(x, params["conv_3x3_1"])              # [N,H/4,W/4,64] bf16
    x = conv3x3_s2_direct(x, params["conv_3x3_2"],
                          p_1x1=params["conv_1x1"])             # [N,H/8,W/8,c2] bf16
    return jnp.transpose(x, (0, 3, 1, 2)).astype(jnp.float32)   # NHWC -> NCHW


# ----------------------------------------------------------------------------
# Parameter init
# ----------------------------------------------------------------------------
def init_conv_module(key, c_in, c_out, k):
    kw_key, g_key, b_key, m_key, v_key = jax.random.split(key, 5)
    return {
        "w": 0.05 * jax.random.normal(kw_key, (c_out, c_in, k, k), jnp.float32),
        "gamma": 1.0 + 0.1 * jax.random.normal(g_key, (c_out,), jnp.float32),
        "beta": 0.1 * jax.random.normal(b_key, (c_out,), jnp.float32),
        "mean": 0.05 * jax.random.normal(m_key, (c_out,), jnp.float32),
        "var": jnp.abs(1.0 + 0.1 * jax.random.normal(v_key, (c_out,), jnp.float32)),
    }


def init_spatial_path(key, c1, c2):
    ch = 64
    k0, k1, k2, k3 = jax.random.split(key, 4)
    return {
        "conv_7x7":   init_conv_module(k0, c1, ch, 7),
        "conv_3x3_1": init_conv_module(k1, ch, ch, 3),
        "conv_3x3_2": init_conv_module(k2, ch, ch, 3),
        "conv_1x1":   init_conv_module(k3, ch, c2, 1),
    }


# ----------------------------------------------------------------------------
# Pure-JAX f32 reference (lax.conv) for correctness verification
# ----------------------------------------------------------------------------
def _ref_conv_module(x_nchw, params, stride, pad):
    y = lax.conv_general_dilated(
        x_nchw, params["w"], (stride, stride), ((pad, pad), (pad, pad)),
        dimension_numbers=("NCHW", "OIHW", "NCHW"))
    scale = params["gamma"] / jnp.sqrt(params["var"] + _BN_EPS)
    bias = params["beta"] - params["mean"] * scale
    y = y * scale[None, :, None, None] + bias[None, :, None, None]
    return jnp.maximum(y, 0.0)


def spatial_path_reference(x_nchw, params):
    x = _ref_conv_module(x_nchw, params["conv_7x7"], 2, 3)
    x = _ref_conv_module(x, params["conv_3x3_1"], 2, 1)
    x = _ref_conv_module(x, params["conv_3x3_2"], 2, 1)
    return _ref_conv_module(x, params["conv_1x1"], 1, 0)


if __name__ == "__main__":
    key = jax.random.PRNGKey(0)
    k_x, k_p = jax.random.split(key)

    N, C1, H, W = 2, 3, 32, 32      # small RGB-like input
    C2 = 128                        # standard BiSeNet SpatialPath output width
    x = jax.random.normal(k_x, (N, C1, H, W), jnp.float32)
    params = init_spatial_path(k_p, C1, C2)

    out = jax.block_until_ready(spatial_path_forward(x, params))
    assert out.shape == (N, C2, H // 8, W // 8), out.shape

    ref = jax.block_until_ready(spatial_path_reference(x, params))
    # bf16 GEMM operands + bf16 intermediate activations -> relaxed tolerance
    np.testing.assert_allclose(np.asarray(out), np.asarray(ref),
                               rtol=5e-2, atol=5e-2)

    print("KERNEL_OK")
</pallas_src>

<mosaic_0001>
module attributes {stable_mosaic.version = 11 : i64} {
  func.func @_gemm_bias_relu_kernel(%arg0: i32, %arg1: memref<256x160xbf16, #tpu.memory_space<vmem>>, %arg2: memref<160x64xbf16, #tpu.memory_space<vmem>>, %arg3: memref<1x64xf32, #tpu.memory_space<vmem>>, %arg4: memref<256x64xbf16, #tpu.memory_space<vmem>>) attributes {dimension_semantics = [#tpu.dimension_semantics<parallel>], iteration_bounds = array<i64: 2>, scalar_prefetch = 0 : i64, scratch_operands = 0 : i64, tpu.core_type = #tpu.core_type<tc>, window_params = [{transform_indices = @transform_0, window_bounds = array<i64: 256, 160>}, {pipeline_mode = #tpu.pipeline_mode<synchronous>, transform_indices = @transform_1, window_bounds = array<i64: 160, 64>}, {pipeline_mode = #tpu.pipeline_mode<synchronous>, transform_indices = @transform_2, window_bounds = array<i64: 1, 64>}, {transform_indices = @transform_3, window_bounds = array<i64: 256, 64>}]} {
    %c0 = arith.constant 0 : index
    %c0_0 = arith.constant 0 : index
    %0 = vector.load %arg1[%c0, %c0_0] : memref<256x160xbf16, #tpu.memory_space<vmem>>, vector<256x160xbf16>
    %c0_1 = arith.constant 0 : index
    %c0_2 = arith.constant 0 : index
    %1 = vector.load %arg2[%c0_1, %c0_2] : memref<160x64xbf16, #tpu.memory_space<vmem>>, vector<160x64xbf16>
    %cst = arith.constant dense<0.000000e+00> : vector<256x64xf32>
    %2 = tpu.matmul %0, %1, %cst {dimension_numbers = #tpu.dot_dimension_numbers<[1], [0], [0], [1], [0, 0, 1, 1], [], []>} : vector<256x160xbf16>, vector<160x64xbf16>, vector<256x64xf32> -> vector<256x64xf32>
    %c0_3 = arith.constant 0 : index
    %c0_4 = arith.constant 0 : index
    %3 = vector.load %arg3[%c0_3, %c0_4] : memref<1x64xf32, #tpu.memory_space<vmem>>, vector<1x64xf32>
    %4 = vector.broadcast %3 : vector<1x64xf32> to vector<256x64xf32>
    %5 = arith.addf %2, %4 : vector<256x64xf32>
    %cst_5 = arith.constant 0.000000e+00 : f32
    %6 = vector.broadcast %cst_5 : f32 to vector<256x64xf32>
    %7 = arith.maximumf %5, %6 : vector<256x64xf32>
    %8 = arith.truncf %7 : vector<256x64xf32> to vector<256x64xbf16>
    %c0_6 = arith.constant 0 : index
    %c0_7 = arith.constant 0 : index
    %9 = vector.load %arg4[%c0_6, %c0_7] : memref<256x64xbf16, #tpu.memory_space<vmem>>, vector<256x64xbf16>
    tpu.vector_store %arg4[%c0_6, %c0_7], %8 {strides = array<i32>} : memref<256x64xbf16, #tpu.memory_space<vmem>>, vector<256x64xbf16>,
    return
  }
  func.func @transform_0(%arg0: i32) -> (i32, i32) {
    %c0_i32 = arith.constant 0 : i32
    %c0_i32_0 = arith.constant 0 : i32
    return %arg0, %c0_i32 : i32, i32
  }
  func.func @transform_1(%arg0: i32) -> (i32, i32) {
    %c0_i32 = arith.constant 0 : i32
    %c0_i32_0 = arith.constant 0 : i32
    %c0_i32_1 = arith.constant 0 : i32
    return %c0_i32, %c0_i32_0 : i32, i32
  }
  func.func @transform_2(%arg0: i32) -> (i32, i32) {
    %c0_i32 = arith.constant 0 : i32
    %c0_i32_0 = arith.constant 0 : i32
    %c0_i32_1 = arith.constant 0 : i32
    return %c0_i32, %c0_i32_0 : i32, i32
  }
  func.func @transform_3(%arg0: i32) -> (i32, i32) {
    %c0_i32 = arith.constant 0 : i32
    %c0_i32_0 = arith.constant 0 : i32
    return %arg0, %c0_i32 : i32, i32
  }
}

module attributes {stable_mosaic.version = 11 : i64} {
  func.func @kernel(%arg0: i32, %arg1: i32, %arg2: memref<1x8x9x64xbf16, #tpu.memory_space<vmem>>, %arg3: memref<1x8x9x64xbf16, #tpu.memory_space<vmem>>, %arg4: memref<1x8x9x64xbf16, #tpu.memory_space<vmem>>, %arg5: memref<1x8x9x64xbf16, #tpu.memory_space<vmem>>, %arg6: memref<1x8x9x64xbf16, #tpu.memory_space<vmem>>, %arg7: memref<1x8x9x64xbf16, #tpu.memory_space<vmem>>, %arg8: memref<9x64x64xbf16, #tpu.memory_space<vmem>>, %arg9: memref<1x64xf32, #tpu.memory_space<vmem>>, %arg10: memref<1x8x8x64xbf16, #tpu.memory_space<vmem>>) attributes {dimension_semantics = [#tpu.dimension_semantics<parallel>, #tpu.dimension_semantics<parallel>], iteration_bounds = array<i64: 2, 1>, scalar_prefetch = 0 : i64, scratch_operands = 0 : i64, tpu.core_type = #tpu.core_type<tc>, window_params = [{transform_indices = @transform_0, window_bounds = array<i64: 1, 8, 9, 64>}, {transform_indices = @transform_1, window_bounds = array<i64: 1, 8, 9, 64>}, {transform_indices = @transform_2, window_bounds = array<i64: 1, 8, 9, 64>}, {transform_indices = @transform_3, window_bounds = array<i64: 1, 8, 9, 64>}, {transform_indices = @transform_4, window_bounds = array<i64: 1, 8, 9, 64>}, {transform_indices = @transform_5, window_bounds = array<i64: 1, 8, 9, 64>}, {pipeline_mode = #tpu.pipeline_mode<synchronous>, transform_indices = @transform_6, window_bounds = array<i64: 9, 64, 64>}, {pipeline_mode = #tpu.pipeline_mode<synchronous>, transform_indices = @transform_7, window_bounds = array<i64: 1, 64>}, {transform_indices = @transform_8, window_bounds = array<i64: 1, 8, 8, 64>}]} {
    %cst = arith.constant 0.000000e+00 : f32
    %0 = vector.broadcast %cst : f32 to vector<8x64xf32>
    %c0 = arith.constant 0 : index
    %c0_0 = arith.constant 0 : index
    %c0_1 = arith.constant 0 : index
    %c0_2 = arith.constant 0 : index
    %1 = vector.load %arg2[%c0, %c0_0, %c0_1, %c0_2] : memref<1x8x9x64xbf16, #tpu.memory_space<vmem>>, vector<1x1x8x64xbf16>
    %2 = vector.shape_cast %1 : vector<1x1x8x64xbf16> to vector<8x64xbf16>
    %c0_3 = arith.constant 0 : index
    %c0_4 = arith.constant 0 : index
    %c0_5 = arith.constant 0 : index
    %3 = vector.load %arg8[%c0_3, %c0_4, %c0_5] : memref<9x64x64xbf16, #tpu.memory_space<vmem>>, vector<1x64x64xbf16>
    %4 = vector.shape_cast %3 : vector<1x64x64xbf16> to vector<64x64xbf16>
    %cst_6 = arith.constant dense<0.000000e+00> : vector<8x64xf32>
    %5 = tpu.matmul %2, %4, %cst_6 {dimension_numbers = #tpu.dot_dimension_numbers<[1], [0], [0], [1], [0, 0, 1, 1], [], []>} : vector<8x64xbf16>, vector<64x64xbf16>, vector<8x64xf32> -> vector<8x64xf32>
    %6 = arith.addf %0, %5 : vector<8x64xf32>
    %c0_7 = arith.constant 0 : index
    %c0_8 = arith.constant 0 : index
    %c0_9 = arith.constant 0 : index
    %c0_10 = arith.constant 0 : index
    %7 = vector.load %arg5[%c0_7, %c0_8, %c0_9, %c0_10] : memref<1x8x9x64xbf16, #tpu.memory_space<vmem>>, vector<1x1x8x64xbf16>
    %8 = vector.shape_cast %7 : vector<1x1x8x64xbf16> to vector<8x64xbf16>
    %c1 = arith.constant 1 : index
    %c0_11 = arith.constant 0 : index
    %c0_12 = arith.constant 0 : index
    %9 = vector.load %arg8[%c1, %c0_11, %c0_12] : memref<9x64x64xbf16, #tpu.memory_space<vmem>>, vector<1x64x64xbf16>
    %10 = vector.shape_cast %9 : vector<1x64x64xbf16> to vector<64x64xbf16>
    %cst_13 = arith.constant dense<0.000000e+00> : vector<8x64xf32>
    %11 = tpu.matmul %8, %10, %cst_13 {dimension_numbers = #tpu.dot_dimension_numbers<[1], [0], [0], [1], [0, 0, 1, 1], [], []>} : vector<8x64xbf16>, vector<64x64xbf16>, vector<8x64xf32> -> vector<8x64xf32>
    %12 = arith.addf %6, %11 : vector<8x64xf32>
    %c0_14 = arith.constant 0 : index
    %c0_15 = arith.constant 0 : index
    %c1_16 = arith.constant 1 : index
    %c0_17 = arith.constant 0 : index
    %13 = vector.load %arg2[%c0_14, %c0_15, %c1_16, %c0_17] : memref<1x8x9x64xbf16, #tpu.memory_space<vmem>>, vector<1x1x8x64xbf16>
    %14 = vector.shape_cast %13 : vector<1x1x8x64xbf16> to vector<8x64xbf16>
    %c2 = arith.constant 2 : index
    %c0_18 = arith.constant 0 : index
    %c0_19 = arith.constant 0 : index
    %15 = vector.load %arg8[%c2, %c0_18, %c0_19] : memref<9x64x64xbf16, #tpu.memory_space<vmem>>, vector<1x64x64xbf16>
    %16 = vector.shape_cast %15 : vector<1x64x64xbf16> to vector<64x64xbf16>
    %cst_20 = arith.constant dense<0.000000e+00> : vector<8x64xf32>
    %17 = tpu.matmul %14, %16, %cst_20 {dimension_numbers = #tpu.dot_dimension_numbers<[1], [0], [0], [1], [0, 0, 1, 1], [], []>} : vector<8x64xbf16>, vector<64x64xbf16>, vector<8x64xf32> -> vector<8x64xf32>
    %18 = arith.addf %12, %17 : vector<8x64xf32>
    %c0_21 = arith.constant 0 : index
    %c0_22 = arith.constant 0 : index
    %c0_23 = arith.constant 0 : index
    %c0_24 = arith.constant 0 : index
    %19 = vector.load %arg3[%c0_21, %c0_22, %c0_23, %c0_24] : memref<1x8x9x64xbf16, #tpu.memory_space<vmem>>, vector<1x1x8x64xbf16>
    %20 = vector.shape_cast %19 : vector<1x1x8x64xbf16> to vector<8x64xbf16>
    %c3 = arith.constant 3 : index
    %c0_25 = arith.constant 0 : index
    %c0_26 = arith.constant 0 : index
    %21 = vector.load %arg8[%c3, %c0_25, %c0_26] : memref<9x64x64xbf16, #tpu.memory_space<vmem>>, vector<1x64x64xbf16>
    %22 = vector.shape_cast %21 : vector<1x64x64xbf16> to vector<64x64xbf16>
    %cst_27 = arith.constant dense<0.000000e+00> : vector<8x64xf32>
    %23 = tpu.matmul %20, %22, %cst_27 {dimension_numbers = #tpu.dot_dimension_numbers<[1], [0], [0], [1], [0, 0, 1, 1], [], []>} : vector<8x64xbf16>, vector<64x64xbf16>, vector<8x64xf32> -> vector<8x64xf32>
    %24 = arith.addf %18, %23 : vector<8x64xf32>
    %c0_28 = arith.constant 0 : index
    %c0_29 = arith.constant 0 : index
    %c0_30 = arith.constant 0 : index
    %c0_31 = arith.constant 0 : index
    %25 = vector.load %arg6[%c0_28, %c0_29, %c0_30, %c0_31] : memref<1x8x9x64xbf16, #tpu.memory_space<vmem>>, vector<1x1x8x64xbf16>
    %26 = vector.shape_cast %25 : vector<1x1x8x64xbf16> to vector<8x64xbf16>
    %c4 = arith.constant 4 : index
    %c0_32 = arith.constant 0 : index
    %c0_33 = arith.constant 0 : index
    %27 = vector.load %arg8[%c4, %c0_32, %c0_33] : memref<9x64x64xbf16, #tpu.memory_space<vmem>>, vector<1x64x64xbf16>
    %28 = vector.shape_cast %27 : vector<1x64x64xbf16> to vector<64x64xbf16>
    %cst_34 = arith.constant dense<0.000000e+00> : vector<8x64xf32>
    %29 = tpu.matmul %26, %28, %cst_34 {dimension_numbers = #tpu.dot_dimension_numbers<[1], [0], [0], [1], [0, 0, 1, 1], [], []>} : vector<8x64xbf16>, vector<64x64xbf16>, vector<8x64xf32> -> vector<8x64xf32>
    %30 = arith.addf %24, %29 : vector<8x64xf32>
    %c0_35 = arith.constant 0 : index
    %c0_36 = arith.constant 0 : index
    %c1_37 = arith.constant 1 : index
    %c0_38 = arith.constant 0 : index
    %31 = vector.load %arg3[%c0_35, %c0_36, %c1_37, %c0_38] : memref<1x8x9x64xbf16, #tpu.memory_space<vmem>>, vector<1x1x8x64xbf16>
    %32 = vector.shape_cast %31 : vector<1x1x8x64xbf16> to vector<8x64xbf16>
    %c5 = arith.constant 5 : index
    %c0_39 = arith.constant 0 : index
    %c0_40 = arith.constant 0 : index
    %33 = vector.load %arg8[%c5, %c0_39, %c0_40] : memref<9x64x64xbf16, #tpu.memory_space<vmem>>, vector<1x64x64xbf16>
    %34 = vector.shape_cast %33 : vector<1x64x64xbf16> to vector<64x64xbf16>
    %cst_41 = arith.constant dense<0.000000e+00> : vector<8x64xf32>
    %35 = tpu.matmul %32, %34, %cst_41 {dimension_numbers = #tpu.dot_dimension_numbers<[1], [0], [0], [1], [0, 0, 1, 1], [], []>} : vector<8x64xbf16>, vector<64x64xbf16>, vector<8x64xf32> -> vector<8x64xf32>
    %36 = arith.addf %30, %35 : vector<8x64xf32>
    %c0_42 = arith.constant 0 : index
    %c0_43 = arith.constant 0 : index
    %c0_44 = arith.constant 0 : index
    %c0_45 = arith.constant 0 : index
    %37 = vector.load %arg4[%c0_42, %c0_43, %c0_44, %c0_45] : memref<1x8x9x64xbf16, #tpu.memory_space<vmem>>, vector<1x1x8x64xbf16>
    %38 = vector.shape_cast %37 : vector<1x1x8x64xbf16> to vector<8x64xbf16>
    %c6 = arith.constant 6 : index
    %c0_46 = arith.constant 0 : index
    %c0_47 = arith.constant 0 : index
    %39 = vector.load %arg8[%c6, %c0_46, %c0_47] : memref<9x64x64xbf16, #tpu.memory_space<vmem>>, vector<1x64x64xbf16>
    %40 = vector.shape_cast %39 : vector<1x64x64xbf16> to vector<64x64xbf16>
    %cst_48 = arith.constant dense<0.000000e+00> : vector<8x64xf32>
    %41 = tpu.matmul %38, %40, %cst_48 {dimension_numbers = #tpu.dot_dimension_numbers<[1], [0], [0], [1], [0, 0, 1, 1], [], []>} : vector<8x64xbf16>, vector<64x64xbf16>, vector<8x64xf32> -> vector<8x64xf32>
    %42 = arith.addf %36, %41 : vector<8x64xf32>
    %c0_49 = arith.constant 0 : index
    %c0_50 = arith.constant 0 : index
    %c0_51 = arith.constant 0 : index
    %c0_52 = arith.constant 0 : index
    %43 = vector.load %arg7[%c0_49, %c0_50, %c0_51, %c0_52] : memref<1x8x9x64xbf16, #tpu.memory_space<vmem>>, vector<1x1x8x64xbf16>
    %44 = vector.shape_cast %43 : vector<1x1x8x64xbf16> to vector<8x64xbf16>
    %c7 = arith.constant 7 : index
    %c0_53 = arith.constant 0 : index
    %c0_54 = arith.constant 0 : index
    %45 = vector.load %arg8[%c7, %c0_53, %c0_54] : memref<9x64x64xbf16, #tpu.memory_space<vmem>>, vector<1x64x64xbf16>
    %46 = vector.shape_cast %45 : vector<1x64x64xbf16> to vector<64x64xbf16>
    %cst_55 = arith.constant dense<0.000000e+00> : vector<8x64xf32>
    %47 = tpu.matmul %44, %46, %cst_55 {dimension_numbers = #tpu.dot_dimension_numbers<[1], [0], [0], [1], [0, 0, 1, 1], [], []>} : vector<8x64xbf16>, vector<64x64xbf16>, vector<8x64xf32> -> vector<8x64xf32>
    %48 = arith.addf %42, %47 : vector<8x64xf32>
    %c0_56 = arith.constant 0 : index
    %c0_57 = arith.constant 0 : index
    %c1_58 = arith.constant 1 : index
    %c0_59 = arith.constant 0 : index
    %49 = vector.load %arg4[%c0_56, %c0_57, %c1_58, %c0_59] : memref<1x8x9x64xbf16, #tpu.memory_space<vmem>>, vector<1x1x8x64xbf16>
    %50 = vector.shape_cast %49 : vector<1x1x8x64xbf16> to vector<8x64xbf16>
    %c8 = arith.constant 8 : index
    %c0_60 = arith.constant 0 : index
    %c0_61 = arith.constant 0 : index
    %51 = vector.load %arg8[%c8, %c0_60, %c0_61] : memref<9x64x64xbf16, #tpu.memory_space<vmem>>, vector<1x64x64xbf16>
    %52 = vector.shape_cast %51 : vector<1x64x64xbf16> to vector<64x64xbf16>
    %cst_62 = arith.constant dense<0.000000e+00> : vector<8x64xf32>
    %53 = tpu.matmul %50, %52, %cst_62 {dimension_numbers = #tpu.dot_dimension_numbers<[1], [0], [0], [1], [0, 0, 1, 1], [], []>} : vector<8x64xbf16>, vector<64x64xbf16>, vector<8x64xf32> -> vector<8x64xf32>
    %54 = arith.addf %48, %53 : vector<8x64xf32>
    %c0_63 = arith.constant 0 : index
    %c0_64 = arith.constant 0 : index
    %55 = vector.load %arg9[%c0_63, %c0_64] : memref<1x64xf32, #tpu.memory_space<vmem>>, vector<1x64xf32>
    %56 = vector.broadcast %55 : vector<1x64xf32> to vector<8x64xf32>
    %57 = arith.addf %54, %56 : vector<8x64xf32>
    %cst_65 = arith.constant 0.000000e+00 : f32
    %58 = vector.broadcast %cst_65 : f32 to vector<8x64xf32>
    %59 = arith.maximumf %57, %58 : vector<8x64xf32>
    %60 = arith.truncf %59 : vector<8x64xf32> to vector<8x64xbf16>
    %c0_66 = arith.constant 0 : index
    %c0_67 = arith.constant 0 : index
    %c0_68 = arith.constant 0 : index
    %c0_69 = arith.constant 0 : index
    %61 = vector.load %arg10[%c0_66, %c0_67, %c0_68, %c0_69] : memref<1x8x8x64xbf16, #tpu.memory_space<vmem>>, vector<1x1x8x64xbf16>
    %62 = vector.shape_cast %61 : vector<1x1x8x64xbf16> to vector<8x64xbf16>
    %63 = vector.shape_cast %60 : vector<8x64xbf16> to vector<1x1x8x64xbf16>
    tpu.vector_store %arg10[%c0_66, %c0_67, %c0_68, %c0_69], %63 {strides = array<i32>} : memref<1x8x8x64xbf16, #tpu.memory_space<vmem>>, vector<1x1x8x64xbf16>,
    %cst_70 = arith.constant 0.000000e+00 : f32
    %64 = vector.broadcast %cst_70 : f32 to vector<8x64xf32>
    %c0_71 = arith.constant 0 : index
    %c1_72 = arith.constant 1 : index
    %c0_73 = arith.constant 0 : index
    %c0_74 = arith.constant 0 : index
    %65 = vector.load %arg2[%c0_71, %c1_72, %c0_73, %c0_74] : memref<1x8x9x64xbf16, #tpu.memory_space<vmem>>, vector<1x1x8x64xbf16>
    %66 = vector.shape_cast %65 : vector<1x1x8x64xbf16> to vector<8x64xbf16>
    %c0_75 = arith.constant 0 : index
    %c0_76 = arith.constant 0 : index
    %c0_77 = arith.constant 0 : index
    %67 = vector.load %arg8[%c0_75, %c0_76, %c0_77] : memref<9x64x64xbf16, #tpu.memory_space<vmem>>, vector<1x64x64xbf16>
    %68 = vector.shape_cast %67 : vector<1x64x64xbf16> to vector<64x64xbf16>
    %cst_78 = arith.constant dense<0.000000e+00> : vector<8x64xf32>
    %69 = tpu.matmul %66, %68, %cst_78 {dimension_numbers = #tpu.dot_dimension_numbers<[1], [0], [0], [1], [0, 0, 1, 1], [], []>} : vector<8x64xbf16>, vector<64x64xbf16>, vector<8x64xf32> -> vector<8x64xf32>
    %70 = arith.addf %64, %69 : vector<8x64xf32>
    %c0_79 = arith.constant 0 : index
    %c1_80 = arith.constant 1 : index
    %c0_81 = arith.constant 0 : index
    %c0_82 = arith.constant 0 : index
    %71 = vector.load %arg5[%c0_79, %c1_80, %c0_81, %c0_82] : memref<1x8x9x64xbf16, #tpu.memory_space<vmem>>, vector<1x1x8x64xbf16>
    %72 = vector.shape_cast %71 : vector<1x1x8x64xbf16> to vector<8x64xbf16>
    %c1_83 = arith.constant 1 : index
    %c0_84 = arith.constant 0 : index
    %c0_85 = arith.constant 0 : index
    %73 = vector.load %arg8[%c1_83, %c0_84, %c0_85] : memref<9x64x64xbf16, #tpu.memory_space<vmem>>, vector<1x64x64xbf16>
    %74 = vector.shape_cast %73 : vector<1x64x64xbf16> to vector<64x64xbf16>
    %cst_86 = arith.constant dense<0.000000e+00> : vector<8x64xf32>
    %75 = tpu.matmul %72, %74, %cst_86 {dimension_numbers = #tpu.dot_dimension_numbers<[1], [0], [0], [1], [0, 0, 1, 1], [], []>} : vector<8x64xbf16>, vector<64x64xbf16>, vector<8x64xf32> -> vector<8x64xf32>
    %76 = arith.addf %70, %75 : vector<8x64xf32>
    %c0_87 = arith.constant 0 : index
    %c1_88 = arith.constant 1 : index
    %c1_89 = arith.constant 1 : index
    %c0_90 = arith.constant 0 : index
    %77 = vector.load %arg2[%c0_87, %c1_88, %c1_89, %c0_90] : memref<1x8x9x64xbf16, #tpu.memory_space<vmem>>, vector<1x1x8x64xbf16>
    %78 = vector.shape_cast %77 : vector<1x1x8x64xbf16> to vector<8x64xbf16>
    %c2_91 = arith.constant 2 : index
    %c0_92 = arith.constant 0 : index
    %c0_93 = arith.constant 0 : index
    %79 = vector.load %arg8[%c2_91, %c0_92, %c0_93] : memref<9x64x64xbf16, #tpu.memory_space<vmem>>, vector<1x64x64xbf16>
    %80 = vector.shape_cast %79 : vector<1x64x64xbf16> to vector<64x64xbf16>
    %cst_94 = arith.constant dense<0.000000e+00> : vector<8x64xf32>
    %81 = tpu.matmul %78, %80, %cst_94 {dimension_numbers = #tpu.dot_dimension_numbers<[1], [0], [0], [1], [0, 0, 1, 1], [], []>} : vector<8x64xbf16>, vector<64x64xbf16>, vector<8x64xf32> -> vector<8x64xf32>
    %82 = arith.addf %76, %81 : vector<8x64xf32>
    %c0_95 = arith.constant 0 : index
    %c1_96 = arith.constant 1 : index
    %c0_97 = arith.constant 0 : index
    %c0_98 = arith.constant 0 : index
    %83 = vector.load %arg3[%c0_95, %c1_96, %c0_97, %c0_98] : memref<1x8x9x64xbf16, #tpu.memory_space<vmem>>, vector<1x1x8x64xbf16>
    %84 = vector.shape_cast %83 : vector<1x1x8x64xbf16> to vector<8x64xbf16>
    %c3_99 = arith.constant 3 : index
    %c0_100 = arith.constant 0 : index
    %c0_101 = arith.constant 0 : index
    %85 = vector.load %arg8[%c3_99, %c0_100, %c0_101] : memref<9x64x64xbf16, #tpu.memory_space<vmem>>, vector<1x64x64xbf16>
    %86 = vector.shape_cast %85 : vector<1x64x64xbf16> to vector<64x64xbf16>
    %cst_102 = arith.constant dense<0.000000e+00> : vector<8x64xf32>
    %87 = tpu.matmul %84, %86, %cst_102 {dimension_numbers = #tpu.dot_dimension_numbers<[1], [0], [0], [1], [0, 0, 1, 1], [], []>} : vector<8x64xbf16>, vector<64x64xbf16>, vector<8x64xf32> -> vector<8x64xf32>
    %88 = arith.addf %82, %87 : vector<8x64xf32>
    %c0_103 = arith.constant 0 : index
    %c1_104 = arith.constant 1 : index
    %c0_105 = arith.constant 0 : index
    %c0_106 = arith.constant 0 : index
    %89 = vector.load %arg6[%c0_103, %c1_104, %c0_105, %c0_106] : memref<1x8x9x64xbf16, #tpu.memory_space<vmem>>, vector<1x1x8x64xbf16>
    %90 = vector.shape_cast %89 : vector<1x1x8x64xbf16> to vector<8x64xbf16>
    %c4_107 = arith.constant 4 : index
    %c0_108 = arith.constant 0 : index
    %c0_109 = arith.constant 0 : index
    %91 = vector.load %arg8[%c4_107, %c0_108, %c0_109] : memref<9x64x64xbf16, #tpu.memory_space<vmem>>, vector<1x64x64xbf16>
    %92 = vector.shape_cast %91 : vector<1x64x64xbf16> to vector<64x64xbf16>
    %cst_110 = arith.constant dense<0.000000e+00> : vector<8x64xf32>
    %93 = tpu.matmul %90, %92, %cst_110 {dimension_numbers = #tpu.dot_dimension_numbers<[1], [0], [0], [1], [0, 0, 1, 1], [], []>} : vector<8x64xbf16>, vector<64x64xbf16>, vector<8x64xf32> -> vector<8x64xf32>
    %94 = arith.addf %88, %93 : vector<8x64xf32>
    %c0_111 = arith.constant 0 : index
    %c1_112 = arith.constant 1 : index
    %c1_113 = arith.constant 1 : index
    %c0_114 = arith.constant 0 : index
    %95 = vector.load %arg3[%c0_111, %c1_112, %c1_113, %c0_114] : memref<1x8x9x64xbf16, #tpu.memory_space<vmem>>, vector<1x1x8x64xbf16>
    %96 = vector.shape_cast %95 : vector<1x1x8x64xbf16> to vector<8x64xbf16>
    %c5_115 = arith.constant 5 : index
    %c0_116 = arith.constant 0 : index
    %c0_117 = arith.constant 0 : index
    %97 = vector.load %arg8[%c5_115, %c0_116, %c0_117] : memref<9x64x64xbf16, #tpu.memory_space<vmem>>, vector<1x64x64xbf16>
    %98 = vector.shape_cast %97 : vector<1x64x64xbf16> to vector<64x64xbf16>
    %cst_118 = arith.constant dense<0.000000e+00> : vector<8x64xf32>
    %99 = tpu.matmul %96, %98, %cst_118 {dimension_numbers = #tpu.dot_dimension_numbers<[1], [0], [0], [1], [0, 0, 1, 1], [], []>} : vector<8x64xbf16>, vector<64x64xbf16>, vector<8x64xf32> -> vector<8x64xf32>
    %100 = arith.addf %94, %99 : vector<8x64xf32>
    %c0_119 = arith.constant 0 : index
    %c1_120 = arith.constant 1 : index
    %c0_121 = arith.constant 0 : index
    %c0_122 = arith.constant 0 : index
    %101 = vector.load %arg4[%c0_119, %c1_120, %c0_121, %c0_122] : memref<1x8x9x64xbf16, #tpu.memory_space<vmem>>, vector<1x1x8x64xbf16>
    %102 = vector.shape_cast %101 : vector<1x1x8x64xbf16> to vector<8x64xbf16>
    %c6_123 = arith.constant 6 : index
    %c0_124 = arith.constant 0 : index
    %c0_125 = arith.constant 0 : index
    %103 = vector.load %arg8[%c6_123, %c0_124, %c0_125] : memref<9x64x64xbf16, #tpu.memory_space<vmem>>, vector<1x64x64xbf16>
    %104 = vector.shape_cast %103 : vector<1x64x64xbf16> to vector<64x64xbf16>
    %cst_126 = arith.constant dense<0.000000e+00> : vector<8x64xf32>
    %105 = tpu.matmul %102, %104, %cst_126 {dimension_numbers = #tpu.dot_dimension_numbers<[1], [0], [0], [1], [0, 0, 1, 1], [], []>} : vector<8x64xbf16>, vector<64x64xbf16>, vector<8x64xf32> -> vector<8x64xf32>
    %106 = arith.addf %100, %105 : vector<8x64xf32>
    %c0_127 = arith.constant 0 : index
    %c1_128 = arith.constant 1 : index
    %c0_129 = arith.constant 0 : index
    %c0_130 = arith.constant 0 : index
    %107 = vector.load %arg7[%c0_127, %c1_128, %c0_129, %c0_130] : memref<1x8x9x64xbf16, #tpu.memory_space<vmem>>, vector<1x1x8x64xbf16>
    %108 = vector.shape_cast %107 : vector<1x1x8x64xbf16> to vector<8x64xbf16>
    %c7_131 = arith.constant 7 : index
    %c0_132 = arith.constant 0 : index
    %c0_133 = arith.constant 0 : index
    %109 = vector.load %arg8[%c7_131, %c0_132, %c0_133] : memref<9x64x64xbf16, #tpu.memory_space<vmem>>, vector<1x64x64xbf16>
    %110 = vector.shape_cast %109 : vector<1x64x64xbf16> to vector<64x64xbf16>
    %cst_134 = arith.constant dense<0.000000e+00> : vector<8x64xf32>
    %111 = tpu.matmul %108, %110, %cst_134 {dimension_numbers = #tpu.dot_dimension_numbers<[1], [0], [0], [1], [0, 0, 1, 1], [], []>} : vector<8x64xbf16>, vector<64x64xbf16>, vector<8x64xf32> -> vector<8x64xf32>
    %112 = arith.addf %106, %111 : vector<8x64xf32>
    %c0_135 = arith.constant 0 : index
    %c1_136 = arith.constant 1 : index
    %c1_137 = arith.constant 1 : index
    %c0_138 = arith.constant 0 : index
    %113 = vector.load %arg4[%c0_135, %c1_136, %c1_137, %c0_138] : memref<1x8x9x64xbf16, #tpu.memory_space<vmem>>, vector<1x1x8x64xbf16>
    %114 = vector.shape_cast %113 : vector<1x1x8x64xbf16> to vector<8x64xbf16>
    %c8_139 = arith.constant 8 : index
    %c0_140 = arith.constant 0 : index
    %c0_141 = arith.constant 0 : index
    %115 = vector.load %arg8[%c8_139, %c0_140, %c0_141] : memref<9x64x64xbf16, #tpu.memory_space<vmem>>, vector<1x64x64xbf16>
    %116 = vector.shape_cast %115 : vector<1x64x64xbf16> to vector<64x64xbf16>
    %cst_142 = arith.constant dense<0.000000e+00> : vector<8x64xf32>
    %117 = tpu.matmul %114, %116, %cst_142 {dimension_numbers = #tpu.dot_dimension_numbers<[1], [0], [0], [1], [0, 0, 1, 1], [], []>} : vector<8x64xbf16>, vector<64x64xbf16>, vector<8x64xf32> -> vector<8x64xf32>
    %118 = arith.addf %112, %117 : vector<8x64xf32>
    %c0_143 = arith.constant 0 : index
    %c0_144 = arith.constant 0 : index
    %119 = vector.load %arg9[%c0_143, %c0_144] : memref<1x64xf32, #tpu.memory_space<vmem>>, vector<1x64xf32>
    %120 = vector.broadcast %119 : vector<1x64xf32> to vector<8x64xf32>
    %121 = arith.addf %118, %120 : vector<8x64xf32>
    %cst_145 = arith.constant 0.000000e+00 : f32
    %122 = vector.broadcast %cst_145 : f32 to vector<8x64xf32>
    %123 = arith.maximumf %121, %122 : vector<8x64xf32>
    %124 = arith.truncf %123 : vector<8x64xf32> to vector<8x64xbf16>
    %c0_146 = arith.constant 0 : index
    %c1_147 = arith.constant 1 : index
    %c0_148 = arith.constant 0 : index
    %c0_149 = arith.constant 0 : index
    %125 = vector.load %arg10[%c0_146, %c1_147, %c0_148, %c0_149] : memref<1x8x8x64xbf16, #tpu.memory_space<vmem>>, vector<1x1x8x64xbf16>
    %126 = vector.shape_cast %125 : vector<1x1x8x64xbf16> to vector<8x64xbf16>
    %127 = vector.shape_cast %124 : vector<8x64xbf16> to vector<1x1x8x64xbf16>
    tpu.vector_store %arg10[%c0_146, %c1_147, %c0_148, %c0_149], %127 {strides = array<i32>} : memref<1x8x8x64xbf16, #tpu.memory_space<vmem>>, vector<1x1x8x64xbf16>,
    %cst_150 = arith.constant 0.000000e+00 : f32
    %128 = vector.broadcast %cst_150 : f32 to vector<8x64xf32>
    %c0_151 = arith.constant 0 : index
    %c2_152 = arith.constant 2 : index
    %c0_153 = arith.constant 0 : index
    %c0_154 = arith.constant 0 : index
    %129 = vector.load %arg2[%c0_151, %c2_152, %c0_153, %c0_154] : memref<1x8x9x64xbf16, #tpu.memory_space<vmem>>, vector<1x1x8x64xbf16>
    %130 = vector.shape_cast %129 : vector<1x1x8x64xbf16> to vector<8x64xbf16>
    %c0_155 = arith.constant 0 : index
    %c0_156 = arith.constant 0 : index
    %c0_157 = arith.constant 0 : index
    %131 = vector.load %arg8[%c0_155, %c0_156, %c0_157] : memref<9x64x64xbf16, #tpu.memory_space<vmem>>, vector<1x64x64xbf16>
    %132 = vector.shape_cast %131 : vector<1x64x64xbf16> to vector<64x64xbf16>
    %cst_158 = arith.constant dense<0.000000e+00> : vector<8x64xf32>
    %133 = tpu.matmul %130, %132, %cst_158 {dimension_numbers = #tpu.dot_dimension_numbers<[1], [0], [0], [1], [0, 0, 1, 1], [], []>} : vector<8x64xbf16>, vector<64x64xbf16>, vector<8x64xf32> -> vector<8x64xf32>
    %134 = arith.addf %128, %133 : vector<8x64xf32>
    %c0_159 = arith.constant 0 : index
    %c2_160 = arith.constant 2 : index
    %c0_161 = arith.constant 0 : index
    %c0_162 = arith.constant 0 : index
    %135 = vector.load %arg5[%c0_159, %c2_160, %c0_161, %c0_162] : memref<1x8x9x64xbf16, #tpu.memory_space<vmem>>, vector<1x1x8x64xbf16>
    %136 = vector.shape_cast %135 : vector<1x1x8x64xbf16> to vector<8x64xbf16>
    %c1_163 = arith.constant 1 : index
    %c0_164 = arith.constant 0 : index
    %c0_165 = arith.constant 0 : index
    %137 = vector.load %arg8[%c1_163, %c0_164, %c0_165] : memref<9x64x64xbf16, #tpu.memory_space<vmem>>, vector<1x64x64xbf16>
    %138 = vector.shape_cast %137 : vector<1x64x64xbf16> to vector<64x64xbf16>
    %cst_166 = arith.constant dense<0.000000e+00> : vector<8x64xf32>
    %139 = tpu.matmul %136, %138, %cst_166 {dimension_numbers = #tpu.dot_dimension_numbers<[1], [0], [0], [1], [0, 0, 1, 1], [], []>} : vector<8x64xbf16>, vector<64x64xbf16>, vector<8x64xf32> -> vector<8x64xf32>
    %140 = arith.addf %134, %139 : vector<8x64xf32>
    %c0_167 = arith.constant 0 : index
    %c2_168 = arith.constant 2 : index
    %c1_169 = arith.constant 1 : index
    %c0_170 = arith.constant 0 : index
    %141 = vector.load %arg2[%c0_167, %c2_168, %c1_169, %c0_170] : memref<1x8x9x64xbf16, #tpu.memory_space<vmem>>, vector<1x1x8x64xbf16>
    %142 = vector.shape_cast %141 : vector<1x1x8x64xbf16> to vector<8x64xbf16>
    %c2_171 = arith.constant 2 : index
    %c0_172 = arith.constant 0 : index
    %c0_173 = arith.constant 0 : index
    %143 = vector.load %arg8[%c2_171, %c0_172, %c0_173] : memref<9x64x64xbf16, #tpu.memory_space<vmem>>, vector<1x64x64xbf16>
    %144 = vector.shape_cast %143 : vector<1x64x64xbf16> to vector<64x64xbf16>
    %cst_174 = arith.constant dense<0.000000e+00> : vector<8x64xf32>
    %145 = tpu.matmul %142, %144, %cst_174 {dimension_numbers = #tpu.dot_dimension_numbers<[1], [0], [0], [1], [0, 0, 1, 1], [], []>} : vector<8x64xbf16>, vector<64x64xbf16>, vector<8x64xf32> -> vector<8x64xf32>
    %146 = arith.addf %140, %145 : vector<8x64xf32>
    %c0_175 = arith.constant 0 : index
    %c2_176 = arith.constant 2 : index
    %c0_177 = arith.constant 0 : index
    %c0_178 = arith.constant 0 : index
    %147 = vector.load %arg3[%c0_175, %c2_176, %c0_177, %c0_178] : memref<1x8x9x64xbf16, #tpu.memory_space<vmem>>, vector<1x1x8x64xbf16>
    %148 = vector.shape_cast %147 : vector<1x1x8x64xbf16> to vector<8x64xbf16>
    %c3_179 = arith.constant 3 : index
    %c0_180 = arith.constant 0 : index
    %c0_181 = arith.constant 0 : index
    %149 = vector.load %arg8[%c3_179, %c0_180, %c0_181] : memref<9x64x64xbf16, #tpu.memory_space<vmem>>, vector<1x64x64xbf16>
    %150 = vector.shape_cast %149 : vector<1x64x64xbf16> to vector<64x64xbf16>
    %cst_182 = arith.constant dense<0.000000e+00> : vector<8x64xf32>
    %151 = tpu.matmul %148, %150, %cst_182 {dimension_numbers = #tpu.dot_dimension_numbers<[1], [0], [0], [1], [0, 0, 1, 1], [], []>} : vector<8x64xbf16>, vector<64x64xbf16>, vector<8x64xf32> -> vector<8x64xf32>
    %152 = arith.addf %146, %151 : vector<8x64xf32>
    %c0_183 = arith.constant 0 : index
    %c2_184 = arith.constant 2 : index
    %c0_185 = arith.constant 0 : index
    %c0_186 = arith.constant 0 : index
    %153 = vector.load %arg6[%c0_183, %c2_184, %c0_185, %c0_186] : memref<1x8x9x64xbf16, #tpu.memory_space<vmem>>, vector<1x1x8x64xbf16>
    %154 = vector.shape_cast %153 : vector<1x1x8x64xbf16> to vector<8x64xbf16>
    %c4_187 = arith.constant 4 : index
    %c0_188 = arith.constant 0 : index
    %c0_189 = arith.constant 0 : index
    %155 = vector.load %arg8[%c4_187, %c0_188, %c0_189] : memref<9x64x64xbf16, #tpu.memory_space<vmem>>, vector<1x64x64xbf16>
    %156 = vector.shape_cast %155 : vector<1x64x64xbf16> to vector<64x64xbf16>
    %cst_190 = arith.constant dense<0.000000e+00> : vector<8x64xf32>
    %157 = tpu.matmul %154, %156, %cst_190 {dimension_numbers = #tpu.dot_dimension_numbers<[1], [0], [0], [1], [0, 0, 1, 1], [], []>} : vector<8x64xbf16>, vector<64x64xbf16>, vector<8x64xf32> -> vector<8x64xf32>
    %158 = arith.addf %152, %157 : vector<8x64xf32>
    %c0_191 = arith.constant 0 : index
    %c2_192 = arith.constant 2 : index
    %c1_193 = arith.constant 1 : index
    %c0_194 = arith.constant 0 : index
    %159 = vector.load %arg3[%c0_191, %c2_192, %c1_193, %c0_194] : memref<1x8x9x64xbf16, #tpu.memory_space<vmem>>, vector<1x1x8x64xbf16>
    %160 = vector.shape_cast %159 : vector<1x1x8x64xbf16> to vector<8x64xbf16>
    %c5_195 = arith.constant 5 : index
    %c0_196 = arith.constant 0 : index
    %c0_197 = arith.constant 0 : index
    %161 = vector.load %arg8[%c5_195, %c0_196, %c0_197] : memref<9x64x64xbf16, #tpu.memory_space<vmem>>, vector<1x64x64xbf16>
    %162 = vector.shape_cast %161 : vector<1x64x64xbf16> to vector<64x64xbf16>
    %cst_198 = arith.constant dense<0.000000e+00> : vector<8x64xf32>
    %163 = tpu.matmul %160, %162, %cst_198 {dimension_numbers = #tpu.dot_dimension_numbers<[1], [0], [0], [1], [0, 0, 1, 1], [], []>} : vector<8x64xbf16>, vector<64x64xbf16>, vector<8x64xf32> -> vector<8x64xf32>
    %164 = arith.addf %158, %163 : vector<8x64xf32>
    %c0_199 = arith.constant 0 : index
    %c2_200 = arith.constant 2 : index
    %c0_201 = arith.constant 0 : index
    %c0_202 = arith.constant 0 : index
    %165 = vector.load %arg4[%c0_199, %c2_200, %c0_201, %c0_202] : memref<1x8x9x64xbf16, #tpu.memory_space<vmem>>, vector<1x1x8x64xbf16>
    %166 = vector.shape_cast %165 : vector<1x1x8x64xbf16> to vector<8x64xbf16>
    %c6_203 = arith.constant 6 : index
    %c0_204 = arith.constant 0 : index
    %c0_205 = arith.constant 0 : index
    %167 = vector.load %arg8[%c6_203, %c0_204, %c0_205] : memref<9x64x64xbf16, #tpu.memory_space<vmem>>, vector<1x64x64xbf16>
    %168 = vector.shape_cast %167 : vector<1x64x64xbf16> to vector<64x64xbf16>
    %cst_206 = arith.constant dense<0.000000e+00> : vector<8x64xf32>
    %169 = tpu.matmul %166, %168, %cst_206 {dimension_numbers = #tpu.dot_dimension_numbers<[1], [0], [0], [1], [0, 0, 1, 1], [], []>} : vector<8x64xbf16>, vector<64x64xbf16>, vector<8x64xf32> -> vector<8x64xf32>
    %170 = arith.addf %164, %169 : vector<8x64xf32>
    %c0_207 = arith.constant 0 : index
    %c2_208 = arith.constant 2 : index
    %c0_209 = arith.constant 0 : index
    %c0_210 = arith.constant 0 : index
    %171 = vector.load %arg7[%c0_207, %c2_208, %c0_209, %c0_210] : memref<1x8x9x64xbf16, #tpu.memory_space<vmem>>, vector<1x1x8x64xbf16>
    %172 = vector.shape_cast %171 : vector<1x1x8x64xbf16> to vector<8x64xbf16>
    %c7_211 = arith.constant 7 : index
    %c0_212 = arith.constant 0 : index
    %c0_213 = arith.constant 0 : index
    %173 = vector.load %arg8[%c7_211, %c0_212, %c0_213] : memref<9x64x64xbf16, #tpu.memory_space<vmem>>, vector<1x64x64xbf16>
    %174 = vector.shape_cast %173 : vector<1x64x64xbf16> to vector<64x64xbf16>
    %cst_214 = arith.constant dense<0.000000e+00> : vector<8x64xf32>
    %175 = tpu.matmul %172, %174, %cst_214 {dimension_numbers = #tpu.dot_dimension_numbers<[1], [0], [0], [1], [0, 0, 1, 1], [], []>} : vector<8x64xbf16>, vector<64x64xbf16>, vector<8x64xf32> -> vector<8x64xf32>
    %176 = arith.addf %170, %175 : vector<8x64xf32>
    %c0_215 = arith.constant 0 : index
    %c2_216 = arith.constant 2 : index
    %c1_217 = arith.constant 1 : index
    %c0_218 = arith.constant 0 : index
    %177 = vector.load %arg4[%c0_215, %c2_216, %c1_217, %c0_218] : memref<1x8x9x64xbf16, #tpu.memory_space<vmem>>, vector<1x1x8x64xbf16>
    %178 = vector.shape_cast %177 : vector<1x1x8x64xbf16> to vector<8x64xbf16>
    %c8_219 = arith.constant 8 : index
    %c0_220 = arith.constant 0 : index
    %c0_221 = arith.constant 0 : index
    %179 = vector.load %arg8[%c8_219, %c0_220, %c0_221] : memref<9x64x64xbf16, #tpu.memory_space<vmem>>, vector<1x64x64xbf16>
    %180 = vector.shape_cast %179 : vector<1x64x64xbf16> to vector<64x64xbf16>
    %cst_222 = arith.constant dense<0.000000e+00> : vector<8x64xf32>
    %181 = tpu.matmul %178, %180, %cst_222 {dimension_numbers = #tpu.dot_dimension_numbers<[1], [0], [0], [1], [0, 0, 1, 1], [], []>} : vector<8x64xbf16>, vector<64x64xbf16>, vector<8x64xf32> -> vector<8x64xf32>
    %182 = arith.addf %176, %181 : vector<8x64xf32>
    %c0_223 = arith.constant 0 : index
    %c0_224 = arith.constant 0 : index
    %183 = vector.load %arg9[%c0_223, %c0_224] : memref<1x64xf32, #tpu.memory_space<vmem>>, vector<1x64xf32>
    %184 = vector.broadcast %183 : vector<1x64xf32> to vector<8x64xf32>
    %185 = arith.addf %182, %184 : vector<8x64xf32>
    %cst_225 = arith.constant 0.000000e+00 : f32
    %186 = vector.broadcast %cst_225 : f32 to vector<8x64xf32>
    %187 = arith.maximumf %185, %186 : vector<8x64xf32>
    %188 = arith.truncf %187 : vector<8x64xf32> to vector<8x64xbf16>
    %c0_226 = arith.constant 0 : index
    %c2_227 = arith.constant 2 : index
    %c0_228 = arith.constant 0 : index
    %c0_229 = arith.constant 0 : index
    %189 = vector.load %arg10[%c0_226, %c2_227, %c0_228, %c0_229] : memref<1x8x8x64xbf16, #tpu.memory_space<vmem>>, vector<1x1x8x64xbf16>
    %190 = vector.shape_cast %189 : vector<1x1x8x64xbf16> to vector<8x64xbf16>
    %191 = vector.shape_cast %188 : vector<8x64xbf16> to vector<1x1x8x64xbf16>
    tpu.vector_store %arg10[%c0_226, %c2_227, %c0_228, %c0_229], %191 {strides = array<i32>} : memref<1x8x8x64xbf16, #tpu.memory_space<vmem>>, vector<1x1x8x64xbf16>,
    %cst_230 = arith.constant 0.000000e+00 : f32
    %192 = vector.broadcast %cst_230 : f32 to vector<8x64xf32>
    %c0_231 = arith.constant 0 : index
    %c3_232 = arith.constant 3 : index
    %c0_233 = arith.constant 0 : index
    %c0_234 = arith.constant 0 : index
    %193 = vector.load %arg2[%c0_231, %c3_232, %c0_233, %c0_234] : memref<1x8x9x64xbf16, #tpu.memory_space<vmem>>, vector<1x1x8x64xbf16>
    %194 = vector.shape_cast %193 : vector<1x1x8x64xbf16> to vector<8x64xbf16>
    %c0_235 = arith.constant 0 : index
    %c0_236 = arith.constant 0 : index
    %c0_237 = arith.constant 0 : index
    %195 = vector.load %arg8[%c0_235, %c0_236, %c0_237] : memref<9x64x64xbf16, #tpu.memory_space<vmem>>, vector<1x64x64xbf16>
    %196 = vector.shape_cast %195 : vector<1x64x64xbf16> to vector<64x64xbf16>
    %cst_238 = arith.constant dense<0.000000e+00> : vector<8x64xf32>
    %197 = tpu.matmul %194, %196, %cst_238 {dimension_numbers = #tpu.dot_dimension_numbers<[1], [0], [0], [1], [0, 0, 1, 1], [], []>} : vector<8x64xbf16>, vector<64x64xbf16>, vector<8x64xf32> -> vector<8x64xf32>
    %198 = arith.addf %192, %197 : vector<8x64xf32>
    %c0_239 = arith.constant 0 : index
    %c3_240 = arith.constant 3 : index
    %c0_241 = arith.constant 0 : index
    %c0_242 = arith.constant 0 : index
    %199 = vector.load %arg5[%c0_239, %c3_240, %c0_241, %c0_242] : memref<1x8x9x64xbf16, #tpu.memory_space<vmem>>, vector<1x1x8x64xbf16>
    %200 = vector.shape_cast %199 : vector<1x1x8x64xbf16> to vector<8x64xbf16>
    %c1_243 = arith.constant 1 : index
    %c0_244 = arith.constant 0 : index
    %c0_245 = arith.constant 0 : index
    %201 = vector.load %arg8[%c1_243, %c0_244, %c0_245] : memref<9x64x64xbf16, #tpu.memory_space<vmem>>, vector<1x64x64xbf16>
    %202 = vector.shape_cast %201 : vector<1x64x64xbf16> to vector<64x64xbf16>
    %cst_246 = arith.constant dense<0.000000e+00> : vector<8x64xf32>
    %203 = tpu.matmul %200, %202, %cst_246 {dimension_numbers = #tpu.dot_dimension_numbers<[1], [0], [0], [1], [0, 0, 1, 1], [], []>} : vector<8x64xbf16>, vector<64x64xbf16>, vector<8x64xf32> -> vector<8x64xf32>
    %204 = arith.addf %198, %203 : vector<8x64xf32>
    %c0_247 = arith.constant 0 : index
    %c3_248 = arith.constant 3 : index
    %c1_249 = arith.constant 1 : index
    %c0_250 = arith.constant 0 : index
    %205 = vector.load %arg2[%c0_247, %c3_248, %c1_249, %c0_250] : memref<1x8x9x64xbf16, #tpu.memory_space<vmem>>, vector<1x1x8x64xbf16>
    %206 = vector.shape_cast %205 : vector<1x1x8x64xbf16> to vector<8x64xbf16>
    %c2_251 = arith.constant 2 : index
    %c0_252 = arith.constant 0 : index
    %c0_253 = arith.constant 0 : index
    %207 = vector.load %arg8[%c2_251, %c0_252, %c0_253] : memref<9x64x64xbf16, #tpu.memory_space<vmem>>, vector<1x64x64xbf16>
    %208 = vector.shape_cast %207 : vector<1x64x64xbf16> to vector<64x64xbf16>
    %cst_254 = arith.constant dense<0.000000e+00> : vector<8x64xf32>
    %209 = tpu.matmul %206, %208, %cst_254 {dimension_numbers = #tpu.dot_dimension_numbers<[1], [0], [0], [1], [0, 0, 1, 1], [], []>} : vector<8x64xbf16>, vector<64x64xbf16>, vector<8x64xf32> -> vector<8x64xf32>
    %210 = arith.addf %204, %209 : vector<8x64xf32>
    %c0_255 = arith.constant 0 : index
    %c3_256 = arith.constant 3 : index
    %c0_257 = arith.constant 0 : index
    %c0_258 = arith.constant 0 : index
    %211 = vector.load %arg3[%c0_255, %c3_256, %c0_257, %c0_258] : memref<1x8x9x64xbf16, #tpu.memory_space<vmem>>, vector<1x1x8x64xbf16>
    %212 = vector.shape_cast %211 : vector<1x1x8x64xbf16> to vector<8x64xbf16>
    %c3_259 = arith.constant 3 : index
    %c0_260 = arith.constant 0 : index
    %c0_261 = arith.constant 0 : index
    %213 = vector.load %arg8[%c3_259, %c0_260, %c0_261] : memref<9x64x64xbf16, #tpu.memory_space<vmem>>, vector<1x64x64xbf16>
    %214 = vector.shape_cast %213 : vector<1x64x64xbf16> to vector<64x64xbf16>
    %cst_262 = arith.constant dense<0.000000e+00> : vector<8x64xf32>
    %215 = tpu.matmul %212, %214, %cst_262 {dimension_numbers = #tpu.dot_dimension_numbers<[1], [0], [0], [1], [0, 0, 1, 1], [], []>} : vector<8x64xbf16>, vector<64x64xbf16>, vector<8x64xf32> -> vector<8x64xf32>
    %216 = arith.addf %210, %215 : vector<8x64xf32>
    %c0_263 = arith.constant 0 : index
    %c3_264 = arith.constant 3 : index
    %c0_265 = arith.constant 0 : index
    %c0_266 = arith.constant 0 : index
    %217 = vector.load %arg6[%c0_263, %c3_264, %c0_265, %c0_266] : memref<1x8x9x64xbf16, #tpu.memory_space<vmem>>, vector<1x1x8x64xbf16>
    %218 = vector.shape_cast %217 : vector<1x1x8x64xbf16> to vector<8x64xbf16>
    %c4_267 = arith.constant 4 : index
    %c0_268 = arith.constant 0 : index
    %c0_269 = arith.constant 0 : index
    %219 = vector.load %arg8[%c4_267, %c0_268, %c0_269] : memref<9x64x64xbf16, #tpu.memory_space<vmem>>, vector<1x64x64xbf16>
    %220 = vector.shape_cast %219 : vector<1x64x64xbf16> to vector<64x64xbf16>
    %cst_270 = arith.constant dense<0.000000e+00> : vector<8x64xf32>
    %221 = tpu.matmul %218, %220, %cst_270 {dimension_numbers = #tpu.dot_dimension_numbers<[1], [0], [0], [1], [0, 0, 1, 1], [], []>} : vector<8x64xbf16>, vector<64x64xbf16>, vector<8x64xf32> -> vector<8x64xf32>
    %222 = arith.addf %216, %221 : vector<8x64xf32>
    %c0_271 = arith.constant 0 : index
    %c3_272 = arith.constant 3 : index
    %c1_273 = arith.constant 1 : index
    %c0_274 = arith.constant 0 : index
    %223 = vector.load %arg3[%c0_271, %c3_272, %c1_273, %c0_274] : memref<1x8x9x64xbf16, #tpu.memory_space<vmem>>, vector<1x1x8x64xbf16>
    %224 = vector.shape_cast %223 : vector<1x1x8x64xbf16> to vector<8x64xbf16>
    %c5_275 = arith.constant 5 : index
    %c0_276 = arith.constant 0 : index
    %c0_277 = arith.constant 0 : index
    %225 = vector.load %arg8[%c5_275, %c0_276, %c0_277] : memref<9x64x64xbf16, #tpu.memory_space<vmem>>, vector<1x64x64xbf16>
    %226 = vector.shape_cast %225 : vector<1x64x64xbf16> to vector<64x64xbf16>
    %cst_278 = arith.constant dense<0.000000e+00> : vector<8x64xf32>
    %227 = tpu.matmul %224, %226, %cst_278 {dimension_numbers = #tpu.dot_dimension_numbers<[1], [0], [0], [1], [0, 0, 1, 1], [], []>} : vector<8x64xbf16>, vector<64x64xbf16>, vector<8x64xf32> -> vector<8x64xf32>
    %228 = arith.addf %222, %227 : vector<8x64xf32>
    %c0_279 = arith.constant 0 : index
    %c3_280 = arith.constant 3 : index
    %c0_281 = arith.constant 0 : index
    %c0_282 = arith.constant 0 : index
    %229 = vector.load %arg4[%c0_279, %c3_280, %c0_281, %c0_282] : memref<1x8x9x64xbf16, #tpu.memory_space<vmem>>, vector<1x1x8x64xbf16>
    %230 = vector.shape_cast %229 : vector<1x1x8x64xbf16> to vector<8x64xbf16>
    %c6_283 = arith.constant 6 : index
    %c0_284 = arith.constant 0 : index
    %c0_285 = arith.constant 0 : index
    %231 = vector.load %arg8[%c6_283, %c0_284, %c0_285] : memref<9x64x64xbf16, #tpu.memory_space<vmem>>, vector<1x64x64xbf16>
    %232 = vector.shape_cast %231 : vector<1x64x64xbf16> to vector<64x64xbf16>
    %cst_286 = arith.constant dense<0.000000e+00> : vector<8x64xf32>
    %233 = tpu.matmul %230, %232, %cst_286 {dimension_numbers = #tpu.dot_dimension_numbers<[1], [0], [0], [1], [0, 0, 1, 1], [], []>} : vector<8x64xbf16>, vector<64x64xbf16>, vector<8x64xf32> -> vector<8x64xf32>
    %234 = arith.addf %228, %233 : vector<8x64xf32>
    %c0_287 = arith.constant 0 : index
    %c3_288 = arith.constant 3 : index
    %c0_289 = arith.constant 0 : index
    %c0_290 = arith.constant 0 : index
    %235 = vector.load %arg7[%c0_287, %c3_288, %c0_289, %c0_290] : memref<1x8x9x64xbf16, #tpu.memory_space<vmem>>, vector<1x1x8x64xbf16>
    %236 = vector.shape_cast %235 : vector<1x1x8x64xbf16> to vector<8x64xbf16>
    %c7_291 = arith.constant 7 : index
    %c0_292 = arith.constant 0 : index
    %c0_293 = arith.constant 0 : index
    %237 = vector.load %arg8[%c7_291, %c0_292, %c0_293] : memref<9x64x64xbf16, #tpu.memory_space<vmem>>, vector<1x64x64xbf16>
    %238 = vector.shape_cast %237 : vector<1x64x64xbf16> to vector<64x64xbf16>
    %cst_294 = arith.constant dense<0.000000e+00> : vector<8x64xf32>
    %239 = tpu.matmul %236, %238, %cst_294 {dimension_numbers = #tpu.dot_dimension_numbers<[1], [0], [0], [1], [0, 0, 1, 1], [], []>} : vector<8x64xbf16>, vector<64x64xbf16>, vector<8x64xf32> -> vector<8x64xf32>
    %240 = arith.addf %234, %239 : vector<8x64xf32>
    %c0_295 = arith.constant 0 : index
    %c3_296 = arith.constant 3 : index
    %c1_297 = arith.constant 1 : index
    %c0_298 = arith.constant 0 : index
    %241 = vector.load %arg4[%c0_295, %c3_296, %c1_297, %c0_298] : memref<1x8x9x64xbf16, #tpu.memory_space<vmem>>, vector<1x1x8x64xbf16>
    %242 = vector.shape_cast %241 : vector<1x1x8x64xbf16> to vector<8x64xbf16>
    %c8_299 = arith.constant 8 : index
    %c0_300 = arith.constant 0 : index
    %c0_301 = arith.constant 0 : index
    %243 = vector.load %arg8[%c8_299, %c0_300, %c0_301] : memref<9x64x64xbf16, #tpu.memory_space<vmem>>, vector<1x64x64xbf16>
    %244 = vector.shape_cast %243 : vector<1x64x64xbf16> to vector<64x64xbf16>
    %cst_302 = arith.constant dense<0.000000e+00> : vector<8x64xf32>
    %245 = tpu.matmul %242, %244, %cst_302 {dimension_numbers = #tpu.dot_dimension_numbers<[1], [0], [0], [1], [0, 0, 1, 1], [], []>} : vector<8x64xbf16>, vector<64x64xbf16>, vector<8x64xf32> -> vector<8x64xf32>
    %246 = arith.addf %240, %245 : vector<8x64xf32>
    %c0_303 = arith.constant 0 : index
    %c0_304 = arith.constant 0 : index
    %247 = vector.load %arg9[%c0_303, %c0_304] : memref<1x64xf32, #tpu.memory_space<vmem>>, vector<1x64xf32>
    %248 = vector.broadcast %247 : vector<1x64xf32> to vector<8x64xf32>
    %249 = arith.addf %246, %248 : vector<8x64xf32>
    %cst_305 = arith.constant 0.000000e+00 : f32
    %250 = vector.broadcast %cst_305 : f32 to vector<8x64xf32>
    %251 = arith.maximumf %249, %250 : vector<8x64xf32>
    %252 = arith.truncf %251 : vector<8x64xf32> to vector<8x64xbf16>
    %c0_306 = arith.constant 0 : index
    %c3_307 = arith.constant 3 : index
    %c0_308 = arith.constant 0 : index
    %c0_309 = arith.constant 0 : index
    %253 = vector.load %arg10[%c0_306, %c3_307, %c0_308, %c0_309] : memref<1x8x8x64xbf16, #tpu.memory_space<vmem>>, vector<1x1x8x64xbf16>
    %254 = vector.shape_cast %253 : vector<1x1x8x64xbf16> to vector<8x64xbf16>
    %255 = vector.shape_cast %252 : vector<8x64xbf16> to vector<1x1x8x64xbf16>
    tpu.vector_store %arg10[%c0_306, %c3_307, %c0_308, %c0_309], %255 {strides = array<i32>} : memref<1x8x8x64xbf16, #tpu.memory_space<vmem>>, vector<1x1x8x64xbf16>,
    %cst_310 = arith.constant 0.000000e+00 : f32
    %256 = vector.broadcast %cst_310 : f32 to vector<8x64xf32>
    %c0_311 = arith.constant 0 : index
    %c4_312 = arith.constant 4 : index
    %c0_313 = arith.constant 0 : index
    %c0_314 = arith.constant 0 : index
    %257 = vector.load %arg2[%c0_311, %c4_312, %c0_313, %c0_314] : memref<1x8x9x64xbf16, #tpu.memory_space<vmem>>, vector<1x1x8x64xbf16>
    %258 = vector.shape_cast %257 : vector<1x1x8x64xbf16> to vector<8x64xbf16>
    %c0_315 = arith.constant 0 : index
    %c0_316 = arith.constant 0 : index
    %c0_317 = arith.constant 0 : index
    %259 = vector.load %arg8[%c0_315, %c0_316, %c0_317] : memref<9x64x64xbf16, #tpu.memory_space<vmem>>, vector<1x64x64xbf16>
    %260 = vector.shape_cast %259 : vector<1x64x64xbf16> to vector<64x64xbf16>
    %cst_318 = arith.constant dense<0.000000e+00> : vector<8x64xf32>
    %261 = tpu.matmul %258, %260, %cst_318 {dimension_numbers = #tpu.dot_dimension_numbers<[1], [0], [0], [1], [0, 0, 1, 1], [], []>} : vector<8x64xbf16>, vector<64x64xbf16>, vector<8x64xf32> -> vector<8x64xf32>
    %262 = arith.addf %256, %261 : vector<8x64xf32>
    %c0_319 = arith.constant 0 : index
    %c4_320 = arith.constant 4 : index
    %c0_321 = arith.constant 0 : index
    %c0_322 = arith.constant 0 : index
    %263 = vector.load %arg5[%c0_319, %c4_320, %c0_321, %c0_322] : memref<1x8x9x64xbf16, #tpu.memory_space<vmem>>, vector<1x1x8x64xbf16>
    %264 = vector.shape_cast %263 : vector<1x1x8x64xbf16> to vector<8x64xbf16>
    %c1_323 = arith.constant 1 : index
    %c0_324 = arith.constant 0 : index
    %c0_325 = arith.constant 0 : index
    %265 = vector.load %arg8[%c1_323, %c0_324, %c0_325] : memref<9x64x64xbf16, #tpu.memory_space<vmem>>, vector<1x64x64xbf16>
    %266 = vector.shape_cast %265 : vector<1x64x64xbf16> to vector<64x64xbf16>
    %cst_326 = arith.constant dense<0.000000e+00> : vector<8x64xf32>
    %267 = tpu.matmul %264, %266, %cst_326 {dimension_numbers = #tpu.dot_dimension_numbers<[1], [0], [0], [1], [0, 0, 1, 1], [], []>} : vector<8x64xbf16>, vector<64x64xbf16>, vector<8x64xf32> -> vector<8x64xf32>
    %268 = arith.addf %262, %267 : vector<8x64xf32>
    %c0_327 = arith.constant 0 : index
    %c4_328 = arith.constant 4 : index
    %c1_329 = arith.constant 1 : index
    %c0_330 = arith.constant 0 : index
    %269 = vector.load %arg2[%c0_327, %c4_328, %c1_329, %c0_330] : memref<1x8x9x64xbf16, #tpu.memory_space<vmem>>, vector<1x1x8x64xbf16>
    %270 = vector.shape_cast %269 : vector<1x1x8x64xbf16> to vector<8x64xbf16>
    %c2_331 = arith.constant 2 : index
    %c0_332 = arith.constant 0 : index
    %c0_333 = arith.constant 0 : index
    %271 = vector.load %arg8[%c2_331, %c0_332, %c0_333] : memref<9x64x64xbf16, #tpu.memory_space<vmem>>, vector<1x64x64xbf16>
    %272 = vector.shape_cast %271 : vector<1x64x64xbf16> to vector<64x64xbf16>
    %cst_334 = arith.constant dense<0.000000e+00> : vector<8x64xf32>
    %273 = tpu.matmul %270, %272, %cst_334 {dimension_numbers = #tpu.dot_dimension_numbers<[1], [0], [0], [1], [0, 0, 1, 1], [], []>} : vector<8x64xbf16>, vector<64x64xbf16>, vector<8x64xf32> -> vector<8x64xf32>
    %274 = arith.addf %268, %273 : vector<8x64xf32>
    %c0_335 = arith.constant 0 : index
    %c4_336 = arith.constant 4 : index
    %c0_337 = arith.constant 0 : index
    %c0_338 = arith.constant 0 : index
    %275 = vector.load %arg3[%c0_335, %c4_336, %c0_337, %c0_338] : memref<1x8x9x64xbf16, #tpu.memory_space<vmem>>, vector<1x1x8x64xbf16>
    %276 = vector.shape_cast %275 : vector<1x1x8x64xbf16> to vector<8x64xbf16>
    %c3_339 = arith.constant 3 : index
    %c0_340 = arith.constant 0 : index
    %c0_341 = arith.constant 0 : index
    %277 = vector.load %arg8[%c3_339, %c0_340, %c0_341] : memref<9x64x64xbf16, #tpu.memory_space<vmem>>, vector<1x64x64xbf16>
    %278 = vector.shape_cast %277 : vector<1x64x64xbf16> to vector<64x64xbf16>
    %cst_342 = arith.constant dense<0.000000e+00> : vector<8x64xf32>
    %279 = tpu.matmul %276, %278, %cst_342 {dimension_numbers = #tpu.dot_dimension_numbers<[1], [0], [0], [1], [0, 0, 1, 1], [], []>} : vector<8x64xbf16>, vector<64x64xbf16>, vector<8x64xf32> -> vector<8x64xf32>
    %280 = arith.addf %274, %279 : vector<8x64xf32>
    %c0_343 = arith.constant 0 : index
    %c4_344 = arith.constant 4 : index
    %c0_345 = arith.constant 0 : index
    %c0_346 = arith.constant 0 : index
    %281 = vector.load %arg6[%c0_343, %c4_344, %c0_345, %c0_346] : memref<1x8x9x64xbf16, #tpu.memory_space<vmem>>, vector<1x1x8x64xbf16>
    %282 = vector.shape_cast %281 : vector<1x1x8x64xbf16> to vector<8x64xbf16>
    %c4_347 = arith.constant 4 : index
    %c0_348 = arith.constant 0 : index
    %c0_349 = arith.constant 0 : index
    %283 = vector.load %arg8[%c4_347, %c0_348, %c0_349] : memref<9x64x64xbf16, #tpu.memory_space<vmem>>, vector<1x64x64xbf16>
    %284 = vector.shape_cast %283 : vector<1x64x64xbf16> to vector<64x64xbf16>
    %cst_350 = arith.constant dense<0.000000e+00> : vector<8x64xf32>
    %285 = tpu.matmul %282, %284, %cst_350 {dimension_numbers = #tpu.dot_dimension_numbers<[1], [0], [0], [1], [0, 0, 1, 1], [], []>} : vector<8x64xbf16>, vector<64x64xbf16>, vector<8x64xf32> -> vector<8x64xf32>
    %286 = arith.addf %280, %285 : vector<8x64xf32>
    %c0_351 = arith.constant 0 : index
    %c4_352 = arith.constant 4 : index
    %c1_353 = arith.constant 1 : index
    %c0_354 = arith.constant 0 : index
    %287 = vector.load %arg3[%c0_351, %c4_352, %c1_353, %c0_354] : memref<1x8x9x64xbf16, #tpu.memory_space<vmem>>, vector<1x1x8x64xbf16>
    %288 = vector.shape_cast %287 : vector<1x1x8x64xbf16> to vector<8x64xbf16>
    %c5_355 = arith.constant 5 : index
    %c0_356 = arith.constant 0 : index
    %c0_357 = arith.constant 0 : index
    %289 = vector.load %arg8[%c5_355, %c0_356, %c0_357] : memref<9x64x64xbf16, #tpu.memory_space<vmem>>, vector<1x64x64xbf16>
    %290 = vector.shape_cast %289 : vector<1x64x64xbf16> to vector<64x64xbf16>
    %cst_358 = arith.constant dense<0.000000e+00> : vector<8x64xf32>
    %291 = tpu.matmul %288, %290, %cst_358 {dimension_numbers = #tpu.dot_dimension_numbers<[1], [0], [0], [1], [0, 0, 1, 1], [], []>} : vector<8x64xbf16>, vector<64x64xbf16>, vector<8x64xf32> -> vector<8x64xf32>
    %292 = arith.addf %286, %291 : vector<8x64xf32>
    %c0_359 = arith.constant 0 : index
    %c4_360 = arith.constant 4 : index
    %c0_361 = arith.constant 0 : index
    %c0_362 = arith.constant 0 : index
    %293 = vector.load %arg4[%c0_359, %c4_360, %c0_361, %c0_362] : memref<1x8x9x64xbf16, #tpu.memory_space<vmem>>, vector<1x1x8x64xbf16>
    %294 = vector.shape_cast %293 : vector<1x1x8x64xbf16> to vector<8x64xbf16>
    %c6_363 = arith.constant 6 : index
    %c0_364 = arith.constant 0 : index
    %c0_365 = arith.constant 0 : index
    %295 = vector.load %arg8[%c6_363, %c0_364, %c0_365] : memref<9x64x64xbf16, #tpu.memory_space<vmem>>, vector<1x64x64xbf16>
    %296 = vector.shape_cast %295 : vector<1x64x64xbf16> to vector<64x64xbf16>
    %cst_366 = arith.constant dense<0.000000e+00> : vector<8x64xf32>
    %297 = tpu.matmul %294, %296, %cst_366 {dimension_numbers = #tpu.dot_dimension_numbers<[1], [0], [0], [1], [0, 0, 1, 1], [], []>} : vector<8x64xbf16>, vector<64x64xbf16>, vector<8x64xf32> -> vector<8x64xf32>
    %298 = arith.addf %292, %297 : vector<8x64xf32>
    %c0_367 = arith.constant 0 : index
    %c4_368 = arith.constant 4 : index
    %c0_369 = arith.constant 0 : index
    %c0_370 = arith.constant 0 : index
    %299 = vector.load %arg7[%c0_367, %c4_368, %c0_369, %c0_370] : memref<1x8x9x64xbf16, #tpu.memory_space<vmem>>, vector<1x1x8x64xbf16>
    %300 = vector.shape_cast %299 : vector<1x1x8x64xbf16> to vector<8x64xbf16>
    %c7_371 = arith.constant 7 : index
    %c0_372 = arith.constant 0 : index
    %c0_373 = arith.constant 0 : index
    %301 = vector.load %arg8[%c7_371, %c0_372, %c0_373] : memref<9x64x64xbf16, #tpu.memory_space<vmem>>, vector<1x64x64xbf16>
    %302 = vector.shape_cast %301 : vector<1x64x64xbf16> to vector<64x64xbf16>
    %cst_374 = arith.constant dense<0.000000e+00> : vector<8x64xf32>
    %303 = tpu.matmul %300, %302, %cst_374 {dimension_numbers = #tpu.dot_dimension_numbers<[1], [0], [0], [1], [0, 0, 1, 1], [], []>} : vector<8x64xbf16>, vector<64x64xbf16>, vector<8x64xf32> -> vector<8x64xf32>
    %304 = arith.addf %298, %303 : vector<8x64xf32>
    %c0_375 = arith.constant 0 : index
    %c4_376 = arith.constant 4 : index
    %c1_377 = arith.constant 1 : index
    %c0_378 = arith.constant 0 : index
    %305 = vector.load %arg4[%c0_375, %c4_376, %c1_377, %c0_378] : memref<1x8x9x64xbf16, #tpu.memory_space<vmem>>, vector<1x1x8x64xbf16>
    %306 = vector.shape_cast %305 : vector<1x1x8x64xbf16> to vector<8x64xbf16>
    %c8_379 = arith.constant 8 : index
    %c0_380 = arith.constant 0 : index
    %c0_381 = arith.constant 0 : index
    %307 = vector.load %arg8[%c8_379, %c0_380, %c0_381] : memref<9x64x64xbf16, #tpu.memory_space<vmem>>, vector<1x64x64xbf16>
    %308 = vector.shape_cast %307 : vector<1x64x64xbf16> to vector<64x64xbf16>
    %cst_382 = arith.constant dense<0.000000e+00> : vector<8x64xf32>
    %309 = tpu.matmul %306, %308, %cst_382 {dimension_numbers = #tpu.dot_dimension_numbers<[1], [0], [0], [1], [0, 0, 1, 1], [], []>} : vector<8x64xbf16>, vector<64x64xbf16>, vector<8x64xf32> -> vector<8x64xf32>
    %310 = arith.addf %304, %309 : vector<8x64xf32>
    %c0_383 = arith.constant 0 : index
    %c0_384 = arith.constant 0 : index
    %311 = vector.load %arg9[%c0_383, %c0_384] : memref<1x64xf32, #tpu.memory_space<vmem>>, vector<1x64xf32>
    %312 = vector.broadcast %311 : vector<1x64xf32> to vector<8x64xf32>
    %313 = arith.addf %310, %312 : vector<8x64xf32>
    %cst_385 = arith.constant 0.000000e+00 : f32
    %314 = vector.broadcast %cst_385 : f32 to vector<8x64xf32>
    %315 = arith.maximumf %313, %314 : vector<8x64xf32>
    %316 = arith.truncf %315 : vector<8x64xf32> to vector<8x64xbf16>
    %c0_386 = arith.constant 0 : index
    %c4_387 = arith.constant 4 : index
    %c0_388 = arith.constant 0 : index
    %c0_389 = arith.constant 0 : index
    %317 = vector.load %arg10[%c0_386, %c4_387, %c0_388, %c0_389] : memref<1x8x8x64xbf16, #tpu.memory_space<vmem>>, vector<1x1x8x64xbf16>
    %318 = vector.shape_cast %317 : vector<1x1x8x64xbf16> to vector<8x64xbf16>
    %319 = vector.shape_cast %316 : vector<8x64xbf16> to vector<1x1x8x64xbf16>
    tpu.vector_store %arg10[%c0_386, %c4_387, %c0_388, %c0_389], %319 {strides = array<i32>} : memref<1x8x8x64xbf16, #tpu.memory_space<vmem>>, vector<1x1x8x64xbf16>,
    %cst_390 = arith.constant 0.000000e+00 : f32
    %320 = vector.broadcast %cst_390 : f32 to vector<8x64xf32>
    %c0_391 = arith.constant 0 : index
    %c5_392 = arith.constant 5 : index
    %c0_393 = arith.constant 0 : index
    %c0_394 = arith.constant 0 : index
    %321 = vector.load %arg2[%c0_391, %c5_392, %c0_393, %c0_394] : memref<1x8x9x64xbf16, #tpu.memory_space<vmem>>, vector<1x1x8x64xbf16>
    %322 = vector.shape_cast %321 : vector<1x1x8x64xbf16> to vector<8x64xbf16>
    %c0_395 = arith.constant 0 : index
    %c0_396 = arith.constant 0 : index
    %c0_397 = arith.constant 0 : index
    %323 = vector.load %arg8[%c0_395, %c0_396, %c0_397] : memref<9x64x64xbf16, #tpu.memory_space<vmem>>, vector<1x64x64xbf16>
    %324 = vector.shape_cast %323 : vector<1x64x64xbf16> to vector<64x64xbf16>
    %cst_398 = arith.constant dense<0.000000e+00> : vector<8x64xf32>
    %325 = tpu.matmul %322, %324, %cst_398 {dimension_numbers = #tpu.dot_dimension_numbers<[1], [0], [0], [1], [0, 0, 1, 1], [], []>} : vector<8x64xbf16>, vector<64x64xbf16>, vector<8x64xf32> -> vector<8x64xf32>
    %326 = arith.addf %320, %325 : vector<8x64xf32>
    %c0_399 = arith.constant 0 : index
    %c5_400 = arith.constant 5 : index
    %c0_401 = arith.constant 0 : index
    %c0_402 = arith.constant 0 : index
    %327 = vector.load %arg5[%c0_399, %c5_400, %c0_401, %c0_402] : memref<1x8x9x64xbf16, #tpu.memory_space<vmem>>, vector<1x1x8x64xbf16>
    %328 = vector.shape_cast %327 : vector<1x1x8x64xbf16> to vector<8x64xbf16>
    %c1_403 = arith.constant 1 : index
    %c0_404 = arith.constant 0 : index
    %c0_405 = arith.constant 0 : index
    %329 = vector.load %arg8[%c1_403, %c0_404, %c0_405] : memref<9x64x64xbf16, #tpu.memory_space<vmem>>, vector<1x64x64xbf16>
    %330 = vector.shape_cast %329 : vector<1x64x64xbf16> to vector<64x64xbf16>
    %cst_406 = arith.constant dense<0.000000e+00> : vector<8x64xf32>
    %331 = tpu.matmul %328, %330, %cst_406 {dimension_numbers = #tpu.dot_dimension_numbers<[1], [0], [0], [1], [0, 0, 1, 1], [], []>} : vector<8x64xbf16>, vector<64x64xbf16>, vector<8x64xf32> -> vector<8x64xf32>
    %332 = arith.addf %326, %331 : vector<8x64xf32>
    %c0_407 = arith.constant 0 : index
    %c5_408 = arith.constant 5 : index
    %c1_409 = arith.constant 1 : index
    %c0_410 = arith.constant 0 : index
    %333 = vector.load %arg2[%c0_407, %c5_408, %c1_409, %c0_410] : memref<1x8x9x64xbf16, #tpu.memory_space<vmem>>, vector<1x1x8x64xbf16>
    %334 = vector.shape_cast %333 : vector<1x1x8x64xbf16> to vector<8x64xbf16>
    %c2_411 = arith.constant 2 : index
    %c0_412 = arith.constant 0 : index
    %c0_413 = arith.constant 0 : index
    %335 = vector.load %arg8[%c2_411, %c0_412, %c0_413] : memref<9x64x64xbf16, #tpu.memory_space<vmem>>, vector<1x64x64xbf16>
    %336 = vector.shape_cast %335 : vector<1x64x64xbf16> to vector<64x64xbf16>
    %cst_414 = arith.constant dense<0.000000e+00> : vector<8x64xf32>
    %337 = tpu.matmul %334, %336, %cst_414 {dimension_numbers = #tpu.dot_dimension_numbers<[1], [0], [0], [1], [0, 0, 1, 1], [], []>} : vector<8x64xbf16>, vector<64x64xbf16>, vector<8x64xf32> -> vector<8x64xf32>
    %338 = arith.addf %332, %337 : vector<8x64xf32>
    %c0_415 = arith.constant 0 : index
    %c5_416 = arith.constant 5 : index
    %c0_417 = arith.constant 0 : index
    %c0_418 = arith.constant 0 : index
    %339 = vector.load %arg3[%c0_415, %c5_416, %c0_417, %c0_418] : memref<1x8x9x64xbf16, #tpu.memory_space<vmem>>, vector<1x1x8x64xbf16>
    %340 = vector.shape_cast %339 : vector<1x1x8x64xbf16> to vector<8x64xbf16>
    %c3_419 = arith.constant 3 : index
    %c0_420 = arith.constant 0 : index
    %c0_421 = arith.constant 0 : index
    %341 = vector.load %arg8[%c3_419, %c0_420, %c0_421] : memref<9x64x64xbf16, #tpu.memory_space<vmem>>, vector<1x64x64xbf16>
    %342 = vector.shape_cast %341 : vector<1x64x64xbf16> to vector<64x64xbf16>
    %cst_422 = arith.constant dense<0.000000e+00> : vector<8x64xf32>
    %343 = tpu.matmul %340, %342, %cst_422 {dimension_numbers = #tpu.dot_dimension_numbers<[1], [0], [0], [1], [0, 0, 1, 1], [], []>} : vector<8x64xbf16>, vector<64x64xbf16>, vector<8x64xf32> -> vector<8x64xf32>
    %344 = arith.addf %338, %343 : vector<8x64xf32>
    %c0_423 = arith.constant 0 : index
    %c5_424 = arith.constant 5 : index
    %c0_425 = arith.constant 0 : index
    %c0_426 = arith.constant 0 : index
    %345 = vector.load %arg6[%c0_423, %c5_424, %c0_425, %c0_426] : memref<1x8x9x64xbf16, #tpu.memory_space<vmem>>, vector<1x1x8x64xbf16>
    %346 = vector.shape_cast %345 : vector<1x1x8x64xbf16> to vector<8x64xbf16>
    %c4_427 = arith.constant 4 : index
    %c0_428 = arith.constant 0 : index
    %c0_429 = arith.constant 0 : index
    %347 = vector.load %arg8[%c4_427, %c0_428, %c0_429] : memref<9x64x64xbf16, #tpu.memory_space<vmem>>, vector<1x64x64xbf16>
    %348 = vector.shape_cast %347 : vector<1x64x64xbf16> to vector<64x64xbf16>
    %cst_430 = arith.constant dense<0.000000e+00> : vector<8x64xf32>
    %349 = tpu.matmul %346, %348, %cst_430 {dimension_numbers = #tpu.dot_dimension_numbers<[1], [0], [0], [1], [0, 0, 1, 1], [], []>} : vector<8x64xbf16>, vector<64x64xbf16>, vector<8x64xf32> -> vector<8x64xf32>
    %350 = arith.addf %344, %349 : vector<8x64xf32>
    %c0_431 = arith.constant 0 : index
    %c5_432 = arith.constant 5 : index
    %c1_433 = arith.constant 1 : index
    %c0_434 = arith.constant 0 : index
    %351 = vector.load %arg3[%c0_431, %c5_432, %c1_433, %c0_434] : memref<1x8x9x64xbf16, #tpu.memory_space<vmem>>, vector<1x1x8x64xbf16>
    %352 = vector.shape_cast %351 : vector<1x1x8x64xbf16> to vector<8x64xbf16>
    %c5_435 = arith.constant 5 : index
    %c0_436 = arith.constant 0 : index
    %c0_437 = arith.constant 0 : index
    %353 = vector.load %arg8[%c5_435, %c0_436, %c0_437] : memref<9x64x64xbf16, #tpu.memory_space<vmem>>, vector<1x64x64xbf16>
    %354 = vector.shape_cast %353 : vector<1x64x64xbf16> to vector<64x64xbf16>
    %cst_438 = arith.constant dense<0.000000e+00> : vector<8x64xf32>
    %355 = tpu.matmul %352, %354, %cst_438 {dimension_numbers = #tpu.dot_dimension_numbers<[1], [0], [0], [1], [0, 0, 1, 1], [], []>} : vector<8x64xbf16>, vector<64x64xbf16>, vector<8x64xf32> -> vector<8x64xf32>
    %356 = arith.addf %350, %355 : vector<8x64xf32>
    %c0_439 = arith.constant 0 : index
    %c5_440 = arith.constant 5 : index
    %c0_441 = arith.constant 0 : index
    %c0_442 = arith.constant 0 : index
    %357 = vector.load %arg4[%c0_439, %c5_440, %c0_441, %c0_442] : memref<1x8x9x64xbf16, #tpu.memory_space<vmem>>, vector<1x1x8x64xbf16>
    %358 = vector.shape_cast %357 : vector<1x1x8x64xbf16> to vector<8x64xbf16>
    %c6_443 = arith.constant 6 : index
    %c0_444 = arith.constant 0 : index
    %c0_445 = arith.constant 0 : index
    %359 = vector.load %arg8[%c6_443, %c0_444, %c0_445] : memref<9x64x64xbf16, #tpu.memory_space<vmem>>, vector<1x64x64xbf16>
    %360 = vector.shape_cast %359 : vector<1x64x64xbf16> to vector<64x64xbf16>
    %cst_446 = arith.constant dense<0.000000e+00> : vector<8x64xf32>
    %361 = tpu.matmul %358, %360, %cst_446 {dimension_numbers = #tpu.dot_dimension_numbers<[1], [0], [0], [1], [0, 0, 1, 1], [], []>} : vector<8x64xbf16>, vector<64x64xbf16>, vector<8x64xf32> -> vector<8x64xf32>
    %362 = arith.addf %356, %361 : vector<8x64xf32>
    %c0_447 = arith.constant 0 : index
    %c5_448 = arith.constant 5 : index
    %c0_449 = arith.constant 0 : index
    %c0_450 = arith.constant 0 : index
    %363 = vector.load %arg7[%c0_447, %c5_448, %c0_449, %c0_450] : memref<1x8x9x64xbf16, #tpu.memory_space<vmem>>, vector<1x1x8x64xbf16>
    %364 = vector.shape_cast %363 : vector<1x1x8x64xbf16> to vector<8x64xbf16>
    %c7_451 = arith.constant 7 : index
    %c0_452 = arith.constant 0 : index
    %c0_453 = arith.constant 0 : index
    %365 = vector.load %arg8[%c7_451, %c0_452, %c0_453] : memref<9x64x64xbf16, #tpu.memory_space<vmem>>, vector<1x64x64xbf16>
    %366 = vector.shape_cast %365 : vector<1x64x64xbf16> to vector<64x64xbf16>
    %cst_454 = arith.constant dense<0.000000e+00> : vector<8x64xf32>
    %367 = tpu.matmul %364, %366, %cst_454 {dimension_numbers = #tpu.dot_dimension_numbers<[1], [0], [0], [1], [0, 0, 1, 1], [], []>} : vector<8x64xbf16>, vector<64x64xbf16>, vector<8x64xf32> -> vector<8x64xf32>
    %368 = arith.addf %362, %367 : vector<8x64xf32>
    %c0_455 = arith.constant 0 : index
    %c5_456 = arith.constant 5 : index
    %c1_457 = arith.constant 1 : index
    %c0_458 = arith.constant 0 : index
    %369 = vector.load %arg4[%c0_455, %c5_456, %c1_457, %c0_458] : memref<1x8x9x64xbf16, #tpu.memory_space<vmem>>, vector<1x1x8x64xbf16>
    %370 = vector.shape_cast %369 : vector<1x1x8x64xbf16> to vector<8x64xbf16>
    %c8_459 = arith.constant 8 : index
    %c0_460 = arith.constant 0 : index
    %c0_461 = arith.constant 0 : index
    %371 = vector.load %arg8[%c8_459, %c0_460, %c0_461] : memref<9x64x64xbf16, #tpu.memory_space<vmem>>, vector<1x64x64xbf16>
    %372 = vector.shape_cast %371 : vector<1x64x64xbf16> to vector<64x64xbf16>
    %cst_462 = arith.constant dense<0.000000e+00> : vector<8x64xf32>
    %373 = tpu.matmul %370, %372, %cst_462 {dimension_numbers = #tpu.dot_dimension_numbers<[1], [0], [0], [1], [0, 0, 1, 1], [], []>} : vector<8x64xbf16>, vector<64x64xbf16>, vector<8x64xf32> -> vector<8x64xf32>
    %374 = arith.addf %368, %373 : vector<8x64xf32>
    %c0_463 = arith.constant 0 : index
    %c0_464 = arith.constant 0 : index
    %375 = vector.load %arg9[%c0_463, %c0_464] : memref<1x64xf32, #tpu.memory_space<vmem>>, vector<1x64xf32>
    %376 = vector.broadcast %375 : vector<1x64xf32> to vector<8x64xf32>
    %377 = arith.addf %374, %376 : vector<8x64xf32>
    %cst_465 = arith.constant 0.000000e+00 : f32
    %378 = vector.broadcast %cst_465 : f32 to vector<8x64xf32>
    %379 = arith.maximumf %377, %378 : vector<8x64xf32>
    %380 = arith.truncf %379 : vector<8x64xf32> to vector<8x64xbf16>
    %c0_466 = arith.constant 0 : index
    %c5_467 = arith.constant 5 : index
    %c0_468 = arith.constant 0 : index
    %c0_469 = arith.constant 0 : index
    %381 = vector.load %arg10[%c0_466, %c5_467, %c0_468, %c0_469] : memref<1x8x8x64xbf16, #tpu.memory_space<vmem>>, vector<1x1x8x64xbf16>
    %382 = vector.shape_cast %381 : vector<1x1x8x64xbf16> to vector<8x64xbf16>
    %383 = vector.shape_cast %380 : vector<8x64xbf16> to vector<1x1x8x64xbf16>
    tpu.vector_store %arg10[%c0_466, %c5_467, %c0_468, %c0_469], %383 {strides = array<i32>} : memref<1x8x8x64xbf16, #tpu.memory_space<vmem>>, vector<1x1x8x64xbf16>,
    %cst_470 = arith.constant 0.000000e+00 : f32
    %384 = vector.broadcast %cst_470 : f32 to vector<8x64xf32>
    %c0_471 = arith.constant 0 : index
    %c6_472 = arith.constant 6 : index
    %c0_473 = arith.constant 0 : index
    %c0_474 = arith.constant 0 : index
    %385 = vector.load %arg2[%c0_471, %c6_472, %c0_473, %c0_474] : memref<1x8x9x64xbf16, #tpu.memory_space<vmem>>, vector<1x1x8x64xbf16>
    %386 = vector.shape_cast %385 : vector<1x1x8x64xbf16> to vector<8x64xbf16>
    %c0_475 = arith.constant 0 : index
    %c0_476 = arith.constant 0 : index
    %c0_477 = arith.constant 0 : index
    %387 = vector.load %arg8[%c0_475, %c0_476, %c0_477] : memref<9x64x64xbf16, #tpu.memory_space<vmem>>, vector<1x64x64xbf16>
    %388 = vector.shape_cast %387 : vector<1x64x64xbf16> to vector<64x64xbf16>
    %cst_478 = arith.constant dense<0.000000e+00> : vector<8x64xf32>
    %389 = tpu.matmul %386, %388, %cst_478 {dimension_numbers = #tpu.dot_dimension_numbers<[1], [0], [0], [1], [0, 0, 1, 1], [], []>} : vector<8x64xbf16>, vector<64x64xbf16>, vector<8x64xf32> -> vector<8x64xf32>
    %390 = arith.addf %384, %389 : vector<8x64xf32>
    %c0_479 = arith.constant 0 : index
    %c6_480 = arith.constant 6 : index
    %c0_481 = arith.constant 0 : index
    %c0_482 = arith.constant 0 : index
    %391 = vector.load %arg5[%c0_479, %c6_480, %c0_481, %c0_482] : memref<1x8x9x64xbf16, #tpu.memory_space<vmem>>, vector<1x1x8x64xbf16>
    %392 = vector.shape_cast %391 : vector<1x1x8x64xbf16> to vector<8x64xbf16>
    %c1_483 = arith.constant 1 : index
    %c0_484 = arith.constant 0 : index
    %c0_485 = arith.constant 0 : index
    %393 = vector.load %arg8[%c1_483, %c0_484, %c0_485] : memref<9x64x64xbf16, #tpu.memory_space<vmem>>, vector<1x64x64xbf16>
    %394 = vector.shape_cast %393 : vector<1x64x64xbf16> to vector<64x64xbf16>
    %cst_486 = arith.constant dense<0.000000e+00> : vector<8x64xf32>
    %395 = tpu.matmul %392, %394, %cst_486 {dimension_numbers = #tpu.dot_dimension_numbers<[1], [0], [0], [1], [0, 0, 1, 1], [], []>} : vector<8x64xbf16>, vector<64x64xbf16>, vector<8x64xf32> -> vector<8x64xf32>
    %396 = arith.addf %390, %395 : vector<8x64xf32>
    %c0_487 = arith.constant 0 : index
    %c6_488 = arith.constant 6 : index
    %c1_489 = arith.constant 1 : index
    %c0_490 = arith.constant 0 : index
    %397 = vector.load %arg2[%c0_487, %c6_488, %c1_489, %c0_490] : memref<1x8x9x64xbf16, #tpu.memory_space<vmem>>, vector<1x1x8x64xbf16>
    %398 = vector.shape_cast %397 : vector<1x1x8x64xbf16> to vector<8x64xbf16>
    %c2_491 = arith.constant 2 : index
    %c0_492 = arith.constant 0 : index
    %c0_493 = arith.constant 0 : index
    %399 = vector.load %arg8[%c2_491, %c0_492, %c0_493] : memref<9x64x64xbf16, #tpu.memory_space<vmem>>, vector<1x64x64xbf16>
    %400 = vector.shape_cast %399 : vector<1x64x64xbf16> to vector<64x64xbf16>
    %cst_494 = arith.constant dense<0.000000e+00> : vector<8x64xf32>
    %401 = tpu.matmul %398, %400, %cst_494 {dimension_numbers = #tpu.dot_dimension_numbers<[1], [0], [0], [1], [0, 0, 1, 1], [], []>} : vector<8x64xbf16>, vector<64x64xbf16>, vector<8x64xf32> -> vector<8x64xf32>
    %402 = arith.addf %396, %401 : vector<8x64xf32>
    %c0_495 = arith.constant 0 : index
    %c6_496 = arith.constant 6 : index
    %c0_497 = arith.constant 0 : index
    %c0_498 = arith.constant 0 : index
    %403 = vector.load %arg3[%c0_495, %c6_496, %c0_497, %c0_498] : memref<1x8x9x64xbf16, #tpu.memory_space<vmem>>, vector<1x1x8x64xbf16>
    %404 = vector.shape_cast %403 : vector<1x1x8x64xbf16> to vector<8x64xbf16>
    %c3_499 = arith.constant 3 : index
    %c0_500 = arith.constant 0 : index
    %c0_501 = arith.constant 0 : index
    %405 = vector.load %arg8[%c3_499, %c0_500, %c0_501] : memref<9x64x64xbf16, #tpu.memory_space<vmem>>, vector<1x64x64xbf16>
    %406 = vector.shape_cast %405 : vector<1x64x64xbf16> to vector<64x64xbf16>
    %cst_502 = arith.constant dense<0.000000e+00> : vector<8x64xf32>
    %407 = tpu.matmul %404, %406, %cst_502 {dimension_numbers = #tpu.dot_dimension_numbers<[1], [0], [0], [1], [0, 0, 1, 1], [], []>} : vector<8x64xbf16>, vector<64x64xbf16>, vector<8x64xf32> -> vector<8x64xf32>
    %408 = arith.addf %402, %407 : vector<8x64xf32>
    %c0_503 = arith.constant 0 : index
    %c6_504 = arith.constant 6 : index
    %c0_505 = arith.constant 0 : index
    %c0_506 = arith.constant 0 : index
    %409 = vector.load %arg6[%c0_503, %c6_504, %c0_505, %c0_506] : memref<1x8x9x64xbf16, #tpu.memory_space<vmem>>, vector<1x1x8x64xbf16>
    %410 = vector.shape_cast %409 : vector<1x1x8x64xbf16> to vector<8x64xbf16>
    %c4_507 = arith.constant 4 : index
    %c0_508 = arith.constant 0 : index
    %c0_509 = arith.constant 0 : index
    %411 = vector.load %arg8[%c4_507, %c0_508, %c0_509] : memref<9x64x64xbf16, #tpu.memory_space<vmem>>, vector<1x64x64xbf16>
    %412 = vector.shape_cast %411 : vector<1x64x64xbf16> to vector<64x64xbf16>
    %cst_510 = arith.constant dense<0.000000e+00> : vector<8x64xf32>
    %413 = tpu.matmul %410, %412, %cst_510 {dimension_numbers = #tpu.dot_dimension_numbers<[1], [0], [0], [1], [0, 0, 1, 1], [], []>} : vector<8x64xbf16>, vector<64x64xbf16>, vector<8x64xf32> -> vector<8x64xf32>
    %414 = arith.addf %408, %413 : vector<8x64xf32>
    %c0_511 = arith.constant 0 : index
    %c6_512 = arith.constant 6 : index
    %c1_513 = arith.constant 1 : index
    %c0_514 = arith.constant 0 : index
    %415 = vector.load %arg3[%c0_511, %c6_512, %c1_513, %c0_514] : memref<1x8x9x64xbf16, #tpu.memory_space<vmem>>, vector<1x1x8x64xbf16>
    %416 = vector.shape_cast %415 : vector<1x1x8x64xbf16> to vector<8x64xbf16>
    %c5_515 = arith.constant 5 : index
    %c0_516 = arith.constant 0 : index
    %c0_517 = arith.constant 0 : index
    %417 = vector.load %arg8[%c5_515, %c0_516, %c0_517] : memref<9x64x64xbf16, #tpu.memory_space<vmem>>, vector<1x64x64xbf16>
    %418 = vector.shape_cast %417 : vector<1x64x64xbf16> to vector<64x64xbf16>
    %cst_518 = arith.constant dense<0.000000e+00> : vector<8x64xf32>
    %419 = tpu.matmul %416, %418, %cst_518 {dimension_numbers = #tpu.dot_dimension_numbers<[1], [0], [0], [1], [0, 0, 1, 1], [], []>} : vector<8x64xbf16>, vector<64x64xbf16>, vector<8x64xf32> -> vector<8x64xf32>
    %420 = arith.addf %414, %419 : vector<8x64xf32>
    %c0_519 = arith.constant 0 : index
    %c6_520 = arith.constant 6 : index
    %c0_521 = arith.constant 0 : index
    %c0_522 = arith.constant 0 : index
    %421 = vector.load %arg4[%c0_519, %c6_520, %c0_521, %c0_522] : memref<1x8x9x64xbf16, #tpu.memory_space<vmem>>, vector<1x1x8x64xbf16>
    %422 = vector.shape_cast %421 : vector<1x1x8x64xbf16> to vector<8x64xbf16>
    %c6_523 = arith.constant 6 : index
    %c0_524 = arith.constant 0 : index
    %c0_525 = arith.constant 0 : index
    %423 = vector.load %arg8[%c6_523, %c0_524, %c0_525] : memref<9x64x64xbf16, #tpu.memory_space<vmem>>, vector<1x64x64xbf16>
    %424 = vector.shape_cast %423 : vector<1x64x64xbf16> to vector<64x64xbf16>
    %cst_526 = arith.constant dense<0.000000e+00> : vector<8x64xf32>
    %425 = tpu.matmul %422, %424, %cst_526 {dimension_numbers = #tpu.dot_dimension_numbers<[1], [0], [0], [1], [0, 0, 1, 1], [], []>} : vector<8x64xbf16>, vector<64x64xbf16>, vector<8x64xf32> -> vector<8x64xf32>
    %426 = arith.addf %420, %425 : vector<8x64xf32>
    %c0_527 = arith.constant 0 : index
    %c6_528 = arith.constant 6 : index
    %c0_529 = arith.constant 0 : index
    %c0_530 = arith.constant 0 : index
    %427 = vector.load %arg7[%c0_527, %c6_528, %c0_529, %c0_530] : memref<1x8x9x64xbf16, #tpu.memory_space<vmem>>, vector<1x1x8x64xbf16>
    %428 = vector.shape_cast %427 : vector<1x1x8x64xbf16> to vector<8x64xbf16>
    %c7_531 = arith.constant 7 : index
    %c0_532 = arith.constant 0 : index
    %c0_533 = arith.constant 0 : index
    %429 = vector.load %arg8[%c7_531, %c0_532, %c0_533] : memref<9x64x64xbf16, #tpu.memory_space<vmem>>, vector<1x64x64xbf16>
    %430 = vector.shape_cast %429 : vector<1x64x64xbf16> to vector<64x64xbf16>
    %cst_534 = arith.constant dense<0.000000e+00> : vector<8x64xf32>
    %431 = tpu.matmul %428, %430, %cst_534 {dimension_numbers = #tpu.dot_dimension_numbers<[1], [0], [0], [1], [0, 0, 1, 1], [], []>} : vector<8x64xbf16>, vector<64x64xbf16>, vector<8x64xf32> -> vector<8x64xf32>
    %432 = arith.addf %426, %431 : vector<8x64xf32>
    %c0_535 = arith.constant 0 : index
    %c6_536 = arith.constant 6 : index
    %c1_537 = arith.constant 1 : index
    %c0_538 = arith.constant 0 : index
    %433 = vector.load %arg4[%c0_535, %c6_536, %c1_537, %c0_538] : memref<1x8x9x64xbf16, #tpu.memory_space<vmem>>, vector<1x1x8x64xbf16>
    %434 = vector.shape_cast %433 : vector<1x1x8x64xbf16> to vector<8x64xbf16>
    %c8_539 = arith.constant 8 : index
    %c0_540 = arith.constant 0 : index
    %c0_541 = arith.constant 0 : index
    %435 = vector.load %arg8[%c8_539, %c0_540, %c0_541] : memref<9x64x64xbf16, #tpu.memory_space<vmem>>, vector<1x64x64xbf16>
    %436 = vector.shape_cast %435 : vector<1x64x64xbf16> to vector<64x64xbf16>
    %cst_542 = arith.constant dense<0.000000e+00> : vector<8x64xf32>
    %437 = tpu.matmul %434, %436, %cst_542 {dimension_numbers = #tpu.dot_dimension_numbers<[1], [0], [0], [1], [0, 0, 1, 1], [], []>} : vector<8x64xbf16>, vector<64x64xbf16>, vector<8x64xf32> -> vector<8x64xf32>
    %438 = arith.addf %432, %437 : vector<8x64xf32>
    %c0_543 = arith.constant 0 : index
    %c0_544 = arith.constant 0 : index
    %439 = vector.load %arg9[%c0_543, %c0_544] : memref<1x64xf32, #tpu.memory_space<vmem>>, vector<1x64xf32>
    %440 = vector.broadcast %439 : vector<1x64xf32> to vector<8x64xf32>
    %441 = arith.addf %438, %440 : vector<8x64xf32>
    %cst_545 = arith.constant 0.000000e+00 : f32
    %442 = vector.broadcast %cst_545 : f32 to vector<8x64xf32>
    %443 = arith.maximumf %441, %442 : vector<8x64xf32>
    %444 = arith.truncf %443 : vector<8x64xf32> to vector<8x64xbf16>
    %c0_546 = arith.constant 0 : index
    %c6_547 = arith.constant 6 : index
    %c0_548 = arith.constant 0 : index
    %c0_549 = arith.constant 0 : index
    %445 = vector.load %arg10[%c0_546, %c6_547, %c0_548, %c0_549] : memref<1x8x8x64xbf16, #tpu.memory_space<vmem>>, vector<1x1x8x64xbf16>
    %446 = vector.shape_cast %445 : vector<1x1x8x64xbf16> to vector<8x64xbf16>
    %447 = vector.shape_cast %444 : vector<8x64xbf16> to vector<1x1x8x64xbf16>
    tpu.vector_store %arg10[%c0_546, %c6_547, %c0_548, %c0_549], %447 {strides = array<i32>} : memref<1x8x8x64xbf16, #tpu.memory_space<vmem>>, vector<1x1x8x64xbf16>,
    %cst_550 = arith.constant 0.000000e+00 : f32
    %448 = vector.broadcast %cst_550 : f32 to vector<8x64xf32>
    %c0_551 = arith.constant 0 : index
    %c7_552 = arith.constant 7 : index
    %c0_553 = arith.constant 0 : index
    %c0_554 = arith.constant 0 : index
    %449 = vector.load %arg2[%c0_551, %c7_552, %c0_553, %c0_554] : memref<1x8x9x64xbf16, #tpu.memory_space<vmem>>, vector<1x1x8x64xbf16>
    %450 = vector.shape_cast %449 : vector<1x1x8x64xbf16> to vector<8x64xbf16>
    %c0_555 = arith.constant 0 : index
    %c0_556 = arith.constant 0 : index
    %c0_557 = arith.constant 0 : index
    %451 = vector.load %arg8[%c0_555, %c0_556, %c0_557] : memref<9x64x64xbf16, #tpu.memory_space<vmem>>, vector<1x64x64xbf16>
    %452 = vector.shape_cast %451 : vector<1x64x64xbf16> to vector<64x64xbf16>
    %cst_558 = arith.constant dense<0.000000e+00> : vector<8x64xf32>
    %453 = tpu.matmul %450, %452, %cst_558 {dimension_numbers = #tpu.dot_dimension_numbers<[1], [0], [0], [1], [0, 0, 1, 1], [], []>} : vector<8x64xbf16>, vector<64x64xbf16>, vector<8x64xf32> -> vector<8x64xf32>
    %454 = arith.addf %448, %453 : vector<8x64xf32>
    %c0_559 = arith.constant 0 : index
    %c7_560 = arith.constant 7 : index
    %c0_561 = arith.constant 0 : index
    %c0_562 = arith.constant 0 : index
    %455 = vector.load %arg5[%c0_559, %c7_560, %c0_561, %c0_562] : memref<1x8x9x64xbf16, #tpu.memory_space<vmem>>, vector<1x1x8x64xbf16>
    %456 = vector.shape_cast %455 : vector<1x1x8x64xbf16> to vector<8x64xbf16>
    %c1_563 = arith.constant 1 : index
    %c0_564 = arith.constant 0 : index
    %c0_565 = arith.constant 0 : index
    %457 = vector.load %arg8[%c1_563, %c0_564, %c0_565] : memref<9x64x64xbf16, #tpu.memory_space<vmem>>, vector<1x64x64xbf16>
    %458 = vector.shape_cast %457 : vector<1x64x64xbf16> to vector<64x64xbf16>
    %cst_566 = arith.constant dense<0.000000e+00> : vector<8x64xf32>
    %459 = tpu.matmul %456, %458, %cst_566 {dimension_numbers = #tpu.dot_dimension_numbers<[1], [0], [0], [1], [0, 0, 1, 1], [], []>} : vector<8x64xbf16>, vector<64x64xbf16>, vector<8x64xf32> -> vector<8x64xf32>
    %460 = arith.addf %454, %459 : vector<8x64xf32>
    %c0_567 = arith.constant 0 : index
    %c7_568 = arith.constant 7 : index
    %c1_569 = arith.constant 1 : index
    %c0_570 = arith.constant 0 : index
    %461 = vector.load %arg2[%c0_567, %c7_568, %c1_569, %c0_570] : memref<1x8x9x64xbf16, #tpu.memory_space<vmem>>, vector<1x1x8x64xbf16>
    %462 = vector.shape_cast %461 : vector<1x1x8x64xbf16> to vector<8x64xbf16>
    %c2_571 = arith.constant 2 : index
    %c0_572 = arith.constant 0 : index
    %c0_573 = arith.constant 0 : index
    %463 = vector.load %arg8[%c2_571, %c0_572, %c0_573] : memref<9x64x64xbf16, #tpu.memory_space<vmem>>, vector<1x64x64xbf16>
    %464 = vector.shape_cast %463 : vector<1x64x64xbf16> to vector<64x64xbf16>
    %cst_574 = arith.constant dense<0.000000e+00> : vector<8x64xf32>
    %465 = tpu.matmul %462, %464, %cst_574 {dimension_numbers = #tpu.dot_dimension_numbers<[1], [0], [0], [1], [0, 0, 1, 1], [], []>} : vector<8x64xbf16>, vector<64x64xbf16>, vector<8x64xf32> -> vector<8x64xf32>
    %466 = arith.addf %460, %465 : vector<8x64xf32>
    %c0_575 = arith.constant 0 : index
    %c7_576 = arith.constant 7 : index
    %c0_577 = arith.constant 0 : index
    %c0_578 = arith.constant 0 : index
    %467 = vector.load %arg3[%c0_575, %c7_576, %c0_577, %c0_578] : memref<1x8x9x64xbf16, #tpu.memory_space<vmem>>, vector<1x1x8x64xbf16>
    %468 = vector.shape_cast %467 : vector<1x1x8x64xbf16> to vector<8x64xbf16>
    %c3_579 = arith.constant 3 : index
    %c0_580 = arith.constant 0 : index
    %c0_581 = arith.constant 0 : index
    %469 = vector.load %arg8[%c3_579, %c0_580, %c0_581] : memref<9x64x64xbf16, #tpu.memory_space<vmem>>, vector<1x64x64xbf16>
    %470 = vector.shape_cast %469 : vector<1x64x64xbf16> to vector<64x64xbf16>
    %cst_582 = arith.constant dense<0.000000e+00> : vector<8x64xf32>
    %471 = tpu.matmul %468, %470, %cst_582 {dimension_numbers = #tpu.dot_dimension_numbers<[1], [0], [0], [1], [0, 0, 1, 1], [], []>} : vector<8x64xbf16>, vector<64x64xbf16>, vector<8x64xf32> -> vector<8x64xf32>
    %472 = arith.addf %466, %471 : vector<8x64xf32>
    %c0_583 = arith.constant 0 : index
    %c7_584 = arith.constant 7 : index
    %c0_585 = arith.constant 0 : index
    %c0_586 = arith.constant 0 : index
    %473 = vector.load %arg6[%c0_583, %c7_584, %c0_585, %c0_586] : memref<1x8x9x64xbf16, #tpu.memory_space<vmem>>, vector<1x1x8x64xbf16>
    %474 = vector.shape_cast %473 : vector<1x1x8x64xbf16> to vector<8x64xbf16>
    %c4_587 = arith.constant 4 : index
    %c0_588 = arith.constant 0 : index
    %c0_589 = arith.constant 0 : index
    %475 = vector.load %arg8[%c4_587, %c0_588, %c0_589] : memref<9x64x64xbf16, #tpu.memory_space<vmem>>, vector<1x64x64xbf16>
    %476 = vector.shape_cast %475 : vector<1x64x64xbf16> to vector<64x64xbf16>
    %cst_590 = arith.constant dense<0.000000e+00> : vector<8x64xf32>
    %477 = tpu.matmul %474, %476, %cst_590 {dimension_numbers = #tpu.dot_dimension_numbers<[1], [0], [0], [1], [0, 0, 1, 1], [], []>} : vector<8x64xbf16>, vector<64x64xbf16>, vector<8x64xf32> -> vector<8x64xf32>
    %478 = arith.addf %472, %477 : vector<8x64xf32>
    %c0_591 = arith.constant 0 : index
    %c7_592 = arith.constant 7 : index
    %c1_593 = arith.constant 1 : index
    %c0_594 = arith.constant 0 : index
    %479 = vector.load %arg3[%c0_591, %c7_592, %c1_593, %c0_594] : memref<1x8x9x64xbf16, #tpu.memory_space<vmem>>, vector<1x1x8x64xbf16>
    %480 = vector.shape_cast %479 : vector<1x1x8x64xbf16> to vector<8x64xbf16>
    %c5_595 = arith.constant 5 : index
    %c0_596 = arith.constant 0 : index
    %c0_597 = arith.constant 0 : index
    %481 = vector.load %arg8[%c5_595, %c0_596, %c0_597] : memref<9x64x64xbf16, #tpu.memory_space<vmem>>, vector<1x64x64xbf16>
    %482 = vector.shape_cast %481 : vector<1x64x64xbf16> to vector<64x64xbf16>
    %cst_598 = arith.constant dense<0.000000e+00> : vector<8x64xf32>
    %483 = tpu.matmul %480, %482, %cst_598 {dimension_numbers = #tpu.dot_dimension_numbers<[1], [0], [0], [1], [0, 0, 1, 1], [], []>} : vector<8x64xbf16>, vector<64x64xbf16>, vector<8x64xf32> -> vector<8x64xf32>
    %484 = arith.addf %478, %483 : vector<8x64xf32>
    %c0_599 = arith.constant 0 : index
    %c7_600 = arith.constant 7 : index
    %c0_601 = arith.constant 0 : index
    %c0_602 = arith.constant 0 : index
    %485 = vector.load %arg4[%c0_599, %c7_600, %c0_601, %c0_602] : memref<1x8x9x64xbf16, #tpu.memory_space<vmem>>, vector<1x1x8x64xbf16>
    %486 = vector.shape_cast %485 : vector<1x1x8x64xbf16> to vector<8x64xbf16>
    %c6_603 = arith.constant 6 : index
    %c0_604 = arith.constant 0 : index
    %c0_605 = arith.constant 0 : index
    %487 = vector.load %arg8[%c6_603, %c0_604, %c0_605] : memref<9x64x64xbf16, #tpu.memory_space<vmem>>, vector<1x64x64xbf16>
    %488 = vector.shape_cast %487 : vector<1x64x64xbf16> to vector<64x64xbf16>
    %cst_606 = arith.constant dense<0.000000e+00> : vector<8x64xf32>
    %489 = tpu.matmul %486, %488, %cst_606 {dimension_numbers = #tpu.dot_dimension_numbers<[1], [0], [0], [1], [0, 0, 1, 1], [], []>} : vector<8x64xbf16>, vector<64x64xbf16>, vector<8x64xf32> -> vector<8x64xf32>
    %490 = arith.addf %484, %489 : vector<8x64xf32>
    %c0_607 = arith.constant 0 : index
    %c7_608 = arith.constant 7 : index
    %c0_609 = arith.constant 0 : index
    %c0_610 = arith.constant 0 : index
    %491 = vector.load %arg7[%c0_607, %c7_608, %c0_609, %c0_610] : memref<1x8x9x64xbf16, #tpu.memory_space<vmem>>, vector<1x1x8x64xbf16>
    %492 = vector.shape_cast %491 : vector<1x1x8x64xbf16> to vector<8x64xbf16>
    %c7_611 = arith.constant 7 : index
    %c0_612 = arith.constant 0 : index
    %c0_613 = arith.constant 0 : index
    %493 = vector.load %arg8[%c7_611, %c0_612, %c0_613] : memref<9x64x64xbf16, #tpu.memory_space<vmem>>, vector<1x64x64xbf16>
    %494 = vector.shape_cast %493 : vector<1x64x64xbf16> to vector<64x64xbf16>
    %cst_614 = arith.constant dense<0.000000e+00> : vector<8x64xf32>
    %495 = tpu.matmul %492, %494, %cst_614 {dimension_numbers = #tpu.dot_dimension_numbers<[1], [0], [0], [1], [0, 0, 1, 1], [], []>} : vector<8x64xbf16>, vector<64x64xbf16>, vector<8x64xf32> -> vector<8x64xf32>
    %496 = arith.addf %490, %495 : vector<8x64xf32>
    %c0_615 = arith.constant 0 : index
    %c7_616 = arith.constant 7 : index
    %c1_617 = arith.constant 1 : index
    %c0_618 = arith.constant 0 : index
    %497 = vector.load %arg4[%c0_615, %c7_616, %c1_617, %c0_618] : memref<1x8x9x64xbf16, #tpu.memory_space<vmem>>, vector<1x1x8x64xbf16>
    %498 = vector.shape_cast %497 : vector<1x1x8x64xbf16> to vector<8x64xbf16>
    %c8_619 = arith.constant 8 : index
    %c0_620 = arith.constant 0 : index
    %c0_621 = arith.constant 0 : index
    %499 = vector.load %arg8[%c8_619, %c0_620, %c0_621] : memref<9x64x64xbf16, #tpu.memory_space<vmem>>, vector<1x64x64xbf16>
    %500 = vector.shape_cast %499 : vector<1x64x64xbf16> to vector<64x64xbf16>
    %cst_622 = arith.constant dense<0.000000e+00> : vector<8x64xf32>
    %501 = tpu.matmul %498, %500, %cst_622 {dimension_numbers = #tpu.dot_dimension_numbers<[1], [0], [0], [1], [0, 0, 1, 1], [], []>} : vector<8x64xbf16>, vector<64x64xbf16>, vector<8x64xf32> -> vector<8x64xf32>
    %502 = arith.addf %496, %501 : vector<8x64xf32>
    %c0_623 = arith.constant 0 : index
    %c0_624 = arith.constant 0 : index
    %503 = vector.load %arg9[%c0_623, %c0_624] : memref<1x64xf32, #tpu.memory_space<vmem>>, vector<1x64xf32>
    %504 = vector.broadcast %503 : vector<1x64xf32> to vector<8x64xf32>
    %505 = arith.addf %502, %504 : vector<8x64xf32>
    %cst_625 = arith.constant 0.000000e+00 : f32
    %506 = vector.broadcast %cst_625 : f32 to vector<8x64xf32>
    %507 = arith.maximumf %505, %506 : vector<8x64xf32>
    %508 = arith.truncf %507 : vector<8x64xf32> to vector<8x64xbf16>
    %c0_626 = arith.constant 0 : index
    %c7_627 = arith.constant 7 : index
    %c0_628 = arith.constant 0 : index
    %c0_629 = arith.constant 0 : index
    %509 = vector.load %arg10[%c0_626, %c7_627, %c0_628, %c0_629] : memref<1x8x8x64xbf16, #tpu.memory_space<vmem>>, vector<1x1x8x64xbf16>
    %510 = vector.shape_cast %509 : vector<1x1x8x64xbf16> to vector<8x64xbf16>
    %511 = vector.shape_cast %508 : vector<8x64xbf16> to vector<1x1x8x64xbf16>
    tpu.vector_store %arg10[%c0_626, %c7_627, %c0_628, %c0_629], %511 {strides = array<i32>} : memref<1x8x8x64xbf16, #tpu.memory_space<vmem>>, vector<1x1x8x64xbf16>,
    return
  }
  func.func @transform_0(%arg0: i32, %arg1: i32) -> (i32, i32, i32, i32) {
    %c0_i32 = arith.constant 0 : i32
    %c0_i32_0 = arith.constant 0 : i32
    %c0_i32_1 = arith.constant 0 : i32
    return %arg0, %arg1, %c0_i32, %c0_i32_0 : i32, i32, i32, i32
  }
  func.func @transform_1(%arg0: i32, %arg1: i32) -> (i32, i32, i32, i32) {
    %c0_i32 = arith.constant 0 : i32
    %c0_i32_0 = arith.constant 0 : i32
    %c0_i32_1 = arith.constant 0 : i32
    return %arg0, %arg1, %c0_i32, %c0_i32_0 : i32, i32, i32, i32
  }
  func.func @transform_2(%arg0: i32, %arg1: i32) -> (i32, i32, i32, i32) {
    %c0_i32 = arith.constant 0 : i32
    %c0_i32_0 = arith.constant 0 : i32
    %c0_i32_1 = arith.constant 0 : i32
    return %arg0, %arg1, %c0_i32, %c0_i32_0 : i32, i32, i32, i32
  }
  func.func @transform_3(%arg0: i32, %arg1: i32) -> (i32, i32, i32, i32) {
    %c0_i32 = arith.constant 0 : i32
    %c0_i32_0 = arith.constant 0 : i32
    %c0_i32_1 = arith.constant 0 : i32
    return %arg0, %arg1, %c0_i32, %c0_i32_0 : i32, i32, i32, i32
  }
  func.func @transform_4(%arg0: i32, %arg1: i32) -> (i32, i32, i32, i32) {
    %c0_i32 = arith.constant 0 : i32
    %c0_i32_0 = arith.constant 0 : i32
    %c0_i32_1 = arith.constant 0 : i32
    return %arg0, %arg1, %c0_i32, %c0_i32_0 : i32, i32, i32, i32
  }
  func.func @transform_5(%arg0: i32, %arg1: i32) -> (i32, i32, i32, i32) {
    %c0_i32 = arith.constant 0 : i32
    %c0_i32_0 = arith.constant 0 : i32
    %c0_i32_1 = arith.constant 0 : i32
    return %arg0, %arg1, %c0_i32, %c0_i32_0 : i32, i32, i32, i32
  }
  func.func @transform_6(%arg0: i32, %arg1: i32) -> (i32, i32, i32) {
    %c0_i32 = arith.constant 0 : i32
    %c0_i32_0 = arith.constant 0 : i32
    %c0_i32_1 = arith.constant 0 : i32
    %c0_i32_2 = arith.constant 0 : i32
    return %c0_i32, %c0_i32_0, %c0_i32_1 : i32, i32, i32
  }
  func.func @transform_7(%arg0: i32, %arg1: i32) -> (i32, i32) {
    %c0_i32 = arith.constant 0 : i32
    %c0_i32_0 = arith.constant 0 : i32
    %c0_i32_1 = arith.constant 0 : i32
    return %c0_i32, %c0_i32_0 : i32, i32
  }
  func.func @transform_8(%arg0: i32, %arg1: i32) -> (i32, i32, i32, i32) {
    %c0_i32 = arith.constant 0 : i32
    %c0_i32_0 = arith.constant 0 : i32
    %c0_i32_1 = arith.constant 0 : i32
    return %arg0, %arg1, %c0_i32, %c0_i32_0 : i32, i32, i32, i32
  }
}

module attributes {stable_mosaic.version = 11 : i64} {
  func.func @kernel(%arg0: i32, %arg1: i32, %arg2: memref<1x4x5x64xbf16, #tpu.memory_space<vmem>>, %arg3: memref<1x4x5x64xbf16, #tpu.memory_space<vmem>>, %arg4: memref<1x4x5x64xbf16, #tpu.memory_space<vmem>>, %arg5: memref<1x4x5x64xbf16, #tpu.memory_space<vmem>>, %arg6: memref<1x4x5x64xbf16, #tpu.memory_space<vmem>>, %arg7: memref<1x4x5x64xbf16, #tpu.memory_space<vmem>>, %arg8: memref<9x64x64xbf16, #tpu.memory_space<vmem>>, %arg9: memref<1x64xf32, #tpu.memory_space<vmem>>, %arg10: memref<64x128xbf16, #tpu.memory_space<vmem>>, %arg11: memref<1x128xf32, #tpu.memory_space<vmem>>, %arg12: memref<1x4x4x128xbf16, #tpu.memory_space<vmem>>) attributes {dimension_semantics = [#tpu.dimension_semantics<parallel>, #tpu.dimension_semantics<parallel>], iteration_bounds = array<i64: 2, 1>, scalar_prefetch = 0 : i64, scratch_operands = 0 : i64, tpu.core_type = #tpu.core_type<tc>, window_params = [{transform_indices = @transform_0, window_bounds = array<i64: 1, 4, 5, 64>}, {transform_indices = @transform_1, window_bounds = array<i64: 1, 4, 5, 64>}, {transform_indices = @transform_2, window_bounds = array<i64: 1, 4, 5, 64>}, {transform_indices = @transform_3, window_bounds = array<i64: 1, 4, 5, 64>}, {transform_indices = @transform_4, window_bounds = array<i64: 1, 4, 5, 64>}, {transform_indices = @transform_5, window_bounds = array<i64: 1, 4, 5, 64>}, {pipeline_mode = #tpu.pipeline_mode<synchronous>, transform_indices = @transform_6, window_bounds = array<i64: 9, 64, 64>}, {pipeline_mode = #tpu.pipeline_mode<synchronous>, transform_indices = @transform_7, window_bounds = array<i64: 1, 64>}, {pipeline_mode = #tpu.pipeline_mode<synchronous>, transform_indices = @transform_8, window_bounds = array<i64: 64, 128>}, {pipeline_mode = #tpu.pipeline_mode<synchronous>, transform_indices = @transform_9, window_bounds = array<i64: 1, 128>}, {transform_indices = @transform_10, window_bounds = array<i64: 1, 4, 4, 128>}]} {
    %cst = arith.constant 0.000000e+00 : f32
    %0 = vector.broadcast %cst : f32 to vector<4x64xf32>
    %c0 = arith.constant 0 : index
    %c0_0 = arith.constant 0 : index
    %c0_1 = arith.constant 0 : index
    %c0_2 = arith.constant 0 : index
    %1 = vector.load %arg2[%c0, %c0_0, %c0_1, %c0_2] : memref<1x4x5x64xbf16, #tpu.memory_space<vmem>>, vector<1x1x4x64xbf16>
    %2 = vector.shape_cast %1 : vector<1x1x4x64xbf16> to vector<4x64xbf16>
    %c0_3 = arith.constant 0 : index
    %c0_4 = arith.constant 0 : index
    %c0_5 = arith.constant 0 : index
    %3 = vector.load %arg8[%c0_3, %c0_4, %c0_5] : memref<9x64x64xbf16, #tpu.memory_space<vmem>>, vector<1x64x64xbf16>
    %4 = vector.shape_cast %3 : vector<1x64x64xbf16> to vector<64x64xbf16>
    %cst_6 = arith.constant dense<0.000000e+00> : vector<4x64xf32>
    %5 = tpu.matmul %2, %4, %cst_6 {dimension_numbers = #tpu.dot_dimension_numbers<[1], [0], [0], [1], [0, 0, 1, 1], [], []>} : vector<4x64xbf16>, vector<64x64xbf16>, vector<4x64xf32> -> vector<4x64xf32>
    %6 = arith.addf %0, %5 : vector<4x64xf32>
    %c0_7 = arith.constant 0 : index
    %c0_8 = arith.constant 0 : index
    %c0_9 = arith.constant 0 : index
    %c0_10 = arith.constant 0 : index
    %7 = vector.load %arg5[%c0_7, %c0_8, %c0_9, %c0_10] : memref<1x4x5x64xbf16, #tpu.memory_space<vmem>>, vector<1x1x4x64xbf16>
    %8 = vector.shape_cast %7 : vector<1x1x4x64xbf16> to vector<4x64xbf16>
    %c1 = arith.constant 1 : index
    %c0_11 = arith.constant 0 : index
    %c0_12 = arith.constant 0 : index
    %9 = vector.load %arg8[%c1, %c0_11, %c0_12] : memref<9x64x64xbf16, #tpu.memory_space<vmem>>, vector<1x64x64xbf16>
    %10 = vector.shape_cast %9 : vector<1x64x64xbf16> to vector<64x64xbf16>
    %cst_13 = arith.constant dense<0.000000e+00> : vector<4x64xf32>
    %11 = tpu.matmul %8, %10, %cst_13 {dimension_numbers = #tpu.dot_dimension_numbers<[1], [0], [0], [1], [0, 0, 1, 1], [], []>} : vector<4x64xbf16>, vector<64x64xbf16>, vector<4x64xf32> -> vector<4x64xf32>
    %12 = arith.addf %6, %11 : vector<4x64xf32>
    %c0_14 = arith.constant 0 : index
    %c0_15 = arith.constant 0 : index
    %c1_16 = arith.constant 1 : index
    %c0_17 = arith.constant 0 : index
    %13 = vector.load %arg2[%c0_14, %c0_15, %c1_16, %c0_17] : memref<1x4x5x64xbf16, #tpu.memory_space<vmem>>, vector<1x1x4x64xbf16>
    %14 = vector.shape_cast %13 : vector<1x1x4x64xbf16> to vector<4x64xbf16>
    %c2 = arith.constant 2 : index
    %c0_18 = arith.constant 0 : index
    %c0_19 = arith.constant 0 : index
    %15 = vector.load %arg8[%c2, %c0_18, %c0_19] : memref<9x64x64xbf16, #tpu.memory_space<vmem>>, vector<1x64x64xbf16>
    %16 = vector.shape_cast %15 : vector<1x64x64xbf16> to vector<64x64xbf16>
    %cst_20 = arith.constant dense<0.000000e+00> : vector<4x64xf32>
    %17 = tpu.matmul %14, %16, %cst_20 {dimension_numbers = #tpu.dot_dimension_numbers<[1], [0], [0], [1], [0, 0, 1, 1], [], []>} : vector<4x64xbf16>, vector<64x64xbf16>, vector<4x64xf32> -> vector<4x64xf32>
    %18 = arith.addf %12, %17 : vector<4x64xf32>
    %c0_21 = arith.constant 0 : index
    %c0_22 = arith.constant 0 : index
    %c0_23 = arith.constant 0 : index
    %c0_24 = arith.constant 0 : index
    %19 = vector.load %arg3[%c0_21, %c0_22, %c0_23, %c0_24] : memref<1x4x5x64xbf16, #tpu.memory_space<vmem>>, vector<1x1x4x64xbf16>
    %20 = vector.shape_cast %19 : vector<1x1x4x64xbf16> to vector<4x64xbf16>
    %c3 = arith.constant 3 : index
    %c0_25 = arith.constant 0 : index
    %c0_26 = arith.constant 0 : index
    %21 = vector.load %arg8[%c3, %c0_25, %c0_26] : memref<9x64x64xbf16, #tpu.memory_space<vmem>>, vector<1x64x64xbf16>
    %22 = vector.shape_cast %21 : vector<1x64x64xbf16> to vector<64x64xbf16>
    %cst_27 = arith.constant dense<0.000000e+00> : vector<4x64xf32>
    %23 = tpu.matmul %20, %22, %cst_27 {dimension_numbers = #tpu.dot_dimension_numbers<[1], [0], [0], [1], [0, 0, 1, 1], [], []>} : vector<4x64xbf16>, vector<64x64xbf16>, vector<4x64xf32> -> vector<4x64xf32>
    %24 = arith.addf %18, %23 : vector<4x64xf32>
    %c0_28 = arith.constant 0 : index
    %c0_29 = arith.constant 0 : index
    %c0_30 = arith.constant 0 : index
    %c0_31 = arith.constant 0 : index
    %25 = vector.load %arg6[%c0_28, %c0_29, %c0_30, %c0_31] : memref<1x4x5x64xbf16, #tpu.memory_space<vmem>>, vector<1x1x4x64xbf16>
    %26 = vector.shape_cast %25 : vector<1x1x4x64xbf16> to vector<4x64xbf16>
    %c4 = arith.constant 4 : index
    %c0_32 = arith.constant 0 : index
    %c0_33 = arith.constant 0 : index
    %27 = vector.load %arg8[%c4, %c0_32, %c0_33] : memref<9x64x64xbf16, #tpu.memory_space<vmem>>, vector<1x64x64xbf16>
    %28 = vector.shape_cast %27 : vector<1x64x64xbf16> to vector<64x64xbf16>
    %cst_34 = arith.constant dense<0.000000e+00> : vector<4x64xf32>
    %29 = tpu.matmul %26, %28, %cst_34 {dimension_numbers = #tpu.dot_dimension_numbers<[1], [0], [0], [1], [0, 0, 1, 1], [], []>} : vector<4x64xbf16>, vector<64x64xbf16>, vector<4x64xf32> -> vector<4x64xf32>
    %30 = arith.addf %24, %29 : vector<4x64xf32>
    %c0_35 = arith.constant 0 : index
    %c0_36 = arith.constant 0 : index
    %c1_37 = arith.constant 1 : index
    %c0_38 = arith.constant 0 : index
    %31 = vector.load %arg3[%c0_35, %c0_36, %c1_37, %c0_38] : memref<1x4x5x64xbf16, #tpu.memory_space<vmem>>, vector<1x1x4x64xbf16>
    %32 = vector.shape_cast %31 : vector<1x1x4x64xbf16> to vector<4x64xbf16>
    %c5 = arith.constant 5 : index
    %c0_39 = arith.constant 0 : index
    %c0_40 = arith.constant 0 : index
    %33 = vector.load %arg8[%c5, %c0_39, %c0_40] : memref<9x64x64xbf16, #tpu.memory_space<vmem>>, vector<1x64x64xbf16>
    %34 = vector.shape_cast %33 : vector<1x64x64xbf16> to vector<64x64xbf16>
    %cst_41 = arith.constant dense<0.000000e+00> : vector<4x64xf32>
    %35 = tpu.matmul %32, %34, %cst_41 {dimension_numbers = #tpu.dot_dimension_numbers<[1], [0], [0], [1], [0, 0, 1, 1], [], []>} : vector<4x64xbf16>, vector<64x64xbf16>, vector<4x64xf32> -> vector<4x64xf32>
    %36 = arith.addf %30, %35 : vector<4x64xf32>
    %c0_42 = arith.constant 0 : index
    %c0_43 = arith.constant 0 : index
    %c0_44 = arith.constant 0 : index
    %c0_45 = arith.constant 0 : index
    %37 = vector.load %arg4[%c0_42, %c0_43, %c0_44, %c0_45] : memref<1x4x5x64xbf16, #tpu.memory_space<vmem>>, vector<1x1x4x64xbf16>
    %38 = vector.shape_cast %37 : vector<1x1x4x64xbf16> to vector<4x64xbf16>
    %c6 = arith.constant 6 : index
    %c0_46 = arith.constant 0 : index
    %c0_47 = arith.constant 0 : index
    %39 = vector.load %arg8[%c6, %c0_46, %c0_47] : memref<9x64x64xbf16, #tpu.memory_space<vmem>>, vector<1x64x64xbf16>
    %40 = vector.shape_cast %39 : vector<1x64x64xbf16> to vector<64x64xbf16>
    %cst_48 = arith.constant dense<0.000000e+00> : vector<4x64xf32>
    %41 = tpu.matmul %38, %40, %cst_48 {dimension_numbers = #tpu.dot_dimension_numbers<[1], [0], [0], [1], [0, 0, 1, 1], [], []>} : vector<4x64xbf16>, vector<64x64xbf16>, vector<4x64xf32> -> vector<4x64xf32>
    %42 = arith.addf %36, %41 : vector<4x64xf32>
    %c0_49 = arith.constant 0 : index
    %c0_50 = arith.constant 0 : index
    %c0_51 = arith.constant 0 : index
    %c0_52 = arith.constant 0 : index
    %43 = vector.load %arg7[%c0_49, %c0_50, %c0_51, %c0_52] : memref<1x4x5x64xbf16, #tpu.memory_space<vmem>>, vector<1x1x4x64xbf16>
    %44 = vector.shape_cast %43 : vector<1x1x4x64xbf16> to vector<4x64xbf16>
    %c7 = arith.constant 7 : index
    %c0_53 = arith.constant 0 : index
    %c0_54 = arith.constant 0 : index
    %45 = vector.load %arg8[%c7, %c0_53, %c0_54] : memref<9x64x64xbf16, #tpu.memory_space<vmem>>, vector<1x64x64xbf16>
    %46 = vector.shape_cast %45 : vector<1x64x64xbf16> to vector<64x64xbf16>
    %cst_55 = arith.constant dense<0.000000e+00> : vector<4x64xf32>
    %47 = tpu.matmul %44, %46, %cst_55 {dimension_numbers = #tpu.dot_dimension_numbers<[1], [0], [0], [1], [0, 0, 1, 1], [], []>} : vector<4x64xbf16>, vector<64x64xbf16>, vector<4x64xf32> -> vector<4x64xf32>
    %48 = arith.addf %42, %47 : vector<4x64xf32>
    %c0_56 = arith.constant 0 : index
    %c0_57 = arith.constant 0 : index
    %c1_58 = arith.constant 1 : index
    %c0_59 = arith.constant 0 : index
    %49 = vector.load %arg4[%c0_56, %c0_57, %c1_58, %c0_59] : memref<1x4x5x64xbf16, #tpu.memory_space<vmem>>, vector<1x1x4x64xbf16>
    %50 = vector.shape_cast %49 : vector<1x1x4x64xbf16> to vector<4x64xbf16>
    %c8 = arith.constant 8 : index
    %c0_60 = arith.constant 0 : index
    %c0_61 = arith.constant 0 : index
    %51 = vector.load %arg8[%c8, %c0_60, %c0_61] : memref<9x64x64xbf16, #tpu.memory_space<vmem>>, vector<1x64x64xbf16>
    %52 = vector.shape_cast %51 : vector<1x64x64xbf16> to vector<64x64xbf16>
    %cst_62 = arith.constant dense<0.000000e+00> : vector<4x64xf32>
    %53 = tpu.matmul %50, %52, %cst_62 {dimension_numbers = #tpu.dot_dimension_numbers<[1], [0], [0], [1], [0, 0, 1, 1], [], []>} : vector<4x64xbf16>, vector<64x64xbf16>, vector<4x64xf32> -> vector<4x64xf32>
    %54 = arith.addf %48, %53 : vector<4x64xf32>
    %c0_63 = arith.constant 0 : index
    %c0_64 = arith.constant 0 : index
    %55 = vector.load %arg9[%c0_63, %c0_64] : memref<1x64xf32, #tpu.memory_space<vmem>>, vector<1x64xf32>
    %56 = vector.broadcast %55 : vector<1x64xf32> to vector<4x64xf32>
    %57 = arith.addf %54, %56 : vector<4x64xf32>
    %cst_65 = arith.constant 0.000000e+00 : f32
    %58 = vector.broadcast %cst_65 : f32 to vector<4x64xf32>
    %59 = arith.maximumf %57, %58 : vector<4x64xf32>
    %60 = arith.truncf %59 : vector<4x64xf32> to vector<4x64xbf16>
    %c0_66 = arith.constant 0 : index
    %c0_67 = arith.constant 0 : index
    %61 = vector.load %arg10[%c0_66, %c0_67] : memref<64x128xbf16, #tpu.memory_space<vmem>>, vector<64x128xbf16>
    %cst_68 = arith.constant dense<0.000000e+00> : vector<4x128xf32>
    %62 = tpu.matmul %60, %61, %cst_68 {dimension_numbers = #tpu.dot_dimension_numbers<[1], [0], [0], [1], [0, 0, 1, 1], [], []>} : vector<4x64xbf16>, vector<64x128xbf16>, vector<4x128xf32> -> vector<4x128xf32>
    %c0_69 = arith.constant 0 : index
    %c0_70 = arith.constant 0 : index
    %63 = vector.load %arg11[%c0_69, %c0_70] : memref<1x128xf32, #tpu.memory_space<vmem>>, vector<1x128xf32>
    %64 = vector.broadcast %63 : vector<1x128xf32> to vector<4x128xf32>
    %65 = arith.addf %62, %64 : vector<4x128xf32>
    %cst_71 = arith.constant 0.000000e+00 : f32
    %66 = vector.broadcast %cst_71 : f32 to vector<4x128xf32>
    %67 = arith.maximumf %65, %66 : vector<4x128xf32>
    %68 = arith.truncf %67 : vector<4x128xf32> to vector<4x128xbf16>
    %c0_72 = arith.constant 0 : index
    %c0_73 = arith.constant 0 : index
    %c0_74 = arith.constant 0 : index
    %c0_75 = arith.constant 0 : index
    %69 = vector.load %arg12[%c0_72, %c0_73, %c0_74, %c0_75] : memref<1x4x4x128xbf16, #tpu.memory_space<vmem>>, vector<1x1x4x128xbf16>
    %70 = vector.shape_cast %69 : vector<1x1x4x128xbf16> to vector<4x128xbf16>
    %71 = vector.shape_cast %68 : vector<4x128xbf16> to vector<1x1x4x128xbf16>
    tpu.vector_store %arg12[%c0_72, %c0_73, %c0_74, %c0_75], %71 {strides = array<i32>} : memref<1x4x4x128xbf16, #tpu.memory_space<vmem>>, vector<1x1x4x128xbf16>,
    %cst_76 = arith.constant 0.000000e+00 : f32
    %72 = vector.broadcast %cst_76 : f32 to vector<4x64xf32>
    %c0_77 = arith.constant 0 : index
    %c1_78 = arith.constant 1 : index
    %c0_79 = arith.constant 0 : index
    %c0_80 = arith.constant 0 : index
    %73 = vector.load %arg2[%c0_77, %c1_78, %c0_79, %c0_80] : memref<1x4x5x64xbf16, #tpu.memory_space<vmem>>, vector<1x1x4x64xbf16>
    %74 = vector.shape_cast %73 : vector<1x1x4x64xbf16> to vector<4x64xbf16>
    %c0_81 = arith.constant 0 : index
    %c0_82 = arith.constant 0 : index
    %c0_83 = arith.constant 0 : index
    %75 = vector.load %arg8[%c0_81, %c0_82, %c0_83] : memref<9x64x64xbf16, #tpu.memory_space<vmem>>, vector<1x64x64xbf16>
    %76 = vector.shape_cast %75 : vector<1x64x64xbf16> to vector<64x64xbf16>
    %cst_84 = arith.constant dense<0.000000e+00> : vector<4x64xf32>
    %77 = tpu.matmul %74, %76, %cst_84 {dimension_numbers = #tpu.dot_dimension_numbers<[1], [0], [0], [1], [0, 0, 1, 1], [], []>} : vector<4x64xbf16>, vector<64x64xbf16>, vector<4x64xf32> -> vector<4x64xf32>
    %78 = arith.addf %72, %77 : vector<4x64xf32>
    %c0_85 = arith.constant 0 : index
    %c1_86 = arith.constant 1 : index
    %c0_87 = arith.constant 0 : index
    %c0_88 = arith.constant 0 : index
    %79 = vector.load %arg5[%c0_85, %c1_86, %c0_87, %c0_88] : memref<1x4x5x64xbf16, #tpu.memory_space<vmem>>, vector<1x1x4x64xbf16>
    %80 = vector.shape_cast %79 : vector<1x1x4x64xbf16> to vector<4x64xbf16>
    %c1_89 = arith.constant 1 : index
    %c0_90 = arith.constant 0 : index
    %c0_91 = arith.constant 0 : index
    %81 = vector.load %arg8[%c1_89, %c0_90, %c0_91] : memref<9x64x64xbf16, #tpu.memory_space<vmem>>, vector<1x64x64xbf16>
    %82 = vector.shape_cast %81 : vector<1x64x64xbf16> to vector<64x64xbf16>
    %cst_92 = arith.constant dense<0.000000e+00> : vector<4x64xf32>
    %83 = tpu.matmul %80, %82, %cst_92 {dimension_numbers = #tpu.dot_dimension_numbers<[1], [0], [0], [1], [0, 0, 1, 1], [], []>} : vector<4x64xbf16>, vector<64x64xbf16>, vector<4x64xf32> -> vector<4x64xf32>
    %84 = arith.addf %78, %83 : vector<4x64xf32>
    %c0_93 = arith.constant 0 : index
    %c1_94 = arith.constant 1 : index
    %c1_95 = arith.constant 1 : index
    %c0_96 = arith.constant 0 : index
    %85 = vector.load %arg2[%c0_93, %c1_94, %c1_95, %c0_96] : memref<1x4x5x64xbf16, #tpu.memory_space<vmem>>, vector<1x1x4x64xbf16>
    %86 = vector.shape_cast %85 : vector<1x1x4x64xbf16> to vector<4x64xbf16>
    %c2_97 = arith.constant 2 : index
    %c0_98 = arith.constant 0 : index
    %c0_99 = arith.constant 0 : index
    %87 = vector.load %arg8[%c2_97, %c0_98, %c0_99] : memref<9x64x64xbf16, #tpu.memory_space<vmem>>, vector<1x64x64xbf16>
    %88 = vector.shape_cast %87 : vector<1x64x64xbf16> to vector<64x64xbf16>
    %cst_100 = arith.constant dense<0.000000e+00> : vector<4x64xf32>
    %89 = tpu.matmul %86, %88, %cst_100 {dimension_numbers = #tpu.dot_dimension_numbers<[1], [0], [0], [1], [0, 0, 1, 1], [], []>} : vector<4x64xbf16>, vector<64x64xbf16>, vector<4x64xf32> -> vector<4x64xf32>
    %90 = arith.addf %84, %89 : vector<4x64xf32>
    %c0_101 = arith.constant 0 : index
    %c1_102 = arith.constant 1 : index
    %c0_103 = arith.constant 0 : index
    %c0_104 = arith.constant 0 : index
    %91 = vector.load %arg3[%c0_101, %c1_102, %c0_103, %c0_104] : memref<1x4x5x64xbf16, #tpu.memory_space<vmem>>, vector<1x1x4x64xbf16>
    %92 = vector.shape_cast %91 : vector<1x1x4x64xbf16> to vector<4x64xbf16>
    %c3_105 = arith.constant 3 : index
    %c0_106 = arith.constant 0 : index
    %c0_107 = arith.constant 0 : index
    %93 = vector.load %arg8[%c3_105, %c0_106, %c0_107] : memref<9x64x64xbf16, #tpu.memory_space<vmem>>, vector<1x64x64xbf16>
    %94 = vector.shape_cast %93 : vector<1x64x64xbf16> to vector<64x64xbf16>
    %cst_108 = arith.constant dense<0.000000e+00> : vector<4x64xf32>
    %95 = tpu.matmul %92, %94, %cst_108 {dimension_numbers = #tpu.dot_dimension_numbers<[1], [0], [0], [1], [0, 0, 1, 1], [], []>} : vector<4x64xbf16>, vector<64x64xbf16>, vector<4x64xf32> -> vector<4x64xf32>
    %96 = arith.addf %90, %95 : vector<4x64xf32>
    %c0_109 = arith.constant 0 : index
    %c1_110 = arith.constant 1 : index
    %c0_111 = arith.constant 0 : index
    %c0_112 = arith.constant 0 : index
    %97 = vector.load %arg6[%c0_109, %c1_110, %c0_111, %c0_112] : memref<1x4x5x64xbf16, #tpu.memory_space<vmem>>, vector<1x1x4x64xbf16>
    %98 = vector.shape_cast %97 : vector<1x1x4x64xbf16> to vector<4x64xbf16>
    %c4_113 = arith.constant 4 : index
    %c0_114 = arith.constant 0 : index
    %c0_115 = arith.constant 0 : index
    %99 = vector.load %arg8[%c4_113, %c0_114, %c0_115] : memref<9x64x64xbf16, #tpu.memory_space<vmem>>, vector<1x64x64xbf16>
    %100 = vector.shape_cast %99 : vector<1x64x64xbf16> to vector<64x64xbf16>
    %cst_116 = arith.constant dense<0.000000e+00> : vector<4x64xf32>
    %101 = tpu.matmul %98, %100, %cst_116 {dimension_numbers = #tpu.dot_dimension_numbers<[1], [0], [0], [1], [0, 0, 1, 1], [], []>} : vector<4x64xbf16>, vector<64x64xbf16>, vector<4x64xf32> -> vector<4x64xf32>
    %102 = arith.addf %96, %101 : vector<4x64xf32>
    %c0_117 = arith.constant 0 : index
    %c1_118 = arith.constant 1 : index
    %c1_119 = arith.constant 1 : index
    %c0_120 = arith.constant 0 : index
    %103 = vector.load %arg3[%c0_117, %c1_118, %c1_119, %c0_120] : memref<1x4x5x64xbf16, #tpu.memory_space<vmem>>, vector<1x1x4x64xbf16>
    %104 = vector.shape_cast %103 : vector<1x1x4x64xbf16> to vector<4x64xbf16>
    %c5_121 = arith.constant 5 : index
    %c0_122 = arith.constant 0 : index
    %c0_123 = arith.constant 0 : index
    %105 = vector.load %arg8[%c5_121, %c0_122, %c0_123] : memref<9x64x64xbf16, #tpu.memory_space<vmem>>, vector<1x64x64xbf16>
    %106 = vector.shape_cast %105 : vector<1x64x64xbf16> to vector<64x64xbf16>
    %cst_124 = arith.constant dense<0.000000e+00> : vector<4x64xf32>
    %107 = tpu.matmul %104, %106, %cst_124 {dimension_numbers = #tpu.dot_dimension_numbers<[1], [0], [0], [1], [0, 0, 1, 1], [], []>} : vector<4x64xbf16>, vector<64x64xbf16>, vector<4x64xf32> -> vector<4x64xf32>
    %108 = arith.addf %102, %107 : vector<4x64xf32>
    %c0_125 = arith.constant 0 : index
    %c1_126 = arith.constant 1 : index
    %c0_127 = arith.constant 0 : index
    %c0_128 = arith.constant 0 : index
    %109 = vector.load %arg4[%c0_125, %c1_126, %c0_127, %c0_128] : memref<1x4x5x64xbf16, #tpu.memory_space<vmem>>, vector<1x1x4x64xbf16>
    %110 = vector.shape_cast %109 : vector<1x1x4x64xbf16> to vector<4x64xbf16>
    %c6_129 = arith.constant 6 : index
    %c0_130 = arith.constant 0 : index
    %c0_131 = arith.constant 0 : index
    %111 = vector.load %arg8[%c6_129, %c0_130, %c0_131] : memref<9x64x64xbf16, #tpu.memory_space<vmem>>, vector<1x64x64xbf16>
    %112 = vector.shape_cast %111 : vector<1x64x64xbf16> to vector<64x64xbf16>
    %cst_132 = arith.constant dense<0.000000e+00> : vector<4x64xf32>
    %113 = tpu.matmul %110, %112, %cst_132 {dimension_numbers = #tpu.dot_dimension_numbers<[1], [0], [0], [1], [0, 0, 1, 1], [], []>} : vector<4x64xbf16>, vector<64x64xbf16>, vector<4x64xf32> -> vector<4x64xf32>
    %114 = arith.addf %108, %113 : vector<4x64xf32>
    %c0_133 = arith.constant 0 : index
    %c1_134 = arith.constant 1 : index
    %c0_135 = arith.constant 0 : index
    %c0_136 = arith.constant 0 : index
    %115 = vector.load %arg7[%c0_133, %c1_134, %c0_135, %c0_136] : memref<1x4x5x64xbf16, #tpu.memory_space<vmem>>, vector<1x1x4x64xbf16>
    %116 = vector.shape_cast %115 : vector<1x1x4x64xbf16> to vector<4x64xbf16>
    %c7_137 = arith.constant 7 : index
    %c0_138 = arith.constant 0 : index
    %c0_139 = arith.constant 0 : index
    %117 = vector.load %arg8[%c7_137, %c0_138, %c0_139] : memref<9x64x64xbf16, #tpu.memory_space<vmem>>, vector<1x64x64xbf16>
    %118 = vector.shape_cast %117 : vector<1x64x64xbf16> to vector<64x64xbf16>
    %cst_140 = arith.constant dense<0.000000e+00> : vector<4x64xf32>
    %119 = tpu.matmul %116, %118, %cst_140 {dimension_numbers = #tpu.dot_dimension_numbers<[1], [0], [0], [1], [0, 0, 1, 1], [], []>} : vector<4x64xbf16>, vector<64x64xbf16>, vector<4x64xf32> -> vector<4x64xf32>
    %120 = arith.addf %114, %119 : vector<4x64xf32>
    %c0_141 = arith.constant 0 : index
    %c1_142 = arith.constant 1 : index
    %c1_143 = arith.constant 1 : index
    %c0_144 = arith.constant 0 : index
    %121 = vector.load %arg4[%c0_141, %c1_142, %c1_143, %c0_144] : memref<1x4x5x64xbf16, #tpu.memory_space<vmem>>, vector<1x1x4x64xbf16>
    %122 = vector.shape_cast %121 : vector<1x1x4x64xbf16> to vector<4x64xbf16>
    %c8_145 = arith.constant 8 : index
    %c0_146 = arith.constant 0 : index
    %c0_147 = arith.constant 0 : index
    %123 = vector.load %arg8[%c8_145, %c0_146, %c0_147] : memref<9x64x64xbf16, #tpu.memory_space<vmem>>, vector<1x64x64xbf16>
    %124 = vector.shape_cast %123 : vector<1x64x64xbf16> to vector<64x64xbf16>
    %cst_148 = arith.constant dense<0.000000e+00> : vector<4x64xf32>
    %125 = tpu.matmul %122, %124, %cst_148 {dimension_numbers = #tpu.dot_dimension_numbers<[1], [0], [0], [1], [0, 0, 1, 1], [], []>} : vector<4x64xbf16>, vector<64x64xbf16>, vector<4x64xf32> -> vector<4x64xf32>
    %126 = arith.addf %120, %125 : vector<4x64xf32>
    %c0_149 = arith.constant 0 : index
    %c0_150 = arith.constant 0 : index
    %127 = vector.load %arg9[%c0_149, %c0_150] : memref<1x64xf32, #tpu.memory_space<vmem>>, vector<1x64xf32>
    %128 = vector.broadcast %127 : vector<1x64xf32> to vector<4x64xf32>
    %129 = arith.addf %126, %128 : vector<4x64xf32>
    %cst_151 = arith.constant 0.000000e+00 : f32
    %130 = vector.broadcast %cst_151 : f32 to vector<4x64xf32>
    %131 = arith.maximumf %129, %130 : vector<4x64xf32>
    %132 = arith.truncf %131 : vector<4x64xf32> to vector<4x64xbf16>
    %c0_152 = arith.constant 0 : index
    %c0_153 = arith.constant 0 : index
    %133 = vector.load %arg10[%c0_152, %c0_153] : memref<64x128xbf16, #tpu.memory_space<vmem>>, vector<64x128xbf16>
    %cst_154 = arith.constant dense<0.000000e+00> : vector<4x128xf32>
    %134 = tpu.matmul %132, %133, %cst_154 {dimension_numbers = #tpu.dot_dimension_numbers<[1], [0], [0], [1], [0, 0, 1, 1], [], []>} : vector<4x64xbf16>, vector<64x128xbf16>, vector<4x128xf32> -> vector<4x128xf32>
    %c0_155 = arith.constant 0 : index
    %c0_156 = arith.constant 0 : index
    %135 = vector.load %arg11[%c0_155, %c0_156] : memref<1x128xf32, #tpu.memory_space<vmem>>, vector<1x128xf32>
    %136 = vector.broadcast %135 : vector<1x128xf32> to vector<4x128xf32>
    %137 = arith.addf %134, %136 : vector<4x128xf32>
    %cst_157 = arith.constant 0.000000e+00 : f32
    %138 = vector.broadcast %cst_157 : f32 to vector<4x128xf32>
    %139 = arith.maximumf %137, %138 : vector<4x128xf32>
    %140 = arith.truncf %139 : vector<4x128xf32> to vector<4x128xbf16>
    %c0_158 = arith.constant 0 : index
    %c1_159 = arith.constant 1 : index
    %c0_160 = arith.constant 0 : index
    %c0_161 = arith.constant 0 : index
    %141 = vector.load %arg12[%c0_158, %c1_159, %c0_160, %c0_161] : memref<1x4x4x128xbf16, #tpu.memory_space<vmem>>, vector<1x1x4x128xbf16>
    %142 = vector.shape_cast %141 : vector<1x1x4x128xbf16> to vector<4x128xbf16>
    %143 = vector.shape_cast %140 : vector<4x128xbf16> to vector<1x1x4x128xbf16>
    tpu.vector_store %arg12[%c0_158, %c1_159, %c0_160, %c0_161], %143 {strides = array<i32>} : memref<1x4x4x128xbf16, #tpu.memory_space<vmem>>, vector<1x1x4x128xbf16>,
    %cst_162 = arith.constant 0.000000e+00 : f32
    %144 = vector.broadcast %cst_162 : f32 to vector<4x64xf32>
    %c0_163 = arith.constant 0 : index
    %c2_164 = arith.constant 2 : index
    %c0_165 = arith.constant 0 : index
    %c0_166 = arith.constant 0 : index
    %145 = vector.load %arg2[%c0_163, %c2_164, %c0_165, %c0_166] : memref<1x4x5x64xbf16, #tpu.memory_space<vmem>>, vector<1x1x4x64xbf16>
    %146 = vector.shape_cast %145 : vector<1x1x4x64xbf16> to vector<4x64xbf16>
    %c0_167 = arith.constant 0 : index
    %c0_168 = arith.constant 0 : index
    %c0_169 = arith.constant 0 : index
    %147 = vector.load %arg8[%c0_167, %c0_168, %c0_169] : memref<9x64x64xbf16, #tpu.memory_space<vmem>>, vector<1x64x64xbf16>
    %148 = vector.shape_cast %147 : vector<1x64x64xbf16> to vector<64x64xbf16>
    %cst_170 = arith.constant dense<0.000000e+00> : vector<4x64xf32>
    %149 = tpu.matmul %146, %148, %cst_170 {dimension_numbers = #tpu.dot_dimension_numbers<[1], [0], [0], [1], [0, 0, 1, 1], [], []>} : vector<4x64xbf16>, vector<64x64xbf16>, vector<4x64xf32> -> vector<4x64xf32>
    %150 = arith.addf %144, %149 : vector<4x64xf32>
    %c0_171 = arith.constant 0 : index
    %c2_172 = arith.constant 2 : index
    %c0_173 = arith.constant 0 : index
    %c0_174 = arith.constant 0 : index
    %151 = vector.load %arg5[%c0_171, %c2_172, %c0_173, %c0_174] : memref<1x4x5x64xbf16, #tpu.memory_space<vmem>>, vector<1x1x4x64xbf16>
    %152 = vector.shape_cast %151 : vector<1x1x4x64xbf16> to vector<4x64xbf16>
    %c1_175 = arith.constant 1 : index
    %c0_176 = arith.constant 0 : index
    %c0_177 = arith.constant 0 : index
    %153 = vector.load %arg8[%c1_175, %c0_176, %c0_177] : memref<9x64x64xbf16, #tpu.memory_space<vmem>>, vector<1x64x64xbf16>
    %154 = vector.shape_cast %153 : vector<1x64x64xbf16> to vector<64x64xbf16>
    %cst_178 = arith.constant dense<0.000000e+00> : vector<4x64xf32>
    %155 = tpu.matmul %152, %154, %cst_178 {dimension_numbers = #tpu.dot_dimension_numbers<[1], [0], [0], [1], [0, 0, 1, 1], [], []>} : vector<4x64xbf16>, vector<64x64xbf16>, vector<4x64xf32> -> vector<4x64xf32>
    %156 = arith.addf %150, %155 : vector<4x64xf32>
    %c0_179 = arith.constant 0 : index
    %c2_180 = arith.constant 2 : index
    %c1_181 = arith.constant 1 : index
    %c0_182 = arith.constant 0 : index
    %157 = vector.load %arg2[%c0_179, %c2_180, %c1_181, %c0_182] : memref<1x4x5x64xbf16, #tpu.memory_space<vmem>>, vector<1x1x4x64xbf16>
    %158 = vector.shape_cast %157 : vector<1x1x4x64xbf16> to vector<4x64xbf16>
    %c2_183 = arith.constant 2 : index
    %c0_184 = arith.constant 0 : index
    %c0_185 = arith.constant 0 : index
    %159 = vector.load %arg8[%c2_183, %c0_184, %c0_185] : memref<9x64x64xbf16, #tpu.memory_space<vmem>>, vector<1x64x64xbf16>
    %160 = vector.shape_cast %159 : vector<1x64x64xbf16> to vector<64x64xbf16>
    %cst_186 = arith.constant dense<0.000000e+00> : vector<4x64xf32>
    %161 = tpu.matmul %158, %160, %cst_186 {dimension_numbers = #tpu.dot_dimension_numbers<[1], [0], [0], [1], [0, 0, 1, 1], [], []>} : vector<4x64xbf16>, vector<64x64xbf16>, vector<4x64xf32> -> vector<4x64xf32>
    %162 = arith.addf %156, %161 : vector<4x64xf32>
    %c0_187 = arith.constant 0 : index
    %c2_188 = arith.constant 2 : index
    %c0_189 = arith.constant 0 : index
    %c0_190 = arith.constant 0 : index
    %163 = vector.load %arg3[%c0_187, %c2_188, %c0_189, %c0_190] : memref<1x4x5x64xbf16, #tpu.memory_space<vmem>>, vector<1x1x4x64xbf16>
    %164 = vector.shape_cast %163 : vector<1x1x4x64xbf16> to vector<4x64xbf16>
    %c3_191 = arith.constant 3 : index
    %c0_192 = arith.constant 0 : index
    %c0_193 = arith.constant 0 : index
    %165 = vector.load %arg8[%c3_191, %c0_192, %c0_193] : memref<9x64x64xbf16, #tpu.memory_space<vmem>>, vector<1x64x64xbf16>
    %166 = vector.shape_cast %165 : vector<1x64x64xbf16> to vector<64x64xbf16>
    %cst_194 = arith.constant dense<0.000000e+00> : vector<4x64xf32>
    %167 = tpu.matmul %164, %166, %cst_194 {dimension_numbers = #tpu.dot_dimension_numbers<[1], [0], [0], [1], [0, 0, 1, 1], [], []>} : vector<4x64xbf16>, vector<64x64xbf16>, vector<4x64xf32> -> vector<4x64xf32>
    %168 = arith.addf %162, %167 : vector<4x64xf32>
    %c0_195 = arith.constant 0 : index
    %c2_196 = arith.constant 2 : index
    %c0_197 = arith.constant 0 : index
    %c0_198 = arith.constant 0 : index
    %169 = vector.load %arg6[%c0_195, %c2_196, %c0_197, %c0_198] : memref<1x4x5x64xbf16, #tpu.memory_space<vmem>>, vector<1x1x4x64xbf16>
    %170 = vector.shape_cast %169 : vector<1x1x4x64xbf16> to vector<4x64xbf16>
    %c4_199 = arith.constant 4 : index
    %c0_200 = arith.constant 0 : index
    %c0_201 = arith.constant 0 : index
    %171 = vector.load %arg8[%c4_199, %c0_200, %c0_201] : memref<9x64x64xbf16, #tpu.memory_space<vmem>>, vector<1x64x64xbf16>
    %172 = vector.shape_cast %171 : vector<1x64x64xbf16> to vector<64x64xbf16>
    %cst_202 = arith.constant dense<0.000000e+00> : vector<4x64xf32>
    %173 = tpu.matmul %170, %172, %cst_202 {dimension_numbers = #tpu.dot_dimension_numbers<[1], [0], [0], [1], [0, 0, 1, 1], [], []>} : vector<4x64xbf16>, vector<64x64xbf16>, vector<4x64xf32> -> vector<4x64xf32>
    %174 = arith.addf %168, %173 : vector<4x64xf32>
    %c0_203 = arith.constant 0 : index
    %c2_204 = arith.constant 2 : index
    %c1_205 = arith.constant 1 : index
    %c0_206 = arith.constant 0 : index
    %175 = vector.load %arg3[%c0_203, %c2_204, %c1_205, %c0_206] : memref<1x4x5x64xbf16, #tpu.memory_space<vmem>>, vector<1x1x4x64xbf16>
    %176 = vector.shape_cast %175 : vector<1x1x4x64xbf16> to vector<4x64xbf16>
    %c5_207 = arith.constant 5 : index
    %c0_208 = arith.constant 0 : index
    %c0_209 = arith.constant 0 : index
    %177 = vector.load %arg8[%c5_207, %c0_208, %c0_209] : memref<9x64x64xbf16, #tpu.memory_space<vmem>>, vector<1x64x64xbf16>
    %178 = vector.shape_cast %177 : vector<1x64x64xbf16> to vector<64x64xbf16>
    %cst_210 = arith.constant dense<0.000000e+00> : vector<4x64xf32>
    %179 = tpu.matmul %176, %178, %cst_210 {dimension_numbers = #tpu.dot_dimension_numbers<[1], [0], [0], [1], [0, 0, 1, 1], [], []>} : vector<4x64xbf16>, vector<64x64xbf16>, vector<4x64xf32> -> vector<4x64xf32>
    %180 = arith.addf %174, %179 : vector<4x64xf32>
    %c0_211 = arith.constant 0 : index
    %c2_212 = arith.constant 2 : index
    %c0_213 = arith.constant 0 : index
    %c0_214 = arith.constant 0 : index
    %181 = vector.load %arg4[%c0_211, %c2_212, %c0_213, %c0_214] : memref<1x4x5x64xbf16, #tpu.memory_space<vmem>>, vector<1x1x4x64xbf16>
    %182 = vector.shape_cast %181 : vector<1x1x4x64xbf16> to vector<4x64xbf16>
    %c6_215 = arith.constant 6 : index
    %c0_216 = arith.constant 0 : index
    %c0_217 = arith.constant 0 : index
    %183 = vector.load %arg8[%c6_215, %c0_216, %c0_217] : memref<9x64x64xbf16, #tpu.memory_space<vmem>>, vector<1x64x64xbf16>
    %184 = vector.shape_cast %183 : vector<1x64x64xbf16> to vector<64x64xbf16>
    %cst_218 = arith.constant dense<0.000000e+00> : vector<4x64xf32>
    %185 = tpu.matmul %182, %184, %cst_218 {dimension_numbers = #tpu.dot_dimension_numbers<[1], [0], [0], [1], [0, 0, 1, 1], [], []>} : vector<4x64xbf16>, vector<64x64xbf16>, vector<4x64xf32> -> vector<4x64xf32>
    %186 = arith.addf %180, %185 : vector<4x64xf32>
    %c0_219 = arith.constant 0 : index
    %c2_220 = arith.constant 2 : index
    %c0_221 = arith.constant 0 : index
    %c0_222 = arith.constant 0 : index
    %187 = vector.load %arg7[%c0_219, %c2_220, %c0_221, %c0_222] : memref<1x4x5x64xbf16, #tpu.memory_space<vmem>>, vector<1x1x4x64xbf16>
    %188 = vector.shape_cast %187 : vector<1x1x4x64xbf16> to vector<4x64xbf16>
    %c7_223 = arith.constant 7 : index
    %c0_224 = arith.constant 0 : index
    %c0_225 = arith.constant 0 : index
    %189 = vector.load %arg8[%c7_223, %c0_224, %c0_225] : memref<9x64x64xbf16, #tpu.memory_space<vmem>>, vector<1x64x64xbf16>
    %190 = vector.shape_cast %189 : vector<1x64x64xbf16> to vector<64x64xbf16>
    %cst_226 = arith.constant dense<0.000000e+00> : vector<4x64xf32>
    %191 = tpu.matmul %188, %190, %cst_226 {dimension_numbers = #tpu.dot_dimension_numbers<[1], [0], [0], [1], [0, 0, 1, 1], [], []>} : vector<4x64xbf16>, vector<64x64xbf16>, vector<4x64xf32> -> vector<4x64xf32>
    %192 = arith.addf %186, %191 : vector<4x64xf32>
    %c0_227 = arith.constant 0 : index
    %c2_228 = arith.constant 2 : index
    %c1_229 = arith.constant 1 : index
    %c0_230 = arith.constant 0 : index
    %193 = vector.load %arg4[%c0_227, %c2_228, %c1_229, %c0_230] : memref<1x4x5x64xbf16, #tpu.memory_space<vmem>>, vector<1x1x4x64xbf16>
    %194 = vector.shape_cast %193 : vector<1x1x4x64xbf16> to vector<4x64xbf16>
    %c8_231 = arith.constant 8 : index
    %c0_232 = arith.constant 0 : index
    %c0_233 = arith.constant 0 : index
    %195 = vector.load %arg8[%c8_231, %c0_232, %c0_233] : memref<9x64x64xbf16, #tpu.memory_space<vmem>>, vector<1x64x64xbf16>
    %196 = vector.shape_cast %195 : vector<1x64x64xbf16> to vector<64x64xbf16>
    %cst_234 = arith.constant dense<0.000000e+00> : vector<4x64xf32>
    %197 = tpu.matmul %194, %196, %cst_234 {dimension_numbers = #tpu.dot_dimension_numbers<[1], [0], [0], [1], [0, 0, 1, 1], [], []>} : vector<4x64xbf16>, vector<64x64xbf16>, vector<4x64xf32> -> vector<4x64xf32>
    %198 = arith.addf %192, %197 : vector<4x64xf32>
    %c0_235 = arith.constant 0 : index
    %c0_236 = arith.constant 0 : index
    %199 = vector.load %arg9[%c0_235, %c0_236] : memref<1x64xf32, #tpu.memory_space<vmem>>, vector<1x64xf32>
    %200 = vector.broadcast %199 : vector<1x64xf32> to vector<4x64xf32>
    %201 = arith.addf %198, %200 : vector<4x64xf32>
    %cst_237 = arith.constant 0.000000e+00 : f32
    %202 = vector.broadcast %cst_237 : f32 to vector<4x64xf32>
    %203 = arith.maximumf %201, %202 : vector<4x64xf32>
    %204 = arith.truncf %203 : vector<4x64xf32> to vector<4x64xbf16>
    %c0_238 = arith.constant 0 : index
    %c0_239 = arith.constant 0 : index
    %205 = vector.load %arg10[%c0_238, %c0_239] : memref<64x128xbf16, #tpu.memory_space<vmem>>, vector<64x128xbf16>
    %cst_240 = arith.constant dense<0.000000e+00> : vector<4x128xf32>
    %206 = tpu.matmul %204, %205, %cst_240 {dimension_numbers = #tpu.dot_dimension_numbers<[1], [0], [0], [1], [0, 0, 1, 1], [], []>} : vector<4x64xbf16>, vector<64x128xbf16>, vector<4x128xf32> -> vector<4x128xf32>
    %c0_241 = arith.constant 0 : index
    %c0_242 = arith.constant 0 : index
    %207 = vector.load %arg11[%c0_241, %c0_242] : memref<1x128xf32, #tpu.memory_space<vmem>>, vector<1x128xf32>
    %208 = vector.broadcast %207 : vector<1x128xf32> to vector<4x128xf32>
    %209 = arith.addf %206, %208 : vector<4x128xf32>
    %cst_243 = arith.constant 0.000000e+00 : f32
    %210 = vector.broadcast %cst_243 : f32 to vector<4x128xf32>
    %211 = arith.maximumf %209, %210 : vector<4x128xf32>
    %212 = arith.truncf %211 : vector<4x128xf32> to vector<4x128xbf16>
    %c0_244 = arith.constant 0 : index
    %c2_245 = arith.constant 2 : index
    %c0_246 = arith.constant 0 : index
    %c0_247 = arith.constant 0 : index
    %213 = vector.load %arg12[%c0_244, %c2_245, %c0_246, %c0_247] : memref<1x4x4x128xbf16, #tpu.memory_space<vmem>>, vector<1x1x4x128xbf16>
    %214 = vector.shape_cast %213 : vector<1x1x4x128xbf16> to vector<4x128xbf16>
    %215 = vector.shape_cast %212 : vector<4x128xbf16> to vector<1x1x4x128xbf16>
    tpu.vector_store %arg12[%c0_244, %c2_245, %c0_246, %c0_247], %215 {strides = array<i32>} : memref<1x4x4x128xbf16, #tpu.memory_space<vmem>>, vector<1x1x4x128xbf16>,
    %cst_248 = arith.constant 0.000000e+00 : f32
    %216 = vector.broadcast %cst_248 : f32 to vector<4x64xf32>
    %c0_249 = arith.constant 0 : index
    %c3_250 = arith.constant 3 : index
    %c0_251 = arith.constant 0 : index
    %c0_252 = arith.constant 0 : index
    %217 = vector.load %arg2[%c0_249, %c3_250, %c0_251, %c0_252] : memref<1x4x5x64xbf16, #tpu.memory_space<vmem>>, vector<1x1x4x64xbf16>
    %218 = vector.shape_cast %217 : vector<1x1x4x64xbf16> to vector<4x64xbf16>
    %c0_253 = arith.constant 0 : index
    %c0_254 = arith.constant 0 : index
    %c0_255 = arith.constant 0 : index
    %219 = vector.load %arg8[%c0_253, %c0_254, %c0_255] : memref<9x64x64xbf16, #tpu.memory_space<vmem>>, vector<1x64x64xbf16>
    %220 = vector.shape_cast %219 : vector<1x64x64xbf16> to vector<64x64xbf16>
    %cst_256 = arith.constant dense<0.000000e+00> : vector<4x64xf32>
    %221 = tpu.matmul %218, %220, %cst_256 {dimension_numbers = #tpu.dot_dimension_numbers<[1], [0], [0], [1], [0, 0, 1, 1], [], []>} : vector<4x64xbf16>, vector<64x64xbf16>, vector<4x64xf32> -> vector<4x64xf32>
    %222 = arith.addf %216, %221 : vector<4x64xf32>
    %c0_257 = arith.constant 0 : index
    %c3_258 = arith.constant 3 : index
    %c0_259 = arith.constant 0 : index
    %c0_260 = arith.constant 0 : index
    %223 = vector.load %arg5[%c0_257, %c3_258, %c0_259, %c0_260] : memref<1x4x5x64xbf16, #tpu.memory_space<vmem>>, vector<1x1x4x64xbf16>
    %224 = vector.shape_cast %223 : vector<1x1x4x64xbf16> to vector<4x64xbf16>
    %c1_261 = arith.constant 1 : index
    %c0_262 = arith.constant 0 : index
    %c0_263 = arith.constant 0 : index
    %225 = vector.load %arg8[%c1_261, %c0_262, %c0_263] : memref<9x64x64xbf16, #tpu.memory_space<vmem>>, vector<1x64x64xbf16>
    %226 = vector.shape_cast %225 : vector<1x64x64xbf16> to vector<64x64xbf16>
    %cst_264 = arith.constant dense<0.000000e+00> : vector<4x64xf32>
    %227 = tpu.matmul %224, %226, %cst_264 {dimension_numbers = #tpu.dot_dimension_numbers<[1], [0], [0], [1], [0, 0, 1, 1], [], []>} : vector<4x64xbf16>, vector<64x64xbf16>, vector<4x64xf32> -> vector<4x64xf32>
    %228 = arith.addf %222, %227 : vector<4x64xf32>
    %c0_265 = arith.constant 0 : index
    %c3_266 = arith.constant 3 : index
    %c1_267 = arith.constant 1 : index
    %c0_268 = arith.constant 0 : index
    %229 = vector.load %arg2[%c0_265, %c3_266, %c1_267, %c0_268] : memref<1x4x5x64xbf16, #tpu.memory_space<vmem>>, vector<1x1x4x64xbf16>
    %230 = vector.shape_cast %229 : vector<1x1x4x64xbf16> to vector<4x64xbf16>
    %c2_269 = arith.constant 2 : index
    %c0_270 = arith.constant 0 : index
    %c0_271 = arith.constant 0 : index
    %231 = vector.load %arg8[%c2_269, %c0_270, %c0_271] : memref<9x64x64xbf16, #tpu.memory_space<vmem>>, vector<1x64x64xbf16>
    %232 = vector.shape_cast %231 : vector<1x64x64xbf16> to vector<64x64xbf16>
    %cst_272 = arith.constant dense<0.000000e+00> : vector<4x64xf32>
    %233 = tpu.matmul %230, %232, %cst_272 {dimension_numbers = #tpu.dot_dimension_numbers<[1], [0], [0], [1], [0, 0, 1, 1], [], []>} : vector<4x64xbf16>, vector<64x64xbf16>, vector<4x64xf32> -> vector<4x64xf32>
    %234 = arith.addf %228, %233 : vector<4x64xf32>
    %c0_273 = arith.constant 0 : index
    %c3_274 = arith.constant 3 : index
    %c0_275 = arith.constant 0 : index
    %c0_276 = arith.constant 0 : index
    %235 = vector.load %arg3[%c0_273, %c3_274, %c0_275, %c0_276] : memref<1x4x5x64xbf16, #tpu.memory_space<vmem>>, vector<1x1x4x64xbf16>
    %236 = vector.shape_cast %235 : vector<1x1x4x64xbf16> to vector<4x64xbf16>
    %c3_277 = arith.constant 3 : index
    %c0_278 = arith.constant 0 : index
    %c0_279 = arith.constant 0 : index
    %237 = vector.load %arg8[%c3_277, %c0_278, %c0_279] : memref<9x64x64xbf16, #tpu.memory_space<vmem>>, vector<1x64x64xbf16>
    %238 = vector.shape_cast %237 : vector<1x64x64xbf16> to vector<64x64xbf16>
    %cst_280 = arith.constant dense<0.000000e+00> : vector<4x64xf32>
    %239 = tpu.matmul %236, %238, %cst_280 {dimension_numbers = #tpu.dot_dimension_numbers<[1], [0], [0], [1], [0, 0, 1, 1], [], []>} : vector<4x64xbf16>, vector<64x64xbf16>, vector<4x64xf32> -> vector<4x64xf32>
    %240 = arith.addf %234, %239 : vector<4x64xf32>
    %c0_281 = arith.constant 0 : index
    %c3_282 = arith.constant 3 : index
    %c0_283 = arith.constant 0 : index
    %c0_284 = arith.constant 0 : index
    %241 = vector.load %arg6[%c0_281, %c3_282, %c0_283, %c0_284] : memref<1x4x5x64xbf16, #tpu.memory_space<vmem>>, vector<1x1x4x64xbf16>
    %242 = vector.shape_cast %241 : vector<1x1x4x64xbf16> to vector<4x64xbf16>
    %c4_285 = arith.constant 4 : index
    %c0_286 = arith.constant 0 : index
    %c0_287 = arith.constant 0 : index
    %243 = vector.load %arg8[%c4_285, %c0_286, %c0_287] : memref<9x64x64xbf16, #tpu.memory_space<vmem>>, vector<1x64x64xbf16>
    %244 = vector.shape_cast %243 : vector<1x64x64xbf16> to vector<64x64xbf16>
    %cst_288 = arith.constant dense<0.000000e+00> : vector<4x64xf32>
    %245 = tpu.matmul %242, %244, %cst_288 {dimension_numbers = #tpu.dot_dimension_numbers<[1], [0], [0], [1], [0, 0, 1, 1], [], []>} : vector<4x64xbf16>, vector<64x64xbf16>, vector<4x64xf32> -> vector<4x64xf32>
    %246 = arith.addf %240, %245 : vector<4x64xf32>
    %c0_289 = arith.constant 0 : index
    %c3_290 = arith.constant 3 : index
    %c1_291 = arith.constant 1 : index
    %c0_292 = arith.constant 0 : index
    %247 = vector.load %arg3[%c0_289, %c3_290, %c1_291, %c0_292] : memref<1x4x5x64xbf16, #tpu.memory_space<vmem>>, vector<1x1x4x64xbf16>
    %248 = vector.shape_cast %247 : vector<1x1x4x64xbf16> to vector<4x64xbf16>
    %c5_293 = arith.constant 5 : index
    %c0_294 = arith.constant 0 : index
    %c0_295 = arith.constant 0 : index
    %249 = vector.load %arg8[%c5_293, %c0_294, %c0_295] : memref<9x64x64xbf16, #tpu.memory_space<vmem>>, vector<1x64x64xbf16>
    %250 = vector.shape_cast %249 : vector<1x64x64xbf16> to vector<64x64xbf16>
    %cst_296 = arith.constant dense<0.000000e+00> : vector<4x64xf32>
    %251 = tpu.matmul %248, %250, %cst_296 {dimension_numbers = #tpu.dot_dimension_numbers<[1], [0], [0], [1], [0, 0, 1, 1], [], []>} : vector<4x64xbf16>, vector<64x64xbf16>, vector<4x64xf32> -> vector<4x64xf32>
    %252 = arith.addf %246, %251 : vector<4x64xf32>
    %c0_297 = arith.constant 0 : index
    %c3_298 = arith.constant 3 : index
    %c0_299 = arith.constant 0 : index
    %c0_300 = arith.constant 0 : index
    %253 = vector.load %arg4[%c0_297, %c3_298, %c0_299, %c0_300] : memref<1x4x5x64xbf16, #tpu.memory_space<vmem>>, vector<1x1x4x64xbf16>
    %254 = vector.shape_cast %253 : vector<1x1x4x64xbf16> to vector<4x64xbf16>
    %c6_301 = arith.constant 6 : index
    %c0_302 = arith.constant 0 : index
    %c0_303 = arith.constant 0 : index
    %255 = vector.load %arg8[%c6_301, %c0_302, %c0_303] : memref<9x64x64xbf16, #tpu.memory_space<vmem>>, vector<1x64x64xbf16>
    %256 = vector.shape_cast %255 : vector<1x64x64xbf16> to vector<64x64xbf16>
    %cst_304 = arith.constant dense<0.000000e+00> : vector<4x64xf32>
    %257 = tpu.matmul %254, %256, %cst_304 {dimension_numbers = #tpu.dot_dimension_numbers<[1], [0], [0], [1], [0, 0, 1, 1], [], []>} : vector<4x64xbf16>, vector<64x64xbf16>, vector<4x64xf32> -> vector<4x64xf32>
    %258 = arith.addf %252, %257 : vector<4x64xf32>
    %c0_305 = arith.constant 0 : index
    %c3_306 = arith.constant 3 : index
    %c0_307 = arith.constant 0 : index
    %c0_308 = arith.constant 0 : index
    %259 = vector.load %arg7[%c0_305, %c3_306, %c0_307, %c0_308] : memref<1x4x5x64xbf16, #tpu.memory_space<vmem>>, vector<1x1x4x64xbf16>
    %260 = vector.shape_cast %259 : vector<1x1x4x64xbf16> to vector<4x64xbf16>
    %c7_309 = arith.constant 7 : index
    %c0_310 = arith.constant 0 : index
    %c0_311 = arith.constant 0 : index
    %261 = vector.load %arg8[%c7_309, %c0_310, %c0_311] : memref<9x64x64xbf16, #tpu.memory_space<vmem>>, vector<1x64x64xbf16>
    %262 = vector.shape_cast %261 : vector<1x64x64xbf16> to vector<64x64xbf16>
    %cst_312 = arith.constant dense<0.000000e+00> : vector<4x64xf32>
    %263 = tpu.matmul %260, %262, %cst_312 {dimension_numbers = #tpu.dot_dimension_numbers<[1], [0], [0], [1], [0, 0, 1, 1], [], []>} : vector<4x64xbf16>, vector<64x64xbf16>, vector<4x64xf32> -> vector<4x64xf32>
    %264 = arith.addf %258, %263 : vector<4x64xf32>
    %c0_313 = arith.constant 0 : index
    %c3_314 = arith.constant 3 : index
    %c1_315 = arith.constant 1 : index
    %c0_316 = arith.constant 0 : index
    %265 = vector.load %arg4[%c0_313, %c3_314, %c1_315, %c0_316] : memref<1x4x5x64xbf16, #tpu.memory_space<vmem>>, vector<1x1x4x64xbf16>
    %266 = vector.shape_cast %265 : vector<1x1x4x64xbf16> to vector<4x64xbf16>
    %c8_317 = arith.constant 8 : index
    %c0_318 = arith.constant 0 : index
    %c0_319 = arith.constant 0 : index
    %267 = vector.load %arg8[%c8_317, %c0_318, %c0_319] : memref<9x64x64xbf16, #tpu.memory_space<vmem>>, vector<1x64x64xbf16>
    %268 = vector.shape_cast %267 : vector<1x64x64xbf16> to vector<64x64xbf16>
    %cst_320 = arith.constant dense<0.000000e+00> : vector<4x64xf32>
    %269 = tpu.matmul %266, %268, %cst_320 {dimension_numbers = #tpu.dot_dimension_numbers<[1], [0], [0], [1], [0, 0, 1, 1], [], []>} : vector<4x64xbf16>, vector<64x64xbf16>, vector<4x64xf32> -> vector<4x64xf32>
    %270 = arith.addf %264, %269 : vector<4x64xf32>
    %c0_321 = arith.constant 0 : index
    %c0_322 = arith.constant 0 : index
    %271 = vector.load %arg9[%c0_321, %c0_322] : memref<1x64xf32, #tpu.memory_space<vmem>>, vector<1x64xf32>
    %272 = vector.broadcast %271 : vector<1x64xf32> to vector<4x64xf32>
    %273 = arith.addf %270, %272 : vector<4x64xf32>
    %cst_323 = arith.constant 0.000000e+00 : f32
    %274 = vector.broadcast %cst_323 : f32 to vector<4x64xf32>
    %275 = arith.maximumf %273, %274 : vector<4x64xf32>
    %276 = arith.truncf %275 : vector<4x64xf32> to vector<4x64xbf16>
    %c0_324 = arith.constant 0 : index
    %c0_325 = arith.constant 0 : index
    %277 = vector.load %arg10[%c0_324, %c0_325] : memref<64x128xbf16, #tpu.memory_space<vmem>>, vector<64x128xbf16>
    %cst_326 = arith.constant dense<0.000000e+00> : vector<4x128xf32>
    %278 = tpu.matmul %276, %277, %cst_326 {dimension_numbers = #tpu.dot_dimension_numbers<[1], [0], [0], [1], [0, 0, 1, 1], [], []>} : vector<4x64xbf16>, vector<64x128xbf16>, vector<4x128xf32> -> vector<4x128xf32>
    %c0_327 = arith.constant 0 : index
    %c0_328 = arith.constant 0 : index
    %279 = vector.load %arg11[%c0_327, %c0_328] : memref<1x128xf32, #tpu.memory_space<vmem>>, vector<1x128xf32>
    %280 = vector.broadcast %279 : vector<1x128xf32> to vector<4x128xf32>
    %281 = arith.addf %278, %280 : vector<4x128xf32>
    %cst_329 = arith.constant 0.000000e+00 : f32
    %282 = vector.broadcast %cst_329 : f32 to vector<4x128xf32>
    %283 = arith.maximumf %281, %282 : vector<4x128xf32>
    %284 = arith.truncf %283 : vector<4x128xf32> to vector<4x128xbf16>
    %c0_330 = arith.constant 0 : index
    %c3_331 = arith.constant 3 : index
    %c0_332 = arith.constant 0 : index
    %c0_333 = arith.constant 0 : index
    %285 = vector.load %arg12[%c0_330, %c3_331, %c0_332, %c0_333] : memref<1x4x4x128xbf16, #tpu.memory_space<vmem>>, vector<1x1x4x128xbf16>
    %286 = vector.shape_cast %285 : vector<1x1x4x128xbf16> to vector<4x128xbf16>
    %287 = vector.shape_cast %284 : vector<4x128xbf16> to vector<1x1x4x128xbf16>
    tpu.vector_store %arg12[%c0_330, %c3_331, %c0_332, %c0_333], %287 {strides = array<i32>} : memref<1x4x4x128xbf16, #tpu.memory_space<vmem>>, vector<1x1x4x128xbf16>,
    return
  }
  func.func @transform_0(%arg0: i32, %arg1: i32) -> (i32, i32, i32, i32) {
    %c0_i32 = arith.constant 0 : i32
    %c0_i32_0 = arith.constant 0 : i32
    %c0_i32_1 = arith.constant 0 : i32
    return %arg0, %arg1, %c0_i32, %c0_i32_0 : i32, i32, i32, i32
  }
  func.func @transform_1(%arg0: i32, %arg1: i32) -> (i32, i32, i32, i32) {
    %c0_i32 = arith.constant 0 : i32
    %c0_i32_0 = arith.constant 0 : i32
    %c0_i32_1 = arith.constant 0 : i32
    return %arg0, %arg1, %c0_i32, %c0_i32_0 : i32, i32, i32, i32
  }
  func.func @transform_2(%arg0: i32, %arg1: i32) -> (i32, i32, i32, i32) {
    %c0_i32 = arith.constant 0 : i32
    %c0_i32_0 = arith.constant 0 : i32
    %c0_i32_1 = arith.constant 0 : i32
    return %arg0, %arg1, %c0_i32, %c0_i32_0 : i32, i32, i32, i32
  }
  func.func @transform_3(%arg0: i32, %arg1: i32) -> (i32, i32, i32, i32) {
    %c0_i32 = arith.constant 0 : i32
    %c0_i32_0 = arith.constant 0 : i32
    %c0_i32_1 = arith.constant 0 : i32
    return %arg0, %arg1, %c0_i32, %c0_i32_0 : i32, i32, i32, i32
  }
  func.func @transform_4(%arg0: i32, %arg1: i32) -> (i32, i32, i32, i32) {
    %c0_i32 = arith.constant 0 : i32
    %c0_i32_0 = arith.constant 0 : i32
    %c0_i32_1 = arith.constant 0 : i32
    return %arg0, %arg1, %c0_i32, %c0_i32_0 : i32, i32, i32, i32
  }
  func.func @transform_5(%arg0: i32, %arg1: i32) -> (i32, i32, i32, i32) {
    %c0_i32 = arith.constant 0 : i32
    %c0_i32_0 = arith.constant 0 : i32
    %c0_i32_1 = arith.constant 0 : i32
    return %arg0, %arg1, %c0_i32, %c0_i32_0 : i32, i32, i32, i32
  }
  func.func @transform_6(%arg0: i32, %arg1: i32) -> (i32, i32, i32) {
    %c0_i32 = arith.constant 0 : i32
    %c0_i32_0 = arith.constant 0 : i32
    %c0_i32_1 = arith.constant 0 : i32
    %c0_i32_2 = arith.constant 0 : i32
    return %c0_i32, %c0_i32_0, %c0_i32_1 : i32, i32, i32
  }
  func.func @transform_7(%arg0: i32, %arg1: i32) -> (i32, i32) {
    %c0_i32 = arith.constant 0 : i32
    %c0_i32_0 = arith.constant 0 : i32
    %c0_i32_1 = arith.constant 0 : i32
    return %c0_i32, %c0_i32_0 : i32, i32
  }
  func.func @transform_8(%arg0: i32, %arg1: i32) -> (i32, i32) {
    %c0_i32 = arith.constant 0 : i32
    %c0_i32_0 = arith.constant 0 : i32
    %c0_i32_1 = arith.constant 0 : i32
    return %c0_i32, %c0_i32_0 : i32, i32
  }
  func.func @transform_9(%arg0: i32, %arg1: i32) -> (i32, i32) {
    %c0_i32 = arith.constant 0 : i32
    %c0_i32_0 = arith.constant 0 : i32
    %c0_i32_1 = arith.constant 0 : i32
    return %c0_i32, %c0_i32_0 : i32, i32
  }
  func.func @transform_10(%arg0: i32, %arg1: i32) -> (i32, i32, i32, i32) {
    %c0_i32 = arith.constant 0 : i32
    %c0_i32_0 = arith.constant 0 : i32
    %c0_i32_1 = arith.constant 0 : i32
    return %arg0, %arg1, %c0_i32, %c0_i32_0 : i32, i32, i32, i32
  }
}

</mosaic_0001>

<bundles_post_ra>
// kernel: spatial_path_forward.3
= control target key start
LH: loop header
LB: loop body
LE: loop exit
PB: predicated region body
PF: predicated region fallthrough
CT: control target
= control target key end

     0   :  { %s1152_s12 = smov 0   ;;  %s1356_s0 = inlined_call_operand.vmem [shape: bf16[512,160], index: 0, kind: input, shape index: {}]   ;;  %s1357_s1 = inlined_call_operand.vmem [shape: bf16[160,64], index: 1, kind: input, shape index: {}]   ;;  %s1358_s2 = inlined_call_operand.vmem [shape: f32[1,64], index: 2, kind: input, shape index: {}]   ;;  %s1359_s3 = inlined_call_operand.vmem [shape: bf16[512,64], index: 3, kind: output, shape index: {}]  }
   0x1 LB: > { %s900_s13 = sadd.s32 4294967295, %s1129_s12   ;;  %p904_p0 = scmp.ge.s32.totalorder %s1129_s12, 1  ;;  %s1129_s12 = sphi %s1152_s12, %s13_s12  }
   0x2   : > { %p139_p1 = scmp.lt.s32.totalorder %s1129_s12, 3 }
   0x4   : > { %p140_p2 = pnand %p904_p0, %p139_p1 }
   0x5   : > { %v1065_v0 = vld [vmem:[%s1357_s1] sm:$0xff] (!%p140_p2)   ;;  %v1131_v1 = vmov (!%p140_p2), 0   ;;  %s905_s16 = sshll.u32 (!%p140_p2), %s900_s13, 5  ;;  %v1066_v2 = vld [vmem:[%s1357_s1 + $0x8] sm:$0xff] (!%p140_p2)   ;;  %v1067_v3 = vld [vmem:[%s1357_s1 + $0x10] sm:$0xff] (!%p140_p2)   ;;  %vm441_vm0 = vcmask (!%p140_p2), 261120  }
   0x6   : > { %143 = sbr.rel (%p140_p2) target bundleno = 323 (0x143), region = 32  ;;  %490 = vmatprep.subr.bf16.mxu0 (!%p140_p2), %v1131_v1  ;;  %1036 = vmatprep.subr.bf16.mxu1 (!%p140_p2), %v1131_v1  ;;  %p165_p3 = scmp.lt.s32.totalorder (!%p140_p2), %s905_s16, 63  ;;  %v1068_v4 = vld [vmem:[%s1357_s1 + $0x18] sm:$0xff] (!%p140_p2)   ;;  %v1069_v7 = vld [vmem:[%s1357_s1 + $0x20] sm:$0xff] (!%p140_p2)   ;;  %v1070_v8 = vld [vmem:[%s1357_s1 + $0x28] sm:$0xff] (!%p140_p2)   ;;  %vm811_vm1 = vcmask (!%p140_p2), 519168  }
   0x7   : > { %491 = vmatpush1.bf16.msra.mxu0 (!%p140_p2), %v1065_v0  ;;  %1046 = vmatpush1.bf16.msra.mxu1 (!%p140_p2), %v1065_v0  ;;  %v1071_v9 = vld [vmem:[%s1357_s1 + $0x30] sm:$0xff] (!%p140_p2)   ;;  %v1072_v10 = vld [vmem:[%s1357_s1 + $0x38] sm:$0xff] (!%p140_p2)   ;;  %v1073_v11 = vld [vmem:[%s1357_s1 + $0x40] sm:$0xff] (!%p140_p2)  }
   0x8   : > { %492 = vmatprep.subr.bf16.mxu0 (!%p140_p2), %v1131_v1  ;;  %1037 = vmatprep.subr.bf16.mxu1 (!%p140_p2), %v1131_v1  ;;  %v1074_v12 = vld [vmem:[%s1357_s1 + $0x48] sm:$0xff] (!%p140_p2)   ;;  %v1249_v43 = vld [vmem:[%s1358_s2] ss:$0 sm:$0xff] (!%p140_p2) }
   0xb   : > { %493 = vmatpush1.bf16.msra.mxu0 (!%p140_p2), %v1066_v2  ;;  %1047 = vmatpush1.bf16.msra.mxu1 (!%p140_p2), %v1066_v2 }
   0xc   : > { %494 = vmatprep.subr.bf16.mxu0 (!%p140_p2), %v1131_v1  ;;  %1038 = vmatprep.subr.bf16.mxu1 (!%p140_p2), %v1131_v1 }
   0xd   : > { %s1361_s16 = smov (!%p165_p3, %s905_s16), 63 }
   0xe   : > { %s1003_s21 = sshll.u32 %s1361_s16, 3  ;;  %s909_s15 = sshll.u32 %s1361_s16, 2 }
   0xf   : > { %s1175_s24 = scalar_lea.vmem %s1356_s0, %s1003_s21  ;;  %495 = vmatpush1.bf16.msra.mxu0 %v1067_v3  ;;  %1048 = vmatpush1.bf16.msra.mxu1 %v1067_v3  ;;  %s1259_s16 = scalar_lea.vmem %s1359_s3, %s909_s15 }
  0x10   : > { %496 = vmatprep.subr.bf16.mxu0 %v1131_v1  ;;  %1039 = vmatprep.subr.bf16.mxu1 %v1131_v1  ;;  %v1077_v5 = vld [vmem:[%s1175_s24 + $0x4] ss:$8 sps:$4 sm:$0xff]   ;;  %v1075_v13 = vld [vmem:[%s1175_s24] ss:$8 sps:$4 sm:$0xff]   ;;  %v1081_v15 = vld [vmem:[%s1175_s24 + $0x14] ss:$8 sps:$4 sm:$0xff]  }
  0x11   : > { %v1080_v6 = vld [vmem:[%s1175_s24 + $0x84] ss:$8 sps:$4 sm:$0xff]   ;;  %953 = vmatprep.mubr.msk.bf16.mxu0 %vm441_vm0, %v1077_v5  ;;  %v1078_v14 = vld [vmem:[%s1175_s24 + $0x80] ss:$8 sps:$4 sm:$0xff]   ;;  %v1083_v16 = vld [vmem:[%s1175_s24 + $0x94] ss:$8 sps:$4 sm:$0xff]  }
  0x12   : > { %961 = vmatprep.mubr.msk.bf16.mxu1 %vm441_vm0, %v1080_v6  ;;  %v1085_v17 = vld [vmem:[%s1175_s24 + $0x10] ss:$8 sps:$4 sm:$0xff]   ;;  %v1087_v19 = vld [vmem:[%s1175_s24 + $0x24] ss:$8 sps:$4 sm:$0xff]   ;;  %v1091_v21 = vld [vmem:[%s1175_s24 + $0x20] ss:$8 sps:$4 sm:$0xff]  }
  0x13   : > { %497 = vmatpush1.bf16.msra.mxu0 %v1068_v4  ;;  %1049 = vmatpush1.bf16.msra.mxu1 %v1068_v4  ;;  %v1086_v18 = vld [vmem:[%s1175_s24 + $0x90] ss:$8 sps:$4 sm:$0xff]   ;;  %v1089_v20 = vld [vmem:[%s1175_s24 + $0xa4] ss:$8 sps:$4 sm:$0xff]   ;;  %v1092_v22 = vld [vmem:[%s1175_s24 + $0xa0] ss:$8 sps:$4 sm:$0xff]  }
  0x14   : > { %498 = vmatprep.subr.bf16.mxu0 %v1131_v1  ;;  %1040 = vmatprep.subr.bf16.mxu1 %v1131_v1  ;;  %v1093_v23 = vld [vmem:[%s1175_s24 + $0x34] ss:$8 sps:$4 sm:$0xff]   ;;  %v1097_v25 = vld [vmem:[%s1175_s24 + $0x30] ss:$8 sps:$4 sm:$0xff]   ;;  %v1099_v27 = vld [vmem:[%s1175_s24 + $0x44] ss:$8 sps:$4 sm:$0xff]  }
  0x15   : > { %v1095_v24 = vld [vmem:[%s1175_s24 + $0xb4] ss:$8 sps:$4 sm:$0xff]   ;;  %v1098_v26 = vld [vmem:[%s1175_s24 + $0xb0] ss:$8 sps:$4 sm:$0xff]   ;;  %v1101_v28 = vld [vmem:[%s1175_s24 + $0xc4] ss:$8 sps:$4 sm:$0xff]  }
  0x16   : > { %v1103_v29 = vld [vmem:[%s1175_s24 + $0x40] ss:$8 sps:$4 sm:$0xff]   ;;  %v1105_v31 = vld [vmem:[%s1175_s24 + $0x54] ss:$8 sps:$4 sm:$0xff]   ;;  %v1109_v33 = vld [vmem:[%s1175_s24 + $0x50] ss:$8 sps:$4 sm:$0xff]  }
  0x17   : > { %499 = vmatpush1.bf16.msra.mxu0 %v1069_v7  ;;  %1050 = vmatpush1.bf16.msra.mxu1 %v1069_v7  ;;  %v1104_v30 = vld [vmem:[%s1175_s24 + $0xc0] ss:$8 sps:$4 sm:$0xff]   ;;  %v1107_v32 = vld [vmem:[%s1175_s24 + $0xd4] ss:$8 sps:$4 sm:$0xff]   ;;  %v1110_v34 = vld [vmem:[%s1175_s24 + $0xd0] ss:$8 sps:$4 sm:$0xff]  }
  0x18   : > { %500 = vmatprep.subr.bf16.mxu0 %v1131_v1  ;;  %1041 = vmatprep.subr.bf16.mxu1 %v1131_v1  ;;  %v1111_v35 = vld [vmem:[%s1175_s24 + $0x64] ss:$8 sps:$4 sm:$0xff]   ;;  %v1115_v37 = vld [vmem:[%s1175_s24 + $0x60] ss:$8 sps:$4 sm:$0xff]   ;;  %v1117_v39 = vld [vmem:[%s1175_s24 + $0x74] ss:$8 sps:$4 sm:$0xff]  }
  0x19   : > { %v1113_v36 = vld [vmem:[%s1175_s24 + $0xe4] ss:$8 sps:$4 sm:$0xff]   ;;  %v1116_v38 = vld [vmem:[%s1175_s24 + $0xe0] ss:$8 sps:$4 sm:$0xff]   ;;  %v1119_v40 = vld [vmem:[%s1175_s24 + $0xf4] ss:$8 sps:$4 sm:$0xff]  }
  0x1a   : > { %v1121_v41 = vld [vmem:[%s1175_s24 + $0x70] ss:$8 sps:$4 sm:$0xff]  }
  0x1b   : > { %501 = vmatpush1.bf16.msra.mxu0 %v1070_v8  ;;  %1051 = vmatpush1.bf16.msra.mxu1 %v1070_v8  ;;  %v1122_v42 = vld [vmem:[%s1175_s24 + $0xf0] ss:$8 sps:$4 sm:$0xff]  }
  0x1c   : > { %502 = vmatprep.subr.bf16.mxu0 %v1131_v1  ;;  %1042 = vmatprep.subr.bf16.mxu1 %v1131_v1 }
  0x1f   : > { %503 = vmatpush1.bf16.msra.mxu0 %v1071_v9  ;;  %1052 = vmatpush1.bf16.msra.mxu1 %v1071_v9 }
  0x20   : > { %504 = vmatprep.subr.bf16.mxu0 %v1131_v1  ;;  %1043 = vmatprep.subr.bf16.mxu1 %v1131_v1 }
  0x23   : > { %505 = vmatpush1.bf16.msra.mxu0 %v1072_v10  ;;  %1053 = vmatpush1.bf16.msra.mxu1 %v1072_v10 }
  0x24   : > { %506 = vmatprep.subr.bf16.mxu0 %v1131_v1  ;;  %1044 = vmatprep.subr.bf16.mxu1 %v1131_v1 }
  0x27   : > { %507 = vmatpush1.bf16.msra.mxu0 %v1073_v11  ;;  %1054 = vmatpush1.bf16.msra.mxu1 %v1073_v11 }
  0x28   : > { %508 = vmatprep.subr.bf16.mxu0 %v1131_v1  ;;  %1045 = vmatprep.subr.bf16.mxu1 %v1131_v1 }
  0x2b   : > { %509 = vmatpush1.bf16.msra.mxu0 %v1074_v12  ;;  %1055 = vmatpush1.bf16.msra.mxu1 %v1074_v12 }
  0x2e   : > { %523 = vmatmul.mubr.bf16.vlgmr.msra.gmra.mrb[0].mxu0 %v1075_v13  ;;  %587 = vmatmul.mubr.bf16.vlgmr.msra.gmra.mrb[0].mxu1 %v1078_v14 }
  0x2f   : > { %954 = vmatprep.mubr.msk.bf16.mxu0 %vm441_vm0, %v1081_v15  ;;  %962 = vmatprep.mubr.msk.bf16.mxu1 %vm441_vm0, %v1083_v16 }
  0x36   : > { %531 = vmatmul.mubr.bf16.gmra.mrb[4].mxu0 %v1085_v17  ;;  %595 = vmatmul.mubr.bf16.gmra.mrb[4].mxu1 %v1086_v18 }
  0x37   : > { %955 = vmatprep.mubr.msk.bf16.mxu0 %vm441_vm0, %v1087_v19  ;;  %963 = vmatprep.mubr.msk.bf16.mxu1 %vm441_vm0, %v1089_v20 }
  0x3e   : > { %539 = vmatmul.mubr.bf16.gmra.mrb[8].mxu0 %v1091_v21  ;;  %603 = vmatmul.mubr.bf16.gmra.mrb[8].mxu1 %v1092_v22 }
  0x3f   : > { %956 = vmatprep.mubr.msk.bf16.mxu0 %vm441_vm0, %v1093_v23  ;;  %964 = vmatprep.mubr.msk.bf16.mxu1 %vm441_vm0, %v1095_v24 }
  0x46   : > { %547 = vmatmul.mubr.bf16.gmra.mrb[12].mxu0 %v1097_v25  ;;  %611 = vmatmul.mubr.bf16.gmra.mrb[12].mxu1 %v1098_v26 }
  0x47   : > { %957 = vmatprep.mubr.msk.bf16.mxu0 %vm441_vm0, %v1099_v27  ;;  %965 = vmatprep.mubr.msk.bf16.mxu1 %vm441_vm0, %v1101_v28 }
  0x4e   : > { %555 = vmatmul.mubr.bf16.gmra.mrb[16].mxu0 %v1103_v29  ;;  %619 = vmatmul.mubr.bf16.gmra.mrb[16].mxu1 %v1104_v30 }
  0x4f   : > { %958 = vmatprep.mubr.msk.bf16.mxu0 %vm441_vm0, %v1105_v31  ;;  %966 = vmatprep.mubr.msk.bf16.mxu1 %vm441_vm0, %v1107_v32 }
  0x56   : > { %563 = vmatmul.mubr.bf16.gmra.mrb[20].mxu0 %v1109_v33  ;;  %627 = vmatmul.mubr.bf16.gmra.mrb[20].mxu1 %v1110_v34 }
  0x57   : > { %959 = vmatprep.mubr.msk.bf16.mxu0 %vm441_vm0, %v1111_v35  ;;  %967 = vmatprep.mubr.msk.bf16.mxu1 %vm441_vm0, %v1113_v36 }
  0x5e   : > { %571 = vmatmul.mubr.bf16.gmra.mrb[24].mxu0 %v1115_v37  ;;  %635 = vmatmul.mubr.bf16.gmra.mrb[24].mxu1 %v1116_v38 }
  0x5f   : > { %960 = vmatprep.mubr.msk.bf16.mxu0 %vm441_vm0, %v1117_v39  ;;  %968 = vmatprep.mubr.msk.bf16.mxu1 %vm441_vm0, %v1119_v40 }
  0x66   : > { %579 = vmatmul.mubr.bf16.gmra.mrb[28].mxu0 %v1121_v41  ;;  %643 = vmatmul.mubr.bf16.gmra.mrb[28].mxu1 %v1122_v42 }
 0x101   : > { %v524_v44 = vpop.f32.mrb[0].mxu0  ;;  %v588_v45 = vpop.f32.mrb[0].mxu1 }
 0x102   : > { %v525_v46 = vadd.f32 %v1249_v43, %v524_v44  ;;  %v589_v47 = vadd.f32 %v1249_v43, %v588_v45  ;;  %v526_v48 = vpop.f32.mrb[1].mxu0  ;;  %v590_v49 = vpop.f32.mrb[1].mxu1 }
 0x103   : > { %v527_v50 = vpop.f32.mrb[2].mxu0  ;;  %v591_v51 = vpop.f32.mrb[2].mxu1 }
 0x104   : > { %v651_v52 = vmax.f32 %v525_v46, 0.0  ;;  %v667_v53 = vmax.f32 %v589_v47, 0.0  ;;  %v528_v54 = vadd.f32 %v1249_v43, %v527_v50  ;;  %v592_v55 = vadd.f32 %v1249_v43, %v591_v51  ;;  %v529_v56 = vpop.f32.mrb[3].mxu0  ;;  %v593_v57 = vpop.f32.mrb[3].mxu1 }
 0x106   : > { %v1004_v58 = vpack.c.bf16 %v651_v52, %v651_v52  ;;  %v1020_v59 = vpack.c.bf16 %v667_v53, %v667_v53  ;;  %v652_v60 = vmax.f32 %v528_v54, 0.0  ;;  %v668_v61 = vmax.f32 %v592_v55, 0.0 }
 0x108   : > { %812 = vst.msk [vmem:[%s1259_s16] sm:$0xf] %vm811_vm1, %v1004_v58  ;;  %828 = vst.msk [vmem:[%s1259_s16 + $0x40] sm:$0xf] %vm811_vm1, %v1020_v59  ;;  %v1005_v62 = vpack.c.bf16 %v652_v60, %v652_v60  ;;  %v1021_v63 = vpack.c.bf16 %v668_v61, %v668_v61 }
 0x109   : > { %v532_v0 = vpop.f32.mrb[4].mxu0  ;;  %v596_v1 = vpop.f32.mrb[4].mxu1 }
 0x10a   : > { %813 = vst.msk [vmem:[%s1259_s16 + $0x4] sm:$0xf] %vm811_vm1, %v1005_v62  ;;  %829 = vst.msk [vmem:[%s1259_s16 + $0x44] sm:$0xf] %vm811_vm1, %v1021_v63  ;;  %v533_v2 = vadd.f32 %v1249_v43, %v532_v0  ;;  %v597_v3 = vadd.f32 %v1249_v43, %v596_v1  ;;  %v534_v4 = vpop.f32.mrb[5].mxu0  ;;  %v598_v5 = vpop.f32.mrb[5].mxu1 }
 0x10b   : > { %v535_v6 = vpop.f32.mrb[6].mxu0  ;;  %v599_v7 = vpop.f32.mrb[6].mxu1 }
 0x10c   : > { %v653_v8 = vmax.f32 %v533_v2, 0.0  ;;  %v669_v9 = vmax.f32 %v597_v3, 0.0  ;;  %v536_v10 = vadd.f32 %v1249_v43, %v535_v6  ;;  %v600_v11 = vadd.f32 %v1249_v43, %v599_v7  ;;  %v537_v12 = vpop.f32.mrb[7].mxu0  ;;  %v601_v13 = vpop.f32.mrb[7].mxu1 }
 0x10e   : > { %v1006_v14 = vpack.c.bf16 %v653_v8, %v653_v8  ;;  %v1022_v15 = vpack.c.bf16 %v669_v9, %v669_v9  ;;  %v654_v16 = vmax.f32 %v536_v10, 0.0  ;;  %v670_v17 = vmax.f32 %v600_v11, 0.0 }
 0x110   : > { %814 = vst.msk [vmem:[%s1259_s16 + $0x8] sm:$0xf] %vm811_vm1, %v1006_v14  ;;  %830 = vst.msk [vmem:[%s1259_s16 + $0x48] sm:$0xf] %vm811_vm1, %v1022_v15  ;;  %v1007_v18 = vpack.c.bf16 %v654_v16, %v654_v16  ;;  %v1023_v19 = vpack.c.bf16 %v670_v17, %v670_v17 }
 0x111   : > { %v540_v20 = vpop.f32.mrb[8].mxu0  ;;  %v604_v21 = vpop.f32.mrb[8].mxu1 }
 0x112   : > { %815 = vst.msk [vmem:[%s1259_s16 + $0xc] sm:$0xf] %vm811_vm1, %v1007_v18  ;;  %831 = vst.msk [vmem:[%s1259_s16 + $0x4c] sm:$0xf] %vm811_vm1, %v1023_v19  ;;  %v541_v22 = vadd.f32 %v1249_v43, %v540_v20  ;;  %v605_v23 = vadd.f32 %v1249_v43, %v604_v21  ;;  %v542_v24 = vpop.f32.mrb[9].mxu0  ;;  %v606_v25 = vpop.f32.mrb[9].mxu1 }
 0x113   : > { %v543_v26 = vpop.f32.mrb[10].mxu0  ;;  %v607_v27 = vpop.f32.mrb[10].mxu1 }
 0x114   : > { %v655_v28 = vmax.f32 %v541_v22, 0.0  ;;  %v671_v29 = vmax.f32 %v605_v23, 0.0  ;;  %v544_v30 = vadd.f32 %v1249_v43, %v543_v26  ;;  %v608_v31 = vadd.f32 %v1249_v43, %v607_v27  ;;  %v545_v32 = vpop.f32.mrb[11].mxu0  ;;  %v609_v33 = vpop.f32.mrb[11].mxu1 }
 0x116   : > { %v1008_v34 = vpack.c.bf16 %v655_v28, %v655_v28  ;;  %v1024_v35 = vpack.c.bf16 %v671_v29, %v671_v29  ;;  %v656_v36 = vmax.f32 %v544_v30, 0.0  ;;  %v672_v37 = vmax.f32 %v608_v31, 0.0 }
 0x118   : > { %816 = vst.msk [vmem:[%s1259_s16 + $0x10] sm:$0xf] %vm811_vm1, %v1008_v34  ;;  %832 = vst.msk [vmem:[%s1259_s16 + $0x50] sm:$0xf] %vm811_vm1, %v1024_v35  ;;  %v1009_v38 = vpack.c.bf16 %v656_v36, %v656_v36  ;;  %v1025_v39 = vpack.c.bf16 %v672_v37, %v672_v37 }
 0x119   : > { %v548_v40 = vpop.f32.mrb[12].mxu0  ;;  %v612_v41 = vpop.f32.mrb[12].mxu1 }
 0x11a   : > { %817 = vst.msk [vmem:[%s1259_s16 + $0x14] sm:$0xf] %vm811_vm1, %v1009_v38  ;;  %833 = vst.msk [vmem:[%s1259_s16 + $0x54] sm:$0xf] %vm811_vm1, %v1025_v39  ;;  %v549_v42 = vadd.f32 %v1249_v43, %v548_v40  ;;  %v613_v44 = vadd.f32 %v1249_v43, %v612_v41  ;;  %v550_v45 = vpop.f32.mrb[13].mxu0  ;;  %v614_v46 = vpop.f32.mrb[13].mxu1 }
 0x11b   : > { %v551_v47 = vpop.f32.mrb[14].mxu0  ;;  %v615_v48 = vpop.f32.mrb[14].mxu1 }
 0x11c   : > { %v657_v49 = vmax.f32 %v549_v42, 0.0  ;;  %v673_v50 = vmax.f32 %v613_v44, 0.0  ;;  %v552_v51 = vadd.f32 %v1249_v43, %v551_v47  ;;  %v616_v52 = vadd.f32 %v1249_v43, %v615_v48  ;;  %v553_v53 = vpop.f32.mrb[15].mxu0  ;;  %v617_v54 = vpop.f32.mrb[15].mxu1 }
 0x11e   : > { %v1010_v55 = vpack.c.bf16 %v657_v49, %v657_v49  ;;  %v1026_v56 = vpack.c.bf16 %v673_v50, %v673_v50  ;;  %v658_v57 = vmax.f32 %v552_v51, 0.0  ;;  %v674_v58 = vmax.f32 %v616_v52, 0.0 }
 0x120   : > { %818 = vst.msk [vmem:[%s1259_s16 + $0x18] sm:$0xf] %vm811_vm1, %v1010_v55  ;;  %834 = vst.msk [vmem:[%s1259_s16 + $0x58] sm:$0xf] %vm811_vm1, %v1026_v56  ;;  %v1011_v59 = vpack.c.bf16 %v658_v57, %v658_v57  ;;  %v1027_v60 = vpack.c.bf16 %v674_v58, %v674_v58 }
 0x121   : > { %v556_v61 = vpop.f32.mrb[16].mxu0  ;;  %v620_v62 = vpop.f32.mrb[16].mxu1 }
 0x122   : > { %819 = vst.msk [vmem:[%s1259_s16 + $0x1c] sm:$0xf] %vm811_vm1, %v1011_v59  ;;  %835 = vst.msk [vmem:[%s1259_s16 + $0x5c] sm:$0xf] %vm811_vm1, %v1027_v60  ;;  %v557_v63 = vadd.f32 %v1249_v43, %v556_v61  ;;  %v621_v0 = vadd.f32 %v1249_v43, %v620_v62  ;;  %v558_v1 = vpop.f32.mrb[17].mxu0  ;;  %v622_v2 = vpop.f32.mrb[17].mxu1 }
 0x123   : > { %v559_v3 = vpop.f32.mrb[18].mxu0  ;;  %v623_v4 = vpop.f32.mrb[18].mxu1 }
 0x124   : > { %v659_v5 = vmax.f32 %v557_v63, 0.0  ;;  %v675_v6 = vmax.f32 %v621_v0, 0.0  ;;  %v560_v7 = vadd.f32 %v1249_v43, %v559_v3  ;;  %v624_v8 = vadd.f32 %v1249_v43, %v623_v4  ;;  %v561_v9 = vpop.f32.mrb[19].mxu0  ;;  %v625_v10 = vpop.f32.mrb[19].mxu1 }
 0x126   : > { %v1012_v11 = vpack.c.bf16 %v659_v5, %v659_v5  ;;  %v1028_v12 = vpack.c.bf16 %v675_v6, %v675_v6  ;;  %v660_v13 = vmax.f32 %v560_v7, 0.0  ;;  %v676_v14 = vmax.f32 %v624_v8, 0.0 }
 0x128   : > { %820 = vst.msk [vmem:[%s1259_s16 + $0x20] sm:$0xf] %vm811_vm1, %v1012_v11  ;;  %836 = vst.msk [vmem:[%s1259_s16 + $0x60] sm:$0xf] %vm811_vm1, %v1028_v12  ;;  %v1013_v15 = vpack.c.bf16 %v660_v13, %v660_v13  ;;  %v1029_v16 = vpack.c.bf16 %v676_v14, %v676_v14 }
 0x129   : > { %v564_v17 = vpop.f32.mrb[20].mxu0  ;;  %v628_v18 = vpop.f32.mrb[20].mxu1 }
 0x12a   : > { %821 = vst.msk [vmem:[%s1259_s16 + $0x24] sm:$0xf] %vm811_vm1, %v1013_v15  ;;  %837 = vst.msk [vmem:[%s1259_s16 + $0x64] sm:$0xf] %vm811_vm1, %v1029_v16  ;;  %v565_v19 = vadd.f32 %v1249_v43, %v564_v17  ;;  %v629_v20 = vadd.f32 %v1249_v43, %v628_v18  ;;  %v566_v21 = vpop.f32.mrb[21].mxu0  ;;  %v630_v22 = vpop.f32.mrb[21].mxu1 }
 0x12b   : > { %v567_v23 = vpop.f32.mrb[22].mxu0  ;;  %v631_v24 = vpop.f32.mrb[22].mxu1 }
 0x12c   : > { %v661_v25 = vmax.f32 %v565_v19, 0.0  ;;  %v677_v26 = vmax.f32 %v629_v20, 0.0  ;;  %v568_v27 = vadd.f32 %v1249_v43, %v567_v23  ;;  %v632_v28 = vadd.f32 %v1249_v43, %v631_v24  ;;  %v569_v29 = vpop.f32.mrb[23].mxu0  ;;  %v633_v30 = vpop.f32.mrb[23].mxu1 }
 0x12e   : > { %v1014_v31 = vpack.c.bf16 %v661_v25, %v661_v25  ;;  %v1030_v32 = vpack.c.bf16 %v677_v26, %v677_v26  ;;  %v662_v33 = vmax.f32 %v568_v27, 0.0  ;;  %v678_v34 = vmax.f32 %v632_v28, 0.0 }
 0x130   : > { %822 = vst.msk [vmem:[%s1259_s16 + $0x28] sm:$0xf] %vm811_vm1, %v1014_v31  ;;  %838 = vst.msk [vmem:[%s1259_s16 + $0x68] sm:$0xf] %vm811_vm1, %v1030_v32  ;;  %v1015_v35 = vpack.c.bf16 %v662_v33, %v662_v33  ;;  %v1031_v36 = vpack.c.bf16 %v678_v34, %v678_v34 }
 0x131   : > { %v572_v37 = vpop.f32.mrb[24].mxu0  ;;  %v636_v38 = vpop.f32.mrb[24].mxu1 }
 0x132   : > { %823 = vst.msk [vmem:[%s1259_s16 + $0x2c] sm:$0xf] %vm811_vm1, %v1015_v35  ;;  %839 = vst.msk [vmem:[%s1259_s16 + $0x6c] sm:$0xf] %vm811_vm1, %v1031_v36  ;;  %v573_v39 = vadd.f32 %v1249_v43, %v572_v37  ;;  %v637_v40 = vadd.f32 %v1249_v43, %v636_v38  ;;  %v574_v41 = vpop.f32.mrb[25].mxu0  ;;  %v638_v42 = vpop.f32.mrb[25].mxu1 }
 0x133   : > { %v575_v44 = vpop.f32.mrb[26].mxu0  ;;  %v639_v45 = vpop.f32.mrb[26].mxu1 }
 0x134   : > { %v663_v46 = vmax.f32 %v573_v39, 0.0  ;;  %v679_v47 = vmax.f32 %v637_v40, 0.0  ;;  %v576_v48 = vadd.f32 %v1249_v43, %v575_v44  ;;  %v640_v49 = vadd.f32 %v1249_v43, %v639_v45  ;;  %v577_v50 = vpop.f32.mrb[27].mxu0  ;;  %v641_v51 = vpop.f32.mrb[27].mxu1 }
 0x136   : > { %v1016_v52 = vpack.c.bf16 %v663_v46, %v663_v46  ;;  %v1032_v53 = vpack.c.bf16 %v679_v47, %v679_v47  ;;  %v664_v54 = vmax.f32 %v576_v48, 0.0  ;;  %v680_v55 = vmax.f32 %v640_v49, 0.0 }
 0x138   : > { %824 = vst.msk [vmem:[%s1259_s16 + $0x30] sm:$0xf] %vm811_vm1, %v1016_v52  ;;  %840 = vst.msk [vmem:[%s1259_s16 + $0x70] sm:$0xf] %vm811_vm1, %v1032_v53  ;;  %v1017_v56 = vpack.c.bf16 %v664_v54, %v664_v54  ;;  %v1033_v57 = vpack.c.bf16 %v680_v55, %v680_v55 }
 0x139   : > { %v580_v58 = vpop.f32.mrb[28].mxu0  ;;  %v644_v59 = vpop.f32.mrb[28].mxu1 }
 0x13a   : > { %825 = vst.msk [vmem:[%s1259_s16 + $0x34] sm:$0xf] %vm811_vm1, %v1017_v56  ;;  %841 = vst.msk [vmem:[%s1259_s16 + $0x74] sm:$0xf] %vm811_vm1, %v1033_v57  ;;  %v581_v60 = vadd.f32 %v1249_v43, %v580_v58  ;;  %v645_v61 = vadd.f32 %v1249_v43, %v644_v59  ;;  %v582_v62 = vpop.f32.mrb[29].mxu0  ;;  %v646_v63 = vpop.f32.mrb[29].mxu1 }
 0x13b   : > { %v583_v0 = vpop.f32.mrb[30].mxu0  ;;  %v647_v1 = vpop.f32.mrb[30].mxu1 }
 0x13c   : > { %v665_v2 = vmax.f32 %v581_v60, 0.0  ;;  %v681_v3 = vmax.f32 %v645_v61, 0.0  ;;  %v584_v4 = vadd.f32 %v1249_v43, %v583_v0  ;;  %v648_v5 = vadd.f32 %v1249_v43, %v647_v1  ;;  %v585_v6 = vpop.f32.mrb[31].mxu0  ;;  %v649_v7 = vpop.f32.mrb[31].mxu1 }
 0x13e   : > { %v1018_v8 = vpack.c.bf16 %v665_v2, %v665_v2  ;;  %v1034_v9 = vpack.c.bf16 %v681_v3, %v681_v3  ;;  %v666_v10 = vmax.f32 %v584_v4, 0.0  ;;  %v682_v11 = vmax.f32 %v648_v5, 0.0 }
 0x140   : > { %826 = vst.msk [vmem:[%s1259_s16 + $0x38] sm:$0xf] %vm811_vm1, %v1018_v8  ;;  %842 = vst.msk [vmem:[%s1259_s16 + $0x78] sm:$0xf] %vm811_vm1, %v1034_v9  ;;  %v1019_v12 = vpack.c.bf16 %v666_v10, %v666_v10  ;;  %v1035_v13 = vpack.c.bf16 %v682_v11, %v682_v11 }
 0x142   : > { %827 = vst.msk [vmem:[%s1259_s16 + $0x3c] sm:$0xf] %vm811_vm1, %v1019_v12  ;;  %843 = vst.msk [vmem:[%s1259_s16 + $0x7c] sm:$0xf] %vm811_vm1, %v1035_v13 }
 0x143 PF: > { %s13_s12 = sadd.s32 1, %s1129_s12  }
 0x144   : > { %p10_p4 = scmp.ge.s32.totalorder %s13_s12, 4  }
 0x146   :  { %12 = sbr.rel (!%p10_p4) target bundleno = 1 (0x1), region = 62 }

// kernel: spatial_path_forward.5
= control target key start
LH: loop header
LB: loop body
LE: loop exit
PB: predicated region body
PF: predicated region fallthrough
CT: control target
= control target key end

     0   :  { %s5617_s13 = smov 0   ;;  %s5619_s14 = smov 0   ;;  %s6552_s0 = inlined_call_operand.vmem [shape: bf16[2,5,5,64], index: 0, kind: input, shape index: {}]   ;;  %s6553_s1 = inlined_call_operand.vmem [shape: bf16[2,5,5,64], index: 1, kind: input, shape index: {}]   ;;  %s6554_s2 = inlined_call_operand.vmem [shape: bf16[2,4,5,64], index: 2, kind: input, shape index: {}]   ;;  %s6555_s3 = inlined_call_operand.vmem [shape: bf16[2,5,5,64], index: 3, kind: input, shape index: {}]   ;;  %s6556_s4 = inlined_call_operand.vmem [shape: bf16[2,5,5,64], index: 4, kind: input, shape index: {}]   ;;  %s6557_s5 = inlined_call_operand.vmem [shape: bf16[2,4,5,64], index: 5, kind: input, shape index: {}]   ;;  %s6558_s6 = inlined_call_operand.vmem [shape: bf16[9,64,64], index: 6, kind: input, shape index: {}]   ;;  %s6559_s7 = inlined_call_operand.vmem [shape: f32[1,64], index: 7, kind: input, shape index: {}]   ;;  %s6560_s8 = inlined_call_operand.vmem [shape: bf16[64,128], index: 8, kind: input, shape index: {}]   ;;  %s6561_s9 = inlined_call_operand.vmem [shape: f32[1,128], index: 9, kind: input, shape index: {}]   ;;  %s6562_s10 = inlined_call_operand.vmem [shape: bf16[2,4,4,128], index: 10, kind: output, shape index: {}]  }
   0x1   :  { %s5621_s15 = smov 0  }
   0x2 LB: > { %s32_s16 = sadd.s32 1, %s5554_s14  ;;  %p4135_p0 = scmp.ge.s32.totalorder %s5558_s15, 1  ;;  %s5558_s15 = sphi %s5621_s15, %s20_s15   ;;  %s5554_s14 = sphi %s5619_s14, %s6564_s14   ;;  %s5550_s13 = sphi %s5617_s13, %s6563_s13  }
   0x3   : > { %p34_p1 = scmp.ge.s32.totalorder %s32_s16, 2  ;;  %p450_p2 = scmp.lt.s32.totalorder %s5558_s15, 3 }
   0x5   : > { %s6566_s16 = smov (%p34_p1, %s32_s16), 0  ;;  %p451_p3 = pnand %p4135_p0, %p450_p2 }
   0x6   : > { %v5364_v0 = vld [vmem:[%s6558_s6 + $0x20] sm:$0xff] (!%p451_p3)   ;;  %v5560_v1 = vmov (!%p451_p3), 0.0   ;;  %v5366_v3 = vld [vmem:[%s6558_s6 + $0x28] sm:$0xff] (!%p451_p3)   ;;  %vm5561_vm0 = vmmov (!%p451_p3), 0   ;;  %p562_p4 = scmp.lt.s32.totalorder (!%p451_p3), %s5550_s13, 1  ;;  %v5368_v5 = vld [vmem:[%s6558_s6 + $0x30] sm:$0xff] (!%p451_p3)  }
   0x7   : > { %454 = sbr.rel (%p451_p3) target bundleno = 1384 (0x568), region = 60  ;;  %4857 = vmatprep.subr.bf16.mxu0 (!%p451_p3), %v5560_v1  ;;  %4869 = vmatprep.subr.bf16.mxu1 (!%p451_p3), %v5560_v1  ;;  %v5365_v2 = vld [vmem:[%s6558_s6] sm:$0xff] (!%p451_p3)   ;;  %v5367_v4 = vld [vmem:[%s6558_s6 + $0x8] sm:$0xff] (!%p451_p3)   ;;  %v5369_v6 = vld [vmem:[%s6558_s6 + $0x10] sm:$0xff] (!%p451_p3)   ;;  %vm703_vm1 = vcmask (!%p451_p3), 523264  }
   0x8   : > { %4858 = vmatpush3.bf16.msra.mxu0 (!%p451_p3), %v5364_v0  ;;  %4865 = vmatprep.mubr.msk.bf16.mxu0 (!%p451_p3), %vm5561_vm0, %v5560_v1  ;;  %v5370_v7 = vld [vmem:[%s6558_s6 + $0x38] sm:$0xff] (!%p451_p3)   ;;  %v5372_v9 = vld [vmem:[%s6558_s6 + $0x40] sm:$0xff] (!%p451_p3)   ;;  %v5374_v14 = vld [vmem:[%s6558_s6 + $0x48] sm:$0xff] (!%p451_p3)  }
   0x9   : > { %4870 = vmatpush3.bf16.msra.mxu1 (!%p451_p3), %v5365_v2  ;;  %4859 = vmatprep.subr.bf16.mxu0 (!%p451_p3), %v5560_v1  ;;  %v5371_v8 = vld [vmem:[%s6558_s6 + $0x18] sm:$0xff] (!%p451_p3)   ;;  %v5373_v12 = vld [vmem:[%s6558_s6 + $0x60] sm:$0xff] (!%p451_p3)   ;;  %v5375_v15 = vld [vmem:[%s6558_s6 + $0x68] sm:$0xff] (!%p451_p3)  }
   0xa   : > { %4871 = vmatprep.subr.bf16.mxu1 (!%p451_p3), %v5560_v1  ;;  %4877 = vmatprep.mubr.msk.bf16.mxu1 (!%p451_p3), %vm5561_vm0, %v5560_v1  ;;  %v5376_v17 = vld [vmem:[%s6558_s6 + $0x50] sm:$0xff] (!%p451_p3)   ;;  %v5378_v21 = vld [vmem:[%s6558_s6 + $0x58] sm:$0xff] (!%p451_p3)   ;;  %v5381_v24 = vld [vmem:[%s6558_s6 + $0x80] sm:$0xff] (!%p451_p3)  }
   0xb   : > { %v5377_v18 = vld [vmem:[%s6558_s6 + $0x70] sm:$0xff] (!%p451_p3)   ;;  %v5379_v22 = vld [vmem:[%s6558_s6 + $0x78] sm:$0xff] (!%p451_p3)   ;;  %v5382_v26 = vld [vmem:[%s6558_s6 + $0xa0] sm:$0xff] (!%p451_p3)  }
   0xc   : > { %4860 = vmatpush3.bf16.msra.mxu0 (!%p451_p3), %v5366_v3  ;;  %v5383_v28 = vld [vmem:[%s6558_s6 + $0x88] sm:$0xff] (!%p451_p3)   ;;  %v5385_v30 = vld [vmem:[%s6558_s6 + $0x90] sm:$0xff] (!%p451_p3)   ;;  %v5387_v35 = vld [vmem:[%s6558_s6 + $0x98] sm:$0xff] (!%p451_p3)  }
   0xd   : > { %4872 = vmatpush3.bf16.msra.mxu1 (!%p451_p3), %v5367_v4  ;;  %4861 = vmatprep.subr.bf16.mxu0 (!%p451_p3), %v5560_v1  ;;  %v5384_v29 = vld [vmem:[%s6558_s6 + $0xa8] sm:$0xff] (!%p451_p3)   ;;  %v5386_v32 = vld [vmem:[%s6558_s6 + $0xb0] sm:$0xff] (!%p451_p3)   ;;  %v5388_v36 = vld [vmem:[%s6558_s6 + $0xb8] sm:$0xff] (!%p451_p3)  }
   0xe   : > { %s6568_s13 = smov (!%p562_p4, %s5550_s13), 1  ;;  %4873 = vmatprep.subr.bf16.mxu1 %v5560_v1  ;;  %v5389_v42 = vld [vmem:[%s6558_s6 + $0xc0] sm:$0xff]   ;;  %v5392_v45 = vld [vmem:[%s6558_s6 + $0xc8] sm:$0xff]   ;;  %v5394_v47 = vld [vmem:[%s6558_s6 + $0xd0] sm:$0xff]  }
   0xf   : > { %s5661_s27 = smul.u32 20, %s6568_s13  ;;  %s4654_s25 = sshll.u32 %s6568_s13, 4  ;;  %v5391_v43 = vld [vmem:[%s6558_s6 + $0xe0] sm:$0xff]   ;;  %v5393_v46 = vld [vmem:[%s6558_s6 + $0xe8] sm:$0xff]   ;;  %v5395_v48 = vld [vmem:[%s6558_s6 + $0xf0] sm:$0xff]  }
  0x10   : > { %4862 = vmatpush3.bf16.msra.mxu0 %v5368_v5  ;;  %s5771_s19 = scalar_lea.vmem %s6554_s2, %s4654_s25  ;;  %v5396_v49 = vld [vmem:[%s6558_s6 + $0xd8] sm:$0xff]   ;;  %s5836_s26 = scalar_lea.vmem %s6557_s5, %s4654_s25  ;;  %v5398_v52 = vld [vmem:[%s6558_s6 + $0x100] sm:$0xff]   ;;  %v5399_v54 = vld [vmem:[%s6558_s6 + $0x108] sm:$0xff]  }
  0x11   : > { %s5675_s18 = scalar_lea.vmem %s6555_s3, %s5661_s27  ;;  %4874 = vmatpush3.bf16.msra.mxu1 %v5369_v6  ;;  %4863 = vmatprep.subr.bf16.mxu0 %v5560_v1  ;;  %s5685_s23 = scalar_lea.vmem %s6552_s0, %s5661_s27  ;;  %v5775_v34 = vld [vmem:[%s5771_s19] ss:$0 sps:$4 sm:$0x77]   ;;  %v5397_v50 = vld [vmem:[%s6558_s6 + $0xf8] sm:$0xff]   ;;  %v5400_v55 = vld [vmem:[%s6558_s6 + $0x110] sm:$0xff]  }
  0x12   : > { %4875 = vmatprep.subr.bf16.mxu1 %v5560_v1  ;;  %v669_v10 = vld [vmem:[%s5675_s18] sm:$0x3]  ;;  %s5728_s28 = scalar_lea.vmem %s6553_s1, %s5661_s27  ;;  %s5788_s30 = scalar_lea.vmem %s6556_s4, %s5661_s27  ;;  %v1318_v38 = vshll.u32 %v5775_v34, 16  ;;  %v1316_v39 = vshrl.u32 %v5775_v34, 16  ;;  %v5401_v56 = vld [vmem:[%s6558_s6 + $0x118] sm:$0xff]   ;;  %v5405_v60 = vld [vmem:[%s6558_s6 + $0x28] sm:$0xff]  }
  0x13   : > { %v660_v11 = vld [vmem:[%s5685_s23] sm:$0x3]  ;;  %v5406_v61 = vld [vmem:[%s6560_s8 + $0x8] sm:$0xff]   ;;  %v5407_v62 = vld [vmem:[%s6558_s6 + $0x30] sm:$0xff]   ;;  %s4656_s20 = sshll.u32 %s6568_s13, 3 }
  0x14   : > { %4864 = vmatpush3.bf16.msra.mxu0 %v5370_v7  ;;  %v5380_v13 = vld [vmem:[%s5685_s23] ss:$0 sps:$4 sm:$0x77]   ;;  %v1320_v40 = vrot.slane %v1318_v38, 1  ;;  %v5408_v63 = vld [vmem:[%s6560_s8 + $0x10] sm:$0xff]   ;;  %v5409_v0 = vld [vmem:[%s6558_s6 + $0x38] sm:$0xff]   ;;  %s6202_s11 = scalar_lea.vmem %s6562_s10, %s4656_s20 }
  0x15   : > { %4876 = vmatpush3.bf16.msra.mxu1 %v5371_v8  ;;  %4881 = vmatprep.subr.bf16.mxu0 %v5560_v1  ;;  %v830_v16 = vshll.u32 %v5380_v13, 16  ;;  %v828_v19 = vshrl.u32 %v5380_v13, 16  ;;  %v902_v25 = vld [vmem:[%s5728_s28] sm:$0x3]  ;;  %v5410_v2 = vld [vmem:[%s6560_s8 + $0x18] sm:$0xff]   ;;  %v5413_v5 = vld [vmem:[%s6558_s6 + $0x48] sm:$0xff]  }
  0x16   : > { %4893 = vmatprep.subr.bf16.mxu1 %v5560_v1  ;;  %v5390_v27 = vld [vmem:[%s5728_s28] ss:$0 sps:$4 sm:$0x77]   ;;  %v1321_v57 = vor.u32 %v1320_v40, %v1316_v39  ;;  %v4266_v4 = vld [vmem:[%s5675_s18 + $0x4] sm:$0x3]  ;;  %v5415_v6 = vld [vmem:[%s6558_s6 + $0x50] sm:$0xff]  }
  0x17   : > { %4866 = vmatmul.mubr.msk.bf16.vlgmr.msra.gmra.mrb[0].mxu0 %vm703_vm1, %v669_v10  ;;  %v832_v20 = vrot.slane %v830_v16, 1  ;;  %v1074_v31 = vshll.u32 %v5390_v27, 16  ;;  %v1072_v33 = vshrl.u32 %v5390_v27, 16  ;;  %v980_v41 = vld [vmem:[%s5788_s30] sm:$0x3]  ;;  %v5417_v8 = vld [vmem:[%s6558_s6 + $0x58] sm:$0xff]  }
  0x18   : > { %4878 = vmatmul.mubr.msk.bf16.vlgmr.msra.gmra.mrb[0].mxu1 %vm703_vm1, %v660_v11  ;;  %4882 = vmatpush3.bf16.msra.mxu0 %v5372_v9  ;;  %v1146_v51 = vld [vmem:[%s5771_s19] sm:$0x3]  ;;  %v5419_v7 = vld [vmem:[%s5685_s23 + $0x4] ss:$0 sps:$4 sm:$0x77]   ;;  %v5426_v16 = vld [vmem:[%s6558_s6 + $0x98] sm:$0xff]  }
  0x19   : > { %4894 = vmatpush3.bf16.msra.mxu1 %v5373_v12  ;;  %4883 = vmatprep.subr.bf16.mxu0 %v5560_v1  ;;  %v833_v23 = vor.u32 %v832_v20, %v828_v19  ;;  %v1076_v37 = vrot.slane %v1074_v31, 1  ;;  %v1224_v53 = vld [vmem:[%s5836_s26] sm:$0x3]  ;;  %v1654_v9 = vshll.u32 %v5419_v7, 16  ;;  %v1652_v10 = vshrl.u32 %v5419_v7, 16  ;;  %v5430_v19 = vld [vmem:[%s6558_s6 + $0xc8] sm:$0xff]  }
  0x1a   : > { %4895 = vmatprep.subr.bf16.mxu1 %v5560_v1  ;;  %4889 = vmatprep.mubr.msk.bf16.mxu0 %vm5561_vm0, %v5560_v1  ;;  %v5403_v58 = vld [vmem:[%s6558_s6 + $0x20] sm:$0xff]   ;;  %v5432_v20 = vld [vmem:[%s6558_s6 + $0xd0] sm:$0xff]  }
  0x1b   : > { %4901 = vmatprep.mubr.msk.bf16.mxu1 %vm5561_vm0, %v5560_v1  ;;  %v1077_v44 = vor.u32 %v1076_v37, %v1072_v33  ;;  %v5404_v59 = vld [vmem:[%s6560_s8] sm:$0xff]   ;;  %v1656_v11 = vrot.slane %v1654_v9, 1 }
  0x1c   : > { %4884 = vmatpush3.bf16.msra.mxu0 %v5374_v14  ;;  %v5411_v3 = vld [vmem:[%s6558_s6 + $0x40] sm:$0xff]   ;;  %v5422_v14 = vld [vmem:[%s6558_s6 + $0x88] sm:$0xff]  }
  0x1d   : > { %4896 = vmatpush3.bf16.msra.mxu1 %v5375_v15  ;;  %4885 = vmatprep.subr.bf16.mxu0 %v5560_v1  ;;  %v1657_v12 = vor.u32 %v1656_v11, %v1652_v10  ;;  %v5420_v13 = vld [vmem:[%s6558_s6 + $0x80] sm:$0xff]   ;;  %v5424_v15 = vld [vmem:[%s6558_s6 + $0x90] sm:$0xff]  }
  0x1e   : > { %4897 = vmatprep.subr.bf16.mxu1 %v5560_v1  ;;  %v5445_v27 = vld [vmem:[%s5771_s19 + $0x4] ss:$0 sps:$4 sm:$0x77]   ;;  %v5988_v9 = vld [vmem:[%s6559_s7] ss:$0 sm:$0xff] }
  0x1f   : > { %v2140_v33 = vshll.u32 %v5445_v27, 16  ;;  %v2138_v38 = vshrl.u32 %v5445_v27, 16  ;;  %v5429_v27 = vld [vmem:[%s6558_s6 + $0xa0] sm:$0xff]  }
  0x20   : > { %4886 = vmatpush3.bf16.msra.mxu0 %v5376_v17  ;;  %v5428_v17 = vld [vmem:[%s6558_s6 + $0xc0] sm:$0xff]  }
  0x21   : > { %4898 = vmatpush3.bf16.msra.mxu1 %v5377_v18  ;;  %4887 = vmatprep.subr.bf16.mxu0 %v5560_v1  ;;  %v4314_v18 = vld [vmem:[%s5788_s30 + $0x4] sm:$0x3]  ;;  %v2142_v39 = vrot.slane %v2140_v33, 1 }
  0x22   : > { %4899 = vmatprep.subr.bf16.mxu1 %v5560_v1 }
  0x23   : > { %v2143_v40 = vor.u32 %v2142_v39, %v2138_v38  ;;  %v5442_v38 = vld [vmem:[%s6558_s6 + $0xf0] sm:$0xff]   ;;  %v5444_v39 = vld [vmem:[%s6558_s6 + $0xf8] sm:$0xff]  }
  0x24   : > { %4888 = vmatpush3.bf16.msra.mxu0 %v5378_v21  ;;  %v5434_v21 = vld [vmem:[%s6558_s6 + $0xd8] sm:$0xff]  }
  0x25   : > { %4900 = vmatpush3.bf16.msra.mxu1 %v5379_v22  ;;  %4905 = vmatprep.subr.bf16.mxu0 %v5560_v1  ;;  %v5437_v22 = vld [vmem:[%s6558_s6 + $0x100] sm:$0xff]  }
  0x26   : > { %4917 = vmatprep.subr.bf16.mxu1 %v5560_v1 }
  0x27   : > { %4890 = vmatmul.mubr.msk.bf16.vlgmr.msra.gmra.mrb[4].mxu0 %vm703_vm1, %v833_v23  ;;  %v4343_v23 = vld [vmem:[%s5771_s19 + $0x4] sm:$0x3] }
  0x28   : > { %4906 = vmatpush3.bf16.msra.mxu0 %v5381_v24  ;;  %4902 = vmatmul.mubr.msk.bf16.vlgmr.msra.gmra.mrb[4].mxu1 %vm703_vm1, %v902_v25  ;;  %v5439_v24 = vld [vmem:[%s6558_s6 + $0x108] sm:$0xff]   ;;  %v5441_v25 = vld [vmem:[%s6558_s6 + $0x110] sm:$0xff]  }
  0x29   : > { %4918 = vmatpush3.bf16.msra.mxu1 %v5382_v26  ;;  %4907 = vmatprep.subr.bf16.mxu0 %v5560_v1 }
  0x2a   : > { %4919 = vmatprep.subr.bf16.mxu1 %v5560_v1  ;;  %4913 = vmatprep.mubr.msk.bf16.mxu0 %vm5561_vm0, %v5560_v1 }
  0x2b   : > { %4925 = vmatprep.mubr.msk.bf16.mxu1 %vm5561_vm0, %v5560_v1 }
  0x2c   : > { %4908 = vmatpush3.bf16.msra.mxu0 %v5383_v28 }
  0x2d   : > { %4920 = vmatpush3.bf16.msra.mxu1 %v5384_v29  ;;  %4909 = vmatprep.subr.bf16.mxu0 %v5560_v1 }
  0x2e   : > { %4921 = vmatprep.subr.bf16.mxu1 %v5560_v1 }
  0x30   : > { %4910 = vmatpush3.bf16.msra.mxu0 %v5385_v30 }
  0x31   : > { %4922 = vmatpush3.bf16.msra.mxu1 %v5386_v32  ;;  %4911 = vmatprep.subr.bf16.mxu0 %v5560_v1 }
  0x32   : > { %4923 = vmatprep.subr.bf16.mxu1 %v5560_v1 }
  0x34   : > { %4912 = vmatpush3.bf16.msra.mxu0 %v5387_v35 }
  0x35   : > { %4924 = vmatpush3.bf16.msra.mxu1 %v5388_v36  ;;  %4929 = vmatprep.subr.bf16.mxu0 %v5560_v1  ;;  %v5443_v36 = vld [vmem:[%s6558_s6 + $0x118] sm:$0xff]  }
  0x36   : > { %4941 = vmatprep.subr.bf16.mxu1 %v5560_v1 }
  0x37   : > { %4914 = vmatmul.mubr.msk.bf16.vlgmr.msra.gmra.mrb[8].mxu0 %vm703_vm1, %v980_v41 }
  0x38   : > { %4930 = vmatpush3.bf16.msra.mxu0 %v5389_v42  ;;  %4926 = vmatmul.mubr.msk.bf16.vlgmr.msra.gmra.mrb[8].mxu1 %vm703_vm1, %v1077_v44 }
  0x39   : > { %4942 = vmatpush3.bf16.msra.mxu1 %v5391_v43  ;;  %4931 = vmatprep.subr.bf16.mxu0 %v5560_v1 }
  0x3a   : > { %4943 = vmatprep.subr.bf16.mxu1 %v5560_v1  ;;  %4937 = vmatprep.mubr.msk.bf16.mxu0 %vm5561_vm0, %v5560_v1 }
  0x3b   : > { %4949 = vmatprep.mubr.msk.bf16.mxu1 %vm5561_vm0, %v5560_v1 }
  0x3c   : > { %4932 = vmatpush3.bf16.msra.mxu0 %v5392_v45 }
  0x3d   : > { %4944 = vmatpush3.bf16.msra.mxu1 %v5393_v46  ;;  %4933 = vmatprep.subr.bf16.mxu0 %v5560_v1 }
  0x3e   : > { %4945 = vmatprep.subr.bf16.mxu1 %v5560_v1 }
  0x40   : > { %4934 = vmatpush3.bf16.msra.mxu0 %v5394_v47 }
  0x41   : > { %4946 = vmatpush3.bf16.msra.mxu1 %v5395_v48  ;;  %4935 = vmatprep.subr.bf16.mxu0 %v5560_v1 }
  0x42   : > { %4947 = vmatprep.subr.bf16.mxu1 %v5560_v1 }
  0x44   : > { %4936 = vmatpush3.bf16.msra.mxu0 %v5396_v49 }
  0x45   : > { %4948 = vmatpush3.bf16.msra.mxu1 %v5397_v50  ;;  %4953 = vmatprep.subr.bf16.mxu0 %v5560_v1 }
  0x46   : > { %4965 = vmatprep.subr.bf16.mxu1 %v5560_v1 }
  0x47   : > { %4938 = vmatmul.mubr.msk.bf16.vlgmr.msra.gmra.mrb[12].mxu0 %vm703_vm1, %v1146_v51 }
  0x48   : > { %4954 = vmatpush3.bf16.msra.mxu0 %v5398_v52  ;;  %4950 = vmatmul.mubr.msk.bf16.vlgmr.msra.gmra.mrb[12].mxu1 %vm703_vm1, %v1224_v53 }
  0x49   : > { %4955 = vmatprep.subr.bf16.mxu0 %v5560_v1  ;;  %4961 = vmatprep.mubr.msk.bf16.mxu0 %vm5561_vm0, %v5560_v1 }
  0x4a   : > { %4973 = vmatprep.mubr.msk.bf16.mxu1 %vm5561_vm0, %v5560_v1  ;;  %4966 = vmatpush3.bf16.msra.mxu1 %v5404_v59 }
  0x4b   : > { %4967 = vmatprep.subr.bf16.mxu1 %v5560_v1 }
  0x4c   : > { %4956 = vmatpush3.bf16.msra.mxu0 %v5399_v54 }
  0x4d   : > { %4957 = vmatprep.subr.bf16.mxu0 %v5560_v1 }
  0x4e   : > { %4968 = vmatpush3.bf16.msra.mxu1 %v5406_v61 }
  0x4f   : > { %4969 = vmatprep.subr.bf16.mxu1 %v5560_v1 }
  0x50   : > { %4958 = vmatpush3.bf16.msra.mxu0 %v5400_v55 }
  0x51   : > { %4959 = vmatprep.subr.bf16.mxu0 %v5560_v1 }
  0x52   : > { %4970 = vmatpush3.bf16.msra.mxu1 %v5408_v63 }
  0x53   : > { %4971 = vmatprep.subr.bf16.mxu1 %v5560_v1 }
  0x54   : > { %4960 = vmatpush3.bf16.msra.mxu0 %v5401_v56 }
  0x55   : > { %4977 = vmatprep.subr.bf16.mxu0 %v5560_v1 }
  0x56   : > { %4972 = vmatpush3.bf16.msra.mxu1 %v5410_v2 }
  0x57   : > { %4962 = vmatmul.mubr.msk.bf16.vlgmr.msra.gmra.mrb[16].mxu0 %vm703_vm1, %v1321_v57  ;;  %4989 = vmatprep.subr.bf16.mxu1 %v5560_v1 }
  0x58   : > { %4985 = vmatprep.mubr.msk.bf16.mxu0 %vm5561_vm0, %v5560_v1  ;;  %4978 = vmatpush3.bf16.msra.mxu0 %v5403_v58 }
  0x59   : > { %4979 = vmatprep.subr.bf16.mxu0 %v5560_v1 }
  0x5c   : > { %4980 = vmatpush3.bf16.msra.mxu0 %v5405_v60 }
  0x5d   : > { %4981 = vmatprep.subr.bf16.mxu0 %v5560_v1 }
  0x60   : > { %4982 = vmatpush3.bf16.msra.mxu0 %v5407_v62 }
  0x61   : > { %4983 = vmatprep.subr.bf16.mxu0 %v5560_v1 }
  0x64   : > { %4984 = vmatpush3.bf16.msra.mxu0 %v5409_v0 }
  0x65   : > { %5001 = vmatprep.subr.bf16.mxu0 %v5560_v1 }
  0x67   : > { %4986 = vmatmul.mubr.msk.bf16.vlgmr.msra.gmra.mrb[20].mxu0 %vm703_vm1, %v4266_v4 }
  0x68   : > { %5002 = vmatpush3.bf16.msra.mxu0 %v5411_v3  ;;  %5009 = vmatprep.mubr.msk.bf16.mxu0 %vm5561_vm0, %v5560_v1 }
  0x69   : > { %5003 = vmatprep.subr.bf16.mxu0 %v5560_v1 }
  0x6c   : > { %5004 = vmatpush3.bf16.msra.mxu0 %v5413_v5 }
  0x6d   : > { %5005 = vmatprep.subr.bf16.mxu0 %v5560_v1 }
  0x70   : > { %5006 = vmatpush3.bf16.msra.mxu0 %v5415_v6 }
  0x71   : > { %5007 = vmatprep.subr.bf16.mxu0 %v5560_v1 }
  0x74   : > { %5008 = vmatpush3.bf16.msra.mxu0 %v5417_v8 }
  0x75   : > { %5025 = vmatprep.subr.bf16.mxu0 %v5560_v1 }
  0x77   : > { %5010 = vmatmul.mubr.msk.bf16.vlgmr.msra.gmra.mrb[24].mxu0 %vm703_vm1, %v1657_v12 }
  0x78   : > { %5026 = vmatpush3.bf16.msra.mxu0 %v5420_v13  ;;  %5033 = vmatprep.mubr.msk.bf16.mxu0 %vm5561_vm0, %v5560_v1 }
  0x79   : > { %5027 = vmatprep.subr.bf16.mxu0 %v5560_v1 }
  0x7c   : > { %5028 = vmatpush3.bf16.msra.mxu0 %v5422_v14 }
  0x7d   : > { %5029 = vmatprep.subr.bf16.mxu0 %v5560_v1 }
  0x80   : > { %5030 = vmatpush3.bf16.msra.mxu0 %v5424_v15 }
  0x81   : > { %5031 = vmatprep.subr.bf16.mxu0 %v5560_v1 }
  0x84   : > { %5032 = vmatpush3.bf16.msra.mxu0 %v5426_v16  ;;  %v5412_v16 = vld [vmem:[%s6558_s6] sm:$0xff]  }
  0x85   : > { %5049 = vmatprep.subr.bf16.mxu0 %v5560_v1 }
  0x87   : > { %5034 = vmatmul.mubr.msk.bf16.vlgmr.msra.gmra.mrb[28].mxu0 %vm703_vm1, %v4314_v18  ;;  %v5414_v18 = vld [vmem:[%s6558_s6 + $0x8] sm:$0xff]  }
  0x88   : > { %5050 = vmatpush3.bf16.msra.mxu0 %v5428_v17  ;;  %5057 = vmatprep.mubr.msk.bf16.mxu0 %vm5561_vm0, %v5560_v1 }
  0x89   : > { %5051 = vmatprep.subr.bf16.mxu0 %v5560_v1 }
  0x8c   : > { %5052 = vmatpush3.bf16.msra.mxu0 %v5430_v19  ;;  %v5416_v19 = vld [vmem:[%s6558_s6 + $0x10] sm:$0xff]  }
  0x8d   : > { %5053 = vmatprep.subr.bf16.mxu0 %v5560_v1 }
  0x90   : > { %5054 = vmatpush3.bf16.msra.mxu0 %v5432_v20  ;;  %v5418_v20 = vld [vmem:[%s6558_s6 + $0x18] sm:$0xff]  }
  0x91   : > { %5055 = vmatprep.subr.bf16.mxu0 %v5560_v1 }
  0x94   : > { %5056 = vmatpush3.bf16.msra.mxu0 %v5434_v21  ;;  %v4265_v21 = vld [vmem:[%s5685_s23 + $0x4] sm:$0x3] }
  0x95   : > { %5073 = vmatprep.subr.bf16.mxu0 %v5560_v1 }
  0x97   : > { %5058 = vmatmul.mubr.msk.bf16.vlgmr.msra.gmra.mrb[32].mxu0 %vm703_vm1, %v4343_v23  ;;  %v5423_v23 = vld [vmem:[%s6558_s6 + $0x68] sm:$0xff]  }
  0x98   : > { %5074 = vmatpush3.bf16.msra.mxu0 %v5437_v22  ;;  %5081 = vmatprep.mubr.msk.bf16.mxu0 %vm5561_vm0, %v5560_v1  ;;  %v5421_v22 = vld [vmem:[%s6558_s6 + $0x60] sm:$0xff]  }
  0x99   : > { %5075 = vmatprep.subr.bf16.mxu0 %v5560_v1 }
  0x9c   : > { %5076 = vmatpush3.bf16.msra.mxu0 %v5439_v24  ;;  %v5425_v24 = vld [vmem:[%s6558_s6 + $0x70] sm:$0xff]  }
  0x9d   : > { %5077 = vmatprep.subr.bf16.mxu0 %v5560_v1 }
  0xa0   : > { %5078 = vmatpush3.bf16.msra.mxu0 %v5441_v25  ;;  %v5427_v25 = vld [vmem:[%s6558_s6 + $0x78] sm:$0xff]  }
  0xa1   : > { %5079 = vmatprep.subr.bf16.mxu0 %v5560_v1 }
  0xa4   : > { %5080 = vmatpush3.bf16.msra.mxu0 %v5443_v36  ;;  %v5438_v36 = vld [vmem:[%s6558_s6 + $0xe0] sm:$0xff]  }
  0xa5   : > { %5097 = vmatprep.subr.bf16.mxu0 %v5560_v1 }
  0xa7   : > { %5082 = vmatmul.mubr.msk.bf16.vlgmr.msra.gmra.mrb[36].mxu0 %vm703_vm1, %v2143_v40  ;;  %v4357_v40 = vld [vmem:[%s5836_s26 + $0x4] sm:$0x3] }
  0xa8   : > { %5105 = vmatprep.mubr.msk.bf16.mxu0 %vm5561_vm0, %v5560_v1 }
  0xea   : > { %v741_v26 = vpop.f32.mrb[0].mxu0 }
  0xeb   : > { %v4867_v28 = vpop.f32.mrb[1].mxu0  ;;  %v808_v29 = vpop.f32.mrb[0].mxu1 }
  0xec   : > { %v809_v30 = vadd.f32 %v808_v29, %v741_v26  ;;  %v744_v31 = vpop.f32.mrb[2].mxu0  ;;  %v4879_v32 = vpop.f32.mrb[1].mxu1  ;;  %v4300_v26 = vld [vmem:[%s5728_s28 + $0x4] sm:$0x3]  ;;  %v5431_v29 = vld [vmem:[%s6558_s6 + $0xa8] sm:$0xff]  }
  0xed   : > { %v4868_v34 = vpop.f32.mrb[3].mxu0  ;;  %v811_v35 = vpop.f32.mrb[2].mxu1  ;;  %v5436_v28 = vld [vmem:[%s5728_s28 + $0x4] ss:$0 sps:$4 sm:$0x77]   ;;  %v5433_v31 = vld [vmem:[%s6558_s6 + $0xb0] sm:$0xff]  }
  0xee   : > { %v4880_v37 = vpop.f32.mrb[3].mxu1  ;;  %v1895_v32 = vshrl.u32 %v5436_v28, 16  ;;  %v5435_v34 = vld [vmem:[%s6558_s6 + $0xb8] sm:$0xff]  }
  0xef   : > { %v5440_v37 = vld [vmem:[%s6558_s6 + $0xe8] sm:$0xff]  }
  0xfa   : > { %v895_v41 = vpop.f32.mrb[4].mxu0 }
  0xfb   : > { %v901_v42 = vadd.f32 %v895_v41, %v809_v30  ;;  %v4891_v43 = vpop.f32.mrb[5].mxu0  ;;  %v973_v44 = vpop.f32.mrb[4].mxu1  ;;  %v1897_v30 = vshll.u32 %v5436_v28, 16  ;;  %v5482_v28 = vld [vmem:[%s6558_s6 + $0x108] sm:$0xff]  }
  0xfc   : > { %v898_v45 = vpop.f32.mrb[6].mxu0  ;;  %v4903_v46 = vpop.f32.mrb[5].mxu1 }
  0xfd   : > { %v979_v47 = vadd.f32 %v973_v44, %v901_v42  ;;  %v4892_v48 = vpop.f32.mrb[7].mxu0  ;;  %v976_v49 = vpop.f32.mrb[6].mxu1  ;;  %v1899_v33 = vrot.slane %v1897_v30, 1 }
  0xfe   : > { %v4904_v50 = vpop.f32.mrb[7].mxu1 }
  0xff   : > { %v1900_v35 = vor.u32 %v1899_v33, %v1895_v32  ;;  %v5484_v33 = vld [vmem:[%s6558_s6 + $0x110] sm:$0xff]  }
 0x10a   : > { %v1051_v51 = vpop.f32.mrb[8].mxu0 }
 0x10b   : > { %v1057_v52 = vadd.f32 %v1051_v51, %v979_v47  ;;  %v4915_v53 = vpop.f32.mrb[9].mxu0  ;;  %v1139_v54 = vpop.f32.mrb[8].mxu1 }
 0x10c   : > { %v1054_v55 = vpop.f32.mrb[10].mxu0  ;;  %v4927_v56 = vpop.f32.mrb[9].mxu1 }
 0x10d   : > { %v1145_v57 = vadd.f32 %v1139_v54, %v1057_v52  ;;  %v4916_v58 = vpop.f32.mrb[11].mxu0  ;;  %v1142_v59 = vpop.f32.mrb[10].mxu1 }
 0x10e   : > { %v4928_v60 = vpop.f32.mrb[11].mxu1  ;;  %v5447_v58 = vld [vmem:[%s6560_s8] sm:$0xff]   ;;  %v5448_v59 = vld [vmem:[%s6558_s6 + $0x28] sm:$0xff]  }
 0x10f   : > { %v5449_v60 = vld [vmem:[%s6560_s8 + $0x8] sm:$0xff]  }
 0x11a   : > { %v1217_v61 = vpop.f32.mrb[12].mxu0 }
 0x11b   : > { %v1223_v62 = vadd.f32 %v1217_v61, %v1145_v57  ;;  %v4939_v63 = vpop.f32.mrb[13].mxu0  ;;  %v1295_v0 = vpop.f32.mrb[12].mxu1  ;;  %v5446_v57 = vld [vmem:[%s6558_s6 + $0x20] sm:$0xff]  }
 0x11c   : > { %v1220_v2 = vpop.f32.mrb[14].mxu0  ;;  %v4951_v3 = vpop.f32.mrb[13].mxu1  ;;  %5098 = vmatpush3.bf16.msra.mxu0 %v5446_v57 }
 0x11d   : > { %v1301_v4 = vadd.f32 %v1295_v0, %v1223_v62  ;;  %v4940_v5 = vpop.f32.mrb[15].mxu0  ;;  %v1298_v6 = vpop.f32.mrb[14].mxu1  ;;  %5099 = vmatprep.subr.bf16.mxu0 %v5560_v1  ;;  %v5450_v62 = vld [vmem:[%s6558_s6 + $0x30] sm:$0xff]  }
 0x11e   : > { %v4952_v7 = vpop.f32.mrb[15].mxu1  ;;  %v5451_v0 = vld [vmem:[%s6560_s8 + $0x10] sm:$0xff]   ;;  %v5453_v5 = vld [vmem:[%s6560_s8 + $0x18] sm:$0xff]   ;;  %v5454_v6 = vld [vmem:[%s6558_s6 + $0x40] sm:$0xff]  }
 0x11f   : > { %v4395_v7 = vld [vmem:[%s5675_s18 + $0x8] sm:$0x3] }
 0x120   : > { %5100 = vmatpush3.bf16.msra.mxu0 %v5448_v59 }
 0x121   : > { %5101 = vmatprep.subr.bf16.mxu0 %v5560_v1 }
 0x124   : > { %5102 = vmatpush3.bf16.msra.mxu0 %v5450_v62 }
 0x125   : > { %5103 = vmatprep.subr.bf16.mxu0 %v5560_v1 }
 0x12a   : > { %v1383_v8 = vpop.f32.mrb[16].mxu0 }
 0x12b   : > { %v1389_v10 = vadd.f32 %v1383_v8, %v1301_v4  ;;  %v4963_v11 = vpop.f32.mrb[17].mxu0  ;;  %v5452_v4 = vld [vmem:[%s6558_s6 + $0x38] sm:$0xff]   ;;  %v5456_v8 = vld [vmem:[%s6558_s6 + $0x48] sm:$0xff]  }
 0x12c   : > { %v1386_v12 = vpop.f32.mrb[18].mxu0  ;;  %5104 = vmatpush3.bf16.msra.mxu0 %v5452_v4  ;;  %v5462_v11 = vld [vmem:[%s5685_s23 + $0x8] ss:$0 sps:$4 sm:$0x77]  }
 0x12d   : > { %v1397_v13 = vadd.f32 %v5988_v9, %v1389_v10  ;;  %v4964_v14 = vpop.f32.mrb[19].mxu0  ;;  %5121 = vmatprep.subr.bf16.mxu0 %v5560_v1  ;;  %v5458_v10 = vld [vmem:[%s6558_s6 + $0x50] sm:$0xff]   ;;  %v5460_v12 = vld [vmem:[%s6558_s6 + $0x58] sm:$0xff]  }
 0x12e   : > { %v2475_v14 = vshrl.u32 %v5462_v11, 16 }
 0x12f   : > { %v1398_v15 = vmax.f32 %v1397_v13, 0.0  ;;  %5106 = vmatmul.mubr.msk.bf16.vlgmr.msra.gmra.mrb[40].mxu0 %vm703_vm1, %v4395_v7  ;;  %v2477_v13 = vshll.u32 %v5462_v11, 16 }
 0x130   : > { %5122 = vmatpush3.bf16.msra.mxu0 %v5454_v6  ;;  %5129 = vmatprep.mubr.msk.bf16.mxu0 %vm5561_vm0, %v5560_v1 }
 0x131   : > { %v1399_v17 = vpack.c.bf16 %v1398_v15, %v1398_v15  ;;  %5123 = vmatprep.subr.bf16.mxu0 %v5560_v1  ;;  %v2479_v15 = vrot.slane %v2477_v13, 1  ;;  %v5464_v13 = vld [vmem:[%s6558_s6 + $0x60] sm:$0xff]  }
 0x133   : > { %4974 = vmatmul.mubr.msk.bf16.vlgmr.msra.gmra.mrb[16].mxu1 %vm703_vm1, %v1399_v17  ;;  %v5463_v17 = vld [vmem:[%s6558_s6 + $0x80] sm:$0xff]  }
 0x134   : > { %4990 = vmatpush3.bf16.msra.mxu1 %v5412_v16  ;;  %4997 = vmatprep.mubr.msk.bf16.mxu1 %vm5561_vm0, %v5560_v1  ;;  %v2480_v16 = vor.u32 %v2479_v15, %v2475_v14  ;;  %v5466_v14 = vld [vmem:[%s6558_s6 + $0x68] sm:$0xff]   ;;  %v5468_v15 = vld [vmem:[%s6558_s6 + $0x70] sm:$0xff]  }
 0x135   : > { %4991 = vmatprep.subr.bf16.mxu1 %v5560_v1  ;;  %5124 = vmatpush3.bf16.msra.mxu0 %v5456_v8 }
 0x136   : > { %5125 = vmatprep.subr.bf16.mxu0 %v5560_v1 }
 0x138   : > { %4992 = vmatpush3.bf16.msra.mxu1 %v5414_v18  ;;  %v5465_v18 = vld [vmem:[%s6558_s6 + $0x88] sm:$0xff]  }
 0x139   : > { %4993 = vmatprep.subr.bf16.mxu1 %v5560_v1  ;;  %5126 = vmatpush3.bf16.msra.mxu0 %v5458_v10 }
 0x13a   : > { %v6074_v41 = vpop.f32.mrb[20].mxu0  ;;  %5127 = vmatprep.subr.bf16.mxu0 %v5560_v1 }
 0x13b   : > { %v4987_v42 = vpop.f32.mrb[21].mxu0 }
 0x13c   : > { %4994 = vmatpush3.bf16.msra.mxu1 %v5416_v19  ;;  %v1569_v43 = vpop.f32.mrb[22].mxu0  ;;  %v5467_v19 = vld [vmem:[%s6558_s6 + $0x90] sm:$0xff]  }
 0x13d   : > { %4995 = vmatprep.subr.bf16.mxu1 %v5560_v1  ;;  %v4988_v44 = vpop.f32.mrb[23].mxu0  ;;  %5128 = vmatpush3.bf16.msra.mxu0 %v5460_v12  ;;  %v4394_v12 = vld [vmem:[%s5685_s23 + $0x8] sm:$0x3] }
 0x13e   : > { %5145 = vmatprep.subr.bf16.mxu0 %v5560_v1 }
 0x140   : > { %4996 = vmatpush3.bf16.msra.mxu1 %v5418_v20  ;;  %5130 = vmatmul.mubr.msk.bf16.vlgmr.msra.gmra.mrb[44].mxu0 %vm703_vm1, %v2480_v16  ;;  %v5469_v20 = vld [vmem:[%s6558_s6 + $0x98] sm:$0xff]  }
 0x141   : > { %5013 = vmatprep.subr.bf16.mxu1 %v5560_v1  ;;  %5146 = vmatpush3.bf16.msra.mxu0 %v5463_v17  ;;  %v5470_v16 = vld [vmem:[%s6558_s6 + $0x78] sm:$0xff]   ;;  %v4429_v17 = vld [vmem:[%s5728_s28 + $0x8] sm:$0x3] }
 0x142   : > { %5153 = vmatprep.mubr.msk.bf16.mxu0 %vm5561_vm0, %v5560_v1  ;;  %5147 = vmatprep.subr.bf16.mxu0 %v5560_v1 }
 0x143   : > { %4998 = vmatmul.mubr.msk.bf16.vlgmr.msra.gmra.mrb[20].mxu1 %vm703_vm1, %v4265_v21  ;;  %v5471_v21 = vld [vmem:[%s6558_s6 + $0xc0] sm:$0xff]  }
 0x144   : > { %5014 = vmatpush3.bf16.msra.mxu1 %v5421_v22  ;;  %5021 = vmatprep.mubr.msk.bf16.mxu1 %vm5561_vm0, %v5560_v1  ;;  %v4443_v22 = vld [vmem:[%s5788_s30 + $0x8] sm:$0x3] }
 0x145   : > { %5015 = vmatprep.subr.bf16.mxu1 %v5560_v1  ;;  %5148 = vmatpush3.bf16.msra.mxu0 %v5465_v18  ;;  %v5472_v18 = vld [vmem:[%s6558_s6 + $0xa0] sm:$0xff]  }
 0x146   : > { %5149 = vmatprep.subr.bf16.mxu0 %v5560_v1 }
 0x148   : > { %5016 = vmatpush3.bf16.msra.mxu1 %v5423_v23  ;;  %v5473_v23 = vld [vmem:[%s6558_s6 + $0xc8] sm:$0xff]  }
 0x149   : > { %5017 = vmatprep.subr.bf16.mxu1 %v5560_v1  ;;  %5150 = vmatpush3.bf16.msra.mxu0 %v5467_v19  ;;  %v5479_v19 = vld [vmem:[%s5728_s28 + $0x8] ss:$0 sps:$4 sm:$0x77]  }
 0x14a   : > { %v6076_v45 = vpop.f32.mrb[24].mxu0  ;;  %5151 = vmatprep.subr.bf16.mxu0 %v5560_v1 }
 0x14b   : > { %v5011_v46 = vpop.f32.mrb[25].mxu0 }
 0x14c   : > { %5018 = vmatpush3.bf16.msra.mxu1 %v5425_v24  ;;  %v1722_v47 = vpop.f32.mrb[26].mxu0  ;;  %v5475_v24 = vld [vmem:[%s6558_s6 + $0xd0] sm:$0xff]  }
 0x14d   : > { %5019 = vmatprep.subr.bf16.mxu1 %v5560_v1  ;;  %v5012_v48 = vpop.f32.mrb[27].mxu0  ;;  %5152 = vmatpush3.bf16.msra.mxu0 %v5469_v20  ;;  %v5474_v20 = vld [vmem:[%s6558_s6 + $0xa8] sm:$0xff]  }
 0x14e   : > { %5169 = vmatprep.subr.bf16.mxu0 %v5560_v1 }
 0x150   : > { %5020 = vmatpush3.bf16.msra.mxu1 %v5427_v25  ;;  %5154 = vmatmul.mubr.msk.bf16.vlgmr.msra.gmra.mrb[48].mxu0 %vm703_vm1, %v4443_v22  ;;  %v5477_v25 = vld [vmem:[%s6558_s6 + $0xd8] sm:$0xff]   ;;  %v5476_v22 = vld [vmem:[%s6558_s6 + $0xb0] sm:$0xff]  }
 0x151   : > { %5037 = vmatprep.subr.bf16.mxu1 %v5560_v1  ;;  %5170 = vmatpush3.bf16.msra.mxu0 %v5471_v21  ;;  %v2720_v21 = vshll.u32 %v5479_v19, 16 }
 0x152   : > { %5177 = vmatprep.mubr.msk.bf16.mxu0 %vm5561_vm0, %v5560_v1  ;;  %5171 = vmatprep.subr.bf16.mxu0 %v5560_v1 }
 0x153   : > { %5022 = vmatmul.mubr.msk.bf16.vlgmr.msra.gmra.mrb[24].mxu1 %vm703_vm1, %v4300_v26  ;;  %v5480_v26 = vld [vmem:[%s6558_s6 + $0x100] sm:$0xff]  }
 0x154   : > { %5038 = vmatpush3.bf16.msra.mxu1 %v5429_v27  ;;  %5045 = vmatprep.mubr.msk.bf16.mxu1 %vm5561_vm0, %v5560_v1  ;;  %v4472_v27 = vld [vmem:[%s5771_s19 + $0x8] sm:$0x3] }
 0x155   : > { %5039 = vmatprep.subr.bf16.mxu1 %v5560_v1  ;;  %5172 = vmatpush3.bf16.msra.mxu0 %v5473_v23  ;;  %v2718_v23 = vshrl.u32 %v5479_v19, 16  ;;  %v5525_v19 = vld [vmem:[%s6558_s6 + $0x108] sm:$0xff]  }
 0x156   : > { %5173 = vmatprep.subr.bf16.mxu0 %v5560_v1 }
 0x158   : > { %5040 = vmatpush3.bf16.msra.mxu1 %v5431_v29  ;;  %v6190_v29 = vld [vmem:[%s6561_s9] ss:$0 sm:$0xff] }
 0x159   : > { %5041 = vmatprep.subr.bf16.mxu1 %v5560_v1  ;;  %5174 = vmatpush3.bf16.msra.mxu0 %v5475_v24  ;;  %v2722_v24 = vrot.slane %v2720_v21, 1 }
 0x15a   : > { %v6078_v49 = vpop.f32.mrb[28].mxu0  ;;  %5175 = vmatprep.subr.bf16.mxu0 %v5560_v1 }
 0x15b   : > { %v5035_v50 = vpop.f32.mrb[29].mxu0 }
 0x15c   : > { %5042 = vmatpush3.bf16.msra.mxu1 %v5433_v31  ;;  %v1878_v51 = vpop.f32.mrb[30].mxu0 }
 0x15d   : > { %5043 = vmatprep.subr.bf16.mxu1 %v5560_v1  ;;  %v5036_v52 = vpop.f32.mrb[31].mxu0  ;;  %5176 = vmatpush3.bf16.msra.mxu0 %v5477_v25  ;;  %v5478_v25 = vld [vmem:[%s6558_s6 + $0xb8] sm:$0xff]  }
 0x15e   : > { %5193 = vmatprep.subr.bf16.mxu0 %v5560_v1 }
 0x160   : > { %5044 = vmatpush3.bf16.msra.mxu1 %v5435_v34  ;;  %5178 = vmatmul.mubr.msk.bf16.vlgmr.msra.gmra.mrb[52].mxu0 %vm703_vm1, %v4472_v27  ;;  %v5481_v27 = vld [vmem:[%s6558_s6 + $0xe0] sm:$0xff]  }
 0x161   : > { %5061 = vmatprep.subr.bf16.mxu1 %v5560_v1  ;;  %5194 = vmatpush3.bf16.msra.mxu0 %v5480_v26  ;;  %v2723_v26 = vor.u32 %v2722_v24, %v2718_v23  ;;  %v5527_v23 = vld [vmem:[%s6558_s6 + $0x110] sm:$0xff]  }
 0x162   : > { %5201 = vmatprep.mubr.msk.bf16.mxu0 %vm5561_vm0, %v5560_v1  ;;  %5195 = vmatprep.subr.bf16.mxu0 %v5560_v1 }
 0x163   : > { %5046 = vmatmul.mubr.msk.bf16.vlgmr.msra.gmra.mrb[28].mxu1 %vm703_vm1, %v1900_v35  ;;  %v5488_v35 = vld [vmem:[%s5771_s19 + $0x8] ss:$0 sps:$4 sm:$0x77]  }
 0x164   : > { %5062 = vmatpush3.bf16.msra.mxu1 %v5438_v36  ;;  %5069 = vmatprep.mubr.msk.bf16.mxu1 %vm5561_vm0, %v5560_v1  ;;  %v2961_v42 = vshrl.u32 %v5488_v35, 16 }
 0x165   : > { %5063 = vmatprep.subr.bf16.mxu1 %v5560_v1  ;;  %5196 = vmatpush3.bf16.msra.mxu0 %v5482_v28  ;;  %v5483_v28 = vld [vmem:[%s6558_s6 + $0xe8] sm:$0xff]  }
 0x166   : > { %5197 = vmatprep.subr.bf16.mxu0 %v5560_v1 }
 0x168   : > { %5064 = vmatpush3.bf16.msra.mxu1 %v5440_v37 }
 0x169   : > { %5065 = vmatprep.subr.bf16.mxu1 %v5560_v1  ;;  %5198 = vmatpush3.bf16.msra.mxu0 %v5484_v33 }
 0x16a   : > { %v6080_v53 = vpop.f32.mrb[32].mxu0  ;;  %5199 = vmatprep.subr.bf16.mxu0 %v5560_v1 }
 0x16b   : > { %v5059_v54 = vpop.f32.mrb[33].mxu0 }
 0x16c   : > { %5066 = vmatpush3.bf16.msra.mxu1 %v5442_v38  ;;  %v2043_v55 = vpop.f32.mrb[34].mxu0  ;;  %v2963_v38 = vshll.u32 %v5488_v35, 16 }
 0x16d   : > { %5067 = vmatprep.subr.bf16.mxu1 %v5560_v1  ;;  %v5060_v56 = vpop.f32.mrb[35].mxu0 }
 0x16e   : > { %v2965_v43 = vrot.slane %v2963_v38, 1 }
 0x170   : > { %5068 = vmatpush3.bf16.msra.mxu1 %v5444_v39  ;;  %v2966_v44 = vor.u32 %v2965_v43, %v2961_v42 }
 0x171   : > { %5085 = vmatprep.subr.bf16.mxu1 %v5560_v1 }
 0x173   : > { %5070 = vmatmul.mubr.msk.bf16.vlgmr.msra.gmra.mrb[32].mxu1 %vm703_vm1, %v4357_v40  ;;  %v5486_v40 = vld [vmem:[%s6558_s6 + $0x118] sm:$0xff]  }
 0x174   : > { %5093 = vmatprep.mubr.msk.bf16.mxu1 %vm5561_vm0, %v5560_v1  ;;  %5086 = vmatpush3.bf16.msra.mxu1 %v5447_v58 }
 0x175   : > { %5087 = vmatprep.subr.bf16.mxu1 %v5560_v1  ;;  %5200 = vmatpush3.bf16.msra.mxu0 %v5486_v40 }
 0x176   : > { %5217 = vmatprep.subr.bf16.mxu0 %v5560_v1 }
 0x178   : > { %5088 = vmatpush3.bf16.msra.mxu1 %v5449_v60  ;;  %5202 = vmatmul.mubr.msk.bf16.vlgmr.msra.gmra.mrb[56].mxu0 %vm703_vm1, %v2966_v44 }
 0x179   : > { %5089 = vmatprep.subr.bf16.mxu1 %v5560_v1  ;;  %5225 = vmatprep.mubr.msk.bf16.mxu0 %vm5561_vm0, %v5560_v1 }
 0x17a   : > { %v6098_v61 = vpop.f32.mrb[36].mxu0 }
 0x17b   : > { %v5083_v63 = vpop.f32.mrb[37].mxu0 }
 0x17c   : > { %v2208_v2 = vpop.f32.mrb[38].mxu0  ;;  %5090 = vmatpush3.bf16.msra.mxu1 %v5451_v0 }
 0x17d   : > { %v5084_v3 = vpop.f32.mrb[39].mxu0  ;;  %5091 = vmatprep.subr.bf16.mxu1 %v5560_v1 }
 0x180   : > { %5092 = vmatpush3.bf16.msra.mxu1 %v5453_v5 }
 0x181   : > { %5109 = vmatprep.subr.bf16.mxu1 %v5560_v1 }
 0x202   : > { %v6302_v33 = vpop.f32.mrb[40].mxu0 }
 0x206   : > { %v1476_v30 = vpop.f32.mrb[16].mxu1 }
 0x207   : > { %v1477_v31 = vadd.f32 %v6190_v29, %v1476_v30  ;;  %v4975_v32 = vpop.f32.mrb[17].mxu1  ;;  %v5485_v30 = vld [vmem:[%s6558_s6 + $0xf0] sm:$0xff]  }
 0x208   : > { %v1479_v34 = vpop.f32.mrb[18].mxu1  ;;  %v4486_v32 = vld [vmem:[%s5836_s26 + $0x8] sm:$0x3] }
 0x209   : > { %v1482_v36 = vmax.f32 %v1477_v31, 0.0  ;;  %v4976_v37 = vpop.f32.mrb[19].mxu1  ;;  %v5487_v31 = vld [vmem:[%s6558_s6 + $0xf8] sm:$0xff]   ;;  %v5107_v34 = vpop.f32.mrb[41].mxu0 }
 0x20a   : > { %v2392_v35 = vpop.f32.mrb[42].mxu0 }
 0x20b   : > { %v1483_v39 = vpack.c.bf16 %v1482_v36, %v1482_v36  ;;  %v5108_v36 = vpop.f32.mrb[43].mxu0 }
 0x20d   : > { %1484 = vst [vmem:[%s6202_s11] sm:$0x3] %v1483_v39 }
 0x213   : > { %v6304_v37 = vpop.f32.mrb[44].mxu0 }
 0x214   : > { %v5131_v38 = vpop.f32.mrb[45].mxu0 }
 0x215   : > { %v2545_v39 = vpop.f32.mrb[46].mxu0 }
 0x216   : > { %v1633_v46 = vpop.f32.mrb[20].mxu1  ;;  %v5132_v40 = vpop.f32.mrb[47].mxu0 }
 0x217   : > { %v1634_v47 = vadd.f32 %v1633_v46, %v6074_v41  ;;  %v4999_v48 = vpop.f32.mrb[21].mxu1 }
 0x218   : > { %v1636_v50 = vpop.f32.mrb[22].mxu1 }
 0x219   : > { %v1725_v51 = vadd.f32 %v6076_v45, %v1634_v47  ;;  %v5000_v52 = vpop.f32.mrb[23].mxu1 }
 0x21a   : > { %v5489_v52 = vld [vmem:[%s6558_s6 + $0x20] sm:$0xff]  }
 0x21b   : > { %5218 = vmatpush3.bf16.msra.mxu0 %v5489_v52 }
 0x21c   : > { %5219 = vmatprep.subr.bf16.mxu0 %v5560_v1 }
 0x223   : > { %v6306_v42 = vpop.f32.mrb[48].mxu0 }
 0x224   : > { %v5155_v43 = vpop.f32.mrb[49].mxu0 }
 0x225   : > { %v2701_v44 = vpop.f32.mrb[50].mxu0 }
 0x226   : > { %v1797_v54 = vpop.f32.mrb[24].mxu1  ;;  %v5156_v46 = vpop.f32.mrb[51].mxu0 }
 0x227   : > { %v1803_v55 = vadd.f32 %v1797_v54, %v1725_v51  ;;  %v5023_v56 = vpop.f32.mrb[25].mxu1  ;;  %v5490_v54 = vld [vmem:[%s6560_s8] sm:$0xff]  }
 0x228   : > { %v1800_v57 = vpop.f32.mrb[26].mxu1  ;;  %v5492_v56 = vld [vmem:[%s6560_s8 + $0x8] sm:$0xff]  }
 0x229   : > { %v1881_v58 = vadd.f32 %v6078_v49, %v1803_v55  ;;  %v5024_v59 = vpop.f32.mrb[27].mxu1  ;;  %v5455_v49 = vld [vmem:[%s6558_s6] sm:$0xff]   ;;  %v5491_v55 = vld [vmem:[%s6558_s6 + $0x28] sm:$0xff]  }
 0x22a   : > { %5220 = vmatpush3.bf16.msra.mxu0 %v5491_v55 }
 0x22b   : > { %5221 = vmatprep.subr.bf16.mxu0 %v5560_v1 }
 0x233   : > { %v6308_v47 = vpop.f32.mrb[52].mxu0 }
 0x234   : > { %v5179_v48 = vpop.f32.mrb[53].mxu0 }
 0x235   : > { %v2866_v50 = vpop.f32.mrb[54].mxu0 }
 0x236   : > { %v1962_v60 = vpop.f32.mrb[28].mxu1  ;;  %v5180_v51 = vpop.f32.mrb[55].mxu0 }
 0x237   : > { %v1968_v62 = vadd.f32 %v1962_v60, %v1881_v58  ;;  %v5047_v63 = vpop.f32.mrb[29].mxu1  ;;  %v5493_v58 = vld [vmem:[%s6558_s6 + $0x30] sm:$0xff]  }
 0x238   : > { %v1965_v0 = vpop.f32.mrb[30].mxu1  ;;  %v5494_v60 = vld [vmem:[%s6560_s8 + $0x10] sm:$0xff]   ;;  %5222 = vmatpush3.bf16.msra.mxu0 %v5493_v58 }
 0x239   : > { %v2046_v2 = vadd.f32 %v6080_v53, %v1968_v62  ;;  %v5048_v3 = vpop.f32.mrb[31].mxu1  ;;  %v5457_v53 = vld [vmem:[%s6558_s6 + $0x8] sm:$0xff]   ;;  %5223 = vmatprep.subr.bf16.mxu0 %v5560_v1  ;;  %v5495_v0 = vld [vmem:[%s6558_s6 + $0x38] sm:$0xff]  }
 0x23a   : > { %v5497_v3 = vld [vmem:[%s6558_s6 + $0x40] sm:$0xff]  }
 0x23c   : > { %5224 = vmatpush3.bf16.msra.mxu0 %v5495_v0 }
 0x23d   : > { %5241 = vmatprep.subr.bf16.mxu0 %v5560_v1 }
 0x246   : > { %v2118_v41 = vpop.f32.mrb[32].mxu1 }
 0x247   : > { %v2124_v4 = vadd.f32 %v2118_v41, %v2046_v2  ;;  %v5071_v5 = vpop.f32.mrb[33].mxu1  ;;  %v5496_v2 = vld [vmem:[%s6560_s8 + $0x18] sm:$0xff]   ;;  %v4524_v41 = vld [vmem:[%s5675_s18 + $0xc] sm:$0x3] }
 0x248   : > { %v2121_v6 = vpop.f32.mrb[34].mxu1  ;;  %5226 = vmatmul.mubr.msk.bf16.vlgmr.msra.gmra.mrb[60].mxu0 %vm703_vm1, %v4524_v41  ;;  %v5501_v5 = vld [vmem:[%s6558_s6 + $0x50] sm:$0xff]  }
 0x249   : > { %v2211_v45 = vadd.f32 %v6098_v61, %v2124_v4  ;;  %v5072_v7 = vpop.f32.mrb[35].mxu1  ;;  %v5461_v61 = vld [vmem:[%s6558_s6 + $0x18] sm:$0xff]   ;;  %5242 = vmatpush3.bf16.msra.mxu0 %v5497_v3  ;;  %5249 = vmatprep.mubr.msk.bf16.mxu0 %vm5561_vm0, %v5560_v1  ;;  %v5499_v4 = vld [vmem:[%s6558_s6 + $0x48] sm:$0xff]  }
 0x24a   : > { %5243 = vmatprep.subr.bf16.mxu0 %v5560_v1  ;;  %v5505_v6 = vld [vmem:[%s5685_s23 + $0xc] ss:$0 sps:$4 sm:$0x77]  }
 0x24b   : > { %v2219_v8 = vadd.f32 %v5988_v9, %v2211_v45  ;;  %v5459_v9 = vld [vmem:[%s6558_s6 + $0x10] sm:$0xff]   ;;  %v6326_v57 = vpop.f32.mrb[56].mxu0  ;;  %v5503_v45 = vld [vmem:[%s6558_s6 + $0x58] sm:$0xff]   ;;  %v3300_v7 = vshll.u32 %v5505_v6, 16 }
 0x24c   : > { %v5203_v59 = vpop.f32.mrb[57].mxu0 }
 0x24d   : > { %v2220_v10 = vmax.f32 %v2219_v8, 0.0  ;;  %v3031_v62 = vpop.f32.mrb[58].mxu0  ;;  %5244 = vmatpush3.bf16.msra.mxu0 %v5499_v4  ;;  %v3298_v8 = vshrl.u32 %v5505_v6, 16  ;;  %v5504_v6 = vld [vmem:[%s6558_s6 + $0x18] sm:$0xff]  }
 0x24e   : > { %v5204_v63 = vpop.f32.mrb[59].mxu0  ;;  %5245 = vmatprep.subr.bf16.mxu0 %v5560_v1 }
 0x24f   : > { %v2221_v11 = vpack.c.bf16 %v2220_v10, %v2220_v10  ;;  %v3302_v10 = vrot.slane %v3300_v7, 1  ;;  %v5507_v7 = vld [vmem:[%s6558_s6 + $0x60] sm:$0xff]  }
 0x251   : > { %5094 = vmatmul.mubr.msk.bf16.vlgmr.msra.gmra.mrb[36].mxu1 %vm703_vm1, %v2221_v11  ;;  %5246 = vmatpush3.bf16.msra.mxu0 %v5501_v5  ;;  %v5506_v11 = vld [vmem:[%s6558_s6 + $0x80] sm:$0xff]   ;;  %v5500_v5 = vld [vmem:[%s6558_s6 + $0x8] sm:$0xff]  }
 0x252   : > { %5110 = vmatpush3.bf16.msra.mxu1 %v5455_v49  ;;  %5117 = vmatprep.mubr.msk.bf16.mxu1 %vm5561_vm0, %v5560_v1  ;;  %v3303_v49 = vor.u32 %v3302_v10, %v3298_v8  ;;  %v5509_v8 = vld [vmem:[%s6558_s6 + $0x68] sm:$0xff]   ;;  %v5511_v10 = vld [vmem:[%s6558_s6 + $0x70] sm:$0xff]  }
 0x253   : > { %5111 = vmatprep.subr.bf16.mxu1 %v5560_v1  ;;  %5247 = vmatprep.subr.bf16.mxu0 %v5560_v1 }
 0x255   : > { %5248 = vmatpush3.bf16.msra.mxu0 %v5503_v45  ;;  %v4523_v45 = vld [vmem:[%s5685_s23 + $0xc] sm:$0x3] }
 0x256   : > { %5112 = vmatpush3.bf16.msra.mxu1 %v5457_v53  ;;  %5265 = vmatprep.subr.bf16.mxu0 %v5560_v1  ;;  %v5508_v53 = vld [vmem:[%s6558_s6 + $0x88] sm:$0xff]  }
 0x257   : > { %5113 = vmatprep.subr.bf16.mxu1 %v5560_v1 }
 0x258   : > { %5250 = vmatmul.mubr.msk.bf16.vlgmr.msra.gmra.mrb[64].mxu0 %vm703_vm1, %v3303_v49  ;;  %v5513_v49 = vld [vmem:[%s6558_s6 + $0x78] sm:$0xff]  }
 0x259   : > { %5266 = vmatpush3.bf16.msra.mxu0 %v5506_v11  ;;  %5273 = vmatprep.mubr.msk.bf16.mxu0 %vm5561_vm0, %v5560_v1  ;;  %v4558_v11 = vld [vmem:[%s5728_s28 + $0xc] sm:$0x3] }
 0x25a   : > { %5114 = vmatpush3.bf16.msra.mxu1 %v5459_v9  ;;  %5267 = vmatprep.subr.bf16.mxu0 %v5560_v1  ;;  %v5510_v9 = vld [vmem:[%s6558_s6 + $0x90] sm:$0xff]  }
 0x25b   : > { %5115 = vmatprep.subr.bf16.mxu1 %v5560_v1 }
 0x25d   : > { %5268 = vmatpush3.bf16.msra.mxu0 %v5508_v53  ;;  %v5515_v53 = vld [vmem:[%s6558_s6 + $0xa0] sm:$0xff]  }
 0x25e   : > { %5116 = vmatpush3.bf16.msra.mxu1 %v5461_v61  ;;  %5269 = vmatprep.subr.bf16.mxu0 %v5560_v1  ;;  %v5512_v61 = vld [vmem:[%s6558_s6 + $0x98] sm:$0xff]  }
 0x25f   : > { %5133 = vmatprep.subr.bf16.mxu1 %v5560_v1 }
 0x261   : > { %5118 = vmatmul.mubr.msk.bf16.vlgmr.msra.gmra.mrb[40].mxu1 %vm703_vm1, %v4394_v12  ;;  %5270 = vmatpush3.bf16.msra.mxu0 %v5510_v9  ;;  %v5514_v12 = vld [vmem:[%s6558_s6 + $0xc0] sm:$0xff]   ;;  %v5522_v9 = vld [vmem:[%s5728_s28 + $0xc] ss:$0 sps:$4 sm:$0x77]  }
 0x262   : > { %5134 = vmatpush3.bf16.msra.mxu1 %v5464_v13  ;;  %5141 = vmatprep.mubr.msk.bf16.mxu1 %vm5561_vm0, %v5560_v1  ;;  %v4572_v13 = vld [vmem:[%s5788_s30 + $0xc] sm:$0x3] }
 0x263   : > { %5135 = vmatprep.subr.bf16.mxu1 %v5560_v1  ;;  %5271 = vmatprep.subr.bf16.mxu0 %v5560_v1 }
 0x265   : > { %5272 = vmatpush3.bf16.msra.mxu0 %v5512_v61  ;;  %v5517_v61 = vld [vmem:[%s6558_s6 + $0xa8] sm:$0xff]  }
 0x266   : > { %5136 = vmatpush3.bf16.msra.mxu1 %v5466_v14  ;;  %5289 = vmatprep.subr.bf16.mxu0 %v5560_v1  ;;  %v5516_v14 = vld [vmem:[%s6558_s6 + $0xc8] sm:$0xff]  }
 0x267   : > { %5137 = vmatprep.subr.bf16.mxu1 %v5560_v1 }
 0x268   : > { %5274 = vmatmul.mubr.msk.bf16.vlgmr.msra.gmra.mrb[68].mxu0 %vm703_vm1, %v4572_v13  ;;  %v5519_v13 = vld [vmem:[%s6558_s6 + $0xb0] sm:$0xff]  }
 0x269   : > { %5290 = vmatpush3.bf16.msra.mxu0 %v5514_v12  ;;  %5297 = vmatprep.mubr.msk.bf16.mxu0 %vm5561_vm0, %v5560_v1  ;;  %v3543_v12 = vshll.u32 %v5522_v9, 16 }
 0x26a   : > { %5138 = vmatpush3.bf16.msra.mxu1 %v5468_v15  ;;  %5291 = vmatprep.subr.bf16.mxu0 %v5560_v1  ;;  %v5518_v15 = vld [vmem:[%s6558_s6 + $0xd0] sm:$0xff]  }
 0x26b   : > { %5139 = vmatprep.subr.bf16.mxu1 %v5560_v1 }
 0x26d   : > { %5292 = vmatpush3.bf16.msra.mxu0 %v5516_v14  ;;  %v3541_v14 = vshrl.u32 %v5522_v9, 16 }
 0x26e   : > { %5140 = vmatpush3.bf16.msra.mxu1 %v5470_v16  ;;  %5293 = vmatprep.subr.bf16.mxu0 %v5560_v1  ;;  %v5520_v16 = vld [vmem:[%s6558_s6 + $0xd8] sm:$0xff]  }
 0x26f   : > { %5157 = vmatprep.subr.bf16.mxu1 %v5560_v1 }
 0x271   : > { %5142 = vmatmul.mubr.msk.bf16.vlgmr.msra.gmra.mrb[44].mxu1 %vm703_vm1, %v4429_v17  ;;  %5294 = vmatpush3.bf16.msra.mxu0 %v5518_v15  ;;  %v5523_v17 = vld [vmem:[%s6558_s6 + $0x100] sm:$0xff]   ;;  %v3545_v15 = vrot.slane %v3543_v12, 1 }
 0x272   : > { %5158 = vmatpush3.bf16.msra.mxu1 %v5472_v18  ;;  %5165 = vmatprep.mubr.msk.bf16.mxu1 %vm5561_vm0, %v5560_v1  ;;  %v4601_v18 = vld [vmem:[%s5771_s19 + $0xc] sm:$0x3] }
 0x273   : > { %5159 = vmatprep.subr.bf16.mxu1 %v5560_v1  ;;  %5295 = vmatprep.subr.bf16.mxu0 %v5560_v1 }
 0x275   : > { %5296 = vmatpush3.bf16.msra.mxu0 %v5520_v16  ;;  %v5521_v16 = vld [vmem:[%s6558_s6 + $0xb8] sm:$0xff]  }
 0x276   : > { %5160 = vmatpush3.bf16.msra.mxu1 %v5474_v20  ;;  %5313 = vmatprep.subr.bf16.mxu0 %v5560_v1 }
 0x277   : > { %5161 = vmatprep.subr.bf16.mxu1 %v5560_v1 }
 0x278   : > { %5298 = vmatmul.mubr.msk.bf16.vlgmr.msra.gmra.mrb[72].mxu0 %vm703_vm1, %v4601_v18  ;;  %v5524_v18 = vld [vmem:[%s6558_s6 + $0xe0] sm:$0xff]  }
 0x279   : > { %5314 = vmatpush3.bf16.msra.mxu0 %v5523_v17  ;;  %5321 = vmatprep.mubr.msk.bf16.mxu0 %vm5561_vm0, %v5560_v1  ;;  %v3546_v17 = vor.u32 %v3545_v15, %v3541_v14 }
 0x27a   : > { %5162 = vmatpush3.bf16.msra.mxu1 %v5476_v22  ;;  %5315 = vmatprep.subr.bf16.mxu0 %v5560_v1 }
 0x27b   : > { %5163 = vmatprep.subr.bf16.mxu1 %v5560_v1 }
 0x27d   : > { %5316 = vmatpush3.bf16.msra.mxu0 %v5525_v19  ;;  %v5526_v19 = vld [vmem:[%s6558_s6 + $0xe8] sm:$0xff]  }
 0x27e   : > { %5164 = vmatpush3.bf16.msra.mxu1 %v5478_v25  ;;  %5317 = vmatprep.subr.bf16.mxu0 %v5560_v1  ;;  %v5531_v25 = vld [vmem:[%s5771_s19 + $0xc] ss:$0 sps:$4 sm:$0x77]  }
 0x27f   : > { %5181 = vmatprep.subr.bf16.mxu1 %v5560_v1 }
 0x281   : > { %5166 = vmatmul.mubr.msk.bf16.vlgmr.msra.gmra.mrb[48].mxu1 %vm703_vm1, %v2723_v26  ;;  %5318 = vmatpush3.bf16.msra.mxu0 %v5527_v23 }
 0x282   : > { %5182 = vmatpush3.bf16.msra.mxu1 %v5481_v27  ;;  %5189 = vmatprep.mubr.msk.bf16.mxu1 %vm5561_vm0, %v5560_v1 }
 0x283   : > { %5183 = vmatprep.subr.bf16.mxu1 %v5560_v1  ;;  %5319 = vmatprep.subr.bf16.mxu0 %v5560_v1 }
 0x286   : > { %5184 = vmatpush3.bf16.msra.mxu1 %v5483_v28  ;;  %v3786_v28 = vshll.u32 %v5531_v25, 16 }
 0x287   : > { %5185 = vmatprep.subr.bf16.mxu1 %v5560_v1 }
 0x28a   : > { %5186 = vmatpush3.bf16.msra.mxu1 %v5485_v30 }
 0x28b   : > { %5187 = vmatprep.subr.bf16.mxu1 %v5560_v1 }
 0x28e   : > { %5188 = vmatpush3.bf16.msra.mxu1 %v5487_v31  ;;  %v3784_v31 = vshrl.u32 %v5531_v25, 16 }
 0x28f   : > { %5205 = vmatprep.subr.bf16.mxu1 %v5560_v1 }
 0x291   : > { %5190 = vmatmul.mubr.msk.bf16.vlgmr.msra.gmra.mrb[52].mxu1 %vm703_vm1, %v4486_v32  ;;  %v3788_v32 = vrot.slane %v3786_v28, 1 }
 0x292   : > { %5213 = vmatprep.mubr.msk.bf16.mxu1 %vm5561_vm0, %v5560_v1  ;;  %5206 = vmatpush3.bf16.msra.mxu1 %v5490_v54 }
 0x293   : > { %5207 = vmatprep.subr.bf16.mxu1 %v5560_v1  ;;  %v3789_v34 = vor.u32 %v3788_v32, %v3784_v31 }
 0x296   : > { %5208 = vmatpush3.bf16.msra.mxu1 %v5492_v56 }
 0x297   : > { %5209 = vmatprep.subr.bf16.mxu1 %v5560_v1 }
 0x29a   : > { %5210 = vmatpush3.bf16.msra.mxu1 %v5494_v60 }
 0x29b   : > { %5211 = vmatprep.subr.bf16.mxu1 %v5560_v1 }
 0x29e   : > { %5212 = vmatpush3.bf16.msra.mxu1 %v5496_v2 }
 0x29f   : > { %5229 = vmatprep.subr.bf16.mxu1 %v5560_v1 }
 0x31b   : > { %v3212_v23 = vpop.f32.mrb[60].mxu0 }
 0x324   : > { %v2298_v20 = vpop.f32.mrb[36].mxu1 }
 0x325   : > { %v2299_v21 = vadd.f32 %v6190_v29, %v2298_v20  ;;  %v5095_v22 = vpop.f32.mrb[37].mxu1  ;;  %v5529_v29 = vld [vmem:[%s6558_s6 + $0x118] sm:$0xff]   ;;  %v5528_v20 = vld [vmem:[%s6558_s6 + $0xf0] sm:$0xff]  }
 0x326   : > { %v2301_v24 = vpop.f32.mrb[38].mxu1  ;;  %5320 = vmatpush3.bf16.msra.mxu0 %v5529_v29  ;;  %v4615_v22 = vld [vmem:[%s5836_s26 + $0xc] sm:$0x3] }
 0x327   : > { %v2304_v26 = vmax.f32 %v2299_v21, 0.0  ;;  %v5096_v27 = vpop.f32.mrb[39].mxu1  ;;  %v5530_v21 = vld [vmem:[%s6558_s6 + $0xf8] sm:$0xff]   ;;  %v5227_v24 = vpop.f32.mrb[61].mxu0 }
 0x328   : > { %v3215_v25 = vpop.f32.mrb[62].mxu0 }
 0x329   : > { %v2305_v30 = vpack.c.bf16 %v2304_v26, %v2304_v26  ;;  %5322 = vmatmul.mubr.msk.bf16.vlgmr.msra.gmra.mrb[76].mxu0 %vm703_vm1, %v3789_v34  ;;  %v5228_v26 = vpop.f32.mrb[63].mxu0 }
 0x32b   : > { %4393 = vst [vmem:[%s6202_s11 + $0x2] sm:$0x3] %v2305_v30  ;;  %v3365_v27 = vpop.f32.mrb[64].mxu0 }
 0x32c   : > { %v5251_v28 = vpop.f32.mrb[65].mxu0 }
 0x32d   : > { %v3368_v30 = vpop.f32.mrb[66].mxu0 }
 0x32e   : > { %v5252_v29 = vpop.f32.mrb[67].mxu0 }
 0x334   : > { %v2456_v35 = vpop.f32.mrb[40].mxu1 }
 0x335   : > { %v2457_v36 = vadd.f32 %v2456_v35, %v6302_v33  ;;  %v5119_v38 = vpop.f32.mrb[41].mxu1 }
 0x336   : > { %v2459_v39 = vpop.f32.mrb[42].mxu1 }
 0x337   : > { %v2548_v40 = vadd.f32 %v6304_v37, %v2457_v36  ;;  %v5120_v43 = vpop.f32.mrb[43].mxu1  ;;  %v6434_v37 = vld [vmem:[%s6559_s7] ss:$0 sm:$0xff] }
 0x338   : > { %v5532_v43 = vld [vmem:[%s6560_s8] sm:$0xff]  }
 0x33b   : > { %v3521_v31 = vpop.f32.mrb[68].mxu0 }
 0x33c   : > { %v5275_v32 = vpop.f32.mrb[69].mxu0 }
 0x33d   : > { %v3524_v34 = vpop.f32.mrb[70].mxu0 }
 0x33e   : > { %v5276_v35 = vpop.f32.mrb[71].mxu0 }
 0x344   : > { %v2620_v44 = vpop.f32.mrb[44].mxu1 }
 0x345   : > { %v2626_v46 = vadd.f32 %v2620_v44, %v2548_v40  ;;  %v5143_v48 = vpop.f32.mrb[45].mxu1  ;;  %v5533_v44 = vld [vmem:[%s6560_s8 + $0x8] sm:$0xff]  }
 0x346   : > { %v2623_v50 = vpop.f32.mrb[46].mxu1 }
 0x347   : > { %v2704_v51 = vadd.f32 %v6306_v42, %v2626_v46  ;;  %v5144_v52 = vpop.f32.mrb[47].mxu1 }
 0x34b   : > { %v3686_v36 = vpop.f32.mrb[72].mxu0 }
 0x34c   : > { %v5299_v38 = vpop.f32.mrb[73].mxu0 }
 0x34d   : > { %v3689_v39 = vpop.f32.mrb[74].mxu0 }
 0x34e   : > { %v5300_v40 = vpop.f32.mrb[75].mxu0 }
 0x354   : > { %v2785_v54 = vpop.f32.mrb[48].mxu1 }
 0x355   : > { %v2791_v55 = vadd.f32 %v2785_v54, %v2704_v51  ;;  %v5167_v56 = vpop.f32.mrb[49].mxu1  ;;  %v5534_v51 = vld [vmem:[%s6560_s8 + $0x10] sm:$0xff]   ;;  %v5535_v54 = vld [vmem:[%s6560_s8 + $0x18] sm:$0xff]  }
 0x356   : > { %v2788_v58 = vpop.f32.mrb[50].mxu1 }
 0x357   : > { %v2869_v59 = vadd.f32 %v6308_v47, %v2791_v55  ;;  %v5168_v60 = vpop.f32.mrb[51].mxu1  ;;  %v5498_v47 = vld [vmem:[%s6558_s6] sm:$0xff]  }
 0x358   : > { %v4516_v55 = vld [vmem:[%s6561_s9] ss:$0 sm:$0xff] }
 0x364   : > { %v2941_v33 = vpop.f32.mrb[52].mxu1 }
 0x365   : > { %v2947_v62 = vadd.f32 %v2941_v33, %v2869_v59  ;;  %v5191_v63 = vpop.f32.mrb[53].mxu1 }
 0x366   : > { %v2944_v0 = vpop.f32.mrb[54].mxu1 }
 0x367   : > { %v3034_v2 = vadd.f32 %v6326_v57, %v2947_v62  ;;  %v5192_v42 = vpop.f32.mrb[55].mxu1  ;;  %v5502_v57 = vld [vmem:[%s6558_s6 + $0x10] sm:$0xff]  }
 0x369   : > { %v3042_v3 = vadd.f32 %v6434_v37, %v3034_v2 }
 0x36b   : > { %v3043_v41 = vmax.f32 %v3042_v3, 0.0 }
 0x36d   : > { %v3044_v4 = vpack.c.bf16 %v3043_v41, %v3043_v41 }
 0x36f   : > { %5214 = vmatmul.mubr.msk.bf16.vlgmr.msra.gmra.mrb[56].mxu1 %vm703_vm1, %v3044_v4 }
 0x370   : > { %5230 = vmatpush3.bf16.msra.mxu1 %v5498_v47  ;;  %5237 = vmatprep.mubr.msk.bf16.mxu1 %vm5561_vm0, %v5560_v1 }
 0x371   : > { %5231 = vmatprep.subr.bf16.mxu1 %v5560_v1 }
 0x374   : > { %5232 = vmatpush3.bf16.msra.mxu1 %v5500_v5 }
 0x375   : > { %5233 = vmatprep.subr.bf16.mxu1 %v5560_v1 }
 0x378   : > { %5234 = vmatpush3.bf16.msra.mxu1 %v5502_v57 }
 0x379   : > { %5235 = vmatprep.subr.bf16.mxu1 %v5560_v1 }
 0x37c   : > { %5236 = vmatpush3.bf16.msra.mxu1 %v5504_v6 }
 0x37d   : > { %5253 = vmatprep.subr.bf16.mxu1 %v5560_v1 }
 0x37f   : > { %5238 = vmatmul.mubr.msk.bf16.vlgmr.msra.gmra.mrb[60].mxu1 %vm703_vm1, %v4523_v45 }
 0x380   : > { %5254 = vmatpush3.bf16.msra.mxu1 %v5507_v7  ;;  %5261 = vmatprep.mubr.msk.bf16.mxu1 %vm5561_vm0, %v5560_v1 }
 0x381   : > { %5255 = vmatprep.subr.bf16.mxu1 %v5560_v1 }
 0x384   : > { %5256 = vmatpush3.bf16.msra.mxu1 %v5509_v8 }
 0x385   : > { %5257 = vmatprep.subr.bf16.mxu1 %v5560_v1 }
 0x388   : > { %5258 = vmatpush3.bf16.msra.mxu1 %v5511_v10 }
 0x389   : > { %5259 = vmatprep.subr.bf16.mxu1 %v5560_v1 }
 0x38c   : > { %5260 = vmatpush3.bf16.msra.mxu1 %v5513_v49 }
 0x38d   : > { %5277 = vmatprep.subr.bf16.mxu1 %v5560_v1 }
 0x38f   : > { %5262 = vmatmul.mubr.msk.bf16.vlgmr.msra.gmra.mrb[64].mxu1 %vm703_vm1, %v4558_v11 }
 0x390   : > { %5278 = vmatpush3.bf16.msra.mxu1 %v5515_v53  ;;  %5285 = vmatprep.mubr.msk.bf16.mxu1 %vm5561_vm0, %v5560_v1 }
 0x391   : > { %5279 = vmatprep.subr.bf16.mxu1 %v5560_v1 }
 0x394   : > { %5280 = vmatpush3.bf16.msra.mxu1 %v5517_v61 }
 0x395   : > { %5281 = vmatprep.subr.bf16.mxu1 %v5560_v1 }
 0x398   : > { %5282 = vmatpush3.bf16.msra.mxu1 %v5519_v13 }
 0x399   : > { %5283 = vmatprep.subr.bf16.mxu1 %v5560_v1 }
 0x39c   : > { %5284 = vmatpush3.bf16.msra.mxu1 %v5521_v16 }
 0x39d   : > { %5301 = vmatprep.subr.bf16.mxu1 %v5560_v1 }
 0x39f   : > { %5286 = vmatmul.mubr.msk.bf16.vlgmr.msra.gmra.mrb[68].mxu1 %vm703_vm1, %v3546_v17 }
 0x3a0   : > { %5302 = vmatpush3.bf16.msra.mxu1 %v5524_v18  ;;  %5309 = vmatprep.mubr.msk.bf16.mxu1 %vm5561_vm0, %v5560_v1 }
 0x3a1   : > { %5303 = vmatprep.subr.bf16.mxu1 %v5560_v1 }
 0x3a4   : > { %5304 = vmatpush3.bf16.msra.mxu1 %v5526_v19 }
 0x3a5   : > { %5305 = vmatprep.subr.bf16.mxu1 %v5560_v1 }
 0x3a8   : > { %5306 = vmatpush3.bf16.msra.mxu1 %v5528_v20 }
 0x3a9   : > { %5307 = vmatprep.subr.bf16.mxu1 %v5560_v1 }
 0x3ac   : > { %5308 = vmatpush3.bf16.msra.mxu1 %v5530_v21 }
 0x3ad   : > { %5325 = vmatprep.subr.bf16.mxu1 %v5560_v1 }
 0x3af   : > { %5310 = vmatmul.mubr.msk.bf16.vlgmr.msra.gmra.mrb[72].mxu1 %vm703_vm1, %v4615_v22 }
 0x3b0   : > { %5333 = vmatprep.mubr.msk.bf16.mxu1 %vm5561_vm0, %v5560_v1  ;;  %5326 = vmatpush3.bf16.msra.mxu1 %v5532_v43 }
 0x3b1   : > { %5327 = vmatprep.subr.bf16.mxu1 %v5560_v1 }
 0x3b4   : > { %5328 = vmatpush3.bf16.msra.mxu1 %v5533_v44 }
 0x3b5   : > { %5329 = vmatprep.subr.bf16.mxu1 %v5560_v1 }
 0x3b8   : > { %5330 = vmatpush3.bf16.msra.mxu1 %v5534_v51 }
 0x3b9   : > { %5331 = vmatprep.subr.bf16.mxu1 %v5560_v1 }
 0x3bc   : > { %5332 = vmatpush3.bf16.msra.mxu1 %v5535_v54 }
 0x3fc   : > { %v3851_v46 = vpop.f32.mrb[76].mxu0 }
 0x3fd   : > { %v5323_v48 = vpop.f32.mrb[77].mxu0 }
 0x3fe   : > { %v3854_v50 = vpop.f32.mrb[78].mxu0 }
 0x3ff   : > { %v5324_v52 = vpop.f32.mrb[79].mxu0 }
 0x442   : > { %v3121_v56 = vpop.f32.mrb[56].mxu1 }
 0x443   : > { %v3122_v58 = vadd.f32 %v4516_v55, %v3121_v56  ;;  %v5215_v59 = vpop.f32.mrb[57].mxu1 }
 0x444   : > { %v3124_v60 = vpop.f32.mrb[58].mxu1 }
 0x445   : > { %v3127_v33 = vmax.f32 %v3122_v58, 0.0  ;;  %v5216_v62 = vpop.f32.mrb[59].mxu1 }
 0x447   : > { %v3128_v63 = vpack.c.bf16 %v3127_v33, %v3127_v33 }
 0x449   : > { %4522 = vst [vmem:[%s6202_s11 + $0x4] sm:$0x3] %v3128_v63 }
 0x452   : > { %v3279_v0 = vpop.f32.mrb[60].mxu1 }
 0x453   : > { %v3280_v2 = vadd.f32 %v3279_v0, %v3212_v23  ;;  %v5239_v1 = vpop.f32.mrb[61].mxu1 }
 0x454   : > { %v3282_v42 = vpop.f32.mrb[62].mxu1 }
 0x455   : > { %v3371_v3 = vadd.f32 %v3365_v27, %v3280_v2  ;;  %v5240_v41 = vpop.f32.mrb[63].mxu1 }
 0x462   : > { %v3443_v47 = vpop.f32.mrb[64].mxu1 }
 0x463   : > { %v3449_v4 = vadd.f32 %v3443_v47, %v3371_v3  ;;  %v5263_v5 = vpop.f32.mrb[65].mxu1 }
 0x464   : > { %v3446_v57 = vpop.f32.mrb[66].mxu1 }
 0x465   : > { %v3527_v6 = vadd.f32 %v3521_v31, %v3449_v4  ;;  %v5264_v45 = vpop.f32.mrb[67].mxu1 }
 0x472   : > { %v3608_v7 = vpop.f32.mrb[68].mxu1 }
 0x473   : > { %v3614_v8 = vadd.f32 %v3608_v7, %v3527_v6  ;;  %v5287_v10 = vpop.f32.mrb[69].mxu1 }
 0x474   : > { %v3611_v49 = vpop.f32.mrb[70].mxu1 }
 0x475   : > { %v3692_v11 = vadd.f32 %v3686_v36, %v3614_v8  ;;  %v5288_v53 = vpop.f32.mrb[71].mxu1 }
 0x482   : > { %v3764_v9 = vpop.f32.mrb[72].mxu1 }
 0x483   : > { %v3770_v61 = vadd.f32 %v3764_v9, %v3692_v11  ;;  %v5311_v12 = vpop.f32.mrb[73].mxu1 }
 0x484   : > { %v3767_v13 = vpop.f32.mrb[74].mxu1 }
 0x485   : > { %v3857_v14 = vadd.f32 %v3851_v46, %v3770_v61  ;;  %v5312_v15 = vpop.f32.mrb[75].mxu1 }
 0x487   : > { %v3865_v16 = vadd.f32 %v6434_v37, %v3857_v14 }
 0x489   : > { %v3866_v17 = vmax.f32 %v3865_v16, 0.0 }
 0x48b   : > { %v3867_v18 = vpack.c.bf16 %v3866_v17, %v3866_v17 }
 0x48d   : > { %5334 = vmatmul.mubr.msk.bf16.vlgmr.msra.gmra.mrb[76].mxu1 %vm703_vm1, %v3867_v18 }
 0x560   : > { %v3944_v19 = vpop.f32.mrb[76].mxu1 }
 0x561   : > { %v3945_v20 = vadd.f32 %v4516_v55, %v3944_v19  ;;  %v5335_v21 = vpop.f32.mrb[77].mxu1 }
 0x562   : > { %v3947_v22 = vpop.f32.mrb[78].mxu1 }
 0x563   : > { %v3950_v23 = vmax.f32 %v3945_v20, 0.0  ;;  %v5336_v24 = vpop.f32.mrb[79].mxu1 }
 0x565   : > { %v3951_v25 = vpack.c.bf16 %v3950_v23, %v3950_v23 }
 0x567   : > { %4651 = vst [vmem:[%s6202_s11 + $0x6] sm:$0x3] %v3951_v25 }
 0x568 PF: > { %s20_s15 = sadd.s32 1, %s5558_s15   ;;  %s6563_s13 = smov %s5554_s14 }
 0x569   : > { %p17_p5 = scmp.ge.s32.totalorder %s20_s15, 4   ;;  %s6564_s14 = smov %s6566_s16 }
 0x56b   :  { %19 = sbr.rel (!%p17_p5) target bundleno = 2 (0x2), region = 134 }

// kernel: spatial_path_forward.4
= control target key start
LH: loop header
LB: loop body
LE: loop exit
PB: predicated region body
PF: predicated region fallthrough
CT: control target
= control target key end

     0   :  { %s9475_s27 = smov 0   ;;  %s9477_s28 = smov 0   ;;  %s11031_s0 = inlined_call_operand.vmem [shape: bf16[2,9,9,64], index: 0, kind: input, shape index: {}]   ;;  %s11032_s1 = inlined_call_operand.vmem [shape: bf16[2,9,9,64], index: 1, kind: input, shape index: {}]   ;;  %s11033_s2 = inlined_call_operand.vmem [shape: bf16[2,8,9,64], index: 2, kind: input, shape index: {}]   ;;  %s11034_s3 = inlined_call_operand.vmem [shape: bf16[2,9,9,64], index: 3, kind: input, shape index: {}]   ;;  %s11035_s4 = inlined_call_operand.vmem [shape: bf16[2,9,9,64], index: 4, kind: input, shape index: {}]   ;;  %s11036_s5 = inlined_call_operand.vmem [shape: bf16[2,8,9,64], index: 5, kind: input, shape index: {}]   ;;  %s11037_s6 = inlined_call_operand.vmem [shape: bf16[9,64,64], index: 6, kind: input, shape index: {}]   ;;  %s11038_s7 = inlined_call_operand.vmem [shape: f32[1,64], index: 7, kind: input, shape index: {}]   ;;  %s11039_s8 = inlined_call_operand.vmem [shape: bf16[2,8,8,64], index: 8, kind: output, shape index: {}]  }
   0x1   :  { %s9479_s29 = smov 0  }
   0x2 LB: > { %s30_s30 = sadd.s32 1, %s9422_s28  ;;  %p6830_p0 = scmp.ge.s32.totalorder %s9426_s29, 1  ;;  %s9426_s29 = sphi %s9479_s29, %s18_s29   ;;  %s9422_s28 = sphi %s9477_s28, %s11041_s28   ;;  %s9418_s27 = sphi %s9475_s27, %s11040_s27  }
   0x3   : > { %p32_p1 = scmp.ge.s32.totalorder %s30_s30, 2  ;;  %p414_p2 = scmp.lt.s32.totalorder %s9426_s29, 3 }
   0x5   : > { %s11043_s30 = smov (%p32_p1, %s30_s30), 0  ;;  %p415_p3 = pnand %p6830_p0, %p414_p2 }
   0x6   : > { %v9092_v0 = vld [vmem:[%s11037_s6 + $0x20] sm:$0xff] (!%p415_p3)   ;;  %v9428_v1 = vmov (!%p415_p3), 0.0   ;;  %v9094_v3 = vld [vmem:[%s11037_s6 + $0x28] sm:$0xff] (!%p415_p3)   ;;  %vm9429_vm0 = vmmov (!%p415_p3), 0   ;;  %p533_p4 = scmp.lt.s32.totalorder (!%p415_p3), %s9418_s27, 1  ;;  %v9096_v5 = vld [vmem:[%s11037_s6 + $0x30] sm:$0xff] (!%p415_p3)  }
   0x7   : > { %418 = sbr.rel (%p415_p3) target bundleno = 806 (0x326), region = 52  ;;  %8201 = vmatprep.subr.bf16.mxu0 (!%p415_p3), %v9428_v1  ;;  %8213 = vmatprep.subr.bf16.mxu1 (!%p415_p3), %v9428_v1  ;;  %v9093_v2 = vld [vmem:[%s11037_s6] sm:$0xff] (!%p415_p3)   ;;  %v9095_v4 = vld [vmem:[%s11037_s6 + $0x8] sm:$0xff] (!%p415_p3)   ;;  %v9097_v6 = vld [vmem:[%s11037_s6 + $0x10] sm:$0xff] (!%p415_p3)   ;;  %vm687_vm1 = vcmask (!%p415_p3), 523264   ;;  %vm1393_vm2 = vcmask (!%p415_p3), 519168  }
   0x8   : > { %8202 = vmatpush3.bf16.msra.mxu0 (!%p415_p3), %v9092_v0  ;;  %8209 = vmatprep.mubr.msk.bf16.mxu0 (!%p415_p3), %vm9429_vm0, %v9428_v1  ;;  %v9098_v7 = vld [vmem:[%s11037_s6 + $0x38] sm:$0xff] (!%p415_p3)   ;;  %v9100_v9 = vld [vmem:[%s11037_s6 + $0x40] sm:$0xff] (!%p415_p3)   ;;  %v9102_v14 = vld [vmem:[%s11037_s6 + $0x48] sm:$0xff] (!%p415_p3)  }
   0x9   : > { %8214 = vmatpush3.bf16.msra.mxu1 (!%p415_p3), %v9093_v2  ;;  %8203 = vmatprep.subr.bf16.mxu0 (!%p415_p3), %v9428_v1  ;;  %v9099_v8 = vld [vmem:[%s11037_s6 + $0x18] sm:$0xff] (!%p415_p3)   ;;  %v9101_v12 = vld [vmem:[%s11037_s6 + $0x60] sm:$0xff] (!%p415_p3)   ;;  %v9103_v15 = vld [vmem:[%s11037_s6 + $0x68] sm:$0xff] (!%p415_p3)  }
   0xa   : > { %8215 = vmatprep.subr.bf16.mxu1 (!%p415_p3), %v9428_v1  ;;  %8221 = vmatprep.mubr.msk.bf16.mxu1 (!%p415_p3), %vm9429_vm0, %v9428_v1  ;;  %v9104_v17 = vld [vmem:[%s11037_s6 + $0x50] sm:$0xff] (!%p415_p3)   ;;  %v9106_v21 = vld [vmem:[%s11037_s6 + $0x58] sm:$0xff] (!%p415_p3)   ;;  %v9109_v25 = vld [vmem:[%s11037_s6 + $0x80] sm:$0xff] (!%p415_p3)  }
   0xb   : > { %v9105_v18 = vld [vmem:[%s11037_s6 + $0x70] sm:$0xff] (!%p415_p3)   ;;  %v9107_v22 = vld [vmem:[%s11037_s6 + $0x78] sm:$0xff] (!%p415_p3)   ;;  %v9110_v26 = vld [vmem:[%s11037_s6 + $0xa0] sm:$0xff] (!%p415_p3)  }
   0xc   : > { %8204 = vmatpush3.bf16.msra.mxu0 (!%p415_p3), %v9094_v3  ;;  %v9111_v27 = vld [vmem:[%s11037_s6 + $0x88] sm:$0xff] (!%p415_p3)   ;;  %v9113_v30 = vld [vmem:[%s11037_s6 + $0x90] sm:$0xff] (!%p415_p3)   ;;  %v9115_v33 = vld [vmem:[%s11037_s6 + $0x98] sm:$0xff] (!%p415_p3)  }
   0xd   : > { %8216 = vmatpush3.bf16.msra.mxu1 (!%p415_p3), %v9095_v4  ;;  %8205 = vmatprep.subr.bf16.mxu0 (!%p415_p3), %v9428_v1  ;;  %v9112_v29 = vld [vmem:[%s11037_s6 + $0xa8] sm:$0xff] (!%p415_p3)   ;;  %v9114_v32 = vld [vmem:[%s11037_s6 + $0xb0] sm:$0xff] (!%p415_p3)   ;;  %v9116_v36 = vld [vmem:[%s11037_s6 + $0xb8] sm:$0xff] (!%p415_p3)  }
   0xe   : > { %s11045_s27 = smov (!%p533_p4, %s9418_s27), 1  ;;  %8217 = vmatprep.subr.bf16.mxu1 %v9428_v1  ;;  %v9118_v39 = vld [vmem:[%s11037_s6 + $0xc0] sm:$0xff]   ;;  %v9120_v41 = vld [vmem:[%s11037_s6 + $0xc8] sm:$0xff]   ;;  %v9122_v43 = vld [vmem:[%s11037_s6 + $0xd0] sm:$0xff]  }
   0xf   : > { %s9519_s19 = smul.u32 72, %s11045_s27  ;;  %s7838_s16 = sshll.u32 %s11045_s27, 6  ;;  %v9119_v40 = vld [vmem:[%s11037_s6 + $0xe0] sm:$0xff]   ;;  %v9121_v42 = vld [vmem:[%s11037_s6 + $0xe8] sm:$0xff]   ;;  %v9123_v44 = vld [vmem:[%s11037_s6 + $0xf0] sm:$0xff]  }
  0x10   : > { %8206 = vmatpush3.bf16.msra.mxu0 %v9096_v5  ;;  %s9640_s25 = scalar_lea.vmem %s11033_s2, %s7838_s16  ;;  %v9124_v45 = vld [vmem:[%s11037_s6 + $0xd8] sm:$0xff]   ;;  %s9691_s20 = scalar_lea.vmem %s11036_s5, %s7838_s16  ;;  %v9126_v48 = vld [vmem:[%s11037_s6 + $0x100] sm:$0xff]   ;;  %v9128_v52 = vld [vmem:[%s11037_s6 + $0x108] sm:$0xff]  }
  0x11   : > { %s9533_s26 = scalar_lea.vmem %s11031_s0, %s9519_s19  ;;  %8218 = vmatpush3.bf16.msra.mxu1 %v9097_v6  ;;  %8207 = vmatprep.subr.bf16.mxu0 %v9428_v1  ;;  %s9543_s13 = scalar_lea.vmem %s11034_s3, %s9519_s19  ;;  %v9125_v46 = vld [vmem:[%s11037_s6 + $0xf8] sm:$0xff]   ;;  %v1136_v47 = vld [vmem:[%s9640_s25] sm:$0xf]  ;;  %v9129_v53 = vld [vmem:[%s11037_s6 + $0x28] sm:$0xff]  }
  0x12   : > { %8219 = vmatprep.subr.bf16.mxu1 %v9428_v1  ;;  %v644_v10 = vld [vmem:[%s9533_s26] sm:$0xf]  ;;  %s9583_s12 = scalar_lea.vmem %s11032_s1, %s9519_s19  ;;  %s9633_s22 = scalar_lea.vmem %s11035_s4, %s9519_s19  ;;  %v9130_v55 = vld [vmem:[%s11037_s6 + $0x110] sm:$0xff]   ;;  %v9132_v59 = vld [vmem:[%s11037_s6 + $0x118] sm:$0xff]  }
  0x13   : > { %v653_v11 = vld [vmem:[%s9543_s13] sm:$0xf]  ;;  %v9131_v56 = vld [vmem:[%s11037_s6 + $0x30] sm:$0xff]   ;;  %v9133_v60 = vld [vmem:[%s11037_s6 + $0x38] sm:$0xff]   ;;  %s7840_s19 = sshll.u32 %s11045_s27, 5 }
  0x14   : > { %8208 = vmatpush3.bf16.msra.mxu0 %v9098_v7  ;;  %v9108_v13 = vld [vmem:[%s9533_s26] sm:$0x1f]   ;;  %v6955_v62 = vld [vmem:[%s9543_s13 + $0x8] sm:$0xf]  ;;  %v9139_v5 = vld [vmem:[%s11037_s6 + $0x10] sm:$0xff]   ;;  %s10298_s24 = scalar_lea.vmem %s11039_s8, %s7840_s19 }
  0x15   : > { %8220 = vmatpush3.bf16.msra.mxu1 %v9099_v8  ;;  %8225 = vmatprep.subr.bf16.mxu0 %v9428_v1  ;;  %v817_v16 = vshll.u32 %v9108_v13, 16  ;;  %v815_v19 = vshrl.u32 %v9108_v13, 16  ;;  %v889_v24 = vld [vmem:[%s9583_s12] sm:$0xf]  ;;  %v9137_v2 = vld [vmem:[%s11037_s6 + $0x8] sm:$0xff]   ;;  %v9140_v7 = vld [vmem:[%s11037_s6 + $0x50] sm:$0xff]  }
  0x16   : > { %8237 = vmatprep.subr.bf16.mxu1 %v9428_v1  ;;  %v9117_v28 = vld [vmem:[%s9583_s12] sm:$0x1f]   ;;  %v9143_v3 = vld [vmem:[%s9533_s26 + $0x8] sm:$0x1f]   ;;  %v9141_v8 = vld [vmem:[%s11037_s6 + $0x18] sm:$0xff]  }
  0x17   : > { %8210 = vmatmul.mubr.msk.bf16.vlgmr.msra.gmra.mrb[0].mxu0 %vm687_vm1, %v653_v11  ;;  %v819_v20 = vrot.slane %v817_v16, 1  ;;  %v1064_v31 = vshll.u32 %v9117_v28, 16  ;;  %v1062_v34 = vshrl.u32 %v9117_v28, 16  ;;  %v967_v37 = vld [vmem:[%s9633_s22] sm:$0xf]  ;;  %v9138_v4 = vld [vmem:[%s11037_s6 + $0x48] sm:$0xff]  }
  0x18   : > { %8222 = vmatmul.mubr.msk.bf16.vlgmr.msra.gmra.mrb[0].mxu1 %vm687_vm1, %v644_v10  ;;  %8226 = vmatpush3.bf16.msra.mxu0 %v9100_v9  ;;  %v1214_v49 = vld [vmem:[%s9691_s20] sm:$0xf]  ;;  %v1567_v6 = vshll.u32 %v9143_v3, 16  ;;  %v1565_v9 = vshrl.u32 %v9143_v3, 16  ;;  %v9142_v11 = vld [vmem:[%s11037_s6 + $0x58] sm:$0xff]   ;;  %v9146_v16 = vld [vmem:[%s11037_s6 + $0x68] sm:$0xff]  }
  0x19   : > { %8238 = vmatpush3.bf16.msra.mxu1 %v9101_v12  ;;  %8227 = vmatprep.subr.bf16.mxu0 %v9428_v1  ;;  %v820_v23 = vor.u32 %v819_v20, %v815_v19  ;;  %v1066_v35 = vrot.slane %v1064_v31, 1  ;;  %v9127_v50 = vld [vmem:[%s11037_s6 + $0x20] sm:$0xff]   ;;  %v6954_v12 = vld [vmem:[%s9533_s26 + $0x8] sm:$0xf]  ;;  %v9149_v19 = vld [vmem:[%s11037_s6 + $0x90] sm:$0xff]  }
  0x1a   : > { %8239 = vmatprep.subr.bf16.mxu1 %v9428_v1  ;;  %8233 = vmatprep.mubr.msk.bf16.mxu0 %vm9429_vm0, %v9428_v1  ;;  %v9134_v51 = vld [vmem:[%s9640_s25] sm:$0x1f]   ;;  %v1569_v10 = vrot.slane %v1567_v6, 1  ;;  %v9150_v20 = vld [vmem:[%s11037_s6 + $0x78] sm:$0xff]   ;;  %v9155_v28 = vld [vmem:[%s11037_s6 + $0xc8] sm:$0xff]  }
  0x1b   : > { %8245 = vmatprep.mubr.msk.bf16.mxu1 %vm9429_vm0, %v9428_v1  ;;  %v1067_v38 = vor.u32 %v1066_v35, %v1062_v34  ;;  %v1311_v54 = vshll.u32 %v9134_v51, 16  ;;  %v1309_v57 = vshrl.u32 %v9134_v51, 16  ;;  %v9135_v63 = vld [vmem:[%s11037_s6] sm:$0xff]   ;;  %v9157_v31 = vld [vmem:[%s11037_s6 + $0xd0] sm:$0xff]   ;;  %v9158_v34 = vld [vmem:[%s11037_s6 + $0xb8] sm:$0xff]  }
  0x1c   : > { %8228 = vmatpush3.bf16.msra.mxu0 %v9102_v14  ;;  %v9136_v0 = vld [vmem:[%s11037_s6 + $0x40] sm:$0xff]   ;;  %v1570_v13 = vor.u32 %v1569_v10, %v1565_v9  ;;  %v9159_v35 = vld [vmem:[%s11037_s6 + $0xd8] sm:$0xff]   ;;  %v9181_v3 = vld [vmem:[%s11037_s6 + $0x68] sm:$0xff]  }
  0x1d   : > { %8240 = vmatpush3.bf16.msra.mxu1 %v9103_v15  ;;  %8229 = vmatprep.subr.bf16.mxu0 %v9428_v1  ;;  %v1313_v58 = vrot.slane %v1311_v54, 1  ;;  %v9144_v14 = vld [vmem:[%s11037_s6 + $0x60] sm:$0xff]   ;;  %v9172_v54 = vld [vmem:[%s11037_s6 + $0x28] sm:$0xff]   ;;  %v9183_v6 = vld [vmem:[%s11037_s6 + $0x70] sm:$0xff]  }
  0x1e   : > { %8241 = vmatprep.subr.bf16.mxu1 %v9428_v1  ;;  %v9145_v15 = vld [vmem:[%s11037_s6 + $0x80] sm:$0xff]   ;;  %v9184_v9 = vld [vmem:[%s11037_s6 + $0x58] sm:$0xff]  }
  0x1f   : > { %v1314_v61 = vor.u32 %v1313_v58, %v1309_v57  ;;  %v9175_v57 = vld [vmem:[%s11037_s6 + $0x10] sm:$0xff]   ;;  %v9176_v58 = vld [vmem:[%s11037_s6 + $0x38] sm:$0xff]  }
  0x20   : > { %8230 = vmatpush3.bf16.msra.mxu0 %v9104_v17  ;;  %v9147_v17 = vld [vmem:[%s11037_s6 + $0x88] sm:$0xff]   ;;  %v9185_v10 = vld [vmem:[%s11037_s6 + $0x78] sm:$0xff]  }
  0x21   : > { %8242 = vmatpush3.bf16.msra.mxu1 %v9105_v18  ;;  %8231 = vmatprep.subr.bf16.mxu0 %v9428_v1  ;;  %v9148_v18 = vld [vmem:[%s11037_s6 + $0x70] sm:$0xff]  }
  0x22   : > { %8243 = vmatprep.subr.bf16.mxu1 %v9428_v1 }
  0x24   : > { %8232 = vmatpush3.bf16.msra.mxu0 %v9106_v21  ;;  %v9151_v21 = vld [vmem:[%s11037_s6 + $0x98] sm:$0xff]  }
  0x25   : > { %8244 = vmatpush3.bf16.msra.mxu1 %v9107_v22  ;;  %8249 = vmatprep.subr.bf16.mxu0 %v9428_v1  ;;  %v6990_v22 = vld [vmem:[%s9583_s12 + $0x8] sm:$0xf] }
  0x26   : > { %8261 = vmatprep.subr.bf16.mxu1 %v9428_v1 }
  0x27   : > { %8234 = vmatmul.mubr.msk.bf16.vlgmr.msra.gmra.mrb[4].mxu0 %vm687_vm1, %v820_v23  ;;  %v7004_v23 = vld [vmem:[%s9633_s22 + $0x8] sm:$0xf] }
  0x28   : > { %8246 = vmatmul.mubr.msk.bf16.vlgmr.msra.gmra.mrb[4].mxu1 %vm687_vm1, %v889_v24  ;;  %8250 = vmatpush3.bf16.msra.mxu0 %v9109_v25  ;;  %v9152_v24 = vld [vmem:[%s11037_s6 + $0xa0] sm:$0xff]  }
  0x29   : > { %8262 = vmatpush3.bf16.msra.mxu1 %v9110_v26  ;;  %8251 = vmatprep.subr.bf16.mxu0 %v9428_v1  ;;  %v9153_v25 = vld [vmem:[%s11037_s6 + $0xc0] sm:$0xff]   ;;  %v9160_v26 = vld [vmem:[%s9583_s12 + $0x8] sm:$0x1f]  }
  0x2a   : > { %8263 = vmatprep.subr.bf16.mxu1 %v9428_v1  ;;  %8257 = vmatprep.mubr.msk.bf16.mxu0 %vm9429_vm0, %v9428_v1 }
  0x2b   : > { %8269 = vmatprep.mubr.msk.bf16.mxu1 %vm9429_vm0, %v9428_v1 }
  0x2c   : > { %8252 = vmatpush3.bf16.msra.mxu0 %v9111_v27  ;;  %v9154_v27 = vld [vmem:[%s11037_s6 + $0xa8] sm:$0xff]  }
  0x2d   : > { %8264 = vmatpush3.bf16.msra.mxu1 %v9112_v29  ;;  %8253 = vmatprep.subr.bf16.mxu0 %v9428_v1  ;;  %v1813_v29 = vshll.u32 %v9160_v26, 16 }
  0x2e   : > { %8265 = vmatprep.subr.bf16.mxu1 %v9428_v1 }
  0x30   : > { %8254 = vmatpush3.bf16.msra.mxu0 %v9113_v30  ;;  %v9156_v30 = vld [vmem:[%s11037_s6 + $0xb0] sm:$0xff]  }
  0x31   : > { %8266 = vmatpush3.bf16.msra.mxu1 %v9114_v32  ;;  %8255 = vmatprep.subr.bf16.mxu0 %v9428_v1  ;;  %v1811_v32 = vshrl.u32 %v9160_v26, 16  ;;  %v9196_v26 = vld [vmem:[%s11037_s6 + $0xc0] sm:$0xff]  }
  0x32   : > { %8267 = vmatprep.subr.bf16.mxu1 %v9428_v1 }
  0x34   : > { %8256 = vmatpush3.bf16.msra.mxu0 %v9115_v33  ;;  %v1815_v33 = vrot.slane %v1813_v29, 1  ;;  %v9198_v29 = vld [vmem:[%s11037_s6 + $0xc8] sm:$0xff]  }
  0x35   : > { %8268 = vmatpush3.bf16.msra.mxu1 %v9116_v36  ;;  %8273 = vmatprep.subr.bf16.mxu0 %v9428_v1 }
  0x36   : > { %8285 = vmatprep.subr.bf16.mxu1 %v9428_v1  ;;  %v1816_v36 = vor.u32 %v1815_v33, %v1811_v32  ;;  %v9201_v32 = vld [vmem:[%s11037_s6 + $0xf0] sm:$0xff]   ;;  %v9202_v33 = vld [vmem:[%s11037_s6 + $0xd8] sm:$0xff]  }
  0x37   : > { %8258 = vmatmul.mubr.msk.bf16.vlgmr.msra.gmra.mrb[8].mxu0 %vm687_vm1, %v967_v37  ;;  %v7034_v37 = vld [vmem:[%s9640_s25 + $0x8] sm:$0xf] }
  0x38   : > { %8270 = vmatmul.mubr.msk.bf16.vlgmr.msra.gmra.mrb[8].mxu1 %vm687_vm1, %v1067_v38  ;;  %8274 = vmatpush3.bf16.msra.mxu0 %v9118_v39  ;;  %v9161_v38 = vld [vmem:[%s11037_s6 + $0xe0] sm:$0xff]  }
  0x39   : > { %8286 = vmatpush3.bf16.msra.mxu1 %v9119_v40  ;;  %8275 = vmatprep.subr.bf16.mxu0 %v9428_v1  ;;  %v9162_v39 = vld [vmem:[%s11037_s6 + $0x100] sm:$0xff]   ;;  %v9163_v40 = vld [vmem:[%s11037_s6 + $0xe8] sm:$0xff]  }
  0x3a   : > { %8287 = vmatprep.subr.bf16.mxu1 %v9428_v1  ;;  %8281 = vmatprep.mubr.msk.bf16.mxu0 %vm9429_vm0, %v9428_v1 }
  0x3b   : > { %8293 = vmatprep.mubr.msk.bf16.mxu1 %vm9429_vm0, %v9428_v1 }
  0x3c   : > { %8276 = vmatpush3.bf16.msra.mxu0 %v9120_v41  ;;  %v9169_v41 = vld [vmem:[%s9640_s25 + $0x8] sm:$0x1f]  }
  0x3d   : > { %8288 = vmatpush3.bf16.msra.mxu1 %v9121_v42  ;;  %8277 = vmatprep.subr.bf16.mxu0 %v9428_v1  ;;  %v9164_v42 = vld [vmem:[%s11037_s6 + $0x108] sm:$0xff]  }
  0x3e   : > { %8289 = vmatprep.subr.bf16.mxu1 %v9428_v1 }
  0x40   : > { %8278 = vmatpush3.bf16.msra.mxu0 %v9122_v43  ;;  %v9165_v43 = vld [vmem:[%s11037_s6 + $0xf0] sm:$0xff]  }
  0x41   : > { %8290 = vmatpush3.bf16.msra.mxu1 %v9123_v44  ;;  %8279 = vmatprep.subr.bf16.mxu0 %v9428_v1  ;;  %v2059_v44 = vshll.u32 %v9169_v41, 16 }
  0x42   : > { %8291 = vmatprep.subr.bf16.mxu1 %v9428_v1 }
  0x44   : > { %8280 = vmatpush3.bf16.msra.mxu0 %v9124_v45  ;;  %v9166_v45 = vld [vmem:[%s11037_s6 + $0x110] sm:$0xff]  }
  0x45   : > { %8292 = vmatpush3.bf16.msra.mxu1 %v9125_v46  ;;  %8297 = vmatprep.subr.bf16.mxu0 %v9428_v1  ;;  %v9167_v46 = vld [vmem:[%s11037_s6 + $0xf8] sm:$0xff]  }
  0x46   : > { %8309 = vmatprep.subr.bf16.mxu1 %v9428_v1 }
  0x47   : > { %8282 = vmatmul.mubr.msk.bf16.vlgmr.msra.gmra.mrb[12].mxu0 %vm687_vm1, %v1136_v47  ;;  %v2057_v47 = vshrl.u32 %v9169_v41, 16  ;;  %v9212_v41 = vld [vmem:[%s9640_s25 + $0x10] sm:$0x1f]  }
  0x48   : > { %8294 = vmatmul.mubr.msk.bf16.vlgmr.msra.gmra.mrb[12].mxu1 %vm687_vm1, %v1214_v49  ;;  %8298 = vmatpush3.bf16.msra.mxu0 %v9126_v48  ;;  %v2061_v48 = vrot.slane %v2059_v44, 1  ;;  %v9168_v49 = vld [vmem:[%s11037_s6 + $0x118] sm:$0xff]   ;;  %v2807_v44 = vshll.u32 %v9212_v41, 16 }
  0x49   : > { %8310 = vmatpush3.bf16.msra.mxu1 %v9127_v50  ;;  %8299 = vmatprep.subr.bf16.mxu0 %v9428_v1  ;;  %v7048_v50 = vld [vmem:[%s9691_s20 + $0x8] sm:$0xf] }
  0x4a   : > { %8311 = vmatprep.subr.bf16.mxu1 %v9428_v1  ;;  %8305 = vmatprep.mubr.msk.bf16.mxu0 %vm9429_vm0, %v9428_v1  ;;  %v2062_v51 = vor.u32 %v2061_v48, %v2057_v47  ;;  %v2805_v47 = vshrl.u32 %v9212_v41, 16  ;;  %v2809_v48 = vrot.slane %v2807_v44, 1  ;;  %v9235_v41 = vld [vmem:[%s11037_s6 + $0xd0] sm:$0xff]  }
  0x4b   : > { %8317 = vmatprep.mubr.msk.bf16.mxu1 %vm9429_vm0, %v9428_v1 }
  0x4c   : > { %8300 = vmatpush3.bf16.msra.mxu0 %v9128_v52  ;;  %v9170_v52 = vld [vmem:[%s11037_s6 + $0x20] sm:$0xff]  }
  0x4d   : > { %8312 = vmatpush3.bf16.msra.mxu1 %v9129_v53  ;;  %8301 = vmatprep.subr.bf16.mxu0 %v9428_v1  ;;  %v9171_v53 = vld [vmem:[%s11037_s6] sm:$0xff]  }
  0x4e   : > { %8313 = vmatprep.subr.bf16.mxu1 %v9428_v1 }
  0x50   : > { %8302 = vmatpush3.bf16.msra.mxu0 %v9130_v55  ;;  %v9173_v55 = vld [vmem:[%s11037_s6 + $0x8] sm:$0xff]  }
  0x51   : > { %8314 = vmatpush3.bf16.msra.mxu1 %v9131_v56  ;;  %8303 = vmatprep.subr.bf16.mxu0 %v9428_v1  ;;  %v9174_v56 = vld [vmem:[%s11037_s6 + $0x30] sm:$0xff]  }
  0x52   : > { %8315 = vmatprep.subr.bf16.mxu1 %v9428_v1 }
  0x54   : > { %8304 = vmatpush3.bf16.msra.mxu0 %v9132_v59  ;;  %v9177_v59 = vld [vmem:[%s11037_s6 + $0x18] sm:$0xff]  }
  0x55   : > { %8316 = vmatpush3.bf16.msra.mxu1 %v9133_v60  ;;  %8321 = vmatprep.subr.bf16.mxu0 %v9428_v1  ;;  %v7081_v60 = vld [vmem:[%s9543_s13 + $0x10] sm:$0xf] }
  0x56   : > { %8333 = vmatprep.subr.bf16.mxu1 %v9428_v1 }
  0x57   : > { %8306 = vmatmul.mubr.msk.bf16.vlgmr.msra.gmra.mrb[16].mxu0 %vm687_vm1, %v1314_v61  ;;  %v7080_v61 = vld [vmem:[%s9533_s26 + $0x10] sm:$0xf] }
  0x58   : > { %8318 = vmatmul.mubr.msk.bf16.vlgmr.msra.gmra.mrb[16].mxu1 %vm687_vm1, %v6955_v62  ;;  %8322 = vmatpush3.bf16.msra.mxu0 %v9135_v63  ;;  %v9178_v62 = vld [vmem:[%s11037_s6 + $0x40] sm:$0xff]  }
  0x59   : > { %8334 = vmatpush3.bf16.msra.mxu1 %v9136_v0  ;;  %8323 = vmatprep.subr.bf16.mxu0 %v9428_v1  ;;  %v9179_v63 = vld [vmem:[%s11037_s6 + $0x60] sm:$0xff]   ;;  %v9186_v0 = vld [vmem:[%s9533_s26 + $0x10] sm:$0x1f]  }
  0x5a   : > { %8335 = vmatprep.subr.bf16.mxu1 %v9428_v1  ;;  %8329 = vmatprep.mubr.msk.bf16.mxu0 %vm9429_vm0, %v9428_v1 }
  0x5b   : > { %8341 = vmatprep.mubr.msk.bf16.mxu1 %vm9429_vm0, %v9428_v1 }
  0x5c   : > { %8324 = vmatpush3.bf16.msra.mxu0 %v9137_v2  ;;  %v9180_v2 = vld [vmem:[%s11037_s6 + $0x48] sm:$0xff]  }
  0x5d   : > { %8336 = vmatpush3.bf16.msra.mxu1 %v9138_v4  ;;  %8325 = vmatprep.subr.bf16.mxu0 %v9428_v1  ;;  %v2315_v4 = vshll.u32 %v9186_v0, 16 }
  0x5e   : > { %8337 = vmatprep.subr.bf16.mxu1 %v9428_v1 }
  0x60   : > { %8326 = vmatpush3.bf16.msra.mxu0 %v9139_v5  ;;  %v9182_v5 = vld [vmem:[%s11037_s6 + $0x50] sm:$0xff]  }
  0x61   : > { %8338 = vmatpush3.bf16.msra.mxu1 %v9140_v7  ;;  %8327 = vmatprep.subr.bf16.mxu0 %v9428_v1  ;;  %v2313_v7 = vshrl.u32 %v9186_v0, 16 }
  0x62   : > { %8339 = vmatprep.subr.bf16.mxu1 %v9428_v1 }
  0x64   : > { %8328 = vmatpush3.bf16.msra.mxu0 %v9141_v8  ;;  %v2317_v8 = vrot.slane %v2315_v4, 1 }
  0x65   : > { %8340 = vmatpush3.bf16.msra.mxu1 %v9142_v11  ;;  %8345 = vmatprep.subr.bf16.mxu0 %v9428_v1 }
  0x66   : > { %8357 = vmatprep.subr.bf16.mxu1 %v9428_v1  ;;  %v2318_v11 = vor.u32 %v2317_v8, %v2313_v7 }
  0x67   : > { %8330 = vmatmul.mubr.msk.bf16.vlgmr.msra.gmra.mrb[20].mxu0 %vm687_vm1, %v6954_v12  ;;  %v7116_v12 = vld [vmem:[%s9583_s12 + $0x10] sm:$0xf] }
  0x68   : > { %8342 = vmatmul.mubr.msk.bf16.vlgmr.msra.gmra.mrb[20].mxu1 %vm687_vm1, %v1570_v13  ;;  %8346 = vmatpush3.bf16.msra.mxu0 %v9144_v14  ;;  %v9187_v13 = vld [vmem:[%s11037_s6 + $0x80] sm:$0xff]  }
  0x69   : > { %8358 = vmatpush3.bf16.msra.mxu1 %v9145_v15  ;;  %8347 = vmatprep.subr.bf16.mxu0 %v9428_v1  ;;  %v9188_v14 = vld [vmem:[%s11037_s6 + $0xa0] sm:$0xff]   ;;  %v9189_v15 = vld [vmem:[%s11037_s6 + $0x88] sm:$0xff]  }
  0x6a   : > { %8359 = vmatprep.subr.bf16.mxu1 %v9428_v1  ;;  %8353 = vmatprep.mubr.msk.bf16.mxu0 %vm9429_vm0, %v9428_v1 }
  0x6b   : > { %8365 = vmatprep.mubr.msk.bf16.mxu1 %vm9429_vm0, %v9428_v1 }
  0x6c   : > { %8348 = vmatpush3.bf16.msra.mxu0 %v9146_v16  ;;  %v9190_v16 = vld [vmem:[%s11037_s6 + $0xa8] sm:$0xff]  }
  0x6d   : > { %8360 = vmatpush3.bf16.msra.mxu1 %v9147_v17  ;;  %8349 = vmatprep.subr.bf16.mxu0 %v9428_v1  ;;  %v9195_v17 = vld [vmem:[%s9583_s12 + $0x10] sm:$0x1f]  }
  0x6e   : > { %8361 = vmatprep.subr.bf16.mxu1 %v9428_v1 }
  0x70   : > { %8350 = vmatpush3.bf16.msra.mxu0 %v9148_v18  ;;  %v9191_v18 = vld [vmem:[%s11037_s6 + $0x90] sm:$0xff]  }
  0x71   : > { %8362 = vmatpush3.bf16.msra.mxu1 %v9149_v19  ;;  %8351 = vmatprep.subr.bf16.mxu0 %v9428_v1  ;;  %v9192_v19 = vld [vmem:[%s11037_s6 + $0xb0] sm:$0xff]  }
  0x72   : > { %8363 = vmatprep.subr.bf16.mxu1 %v9428_v1 }
  0x74   : > { %8352 = vmatpush3.bf16.msra.mxu0 %v9150_v20  ;;  %v2561_v20 = vshll.u32 %v9195_v17, 16 }
  0x75   : > { %8364 = vmatpush3.bf16.msra.mxu1 %v9151_v21  ;;  %8369 = vmatprep.subr.bf16.mxu0 %v9428_v1  ;;  %v9193_v21 = vld [vmem:[%s11037_s6 + $0x98] sm:$0xff]  }
  0x76   : > { %8381 = vmatprep.subr.bf16.mxu1 %v9428_v1 }
  0x77   : > { %8354 = vmatmul.mubr.msk.bf16.vlgmr.msra.gmra.mrb[24].mxu0 %vm687_vm1, %v6990_v22  ;;  %v9194_v22 = vld [vmem:[%s11037_s6 + $0xb8] sm:$0xff]  }
  0x78   : > { %8366 = vmatmul.mubr.msk.bf16.vlgmr.msra.gmra.mrb[24].mxu1 %vm687_vm1, %v7004_v23  ;;  %8370 = vmatpush3.bf16.msra.mxu0 %v9152_v24  ;;  %v2559_v23 = vshrl.u32 %v9195_v17, 16  ;;  %v2563_v24 = vrot.slane %v2561_v20, 1  ;;  %v9227_v20 = vld [vmem:[%s11037_s6 + $0x90] sm:$0xff]  }
  0x79   : > { %8382 = vmatpush3.bf16.msra.mxu1 %v9153_v25  ;;  %8371 = vmatprep.subr.bf16.mxu0 %v9428_v1  ;;  %v7130_v25 = vld [vmem:[%s9633_s22 + $0x10] sm:$0xf] }
  0x7a   : > { %8383 = vmatprep.subr.bf16.mxu1 %v9428_v1  ;;  %8377 = vmatprep.mubr.msk.bf16.mxu0 %vm9429_vm0, %v9428_v1 }
  0x7b   : > { %8389 = vmatprep.mubr.msk.bf16.mxu1 %vm9429_vm0, %v9428_v1 }
  0x7c   : > { %8372 = vmatpush3.bf16.msra.mxu0 %v9154_v27  ;;  %v2564_v27 = vor.u32 %v2563_v24, %v2559_v23 }
  0x7d   : > { %8384 = vmatpush3.bf16.msra.mxu1 %v9155_v28  ;;  %8373 = vmatprep.subr.bf16.mxu0 %v9428_v1  ;;  %v9197_v28 = vld [vmem:[%s11037_s6 + $0xe0] sm:$0xff]  }
  0x7e   : > { %8385 = vmatprep.subr.bf16.mxu1 %v9428_v1 }
  0x80   : > { %8374 = vmatpush3.bf16.msra.mxu0 %v9156_v30  ;;  %v9199_v30 = vld [vmem:[%s11037_s6 + $0xe8] sm:$0xff]  }
  0x81   : > { %8386 = vmatpush3.bf16.msra.mxu1 %v9157_v31  ;;  %8375 = vmatprep.subr.bf16.mxu0 %v9428_v1  ;;  %v9200_v31 = vld [vmem:[%s11037_s6 + $0xd0] sm:$0xff]  }
  0x82   : > { %8387 = vmatprep.subr.bf16.mxu1 %v9428_v1 }
  0x84   : > { %8376 = vmatpush3.bf16.msra.mxu0 %v9158_v34  ;;  %v9203_v34 = vld [vmem:[%s11037_s6 + $0xf8] sm:$0xff]  }
  0x85   : > { %8388 = vmatpush3.bf16.msra.mxu1 %v9159_v35  ;;  %8393 = vmatprep.subr.bf16.mxu0 %v9428_v1  ;;  %v7160_v35 = vld [vmem:[%s9640_s25 + $0x10] sm:$0xf] }
  0x86   : > { %8405 = vmatprep.subr.bf16.mxu1 %v9428_v1 }
  0x87   : > { %8378 = vmatmul.mubr.msk.bf16.vlgmr.msra.gmra.mrb[28].mxu0 %vm687_vm1, %v1816_v36  ;;  %v7174_v36 = vld [vmem:[%s9691_s20 + $0x10] sm:$0xf] }
  0x88   : > { %8390 = vmatmul.mubr.msk.bf16.vlgmr.msra.gmra.mrb[28].mxu1 %vm687_vm1, %v7034_v37  ;;  %8394 = vmatpush3.bf16.msra.mxu0 %v9161_v38  ;;  %v9204_v37 = vld [vmem:[%s11037_s6 + $0x100] sm:$0xff]  }
  0x89   : > { %8406 = vmatpush3.bf16.msra.mxu1 %v9162_v39  ;;  %8395 = vmatprep.subr.bf16.mxu0 %v9428_v1  ;;  %v9205_v38 = vld [vmem:[%s11037_s6 + $0x20] sm:$0xff]   ;;  %v9206_v39 = vld [vmem:[%s11037_s6 + $0x108] sm:$0xff]  }
  0x8a   : > { %8407 = vmatprep.subr.bf16.mxu1 %v9428_v1  ;;  %8401 = vmatprep.mubr.msk.bf16.mxu0 %vm9429_vm0, %v9428_v1 }
  0x8b   : > { %8413 = vmatprep.mubr.msk.bf16.mxu1 %vm9429_vm0, %v9428_v1 }
  0x8c   : > { %8396 = vmatpush3.bf16.msra.mxu0 %v9163_v40  ;;  %v9207_v40 = vld [vmem:[%s11037_s6 + $0x28] sm:$0xff]  }
  0x8d   : > { %8408 = vmatpush3.bf16.msra.mxu1 %v9164_v42  ;;  %8397 = vmatprep.subr.bf16.mxu0 %v9428_v1  ;;  %v9208_v42 = vld [vmem:[%s11037_s6 + $0x110] sm:$0xff]  }
  0x8e   : > { %8409 = vmatprep.subr.bf16.mxu1 %v9428_v1 }
  0x90   : > { %8398 = vmatpush3.bf16.msra.mxu0 %v9165_v43  ;;  %v9209_v43 = vld [vmem:[%s11037_s6 + $0x30] sm:$0xff]  }
  0x91   : > { %8410 = vmatpush3.bf16.msra.mxu1 %v9166_v45  ;;  %8399 = vmatprep.subr.bf16.mxu0 %v9428_v1  ;;  %v9210_v45 = vld [vmem:[%s11037_s6 + $0x118] sm:$0xff]  }
  0x92   : > { %8411 = vmatprep.subr.bf16.mxu1 %v9428_v1 }
  0x94   : > { %8400 = vmatpush3.bf16.msra.mxu0 %v9167_v46  ;;  %v9211_v46 = vld [vmem:[%s11037_s6 + $0x38] sm:$0xff]  }
  0x95   : > { %8412 = vmatpush3.bf16.msra.mxu1 %v9168_v49  ;;  %8417 = vmatprep.subr.bf16.mxu0 %v9428_v1  ;;  %v2810_v49 = vor.u32 %v2809_v48, %v2805_v47 }
  0x96   : > { %8429 = vmatprep.subr.bf16.mxu1 %v9428_v1 }
  0x97   : > { %8402 = vmatmul.mubr.msk.bf16.vlgmr.msra.gmra.mrb[32].mxu0 %vm687_vm1, %v7048_v50  ;;  %v7207_v50 = vld [vmem:[%s9543_s13 + $0x18] sm:$0xf] }
  0x98   : > { %8414 = vmatmul.mubr.msk.bf16.vlgmr.msra.gmra.mrb[32].mxu1 %vm687_vm1, %v2062_v51  ;;  %8418 = vmatpush3.bf16.msra.mxu0 %v9170_v52  ;;  %v9213_v51 = vld [vmem:[%s11037_s6] sm:$0xff]  }
  0x99   : > { %8430 = vmatpush3.bf16.msra.mxu1 %v9171_v53  ;;  %8419 = vmatprep.subr.bf16.mxu0 %v9428_v1  ;;  %v9214_v52 = vld [vmem:[%s11037_s6 + $0x40] sm:$0xff]   ;;  %v9215_v53 = vld [vmem:[%s11037_s6 + $0x8] sm:$0xff]  }
  0x9a   : > { %8431 = vmatprep.subr.bf16.mxu1 %v9428_v1  ;;  %8425 = vmatprep.mubr.msk.bf16.mxu0 %vm9429_vm0, %v9428_v1 }
  0x9b   : > { %8437 = vmatprep.mubr.msk.bf16.mxu1 %vm9429_vm0, %v9428_v1 }
  0x9c   : > { %8420 = vmatpush3.bf16.msra.mxu0 %v9172_v54  ;;  %v9216_v54 = vld [vmem:[%s11037_s6 + $0x48] sm:$0xff]  }
  0x9d   : > { %8432 = vmatpush3.bf16.msra.mxu1 %v9173_v55  ;;  %8421 = vmatprep.subr.bf16.mxu0 %v9428_v1  ;;  %v9221_v55 = vld [vmem:[%s9533_s26 + $0x18] sm:$0x1f]  }
  0x9e   : > { %8433 = vmatprep.subr.bf16.mxu1 %v9428_v1  ;;  %v3061_v7 = vshrl.u32 %v9221_v55, 16 }
  0xa0   : > { %8422 = vmatpush3.bf16.msra.mxu0 %v9174_v56 }
  0xa1   : > { %8434 = vmatpush3.bf16.msra.mxu1 %v9175_v57  ;;  %8423 = vmatprep.subr.bf16.mxu0 %v9428_v1  ;;  %v9217_v57 = vld [vmem:[%s11037_s6 + $0x10] sm:$0xff]  }
  0xa2   : > { %8435 = vmatprep.subr.bf16.mxu1 %v9428_v1 }
  0xa4   : > { %8424 = vmatpush3.bf16.msra.mxu0 %v9176_v58 }
  0xa5   : > { %8436 = vmatpush3.bf16.msra.mxu1 %v9177_v59  ;;  %8441 = vmatprep.subr.bf16.mxu0 %v9428_v1 }
  0xa6   : > { %8453 = vmatprep.subr.bf16.mxu1 %v9428_v1 }
  0xa7   : > { %8426 = vmatmul.mubr.msk.bf16.vlgmr.msra.gmra.mrb[36].mxu0 %vm687_vm1, %v7081_v60  ;;  %v9218_v60 = vld [vmem:[%s11037_s6 + $0x50] sm:$0xff]  }
  0xa8   : > { %8438 = vmatmul.mubr.msk.bf16.vlgmr.msra.gmra.mrb[36].mxu1 %vm687_vm1, %v7080_v61  ;;  %8442 = vmatpush3.bf16.msra.mxu0 %v9178_v62  ;;  %v3063_v61 = vshll.u32 %v9221_v55, 16  ;;  %v9239_v55 = vld [vmem:[%s11037_s6 + $0xe0] sm:$0xff]  }
  0xa9   : > { %8454 = vmatpush3.bf16.msra.mxu1 %v9179_v63  ;;  %8443 = vmatprep.subr.bf16.mxu0 %v9428_v1 }
  0xaa   : > { %8455 = vmatprep.subr.bf16.mxu1 %v9428_v1  ;;  %8449 = vmatprep.mubr.msk.bf16.mxu0 %vm9429_vm0, %v9428_v1  ;;  %v3065_v8 = vrot.slane %v3063_v61, 1  ;;  %v9243_v61 = vld [vmem:[%s11037_s6 + $0xf0] sm:$0xff]  }
  0xab   : > { %8461 = vmatprep.mubr.msk.bf16.mxu1 %vm9429_vm0, %v9428_v1 }
  0xac   : > { %8444 = vmatpush3.bf16.msra.mxu0 %v9180_v2 }
  0xad   : > { %8456 = vmatpush3.bf16.msra.mxu1 %v9181_v3  ;;  %8445 = vmatprep.subr.bf16.mxu0 %v9428_v1 }
  0xae   : > { %8457 = vmatprep.subr.bf16.mxu1 %v9428_v1 }
  0xb0   : > { %8446 = vmatpush3.bf16.msra.mxu0 %v9182_v5  ;;  %v9219_v5 = vld [vmem:[%s11037_s6 + $0x18] sm:$0xff]  }
  0xb1   : > { %8458 = vmatpush3.bf16.msra.mxu1 %v9183_v6  ;;  %8447 = vmatprep.subr.bf16.mxu0 %v9428_v1  ;;  %v9220_v6 = vld [vmem:[%s11037_s6 + $0x58] sm:$0xff]  }
  0xb2   : > { %8459 = vmatprep.subr.bf16.mxu1 %v9428_v1 }
  0xb4   : > { %8448 = vmatpush3.bf16.msra.mxu0 %v9184_v9  ;;  %v7206_v9 = vld [vmem:[%s9533_s26 + $0x18] sm:$0xf] }
  0xb5   : > { %8460 = vmatpush3.bf16.msra.mxu1 %v9185_v10  ;;  %8465 = vmatprep.subr.bf16.mxu0 %v9428_v1  ;;  %v9222_v10 = vld [vmem:[%s11037_s6 + $0x60] sm:$0xff]  }
  0xb6   : > { %8477 = vmatprep.subr.bf16.mxu1 %v9428_v1 }
  0xb7   : > { %8450 = vmatmul.mubr.msk.bf16.vlgmr.msra.gmra.mrb[40].mxu0 %vm687_vm1, %v2318_v11  ;;  %v3066_v11 = vor.u32 %v3065_v8, %v3061_v7 }
  0xb8   : > { %8462 = vmatmul.mubr.msk.bf16.vlgmr.msra.gmra.mrb[40].mxu1 %vm687_vm1, %v7116_v12  ;;  %8466 = vmatpush3.bf16.msra.mxu0 %v9187_v13  ;;  %v9223_v12 = vld [vmem:[%s11037_s6 + $0x80] sm:$0xff]   ;;  %v9224_v13 = vld [vmem:[%s11037_s6 + $0x68] sm:$0xff]  }
  0xb9   : > { %8478 = vmatpush3.bf16.msra.mxu1 %v9188_v14  ;;  %8467 = vmatprep.subr.bf16.mxu0 %v9428_v1  ;;  %v9225_v14 = vld [vmem:[%s11037_s6 + $0x88] sm:$0xff]  }
  0xba   : > { %8479 = vmatprep.subr.bf16.mxu1 %v9428_v1  ;;  %8473 = vmatprep.mubr.msk.bf16.mxu0 %vm9429_vm0, %v9428_v1 }
  0xbb   : > { %8485 = vmatprep.mubr.msk.bf16.mxu1 %vm9429_vm0, %v9428_v1 }
  0xbc   : > { %8468 = vmatpush3.bf16.msra.mxu0 %v9189_v15 }
  0xbd   : > { %8480 = vmatpush3.bf16.msra.mxu1 %v9190_v16  ;;  %8469 = vmatprep.subr.bf16.mxu0 %v9428_v1 }
  0xbe   : > { %8481 = vmatprep.subr.bf16.mxu1 %v9428_v1 }
  0xc0   : > { %8470 = vmatpush3.bf16.msra.mxu0 %v9191_v18 }
  0xc1   : > { %8482 = vmatpush3.bf16.msra.mxu1 %v9192_v19  ;;  %8471 = vmatprep.subr.bf16.mxu0 %v9428_v1  ;;  %v9226_v19 = vld [vmem:[%s11037_s6 + $0x70] sm:$0xff]  }
  0xc2   : > { %8483 = vmatprep.subr.bf16.mxu1 %v9428_v1 }
  0xc4   : > { %8472 = vmatpush3.bf16.msra.mxu0 %v9193_v21 }
  0xc5   : > { %8484 = vmatpush3.bf16.msra.mxu1 %v9194_v22  ;;  %8489 = vmatprep.subr.bf16.mxu0 %v9428_v1 }
  0xc6   : > { %8501 = vmatprep.subr.bf16.mxu1 %v9428_v1 }
  0xc7   : > { %8474 = vmatmul.mubr.msk.bf16.vlgmr.msra.gmra.mrb[44].mxu0 %vm687_vm1, %v7130_v25 }
  0xc8   : > { %8486 = vmatmul.mubr.msk.bf16.vlgmr.msra.gmra.mrb[44].mxu1 %vm687_vm1, %v2564_v27  ;;  %8490 = vmatpush3.bf16.msra.mxu0 %v9196_v26  ;;  %v9228_v27 = vld [vmem:[%s11037_s6 + $0x78] sm:$0xff]  }
  0xc9   : > { %8502 = vmatpush3.bf16.msra.mxu1 %v9197_v28  ;;  %8491 = vmatprep.subr.bf16.mxu0 %v9428_v1  ;;  %v9229_v28 = vld [vmem:[%s11037_s6 + $0x98] sm:$0xff]  }
  0xca   : > { %8503 = vmatprep.subr.bf16.mxu1 %v9428_v1  ;;  %8497 = vmatprep.mubr.msk.bf16.mxu0 %vm9429_vm0, %v9428_v1 }
  0xcb   : > { %8509 = vmatprep.mubr.msk.bf16.mxu1 %vm9429_vm0, %v9428_v1 }
  0xcc   : > { %8492 = vmatpush3.bf16.msra.mxu0 %v9198_v29  ;;  %v7242_v29 = vld [vmem:[%s9583_s12 + $0x18] sm:$0xf] }
  0xcd   : > { %8504 = vmatpush3.bf16.msra.mxu1 %v9199_v30  ;;  %8493 = vmatprep.subr.bf16.mxu0 %v9428_v1  ;;  %v7256_v30 = vld [vmem:[%s9633_s22 + $0x18] sm:$0xf] }
  0xce   : > { %8505 = vmatprep.subr.bf16.mxu1 %v9428_v1 }
  0xd0   : > { %8494 = vmatpush3.bf16.msra.mxu0 %v9200_v31  ;;  %v9230_v31 = vld [vmem:[%s11037_s6 + $0xa0] sm:$0xff]  }
  0xd1   : > { %8506 = vmatpush3.bf16.msra.mxu1 %v9201_v32  ;;  %8495 = vmatprep.subr.bf16.mxu0 %v9428_v1  ;;  %v9231_v32 = vld [vmem:[%s11037_s6 + $0xc0] sm:$0xff]  }
  0xd2   : > { %8507 = vmatprep.subr.bf16.mxu1 %v9428_v1 }
  0xd4   : > { %8496 = vmatpush3.bf16.msra.mxu0 %v9202_v33  ;;  %v9232_v33 = vld [vmem:[%s11037_s6 + $0xa8] sm:$0xff]  }
  0xd5   : > { %8508 = vmatpush3.bf16.msra.mxu1 %v9203_v34  ;;  %8513 = vmatprep.subr.bf16.mxu0 %v9428_v1  ;;  %v9233_v34 = vld [vmem:[%s11037_s6 + $0xc8] sm:$0xff]  }
  0xd6   : > { %8525 = vmatprep.subr.bf16.mxu1 %v9428_v1 }
  0xd7   : > { %8498 = vmatmul.mubr.msk.bf16.vlgmr.msra.gmra.mrb[48].mxu0 %vm687_vm1, %v7160_v35  ;;  %v9238_v35 = vld [vmem:[%s9583_s12 + $0x18] sm:$0x1f]  }
  0xd8   : > { %8510 = vmatmul.mubr.msk.bf16.vlgmr.msra.gmra.mrb[48].mxu1 %vm687_vm1, %v7174_v36  ;;  %8514 = vmatpush3.bf16.msra.mxu0 %v9204_v37  ;;  %v9234_v37 = vld [vmem:[%s11037_s6 + $0xb0] sm:$0xff]  }
  0xd9   : > { %8526 = vmatpush3.bf16.msra.mxu1 %v9205_v38  ;;  %8515 = vmatprep.subr.bf16.mxu0 %v9428_v1 }
  0xda   : > { %8527 = vmatprep.subr.bf16.mxu1 %v9428_v1  ;;  %8521 = vmatprep.mubr.msk.bf16.mxu0 %vm9429_vm0, %v9428_v1 }
  0xdb   : > { %8533 = vmatprep.mubr.msk.bf16.mxu1 %vm9429_vm0, %v9428_v1 }
  0xdc   : > { %8516 = vmatpush3.bf16.msra.mxu0 %v9206_v39 }
  0xdd   : > { %8528 = vmatpush3.bf16.msra.mxu1 %v9207_v40  ;;  %8517 = vmatprep.subr.bf16.mxu0 %v9428_v1 }
  0xde   : > { %8529 = vmatprep.subr.bf16.mxu1 %v9428_v1 }
  0xe0   : > { %8518 = vmatpush3.bf16.msra.mxu0 %v9208_v42  ;;  %v3309_v42 = vshll.u32 %v9238_v35, 16 }
  0xe1   : > { %8530 = vmatpush3.bf16.msra.mxu1 %v9209_v43  ;;  %8519 = vmatprep.subr.bf16.mxu0 %v9428_v1 }
  0xe2   : > { %8531 = vmatprep.subr.bf16.mxu1 %v9428_v1 }
  0xe4   : > { %8520 = vmatpush3.bf16.msra.mxu0 %v9210_v45 }
  0xe5   : > { %8532 = vmatpush3.bf16.msra.mxu1 %v9211_v46  ;;  %8537 = vmatprep.subr.bf16.mxu0 %v9428_v1 }
  0xe6   : > { %8549 = vmatprep.subr.bf16.mxu1 %v9428_v1 }
  0xe7   : > { %8522 = vmatmul.mubr.msk.bf16.vlgmr.msra.gmra.mrb[52].mxu0 %vm687_vm1, %v2810_v49  ;;  %v9236_v49 = vld [vmem:[%s11037_s6 + $0xb8] sm:$0xff]  }
  0xe8   : > { %8534 = vmatmul.mubr.msk.bf16.vlgmr.msra.gmra.mrb[52].mxu1 %vm687_vm1, %v7207_v50  ;;  %8538 = vmatpush3.bf16.msra.mxu0 %v9213_v51  ;;  %v9237_v50 = vld [vmem:[%s11037_s6 + $0xd8] sm:$0xff]   ;;  %v3307_v51 = vshrl.u32 %v9238_v35, 16 }
  0xe9   : > { %8550 = vmatpush3.bf16.msra.mxu1 %v9214_v52  ;;  %8539 = vmatprep.subr.bf16.mxu0 %v9428_v1  ;;  %v3311_v52 = vrot.slane %v3309_v42, 1  ;;  %v9255_v35 = vld [vmem:[%s11037_s6 + $0x18] sm:$0xff]   ;;  %v9259_v42 = vld [vmem:[%s11037_s6 + $0x68] sm:$0xff]  }
  0xea   : > { %v725_v56 = vpop.f32.mrb[0].mxu0  ;;  %8551 = vmatprep.subr.bf16.mxu1 %v9428_v1  ;;  %8545 = vmatprep.mubr.msk.bf16.mxu0 %vm9429_vm0, %v9428_v1 }
  0xeb   : > { %v792_v58 = vpop.f32.mrb[0].mxu1  ;;  %v8211_v59 = vpop.f32.mrb[1].mxu0  ;;  %8557 = vmatprep.mubr.msk.bf16.mxu1 %vm9429_vm0, %v9428_v1 }
  0xec   : > { %v793_v62 = vadd.f32 %v792_v58, %v725_v56  ;;  %v8223_v63 = vpop.f32.mrb[1].mxu1  ;;  %v728_v0 = vpop.f32.mrb[2].mxu0  ;;  %8540 = vmatpush3.bf16.msra.mxu0 %v9215_v53  ;;  %v3312_v53 = vor.u32 %v3311_v52, %v3307_v51  ;;  %v9240_v56 = vld [vmem:[%s11037_s6 + $0x100] sm:$0xff]   ;;  %v9242_v58 = vld [vmem:[%s11037_s6 + $0x108] sm:$0xff]   ;;  %v9247_v59 = vld [vmem:[%s9640_s25 + $0x18] sm:$0x1f]  }
  0xed   : > { %v795_v2 = vpop.f32.mrb[2].mxu1  ;;  %8552 = vmatpush3.bf16.msra.mxu1 %v9216_v54  ;;  %v8212_v3 = vpop.f32.mrb[3].mxu0  ;;  %8541 = vmatprep.subr.bf16.mxu0 %v9428_v1  ;;  %v7286_v54 = vld [vmem:[%s9640_s25 + $0x18] sm:$0xf]  ;;  %v9260_v51 = vld [vmem:[%s11037_s6 + $0x50] sm:$0xff]  }
  0xee   : > { %v8224_v4 = vpop.f32.mrb[3].mxu1  ;;  %8553 = vmatprep.subr.bf16.mxu1 %v9428_v1  ;;  %v9244_v2 = vld [vmem:[%s11037_s6 + $0x110] sm:$0xff]   ;;  %v3555_v3 = vshll.u32 %v9247_v59, 16 }
  0xf0   : > { %8542 = vmatpush3.bf16.msra.mxu0 %v9217_v57  ;;  %v9241_v57 = vld [vmem:[%s11037_s6 + $0xe8] sm:$0xff]  }
  0xf1   : > { %8554 = vmatpush3.bf16.msra.mxu1 %v9218_v60  ;;  %8543 = vmatprep.subr.bf16.mxu0 %v9428_v1 }
  0xf2   : > { %8555 = vmatprep.subr.bf16.mxu1 %v9428_v1 }
  0xf4   : > { %8544 = vmatpush3.bf16.msra.mxu0 %v9219_v5 }
  0xf5   : > { %8556 = vmatpush3.bf16.msra.mxu1 %v9220_v6  ;;  %8561 = vmatprep.subr.bf16.mxu0 %v9428_v1 }
  0xf6   : > { %8573 = vmatprep.subr.bf16.mxu1 %v9428_v1 }
  0xf7   : > { %8546 = vmatmul.mubr.msk.bf16.vlgmr.msra.gmra.mrb[56].mxu0 %vm687_vm1, %v7206_v9 }
  0xf8   : > { %8558 = vmatmul.mubr.msk.bf16.vlgmr.msra.gmra.mrb[56].mxu1 %vm687_vm1, %v3066_v11  ;;  %8562 = vmatpush3.bf16.msra.mxu0 %v9222_v10  ;;  %v9245_v10 = vld [vmem:[%s11037_s6 + $0xf8] sm:$0xff]  }
  0xf9   : > { %8574 = vmatpush3.bf16.msra.mxu1 %v9223_v12  ;;  %8563 = vmatprep.subr.bf16.mxu0 %v9428_v1  ;;  %v9246_v11 = vld [vmem:[%s11037_s6 + $0x118] sm:$0xff]   ;;  %v3553_v12 = vshrl.u32 %v9247_v59, 16 }
  0xfa   : > { %v882_v15 = vpop.f32.mrb[4].mxu0  ;;  %8575 = vmatprep.subr.bf16.mxu1 %v9428_v1  ;;  %8569 = vmatprep.mubr.msk.bf16.mxu0 %vm9429_vm0, %v9428_v1  ;;  %v9262_v59 = vld [vmem:[%s11037_s6 + $0x58] sm:$0xff]  }
  0xfb   : > { %v888_v16 = vadd.f32 %v882_v15, %v793_v62  ;;  %v960_v17 = vpop.f32.mrb[4].mxu1  ;;  %v8235_v18 = vpop.f32.mrb[5].mxu0  ;;  %8581 = vmatprep.mubr.msk.bf16.mxu1 %vm9429_vm0, %v9428_v1  ;;  %v9248_v15 = vld [vmem:[%s11037_s6 + $0x20] sm:$0xff]  }
  0xfc   : > { %v8247_v21 = vpop.f32.mrb[5].mxu1  ;;  %v885_v22 = vpop.f32.mrb[6].mxu0  ;;  %8564 = vmatpush3.bf16.msra.mxu0 %v9224_v13  ;;  %v3557_v13 = vrot.slane %v3555_v3, 1  ;;  %v9250_v18 = vld [vmem:[%s11037_s6 + $0x28] sm:$0xff]   ;;  %v9273_v3 = vld [vmem:[%s9583_s12 + $0x20] sm:$0x1f]  }
  0xfd   : > { %v966_v23 = vadd.f32 %v960_v17, %v888_v16  ;;  %v963_v24 = vpop.f32.mrb[6].mxu1  ;;  %8576 = vmatpush3.bf16.msra.mxu1 %v9225_v14  ;;  %v8236_v25 = vpop.f32.mrb[7].mxu0  ;;  %8565 = vmatprep.subr.bf16.mxu0 %v9428_v1  ;;  %v7300_v14 = vld [vmem:[%s9691_s20 + $0x18] sm:$0xf]  ;;  %v9249_v17 = vld [vmem:[%s11037_s6] sm:$0xff]  }
  0xfe   : > { %v8248_v26 = vpop.f32.mrb[7].mxu1  ;;  %8577 = vmatprep.subr.bf16.mxu1 %v9428_v1  ;;  %v3558_v16 = vor.u32 %v3557_v13, %v3553_v12  ;;  %v9252_v25 = vld [vmem:[%s11037_s6 + $0x30] sm:$0xff]   ;;  %v4057_v12 = vshll.u32 %v9273_v3, 16 }
  0xff   : > { %v9253_v26 = vld [vmem:[%s11037_s6 + $0x10] sm:$0xff]  }
 0x100   : > { %8566 = vmatpush3.bf16.msra.mxu0 %v9226_v19  ;;  %v9251_v19 = vld [vmem:[%s11037_s6 + $0x8] sm:$0xff]  }
 0x101   : > { %8578 = vmatpush3.bf16.msra.mxu1 %v9227_v20  ;;  %8567 = vmatprep.subr.bf16.mxu0 %v9428_v1  ;;  %v10274_v20 = vld [vmem:[%s11038_s7] ss:$0 sm:$0xff] }
 0x102   : > { %8579 = vmatprep.subr.bf16.mxu1 %v9428_v1 }
 0x104   : > { %8568 = vmatpush3.bf16.msra.mxu0 %v9228_v27 }
 0x105   : > { %8580 = vmatpush3.bf16.msra.mxu1 %v9229_v28  ;;  %8585 = vmatprep.subr.bf16.mxu0 %v9428_v1 }
 0x106   : > { %8597 = vmatprep.subr.bf16.mxu1 %v9428_v1 }
 0x107   : > { %8570 = vmatmul.mubr.msk.bf16.vlgmr.msra.gmra.mrb[60].mxu0 %vm687_vm1, %v7242_v29 }
 0x108   : > { %8582 = vmatmul.mubr.msk.bf16.vlgmr.msra.gmra.mrb[60].mxu1 %vm687_vm1, %v7256_v30  ;;  %8586 = vmatpush3.bf16.msra.mxu0 %v9230_v31 }
 0x109   : > { %8598 = vmatpush3.bf16.msra.mxu1 %v9231_v32  ;;  %8587 = vmatprep.subr.bf16.mxu0 %v9428_v1 }
 0x10a   : > { %v1038_v36 = vpop.f32.mrb[8].mxu0  ;;  %8599 = vmatprep.subr.bf16.mxu1 %v9428_v1  ;;  %8593 = vmatprep.mubr.msk.bf16.mxu0 %vm9429_vm0, %v9428_v1 }
 0x10b   : > { %v1044_v38 = vadd.f32 %v1038_v36, %v966_v23  ;;  %v1129_v39 = vpop.f32.mrb[8].mxu1  ;;  %v8259_v40 = vpop.f32.mrb[9].mxu0  ;;  %8605 = vmatprep.mubr.msk.bf16.mxu1 %vm9429_vm0, %v9428_v1 }
 0x10c   : > { %v8271_v43 = vpop.f32.mrb[9].mxu1  ;;  %v1041_v44 = vpop.f32.mrb[10].mxu0  ;;  %8588 = vmatpush3.bf16.msra.mxu0 %v9232_v33  ;;  %v9257_v40 = vld [vmem:[%s11037_s6 + $0x60] sm:$0xff]  }
 0x10d   : > { %v1135_v45 = vadd.f32 %v1129_v39, %v1044_v38  ;;  %v1132_v46 = vpop.f32.mrb[10].mxu1  ;;  %8600 = vmatpush3.bf16.msra.mxu1 %v9233_v34  ;;  %v8260_v47 = vpop.f32.mrb[11].mxu0  ;;  %8589 = vmatprep.subr.bf16.mxu0 %v9428_v1  ;;  %v9254_v34 = vld [vmem:[%s11037_s6 + $0x38] sm:$0xff]   ;;  %v7332_v38 = vld [vmem:[%s9533_s26 + $0x20] sm:$0xf] }
 0x10e   : > { %v8272_v48 = vpop.f32.mrb[11].mxu1  ;;  %8601 = vmatprep.subr.bf16.mxu1 %v9428_v1  ;;  %v9256_v39 = vld [vmem:[%s11037_s6 + $0x40] sm:$0xff]  }
 0x10f   : > { %v9264_v43 = vld [vmem:[%s9533_s26 + $0x20] sm:$0x1f]  }
 0x110   : > { %8590 = vmatpush3.bf16.msra.mxu0 %v9234_v37  ;;  %v7333_v37 = vld [vmem:[%s9543_s13 + $0x20] sm:$0xf]  ;;  %v3811_v48 = vshll.u32 %v9264_v43, 16 }
 0x111   : > { %8602 = vmatpush3.bf16.msra.mxu1 %v9235_v41  ;;  %8591 = vmatprep.subr.bf16.mxu0 %v9428_v1  ;;  %v9258_v41 = vld [vmem:[%s11037_s6 + $0x48] sm:$0xff]  }
 0x112   : > { %8603 = vmatprep.subr.bf16.mxu1 %v9428_v1 }
 0x114   : > { %8592 = vmatpush3.bf16.msra.mxu0 %v9236_v49 }
 0x115   : > { %8604 = vmatpush3.bf16.msra.mxu1 %v9237_v50  ;;  %8609 = vmatprep.subr.bf16.mxu0 %v9428_v1 }
 0x116   : > { %8621 = vmatprep.subr.bf16.mxu1 %v9428_v1 }
 0x117   : > { %8594 = vmatmul.mubr.msk.bf16.vlgmr.msra.gmra.mrb[64].mxu0 %vm687_vm1, %v3312_v53 }
 0x118   : > { %8606 = vmatmul.mubr.msk.bf16.vlgmr.msra.gmra.mrb[64].mxu1 %vm687_vm1, %v7286_v54  ;;  %8610 = vmatpush3.bf16.msra.mxu0 %v9239_v55  ;;  %v9261_v55 = vld [vmem:[%s11037_s6 + $0x70] sm:$0xff]  }
 0x119   : > { %8622 = vmatpush3.bf16.msra.mxu1 %v9240_v56  ;;  %8611 = vmatprep.subr.bf16.mxu0 %v9428_v1 }
 0x11a   : > { %v1207_v60 = vpop.f32.mrb[12].mxu0  ;;  %8623 = vmatprep.subr.bf16.mxu1 %v9428_v1  ;;  %8617 = vmatprep.mubr.msk.bf16.mxu0 %vm9429_vm0, %v9428_v1 }
 0x11b   : > { %v1213_v62 = vadd.f32 %v1207_v60, %v1135_v45  ;;  %v1285_v63 = vpop.f32.mrb[12].mxu1  ;;  %v8283_v0 = vpop.f32.mrb[13].mxu0  ;;  %8629 = vmatprep.mubr.msk.bf16.mxu1 %vm9429_vm0, %v9428_v1  ;;  %v9263_v60 = vld [vmem:[%s11037_s6 + $0x78] sm:$0xff]  }
 0x11c   : > { %v8295_v4 = vpop.f32.mrb[13].mxu1  ;;  %v1210_v5 = vpop.f32.mrb[14].mxu0  ;;  %8612 = vmatpush3.bf16.msra.mxu0 %v9241_v57  ;;  %v3809_v57 = vshrl.u32 %v9264_v43, 16  ;;  %v9266_v0 = vld [vmem:[%s11037_s6 + $0xa0] sm:$0xff]  }
 0x11d   : > { %v1291_v6 = vadd.f32 %v1285_v63, %v1213_v62  ;;  %v1288_v7 = vpop.f32.mrb[14].mxu1  ;;  %8624 = vmatpush3.bf16.msra.mxu1 %v9242_v58  ;;  %v8284_v8 = vpop.f32.mrb[15].mxu0  ;;  %8613 = vmatprep.subr.bf16.mxu0 %v9428_v1  ;;  %v3813_v58 = vrot.slane %v3811_v48, 1  ;;  %v9265_v62 = vld [vmem:[%s11037_s6 + $0x80] sm:$0xff]   ;;  %v9268_v4 = vld [vmem:[%s11037_s6 + $0xa8] sm:$0xff]  }
 0x11e   : > { %v8296_v9 = vpop.f32.mrb[15].mxu1  ;;  %8625 = vmatprep.subr.bf16.mxu1 %v9428_v1  ;;  %v7368_v63 = vld [vmem:[%s9583_s12 + $0x20] sm:$0xf]  ;;  %v9284_v48 = vld [vmem:[%s11037_s6 + $0x108] sm:$0xff]  }
 0x11f   : > { %v7412_v43 = vld [vmem:[%s9640_s25 + $0x20] sm:$0xf] }
 0x120   : > { %8614 = vmatpush3.bf16.msra.mxu0 %v9243_v61  ;;  %v3814_v61 = vor.u32 %v3813_v58, %v3809_v57  ;;  %v9286_v57 = vld [vmem:[%s11037_s6 + $0x110] sm:$0xff]  }
 0x121   : > { %8626 = vmatpush3.bf16.msra.mxu1 %v9244_v2  ;;  %8615 = vmatprep.subr.bf16.mxu0 %v9428_v1  ;;  %v9267_v2 = vld [vmem:[%s11037_s6 + $0x88] sm:$0xff]  }
 0x122   : > { %8627 = vmatprep.subr.bf16.mxu1 %v9428_v1 }
 0x124   : > { %8616 = vmatpush3.bf16.msra.mxu0 %v9245_v10 }
 0x125   : > { %8628 = vmatpush3.bf16.msra.mxu1 %v9246_v11  ;;  %8633 = vmatprep.subr.bf16.mxu0 %v9428_v1  ;;  %v9269_v11 = vld [vmem:[%s11037_s6 + $0x90] sm:$0xff]  }
 0x126   : > { %8645 = vmatprep.subr.bf16.mxu1 %v9428_v1 }
 0x127   : > { %8618 = vmatmul.mubr.msk.bf16.vlgmr.msra.gmra.mrb[68].mxu0 %vm687_vm1, %v7300_v14 }
 0x128   : > { %8630 = vmatmul.mubr.msk.bf16.vlgmr.msra.gmra.mrb[68].mxu1 %vm687_vm1, %v3558_v16  ;;  %8634 = vmatpush3.bf16.msra.mxu0 %v9248_v15  ;;  %v9270_v16 = vld [vmem:[%s11037_s6 + $0xb0] sm:$0xff]  }
 0x129   : > { %8646 = vmatpush3.bf16.msra.mxu1 %v9249_v17  ;;  %8635 = vmatprep.subr.bf16.mxu0 %v9428_v1 }
 0x12a   : > { %v1376_v21 = vpop.f32.mrb[16].mxu0  ;;  %8647 = vmatprep.subr.bf16.mxu1 %v9428_v1  ;;  %8641 = vmatprep.mubr.msk.bf16.mxu0 %vm9429_vm0, %v9428_v1 }
 0x12b   : > { %v1382_v22 = vadd.f32 %v1376_v21, %v1291_v6  ;;  %v1476_v23 = vpop.f32.mrb[16].mxu1  ;;  %v8307_v24 = vpop.f32.mrb[17].mxu0  ;;  %8653 = vmatprep.mubr.msk.bf16.mxu1 %vm9429_vm0, %v9428_v1  ;;  %v4059_v21 = vrot.slane %v4057_v12, 1  ;;  %v9294_v12 = vld [vmem:[%s11037_s6 + $0x48] sm:$0xff]  }
 0x12c   : > { %v8319_v27 = vpop.f32.mrb[17].mxu1  ;;  %v1379_v28 = vpop.f32.mrb[18].mxu0  ;;  %8636 = vmatpush3.bf16.msra.mxu0 %v9250_v18  ;;  %v9271_v18 = vld [vmem:[%s11037_s6 + $0x98] sm:$0xff]  }
 0x12d   : > { %v1390_v29 = vadd.f32 %v10274_v20, %v1382_v22  ;;  %v1479_v30 = vpop.f32.mrb[18].mxu1  ;;  %8648 = vmatpush3.bf16.msra.mxu1 %v9251_v19  ;;  %v8308_v31 = vpop.f32.mrb[19].mxu0  ;;  %8637 = vmatprep.subr.bf16.mxu0 %v9428_v1  ;;  %v4055_v19 = vshrl.u32 %v9273_v3, 16  ;;  %v9272_v22 = vld [vmem:[%s11037_s6 + $0xb8] sm:$0xff]   ;;  %v9276_v27 = vld [vmem:[%s11037_s6 + $0xc8] sm:$0xff]  }
 0x12e   : > { %v8320_v32 = vpop.f32.mrb[19].mxu1  ;;  %8649 = vmatprep.subr.bf16.mxu1 %v9428_v1  ;;  %v9277_v28 = vld [vmem:[%s11037_s6 + $0xe8] sm:$0xff]   ;;  %v9288_v3 = vld [vmem:[%s11037_s6 + $0x118] sm:$0xff]  }
 0x12f   : > { %v1391_v33 = vmax.f32 %v1390_v29, 0.0  ;;  %v4060_v24 = vor.u32 %v4059_v21, %v4055_v19  ;;  %v9295_v19 = vld [vmem:[%s11037_s6 + $0x10] sm:$0xff]  }
 0x130   : > { %8638 = vmatpush3.bf16.msra.mxu0 %v9252_v25  ;;  %v9274_v25 = vld [vmem:[%s11037_s6 + $0xc0] sm:$0xff]  }
 0x131   : > { %v1392_v36 = vpack.c.bf16 %v1391_v33, %v1391_v33  ;;  %8650 = vmatpush3.bf16.msra.mxu1 %v9253_v26  ;;  %8639 = vmatprep.subr.bf16.mxu0 %v9428_v1  ;;  %v9275_v26 = vld [vmem:[%s11037_s6 + $0xe0] sm:$0xff]  }
 0x132   : > { %8651 = vmatprep.subr.bf16.mxu1 %v9428_v1 }
 0x133   : > { %1394 = vst.msk [vmem:[%s10298_s24] sm:$0xf] %vm1393_vm2, %v1392_v36 }
 0x134   : > { %8640 = vmatpush3.bf16.msra.mxu0 %v9254_v34 }
 0x135   : > { %8652 = vmatpush3.bf16.msra.mxu1 %v9255_v35  ;;  %8657 = vmatprep.subr.bf16.mxu0 %v9428_v1  ;;  %v9278_v35 = vld [vmem:[%s11037_s6 + $0xd0] sm:$0xff]  }
 0x136   : > { %8669 = vmatprep.subr.bf16.mxu1 %v9428_v1 }
 0x137   : > { %8642 = vmatmul.mubr.msk.bf16.vlgmr.msra.gmra.mrb[72].mxu0 %vm687_vm1, %v7333_v37 }
 0x138   : > { %8654 = vmatmul.mubr.msk.bf16.vlgmr.msra.gmra.mrb[72].mxu1 %vm687_vm1, %v7332_v38  ;;  %8658 = vmatpush3.bf16.msra.mxu0 %v9256_v39  ;;  %v9279_v39 = vld [vmem:[%s11037_s6 + $0xf0] sm:$0xff]  }
 0x139   : > { %8670 = vmatpush3.bf16.msra.mxu1 %v9257_v40  ;;  %8659 = vmatprep.subr.bf16.mxu0 %v9428_v1 }
 0x13a   : > { %v1543_v44 = vpop.f32.mrb[20].mxu0  ;;  %8671 = vmatprep.subr.bf16.mxu1 %v9428_v1  ;;  %8665 = vmatprep.mubr.msk.bf16.mxu0 %vm9429_vm0, %v9428_v1 }
 0x13b   : > { %v1544_v45 = vadd.f32 %v1543_v44, %v1476_v23  ;;  %v1632_v46 = vpop.f32.mrb[20].mxu1  ;;  %v8331_v47 = vpop.f32.mrb[21].mxu0  ;;  %8677 = vmatprep.mubr.msk.bf16.mxu1 %vm9429_vm0, %v9428_v1  ;;  %v7382_v23 = vld [vmem:[%s9633_s22 + $0x20] sm:$0xf] }
 0x13c   : > { %v8343_v49 = vpop.f32.mrb[21].mxu1  ;;  %v1546_v50 = vpop.f32.mrb[22].mxu0  ;;  %8660 = vmatpush3.bf16.msra.mxu0 %v9258_v41  ;;  %v9280_v41 = vld [vmem:[%s11037_s6 + $0xd8] sm:$0xff]   ;;  %v9282_v44 = vld [vmem:[%s11037_s6 + $0x100] sm:$0xff]  }
 0x13d   : > { %v1638_v52 = vadd.f32 %v1632_v46, %v1544_v45  ;;  %v1635_v53 = vpop.f32.mrb[22].mxu1  ;;  %8672 = vmatpush3.bf16.msra.mxu1 %v9259_v42  ;;  %v8332_v54 = vpop.f32.mrb[23].mxu0  ;;  %8661 = vmatprep.subr.bf16.mxu0 %v9428_v1  ;;  %v9281_v42 = vld [vmem:[%s11037_s6 + $0xf8] sm:$0xff]   ;;  %v7426_v45 = vld [vmem:[%s9691_s20 + $0x20] sm:$0xf]  ;;  %v9285_v49 = vld [vmem:[%s11037_s6 + $0x28] sm:$0xff]  }
 0x13e   : > { %v8344_v56 = vpop.f32.mrb[23].mxu1  ;;  %8673 = vmatprep.subr.bf16.mxu1 %v9428_v1  ;;  %v9283_v46 = vld [vmem:[%s11037_s6 + $0x20] sm:$0xff]  }
 0x13f   : > { %v9290_v47 = vld [vmem:[%s9640_s25 + $0x20] sm:$0x1f]  }
 0x140   : > { %8662 = vmatpush3.bf16.msra.mxu0 %v9260_v51  ;;  %v4303_v54 = vshll.u32 %v9290_v47, 16 }
 0x141   : > { %8674 = vmatpush3.bf16.msra.mxu1 %v9261_v55  ;;  %8663 = vmatprep.subr.bf16.mxu0 %v9428_v1 }
 0x142   : > { %8675 = vmatprep.subr.bf16.mxu1 %v9428_v1 }
 0x144   : > { %8664 = vmatpush3.bf16.msra.mxu0 %v9262_v59 }
 0x145   : > { %8676 = vmatpush3.bf16.msra.mxu1 %v9263_v60  ;;  %8681 = vmatprep.subr.bf16.mxu0 %v9428_v1 }
 0x146   : > { %8693 = vmatprep.subr.bf16.mxu1 %v9428_v1 }
 0x147   : > { %8666 = vmatmul.mubr.msk.bf16.vlgmr.msra.gmra.mrb[76].mxu0 %vm687_vm1, %v3814_v61  ;;  %v9287_v61 = vld [vmem:[%s11037_s6 + $0x30] sm:$0xff]  }
 0x148   : > { %8678 = vmatmul.mubr.msk.bf16.vlgmr.msra.gmra.mrb[76].mxu1 %vm687_vm1, %v7368_v63  ;;  %8682 = vmatpush3.bf16.msra.mxu0 %v9265_v62 }
 0x149   : > { %8694 = vmatpush3.bf16.msra.mxu1 %v9266_v0  ;;  %8683 = vmatprep.subr.bf16.mxu0 %v9428_v1  ;;  %v4301_v0 = vshrl.u32 %v9290_v47, 16 }
 0x14a   : > { %v1710_v5 = vpop.f32.mrb[24].mxu0  ;;  %8695 = vmatprep.subr.bf16.mxu1 %v9428_v1  ;;  %8689 = vmatprep.mubr.msk.bf16.mxu0 %vm9429_vm0, %v9428_v1 }
 0x14b   : > { %v1716_v6 = vadd.f32 %v1710_v5, %v1638_v52  ;;  %v1788_v7 = vpop.f32.mrb[24].mxu1  ;;  %v8355_v8 = vpop.f32.mrb[25].mxu0  ;;  %8701 = vmatprep.mubr.msk.bf16.mxu1 %vm9429_vm0, %v9428_v1  ;;  %v9289_v5 = vld [vmem:[%s11037_s6 + $0x38] sm:$0xff]  }
 0x14c   : > { %v8367_v9 = vpop.f32.mrb[25].mxu1  ;;  %v1713_v10 = vpop.f32.mrb[26].mxu0  ;;  %8684 = vmatpush3.bf16.msra.mxu0 %v9267_v2  ;;  %v4305_v2 = vrot.slane %v4303_v54, 1  ;;  %v7459_v8 = vld [vmem:[%s9543_s13 + $0x28] sm:$0xf] }
 0x14d   : > { %v1794_v13 = vadd.f32 %v1788_v7, %v1716_v6  ;;  %v1791_v14 = vpop.f32.mrb[26].mxu1  ;;  %8696 = vmatpush3.bf16.msra.mxu1 %v9268_v4  ;;  %v8356_v15 = vpop.f32.mrb[27].mxu0  ;;  %8685 = vmatprep.subr.bf16.mxu0 %v9428_v1  ;;  %v9291_v7 = vld [vmem:[%s11037_s6] sm:$0xff]   ;;  %v9293_v10 = vld [vmem:[%s11037_s6 + $0x8] sm:$0xff]  }
 0x14e   : > { %v8368_v17 = vpop.f32.mrb[27].mxu1  ;;  %8697 = vmatprep.subr.bf16.mxu1 %v9428_v1  ;;  %v4306_v6 = vor.u32 %v4305_v2, %v4301_v0  ;;  %v9292_v9 = vld [vmem:[%s11037_s6 + $0x40] sm:$0xff]   ;;  %v9316_v54 = vld [vmem:[%s9583_s12 + $0x28] sm:$0x1f]   ;;  %v9312_v0 = vld [vmem:[%s11037_s6 + $0xb0] sm:$0xff]  }
 0x150   : > { %8686 = vmatpush3.bf16.msra.mxu0 %v9269_v11  ;;  %v9299_v11 = vld [vmem:[%s9533_s26 + $0x28] sm:$0x1f]  }
 0x151   : > { %8698 = vmatpush3.bf16.msra.mxu1 %v9270_v16  ;;  %8687 = vmatprep.subr.bf16.mxu0 %v9428_v1  ;;  %v4559_v21 = vshll.u32 %v9299_v11, 16 }
 0x152   : > { %8699 = vmatprep.subr.bf16.mxu1 %v9428_v1 }
 0x154   : > { %8688 = vmatpush3.bf16.msra.mxu0 %v9271_v18 }
 0x155   : > { %8700 = vmatpush3.bf16.msra.mxu1 %v9272_v22  ;;  %8705 = vmatprep.subr.bf16.mxu0 %v9428_v1 }
 0x156   : > { %8717 = vmatprep.subr.bf16.mxu1 %v9428_v1 }
 0x157   : > { %8690 = vmatmul.mubr.msk.bf16.vlgmr.msra.gmra.mrb[80].mxu0 %vm687_vm1, %v7382_v23 }
 0x158   : > { %8702 = vmatmul.mubr.msk.bf16.vlgmr.msra.gmra.mrb[80].mxu1 %vm687_vm1, %v4060_v24  ;;  %8706 = vmatpush3.bf16.msra.mxu0 %v9274_v25  ;;  %v9296_v24 = vld [vmem:[%s11037_s6 + $0x50] sm:$0xff]  }
 0x159   : > { %8718 = vmatpush3.bf16.msra.mxu1 %v9275_v26  ;;  %8707 = vmatprep.subr.bf16.mxu0 %v9428_v1  ;;  %v9297_v26 = vld [vmem:[%s11037_s6 + $0x18] sm:$0xff]  }
 0x15a   : > { %v1878_v29 = vpop.f32.mrb[28].mxu0  ;;  %8719 = vmatprep.subr.bf16.mxu1 %v9428_v1  ;;  %8713 = vmatprep.mubr.msk.bf16.mxu0 %vm9429_vm0, %v9428_v1 }
 0x15b   : > { %v1884_v30 = vadd.f32 %v1878_v29, %v1794_v13  ;;  %v1956_v31 = vpop.f32.mrb[28].mxu1  ;;  %v8379_v32 = vpop.f32.mrb[29].mxu0  ;;  %8725 = vmatprep.mubr.msk.bf16.mxu1 %vm9429_vm0, %v9428_v1  ;;  %v9298_v29 = vld [vmem:[%s11037_s6 + $0x58] sm:$0xff]  }
 0x15c   : > { %v8391_v33 = vpop.f32.mrb[29].mxu1  ;;  %v1881_v34 = vpop.f32.mrb[30].mxu0  ;;  %8708 = vmatpush3.bf16.msra.mxu0 %v9276_v27  ;;  %v4557_v27 = vshrl.u32 %v9299_v11, 16  ;;  %v9300_v32 = vld [vmem:[%s11037_s6 + $0x60] sm:$0xff]  }
 0x15d   : > { %v1962_v36 = vadd.f32 %v1956_v31, %v1884_v30  ;;  %v1959_v37 = vpop.f32.mrb[30].mxu1  ;;  %8720 = vmatpush3.bf16.msra.mxu1 %v9277_v28  ;;  %v8380_v38 = vpop.f32.mrb[31].mxu0  ;;  %8709 = vmatprep.subr.bf16.mxu0 %v9428_v1  ;;  %v4561_v28 = vrot.slane %v4559_v21, 1  ;;  %v7458_v30 = vld [vmem:[%s9533_s26 + $0x28] sm:$0xf]  ;;  %v9301_v33 = vld [vmem:[%s11037_s6 + $0x80] sm:$0xff]  }
 0x15e   : > { %v8392_v40 = vpop.f32.mrb[31].mxu1  ;;  %8721 = vmatprep.subr.bf16.mxu1 %v9428_v1  ;;  %v9302_v34 = vld [vmem:[%s11037_s6 + $0x68] sm:$0xff]   ;;  %v9317_v11 = vld [vmem:[%s11037_s6 + $0xe0] sm:$0xff]  }
 0x15f   : > { %v4562_v31 = vor.u32 %v4561_v28, %v4557_v27 }
 0x160   : > { %8710 = vmatpush3.bf16.msra.mxu0 %v9278_v35  ;;  %v9303_v35 = vld [vmem:[%s11037_s6 + $0x88] sm:$0xff]  }
 0x161   : > { %8722 = vmatpush3.bf16.msra.mxu1 %v9279_v39  ;;  %8711 = vmatprep.subr.bf16.mxu0 %v9428_v1 }
 0x162   : > { %8723 = vmatprep.subr.bf16.mxu1 %v9428_v1 }
 0x164   : > { %8712 = vmatpush3.bf16.msra.mxu0 %v9280_v41 }
 0x165   : > { %8724 = vmatpush3.bf16.msra.mxu1 %v9281_v42  ;;  %8729 = vmatprep.subr.bf16.mxu0 %v9428_v1  ;;  %v9304_v42 = vld [vmem:[%s11037_s6 + $0x70] sm:$0xff]  }
 0x166   : > { %8741 = vmatprep.subr.bf16.mxu1 %v9428_v1 }
 0x167   : > { %8714 = vmatmul.mubr.msk.bf16.vlgmr.msra.gmra.mrb[84].mxu0 %vm687_vm1, %v7412_v43 }
 0x168   : > { %8726 = vmatmul.mubr.msk.bf16.vlgmr.msra.gmra.mrb[84].mxu1 %vm687_vm1, %v7426_v45  ;;  %8730 = vmatpush3.bf16.msra.mxu0 %v9282_v44 }
 0x169   : > { %8742 = vmatpush3.bf16.msra.mxu1 %v9283_v46  ;;  %8731 = vmatprep.subr.bf16.mxu0 %v9428_v1  ;;  %v9305_v46 = vld [vmem:[%s11037_s6 + $0x90] sm:$0xff]  }
 0x16a   : > { %v2034_v50 = vpop.f32.mrb[32].mxu0  ;;  %8743 = vmatprep.subr.bf16.mxu1 %v9428_v1  ;;  %8737 = vmatprep.mubr.msk.bf16.mxu0 %vm9429_vm0, %v9428_v1 }
 0x16b   : > { %v2040_v51 = vadd.f32 %v2034_v50, %v1962_v36  ;;  %v2124_v52 = vpop.f32.mrb[32].mxu1  ;;  %v8403_v53 = vpop.f32.mrb[33].mxu0  ;;  %8749 = vmatprep.mubr.msk.bf16.mxu1 %vm9429_vm0, %v9428_v1  ;;  %v7494_v50 = vld [vmem:[%s9583_s12 + $0x28] sm:$0xf] }
 0x16c   : > { %v8415_v55 = vpop.f32.mrb[33].mxu1  ;;  %v2037_v56 = vpop.f32.mrb[34].mxu0  ;;  %8732 = vmatpush3.bf16.msra.mxu0 %v9284_v48  ;;  %v9306_v48 = vld [vmem:[%s11037_s6 + $0x78] sm:$0xff]   ;;  %v9309_v53 = vld [vmem:[%s11037_s6 + $0xc0] sm:$0xff]  }
 0x16d   : > { %v2130_v58 = vadd.f32 %v2124_v52, %v2040_v51  ;;  %v2127_v59 = vpop.f32.mrb[34].mxu1  ;;  %8744 = vmatpush3.bf16.msra.mxu1 %v9285_v49  ;;  %v8404_v60 = vpop.f32.mrb[35].mxu0  ;;  %8733 = vmatprep.subr.bf16.mxu0 %v9428_v1  ;;  %v9307_v49 = vld [vmem:[%s11037_s6 + $0x98] sm:$0xff]   ;;  %v9308_v51 = vld [vmem:[%s11037_s6 + $0xa0] sm:$0xff]   ;;  %v7508_v52 = vld [vmem:[%s9633_s22 + $0x28] sm:$0xf] }
 0x16e   : > { %v8416_v62 = vpop.f32.mrb[35].mxu1  ;;  %8745 = vmatprep.subr.bf16.mxu1 %v9428_v1  ;;  %v9310_v55 = vld [vmem:[%s11037_s6 + $0xa8] sm:$0xff]  }
 0x16f   : > { %v2138_v63 = vadd.f32 %v10274_v20, %v2130_v58  ;;  %v9311_v56 = vld [vmem:[%s11037_s6 + $0xc8] sm:$0xff]  }
 0x170   : > { %8734 = vmatpush3.bf16.msra.mxu0 %v9286_v57 }
 0x171   : > { %v2139_v4 = vmax.f32 %v2138_v63, 0.0  ;;  %8746 = vmatpush3.bf16.msra.mxu1 %v9287_v61  ;;  %8735 = vmatprep.subr.bf16.mxu0 %v9428_v1  ;;  %v4805_v61 = vshll.u32 %v9316_v54, 16 }
 0x172   : > { %8747 = vmatprep.subr.bf16.mxu1 %v9428_v1 }
 0x173   : > { %v2140_v20 = vpack.c.bf16 %v2139_v4, %v2139_v4 }
 0x174   : > { %8736 = vmatpush3.bf16.msra.mxu0 %v9288_v3 }
 0x175   : > { %7079 = vst.msk [vmem:[%s10298_s24 + $0x4] sm:$0xf] %vm1393_vm2, %v2140_v20  ;;  %8748 = vmatpush3.bf16.msra.mxu1 %v9289_v5  ;;  %8753 = vmatprep.subr.bf16.mxu0 %v9428_v1  ;;  %v9313_v5 = vld [vmem:[%s11037_s6 + $0xd0] sm:$0xff]  }
 0x176   : > { %8765 = vmatprep.subr.bf16.mxu1 %v9428_v1 }
 0x177   : > { %8738 = vmatmul.mubr.msk.bf16.vlgmr.msra.gmra.mrb[88].mxu0 %vm687_vm1, %v4306_v6  ;;  %v4803_v6 = vshrl.u32 %v9316_v54, 16 }
 0x178   : > { %8750 = vmatmul.mubr.msk.bf16.vlgmr.msra.gmra.mrb[88].mxu1 %vm687_vm1, %v7459_v8  ;;  %8754 = vmatpush3.bf16.msra.mxu0 %v9291_v7  ;;  %v4807_v7 = vrot.slane %v4805_v61, 1  ;;  %v9314_v8 = vld [vmem:[%s11037_s6 + $0xb8] sm:$0xff]   ;;  %v9335_v61 = vld [vmem:[%s11037_s6 + $0x60] sm:$0xff]  }
 0x179   : > { %8766 = vmatpush3.bf16.msra.mxu1 %v9292_v9  ;;  %8755 = vmatprep.subr.bf16.mxu0 %v9428_v1  ;;  %v9315_v9 = vld [vmem:[%s11037_s6 + $0xd8] sm:$0xff]  }
 0x17a   : > { %v2224_v13 = vpop.f32.mrb[36].mxu0  ;;  %8767 = vmatprep.subr.bf16.mxu1 %v9428_v1  ;;  %8761 = vmatprep.mubr.msk.bf16.mxu0 %vm9429_vm0, %v9428_v1 }
 0x17b   : > { %v2291_v14 = vpop.f32.mrb[36].mxu1  ;;  %v8427_v15 = vpop.f32.mrb[37].mxu0  ;;  %8773 = vmatprep.mubr.msk.bf16.mxu1 %vm9429_vm0, %v9428_v1 }
 0x17c   : > { %v2292_v16 = vadd.f32 %v2291_v14, %v2224_v13  ;;  %v8439_v17 = vpop.f32.mrb[37].mxu1  ;;  %v2227_v18 = vpop.f32.mrb[38].mxu0  ;;  %8756 = vmatpush3.bf16.msra.mxu0 %v9293_v10  ;;  %v4808_v10 = vor.u32 %v4807_v7, %v4803_v6  ;;  %v9318_v13 = vld [vmem:[%s11037_s6 + $0x100] sm:$0xff]   ;;  %v9319_v14 = vld [vmem:[%s11037_s6 + $0xe8] sm:$0xff]  }
 0x17d   : > { %v2294_v22 = vpop.f32.mrb[38].mxu1  ;;  %8768 = vmatpush3.bf16.msra.mxu1 %v9294_v12  ;;  %v8428_v23 = vpop.f32.mrb[39].mxu0  ;;  %8757 = vmatprep.subr.bf16.mxu0 %v9428_v1  ;;  %v7538_v12 = vld [vmem:[%s9640_s25 + $0x28] sm:$0xf] }
 0x17e   : > { %v8440_v25 = vpop.f32.mrb[39].mxu1  ;;  %8769 = vmatprep.subr.bf16.mxu1 %v9428_v1  ;;  %v9325_v15 = vld [vmem:[%s9640_s25 + $0x28] sm:$0x1f]  }
 0x17f   : > { %v5051_v25 = vshll.u32 %v9325_v15, 16 }
 0x180   : > { %8758 = vmatpush3.bf16.msra.mxu0 %v9295_v19 }
 0x181   : > { %8770 = vmatpush3.bf16.msra.mxu1 %v9296_v24  ;;  %8759 = vmatprep.subr.bf16.mxu0 %v9428_v1  ;;  %v9321_v24 = vld [vmem:[%s11037_s6 + $0xf0] sm:$0xff]  }
 0x182   : > { %8771 = vmatprep.subr.bf16.mxu1 %v9428_v1 }
 0x184   : > { %8760 = vmatpush3.bf16.msra.mxu0 %v9297_v26 }
 0x185   : > { %8772 = vmatpush3.bf16.msra.mxu1 %v9298_v29  ;;  %8777 = vmatprep.subr.bf16.mxu0 %v9428_v1  ;;  %v9322_v29 = vld [vmem:[%s11037_s6 + $0x110] sm:$0xff]  }
 0x186   : > { %8789 = vmatprep.subr.bf16.mxu1 %v9428_v1 }
 0x187   : > { %8762 = vmatmul.mubr.msk.bf16.vlgmr.msra.gmra.mrb[92].mxu0 %vm687_vm1, %v7458_v30 }
 0x188   : > { %8774 = vmatmul.mubr.msk.bf16.vlgmr.msra.gmra.mrb[92].mxu1 %vm687_vm1, %v4562_v31  ;;  %8778 = vmatpush3.bf16.msra.mxu0 %v9300_v32  ;;  %v9323_v31 = vld [vmem:[%s11037_s6 + $0xf8] sm:$0xff]   ;;  %v5049_v32 = vshrl.u32 %v9325_v15, 16 }
 0x189   : > { %8790 = vmatpush3.bf16.msra.mxu1 %v9301_v33  ;;  %8779 = vmatprep.subr.bf16.mxu0 %v9428_v1  ;;  %v5053_v33 = vrot.slane %v5051_v25, 1  ;;  %v9346_v25 = vld [vmem:[%s11037_s6 + $0xa8] sm:$0xff]  }
 0x18a   : > { %v2380_v36 = vpop.f32.mrb[40].mxu0  ;;  %8791 = vmatprep.subr.bf16.mxu1 %v9428_v1  ;;  %8785 = vmatprep.mubr.msk.bf16.mxu0 %vm9429_vm0, %v9428_v1 }
 0x18b   : > { %v2386_v37 = vadd.f32 %v2380_v36, %v2292_v16  ;;  %v2458_v38 = vpop.f32.mrb[40].mxu1  ;;  %v8451_v39 = vpop.f32.mrb[41].mxu0  ;;  %8797 = vmatprep.mubr.msk.bf16.mxu1 %vm9429_vm0, %v9428_v1  ;;  %v9320_v16 = vld [vmem:[%s11037_s6 + $0x108] sm:$0xff]   ;;  %v5054_v36 = vor.u32 %v5053_v33, %v5049_v32  ;;  %v9347_v32 = vld [vmem:[%s11037_s6 + $0x90] sm:$0xff]  }
 0x18c   : > { %v8463_v40 = vpop.f32.mrb[41].mxu1  ;;  %v2383_v41 = vpop.f32.mrb[42].mxu0  ;;  %8780 = vmatpush3.bf16.msra.mxu0 %v9302_v34  ;;  %v9324_v34 = vld [vmem:[%s11037_s6 + $0x118] sm:$0xff]   ;;  %v9328_v39 = vld [vmem:[%s11037_s6 + $0x28] sm:$0xff]  }
 0x18d   : > { %v2464_v43 = vadd.f32 %v2458_v38, %v2386_v37  ;;  %v2461_v44 = vpop.f32.mrb[42].mxu1  ;;  %8792 = vmatpush3.bf16.msra.mxu1 %v9303_v35  ;;  %v8452_v45 = vpop.f32.mrb[43].mxu0  ;;  %8781 = vmatprep.subr.bf16.mxu0 %v9428_v1  ;;  %v7552_v35 = vld [vmem:[%s9691_s20 + $0x28] sm:$0xf]  ;;  %v9326_v37 = vld [vmem:[%s11037_s6 + $0x20] sm:$0xff]  }
 0x18e   : > { %v8464_v47 = vpop.f32.mrb[43].mxu1  ;;  %8793 = vmatprep.subr.bf16.mxu1 %v9428_v1  ;;  %v9327_v38 = vld [vmem:[%s11037_s6] sm:$0xff]   ;;  %v9329_v40 = vld [vmem:[%s11037_s6 + $0x8] sm:$0xff]  }
 0x190   : > { %8782 = vmatpush3.bf16.msra.mxu0 %v9304_v42  ;;  %v10652_v42 = vld [vmem:[%s11038_s7] ss:$0 sm:$0xff] }
 0x191   : > { %8794 = vmatpush3.bf16.msra.mxu1 %v9305_v46  ;;  %8783 = vmatprep.subr.bf16.mxu0 %v9428_v1 }
 0x192   : > { %8795 = vmatprep.subr.bf16.mxu1 %v9428_v1 }
 0x194   : > { %8784 = vmatpush3.bf16.msra.mxu0 %v9306_v48  ;;  %v9330_v48 = vld [vmem:[%s11037_s6 + $0x30] sm:$0xff]  }
 0x195   : > { %8796 = vmatpush3.bf16.msra.mxu1 %v9307_v49  ;;  %8801 = vmatprep.subr.bf16.mxu0 %v9428_v1 }
 0x196   : > { %8813 = vmatprep.subr.bf16.mxu1 %v9428_v1 }
 0x197   : > { %8786 = vmatmul.mubr.msk.bf16.vlgmr.msra.gmra.mrb[96].mxu0 %vm687_vm1, %v7494_v50 }
 0x198   : > { %8798 = vmatmul.mubr.msk.bf16.vlgmr.msra.gmra.mrb[96].mxu1 %vm687_vm1, %v7508_v52  ;;  %8802 = vmatpush3.bf16.msra.mxu0 %v9308_v51  ;;  %v9331_v52 = vld [vmem:[%s11037_s6 + $0x10] sm:$0xff]  }
 0x199   : > { %8814 = vmatpush3.bf16.msra.mxu1 %v9309_v53  ;;  %8803 = vmatprep.subr.bf16.mxu0 %v9428_v1 }
 0x19a   : > { %v2536_v57 = vpop.f32.mrb[44].mxu0  ;;  %8815 = vmatprep.subr.bf16.mxu1 %v9428_v1  ;;  %8809 = vmatprep.mubr.msk.bf16.mxu0 %vm9429_vm0, %v9428_v1 }
 0x19b   : > { %v2542_v58 = vadd.f32 %v2536_v57, %v2464_v43  ;;  %v2626_v59 = vpop.f32.mrb[44].mxu1  ;;  %v8475_v60 = vpop.f32.mrb[45].mxu0  ;;  %8821 = vmatprep.mubr.msk.bf16.mxu1 %vm9429_vm0, %v9428_v1  ;;  %v9333_v57 = vld [vmem:[%s11037_s6 + $0x18] sm:$0xff]  }
 0x19c   : > { %v8487_v62 = vpop.f32.mrb[45].mxu1  ;;  %v2539_v63 = vpop.f32.mrb[46].mxu0  ;;  %8804 = vmatpush3.bf16.msra.mxu0 %v9310_v55  ;;  %v9332_v55 = vld [vmem:[%s11037_s6 + $0x38] sm:$0xff]   ;;  %v7584_v60 = vld [vmem:[%s9533_s26 + $0x30] sm:$0xf] }
 0x19d   : > { %v2632_v2 = vadd.f32 %v2626_v59, %v2542_v58  ;;  %v2629_v3 = vpop.f32.mrb[46].mxu1  ;;  %8816 = vmatpush3.bf16.msra.mxu1 %v9311_v56  ;;  %v8476_v4 = vpop.f32.mrb[47].mxu0  ;;  %8805 = vmatprep.subr.bf16.mxu0 %v9428_v1  ;;  %v7585_v58 = vld [vmem:[%s9543_s13 + $0x30] sm:$0xf]  ;;  %v9334_v59 = vld [vmem:[%s11037_s6 + $0x40] sm:$0xff]   ;;  %v9336_v63 = vld [vmem:[%s11037_s6 + $0x48] sm:$0xff]  }
 0x19e   : > { %v8488_v20 = vpop.f32.mrb[47].mxu1  ;;  %8817 = vmatprep.subr.bf16.mxu1 %v9428_v1  ;;  %v9342_v62 = vld [vmem:[%s9533_s26 + $0x30] sm:$0x1f]  }
 0x19f   : > { %v5307_v20 = vshll.u32 %v9342_v62, 16 }
 0x1a0   : > { %8806 = vmatpush3.bf16.msra.mxu0 %v9312_v0  ;;  %v9337_v0 = vld [vmem:[%s11037_s6 + $0x68] sm:$0xff]  }
 0x1a1   : > { %8818 = vmatpush3.bf16.msra.mxu1 %v9313_v5  ;;  %8807 = vmatprep.subr.bf16.mxu0 %v9428_v1  ;;  %v5309_v15 = vrot.slane %v5307_v20, 1  ;;  %v9362_v20 = vld [vmem:[%s11037_s6 + $0x108] sm:$0xff]  }
 0x1a2   : > { %8819 = vmatprep.subr.bf16.mxu1 %v9428_v1 }
 0x1a4   : > { %8808 = vmatpush3.bf16.msra.mxu0 %v9314_v8  ;;  %v9338_v8 = vld [vmem:[%s11037_s6 + $0x50] sm:$0xff]  }
 0x1a5   : > { %8820 = vmatpush3.bf16.msra.mxu1 %v9315_v9  ;;  %8825 = vmatprep.subr.bf16.mxu0 %v9428_v1 }
 0x1a6   : > { %8837 = vmatprep.subr.bf16.mxu1 %v9428_v1 }
 0x1a7   : > { %8810 = vmatmul.mubr.msk.bf16.vlgmr.msra.gmra.mrb[100].mxu0 %vm687_vm1, %v4808_v10 }
 0x1a8   : > { %8822 = vmatmul.mubr.msk.bf16.vlgmr.msra.gmra.mrb[100].mxu1 %vm687_vm1, %v7538_v12  ;;  %8826 = vmatpush3.bf16.msra.mxu0 %v9317_v11  ;;  %v9339_v12 = vld [vmem:[%s11037_s6 + $0x70] sm:$0xff]  }
 0x1a9   : > { %8838 = vmatpush3.bf16.msra.mxu1 %v9318_v13  ;;  %8827 = vmatprep.subr.bf16.mxu0 %v9428_v1 }
 0x1aa   : > { %v2704_v17 = vpop.f32.mrb[48].mxu0  ;;  %8839 = vmatprep.subr.bf16.mxu1 %v9428_v1  ;;  %8833 = vmatprep.mubr.msk.bf16.mxu0 %vm9429_vm0, %v9428_v1 }
 0x1ab   : > { %v2710_v18 = vadd.f32 %v2704_v17, %v2632_v2  ;;  %v2782_v19 = vpop.f32.mrb[48].mxu1  ;;  %v8499_v21 = vpop.f32.mrb[49].mxu0  ;;  %8845 = vmatprep.mubr.msk.bf16.mxu1 %vm9429_vm0, %v9428_v1  ;;  %v9341_v17 = vld [vmem:[%s11037_s6 + $0x78] sm:$0xff]  }
 0x1ac   : > { %v8511_v22 = vpop.f32.mrb[49].mxu1  ;;  %v2707_v23 = vpop.f32.mrb[50].mxu0  ;;  %8828 = vmatpush3.bf16.msra.mxu0 %v9319_v14  ;;  %v5305_v14 = vshrl.u32 %v9342_v62, 16  ;;  %v7620_v21 = vld [vmem:[%s9583_s12 + $0x30] sm:$0xf]  ;;  %v9358_v62 = vld [vmem:[%s11037_s6 + $0xd8] sm:$0xff]  }
 0x1ad   : > { %v2788_v26 = vadd.f32 %v2782_v19, %v2710_v18  ;;  %v2785_v27 = vpop.f32.mrb[50].mxu1  ;;  %8840 = vmatpush3.bf16.msra.mxu1 %v9320_v16  ;;  %v8500_v28 = vpop.f32.mrb[51].mxu0  ;;  %8829 = vmatprep.subr.bf16.mxu0 %v9428_v1  ;;  %v9340_v16 = vld [vmem:[%s11037_s6 + $0x58] sm:$0xff]   ;;  %v9343_v19 = vld [vmem:[%s11037_s6 + $0x80] sm:$0xff]   ;;  %v9345_v23 = vld [vmem:[%s11037_s6 + $0x88] sm:$0xff]  }
 0x1ae   : > { %v8512_v30 = vpop.f32.mrb[51].mxu1  ;;  %8841 = vmatprep.subr.bf16.mxu1 %v9428_v1  ;;  %v5310_v18 = vor.u32 %v5309_v15, %v5305_v14  ;;  %v9344_v22 = vld [vmem:[%s11037_s6 + $0xa0] sm:$0xff]   ;;  %v9364_v14 = vld [vmem:[%s11037_s6 + $0x110] sm:$0xff]  }
 0x1b0   : > { %8830 = vmatpush3.bf16.msra.mxu0 %v9321_v24  ;;  %v9351_v24 = vld [vmem:[%s9583_s12 + $0x30] sm:$0x1f]  }
 0x1b1   : > { %8842 = vmatpush3.bf16.msra.mxu1 %v9322_v29  ;;  %8831 = vmatprep.subr.bf16.mxu0 %v9428_v1  ;;  %v5553_v33 = vshll.u32 %v9351_v24, 16 }
 0x1b2   : > { %8843 = vmatprep.subr.bf16.mxu1 %v9428_v1 }
 0x1b4   : > { %8832 = vmatpush3.bf16.msra.mxu0 %v9323_v31 }
 0x1b5   : > { %8844 = vmatpush3.bf16.msra.mxu1 %v9324_v34  ;;  %8849 = vmatprep.subr.bf16.mxu0 %v9428_v1 }
 0x1b6   : > { %8861 = vmatprep.subr.bf16.mxu1 %v9428_v1 }
 0x1b7   : > { %8834 = vmatmul.mubr.msk.bf16.vlgmr.msra.gmra.mrb[104].mxu0 %vm687_vm1, %v7552_v35 }
 0x1b8   : > { %8846 = vmatmul.mubr.msk.bf16.vlgmr.msra.gmra.mrb[104].mxu1 %vm687_vm1, %v5054_v36  ;;  %8850 = vmatpush3.bf16.msra.mxu0 %v9326_v37  ;;  %v9348_v37 = vld [vmem:[%s11037_s6 + $0xb0] sm:$0xff]  }
 0x1b9   : > { %8862 = vmatpush3.bf16.msra.mxu1 %v9327_v38  ;;  %8851 = vmatprep.subr.bf16.mxu0 %v9428_v1 }
 0x1ba   : > { %v2872_v41 = vpop.f32.mrb[52].mxu0  ;;  %8863 = vmatprep.subr.bf16.mxu1 %v9428_v1  ;;  %8857 = vmatprep.mubr.msk.bf16.mxu0 %vm9429_vm0, %v9428_v1 }
 0x1bb   : > { %v2878_v43 = vadd.f32 %v2872_v41, %v2788_v26  ;;  %v2972_v44 = vpop.f32.mrb[52].mxu1  ;;  %v8523_v45 = vpop.f32.mrb[53].mxu0  ;;  %8869 = vmatprep.mubr.msk.bf16.mxu1 %vm9429_vm0, %v9428_v1  ;;  %v5555_v41 = vrot.slane %v5553_v33, 1  ;;  %v9372_v33 = vld [vmem:[%s11037_s6 + $0x48] sm:$0xff]  }
 0x1bc   : > { %v8535_v46 = vpop.f32.mrb[53].mxu1  ;;  %v2875_v47 = vpop.f32.mrb[54].mxu0  ;;  %8852 = vmatpush3.bf16.msra.mxu0 %v9328_v39  ;;  %v9349_v39 = vld [vmem:[%s11037_s6 + $0x98] sm:$0xff]  }
 0x1bd   : > { %v2886_v49 = vadd.f32 %v10652_v42, %v2878_v43  ;;  %v2975_v50 = vpop.f32.mrb[54].mxu1  ;;  %8864 = vmatpush3.bf16.msra.mxu1 %v9329_v40  ;;  %v8524_v51 = vpop.f32.mrb[55].mxu0  ;;  %8853 = vmatprep.subr.bf16.mxu0 %v9428_v1  ;;  %v5551_v40 = vshrl.u32 %v9351_v24, 16  ;;  %v9350_v43 = vld [vmem:[%s11037_s6 + $0xb8] sm:$0xff]   ;;  %v9352_v46 = vld [vmem:[%s11037_s6 + $0xc0] sm:$0xff]  }
 0x1be   : > { %v8536_v53 = vpop.f32.mrb[55].mxu1  ;;  %8865 = vmatprep.subr.bf16.mxu1 %v9428_v1  ;;  %v9353_v47 = vld [vmem:[%s11037_s6 + $0xe0] sm:$0xff]   ;;  %v9366_v24 = vld [vmem:[%s11037_s6 + $0x118] sm:$0xff]  }
 0x1bf   : > { %v2887_v54 = vmax.f32 %v2886_v49, 0.0  ;;  %v5556_v45 = vor.u32 %v5555_v41, %v5551_v40  ;;  %v9355_v49 = vld [vmem:[%s11037_s6 + $0xe8] sm:$0xff]   ;;  %v9373_v40 = vld [vmem:[%s11037_s6 + $0x10] sm:$0xff]  }
 0x1c0   : > { %8854 = vmatpush3.bf16.msra.mxu0 %v9330_v48  ;;  %v9354_v48 = vld [vmem:[%s11037_s6 + $0xc8] sm:$0xff]  }
 0x1c1   : > { %v2888_v56 = vpack.c.bf16 %v2887_v54, %v2887_v54  ;;  %8866 = vmatpush3.bf16.msra.mxu1 %v9331_v52  ;;  %8855 = vmatprep.subr.bf16.mxu0 %v9428_v1 }
 0x1c2   : > { %8867 = vmatprep.subr.bf16.mxu1 %v9428_v1 }
 0x1c3   : > { %7205 = vst.msk [vmem:[%s10298_s24 + $0x8] sm:$0xf] %vm1393_vm2, %v2888_v56  ;;  %v9356_v56 = vld [vmem:[%s11037_s6 + $0xd0] sm:$0xff]  }
 0x1c4   : > { %8856 = vmatpush3.bf16.msra.mxu0 %v9332_v55 }
 0x1c5   : > { %8868 = vmatpush3.bf16.msra.mxu1 %v9333_v57  ;;  %8873 = vmatprep.subr.bf16.mxu0 %v9428_v1 }
 0x1c6   : > { %8885 = vmatprep.subr.bf16.mxu1 %v9428_v1 }
 0x1c7   : > { %8858 = vmatmul.mubr.msk.bf16.vlgmr.msra.gmra.mrb[108].mxu0 %vm687_vm1, %v7585_v58 }
 0x1c8   : > { %8870 = vmatmul.mubr.msk.bf16.vlgmr.msra.gmra.mrb[108].mxu1 %vm687_vm1, %v7584_v60  ;;  %8874 = vmatpush3.bf16.msra.mxu0 %v9334_v59  ;;  %v9357_v60 = vld [vmem:[%s11037_s6 + $0xf0] sm:$0xff]  }
 0x1c9   : > { %8886 = vmatpush3.bf16.msra.mxu1 %v9335_v61  ;;  %8875 = vmatprep.subr.bf16.mxu0 %v9428_v1 }
 0x1ca   : > { %v3039_v2 = vpop.f32.mrb[56].mxu0  ;;  %8887 = vmatprep.subr.bf16.mxu1 %v9428_v1  ;;  %8881 = vmatprep.mubr.msk.bf16.mxu0 %vm9429_vm0, %v9428_v1 }
 0x1cb   : > { %v3040_v3 = vadd.f32 %v3039_v2, %v2972_v44  ;;  %v3128_v4 = vpop.f32.mrb[56].mxu1  ;;  %v8547_v5 = vpop.f32.mrb[57].mxu0  ;;  %8893 = vmatprep.mubr.msk.bf16.mxu1 %vm9429_vm0, %v9428_v1  ;;  %v7634_v44 = vld [vmem:[%s9633_s22 + $0x30] sm:$0xf]  ;;  %v9360_v2 = vld [vmem:[%s11037_s6 + $0x100] sm:$0xff]  }
 0x1cc   : > { %v8559_v6 = vpop.f32.mrb[57].mxu1  ;;  %v3042_v7 = vpop.f32.mrb[58].mxu0  ;;  %8876 = vmatpush3.bf16.msra.mxu0 %v9336_v63  ;;  %v9359_v63 = vld [vmem:[%s11037_s6 + $0xf8] sm:$0xff]   ;;  %v9368_v5 = vld [vmem:[%s9640_s25 + $0x30] sm:$0x1f]  }
 0x1cd   : > { %v3134_v9 = vadd.f32 %v3128_v4, %v3040_v3  ;;  %v3131_v10 = vpop.f32.mrb[58].mxu1  ;;  %8888 = vmatpush3.bf16.msra.mxu1 %v9337_v0  ;;  %v8548_v11 = vpop.f32.mrb[59].mxu0  ;;  %8877 = vmatprep.subr.bf16.mxu0 %v9428_v1  ;;  %v7664_v0 = vld [vmem:[%s9640_s25 + $0x30] sm:$0xf]  ;;  %v9361_v4 = vld [vmem:[%s11037_s6 + $0x20] sm:$0xff]   ;;  %v9363_v6 = vld [vmem:[%s11037_s6 + $0x28] sm:$0xff]  }
 0x1ce   : > { %v8560_v13 = vpop.f32.mrb[59].mxu1  ;;  %8889 = vmatprep.subr.bf16.mxu1 %v9428_v1  ;;  %v7678_v3 = vld [vmem:[%s9691_s20 + $0x30] sm:$0xf]  ;;  %v5799_v11 = vshll.u32 %v9368_v5, 16 }
 0x1d0   : > { %8878 = vmatpush3.bf16.msra.mxu0 %v9338_v8 }
 0x1d1   : > { %8890 = vmatpush3.bf16.msra.mxu1 %v9339_v12  ;;  %8879 = vmatprep.subr.bf16.mxu0 %v9428_v1 }
 0x1d2   : > { %8891 = vmatprep.subr.bf16.mxu1 %v9428_v1 }
 0x1d4   : > { %8880 = vmatpush3.bf16.msra.mxu0 %v9340_v16 }
 0x1d5   : > { %8892 = vmatpush3.bf16.msra.mxu1 %v9341_v17  ;;  %8897 = vmatprep.subr.bf16.mxu0 %v9428_v1 }
 0x1d6   : > { %8909 = vmatprep.subr.bf16.mxu1 %v9428_v1 }
 0x1d7   : > { %8882 = vmatmul.mubr.msk.bf16.vlgmr.msra.gmra.mrb[112].mxu0 %vm687_vm1, %v5310_v18  ;;  %v9365_v18 = vld [vmem:[%s11037_s6 + $0x30] sm:$0xff]  }
 0x1d8   : > { %8894 = vmatmul.mubr.msk.bf16.vlgmr.msra.gmra.mrb[112].mxu1 %vm687_vm1, %v7620_v21  ;;  %8898 = vmatpush3.bf16.msra.mxu0 %v9343_v19 }
 0x1d9   : > { %8910 = vmatpush3.bf16.msra.mxu1 %v9344_v22  ;;  %8899 = vmatprep.subr.bf16.mxu0 %v9428_v1  ;;  %v5797_v22 = vshrl.u32 %v9368_v5, 16 }
 0x1da   : > { %v3206_v26 = vpop.f32.mrb[60].mxu0  ;;  %8911 = vmatprep.subr.bf16.mxu1 %v9428_v1  ;;  %8905 = vmatprep.mubr.msk.bf16.mxu0 %vm9429_vm0, %v9428_v1 }
 0x1db   : > { %v3212_v27 = vadd.f32 %v3206_v26, %v3134_v9  ;;  %v3284_v28 = vpop.f32.mrb[60].mxu1  ;;  %v8571_v29 = vpop.f32.mrb[61].mxu0  ;;  %8917 = vmatprep.mubr.msk.bf16.mxu1 %vm9429_vm0, %v9428_v1  ;;  %v9367_v26 = vld [vmem:[%s11037_s6 + $0x38] sm:$0xff]  }
 0x1dc   : > { %v8583_v30 = vpop.f32.mrb[61].mxu1  ;;  %v3209_v31 = vpop.f32.mrb[62].mxu0  ;;  %8900 = vmatpush3.bf16.msra.mxu0 %v9345_v23  ;;  %v5801_v23 = vrot.slane %v5799_v11, 1  ;;  %v7711_v29 = vld [vmem:[%s9543_s13 + $0x38] sm:$0xf] }
 0x1dd   : > { %v3290_v34 = vadd.f32 %v3284_v28, %v3212_v27  ;;  %v3287_v35 = vpop.f32.mrb[62].mxu1  ;;  %8912 = vmatpush3.bf16.msra.mxu1 %v9346_v25  ;;  %v8572_v36 = vpop.f32.mrb[63].mxu0  ;;  %8901 = vmatprep.subr.bf16.mxu0 %v9428_v1  ;;  %v9369_v28 = vld [vmem:[%s11037_s6] sm:$0xff]   ;;  %v9371_v31 = vld [vmem:[%s11037_s6 + $0x8] sm:$0xff]   ;;  %v9394_v11 = vld [vmem:[%s9583_s12 + $0x38] sm:$0x1f]  }
 0x1de   : > { %v8584_v38 = vpop.f32.mrb[63].mxu1  ;;  %8913 = vmatprep.subr.bf16.mxu1 %v9428_v1  ;;  %v5802_v27 = vor.u32 %v5801_v23, %v5797_v22  ;;  %v9370_v30 = vld [vmem:[%s11037_s6 + $0x40] sm:$0xff]   ;;  %v9390_v22 = vld [vmem:[%s11037_s6 + $0xb0] sm:$0xff]  }
 0x1e0   : > { %8902 = vmatpush3.bf16.msra.mxu0 %v9347_v32  ;;  %v9377_v32 = vld [vmem:[%s9533_s26 + $0x38] sm:$0x1f]  }
 0x1e1   : > { %8914 = vmatpush3.bf16.msra.mxu1 %v9348_v37  ;;  %8903 = vmatprep.subr.bf16.mxu0 %v9428_v1  ;;  %v6055_v41 = vshll.u32 %v9377_v32, 16 }
 0x1e2   : > { %8915 = vmatprep.subr.bf16.mxu1 %v9428_v1 }
 0x1e4   : > { %8904 = vmatpush3.bf16.msra.mxu0 %v9349_v39 }
 0x1e5   : > { %8916 = vmatpush3.bf16.msra.mxu1 %v9350_v43  ;;  %8921 = vmatprep.subr.bf16.mxu0 %v9428_v1 }
 0x1e6   : > { %8933 = vmatprep.subr.bf16.mxu1 %v9428_v1 }
 0x1e7   : > { %8906 = vmatmul.mubr.msk.bf16.vlgmr.msra.gmra.mrb[116].mxu0 %vm687_vm1, %v7634_v44 }
 0x1e8   : > { %8918 = vmatmul.mubr.msk.bf16.vlgmr.msra.gmra.mrb[116].mxu1 %vm687_vm1, %v5556_v45  ;;  %8922 = vmatpush3.bf16.msra.mxu0 %v9352_v46  ;;  %v9374_v45 = vld [vmem:[%s11037_s6 + $0x50] sm:$0xff]  }
 0x1e9   : > { %8934 = vmatpush3.bf16.msra.mxu1 %v9353_v47  ;;  %8923 = vmatprep.subr.bf16.mxu0 %v9428_v1  ;;  %v9375_v47 = vld [vmem:[%s11037_s6 + $0x18] sm:$0xff]  }
 0x1ea   : > { %v3374_v50 = vpop.f32.mrb[64].mxu0  ;;  %8935 = vmatprep.subr.bf16.mxu1 %v9428_v1  ;;  %8929 = vmatprep.mubr.msk.bf16.mxu0 %vm9429_vm0, %v9428_v1 }
 0x1eb   : > { %v3380_v51 = vadd.f32 %v3374_v50, %v3290_v34  ;;  %v3452_v52 = vpop.f32.mrb[64].mxu1  ;;  %v8595_v53 = vpop.f32.mrb[65].mxu0  ;;  %8941 = vmatprep.mubr.msk.bf16.mxu1 %vm9429_vm0, %v9428_v1  ;;  %v9376_v50 = vld [vmem:[%s11037_s6 + $0x58] sm:$0xff]  }
 0x1ec   : > { %v8607_v54 = vpop.f32.mrb[65].mxu1  ;;  %v3377_v55 = vpop.f32.mrb[66].mxu0  ;;  %8924 = vmatpush3.bf16.msra.mxu0 %v9354_v48  ;;  %v6053_v48 = vshrl.u32 %v9377_v32, 16  ;;  %v9378_v53 = vld [vmem:[%s11037_s6 + $0x60] sm:$0xff]  }
 0x1ed   : > { %v3458_v57 = vadd.f32 %v3452_v52, %v3380_v51  ;;  %v3455_v58 = vpop.f32.mrb[66].mxu1  ;;  %8936 = vmatpush3.bf16.msra.mxu1 %v9355_v49  ;;  %v8596_v59 = vpop.f32.mrb[67].mxu0  ;;  %8925 = vmatprep.subr.bf16.mxu0 %v9428_v1  ;;  %v6057_v49 = vrot.slane %v6055_v41, 1  ;;  %v7710_v51 = vld [vmem:[%s9533_s26 + $0x38] sm:$0xf]  ;;  %v9379_v54 = vld [vmem:[%s11037_s6 + $0x80] sm:$0xff]  }
 0x1ee   : > { %v8608_v61 = vpop.f32.mrb[67].mxu1  ;;  %8937 = vmatprep.subr.bf16.mxu1 %v9428_v1  ;;  %v9380_v55 = vld [vmem:[%s11037_s6 + $0x68] sm:$0xff]   ;;  %v9395_v32 = vld [vmem:[%s11037_s6 + $0xe0] sm:$0xff]  }
 0x1ef   : > { %v6058_v52 = vor.u32 %v6057_v49, %v6053_v48 }
 0x1f0   : > { %8926 = vmatpush3.bf16.msra.mxu0 %v9356_v56  ;;  %v9381_v56 = vld [vmem:[%s11037_s6 + $0x88] sm:$0xff]  }
 0x1f1   : > { %8938 = vmatpush3.bf16.msra.mxu1 %v9357_v60  ;;  %8927 = vmatprep.subr.bf16.mxu0 %v9428_v1 }
 0x1f2   : > { %8939 = vmatprep.subr.bf16.mxu1 %v9428_v1 }
 0x1f4   : > { %8928 = vmatpush3.bf16.msra.mxu0 %v9358_v62 }
 0x1f5   : > { %8940 = vmatpush3.bf16.msra.mxu1 %v9359_v63  ;;  %8945 = vmatprep.subr.bf16.mxu0 %v9428_v1  ;;  %v9382_v63 = vld [vmem:[%s11037_s6 + $0x70] sm:$0xff]  }
 0x1f6   : > { %8957 = vmatprep.subr.bf16.mxu1 %v9428_v1 }
 0x1f7   : > { %8930 = vmatmul.mubr.msk.bf16.vlgmr.msra.gmra.mrb[120].mxu0 %vm687_vm1, %v7664_v0 }
 0x1f8   : > { %8942 = vmatmul.mubr.msk.bf16.vlgmr.msra.gmra.mrb[120].mxu1 %vm687_vm1, %v7678_v3  ;;  %8946 = vmatpush3.bf16.msra.mxu0 %v9360_v2 }
 0x1f9   : > { %8958 = vmatpush3.bf16.msra.mxu1 %v9361_v4  ;;  %8947 = vmatprep.subr.bf16.mxu0 %v9428_v1  ;;  %v9383_v4 = vld [vmem:[%s11037_s6 + $0x90] sm:$0xff]  }
 0x1fa   : > { %v3530_v7 = vpop.f32.mrb[68].mxu0  ;;  %8959 = vmatprep.subr.bf16.mxu1 %v9428_v1  ;;  %8953 = vmatprep.mubr.msk.bf16.mxu0 %vm9429_vm0, %v9428_v1 }
 0x1fb   : > { %v3536_v8 = vadd.f32 %v3530_v7, %v3458_v57  ;;  %v3620_v9 = vpop.f32.mrb[68].mxu1  ;;  %v8619_v10 = vpop.f32.mrb[69].mxu0  ;;  %8965 = vmatprep.mubr.msk.bf16.mxu1 %vm9429_vm0, %v9428_v1  ;;  %v7746_v7 = vld [vmem:[%s9583_s12 + $0x38] sm:$0xf] }
 0x1fc   : > { %v8631_v12 = vpop.f32.mrb[69].mxu1  ;;  %v3533_v13 = vpop.f32.mrb[70].mxu0  ;;  %8948 = vmatpush3.bf16.msra.mxu0 %v9362_v20  ;;  %v9384_v20 = vld [vmem:[%s11037_s6 + $0x78] sm:$0xff]   ;;  %v9387_v10 = vld [vmem:[%s11037_s6 + $0xc0] sm:$0xff]  }
 0x1fd   : > { %v3626_v15 = vadd.f32 %v3620_v9, %v3536_v8  ;;  %v3623_v16 = vpop.f32.mrb[70].mxu1  ;;  %8960 = vmatpush3.bf16.msra.mxu1 %v9363_v6  ;;  %v8620_v17 = vpop.f32.mrb[71].mxu0  ;;  %8949 = vmatprep.subr.bf16.mxu0 %v9428_v1  ;;  %v9385_v6 = vld [vmem:[%s11037_s6 + $0x98] sm:$0xff]   ;;  %v9386_v8 = vld [vmem:[%s11037_s6 + $0xa0] sm:$0xff]   ;;  %v9388_v12 = vld [vmem:[%s11037_s6 + $0xa8] sm:$0xff]  }
 0x1fe   : > { %v8632_v19 = vpop.f32.mrb[71].mxu1  ;;  %8961 = vmatprep.subr.bf16.mxu1 %v9428_v1  ;;  %v7760_v9 = vld [vmem:[%s9633_s22 + $0x38] sm:$0xf]  ;;  %v9389_v13 = vld [vmem:[%s11037_s6 + $0xc8] sm:$0xff]  }
 0x1ff   : > { %v3634_v21 = vadd.f32 %v10652_v42, %v3626_v15 }
 0x200   : > { %8950 = vmatpush3.bf16.msra.mxu0 %v9364_v14 }
 0x201   : > { %v3635_v25 = vmax.f32 %v3634_v21, 0.0  ;;  %8962 = vmatpush3.bf16.msra.mxu1 %v9365_v18  ;;  %8951 = vmatprep.subr.bf16.mxu0 %v9428_v1  ;;  %v6301_v18 = vshll.u32 %v9394_v11, 16 }
 0x202   : > { %8963 = vmatprep.subr.bf16.mxu1 %v9428_v1 }
 0x203   : > { %v3636_v42 = vpack.c.bf16 %v3635_v25, %v3635_v25 }
 0x204   : > { %8952 = vmatpush3.bf16.msra.mxu0 %v9366_v24 }
 0x205   : > { %7331 = vst.msk [vmem:[%s10298_s24 + $0xc] sm:$0xf] %vm1393_vm2, %v3636_v42  ;;  %8964 = vmatpush3.bf16.msra.mxu1 %v9367_v26  ;;  %8969 = vmatprep.subr.bf16.mxu0 %v9428_v1  ;;  %v9391_v26 = vld [vmem:[%s11037_s6 + $0xd0] sm:$0xff]  }
 0x206   : > { %8981 = vmatprep.subr.bf16.mxu1 %v9428_v1 }
 0x207   : > { %8954 = vmatmul.mubr.msk.bf16.vlgmr.msra.gmra.mrb[124].mxu0 %vm687_vm1, %v5802_v27  ;;  %v6299_v27 = vshrl.u32 %v9394_v11, 16 }
 0x208   : > { %8966 = vmatmul.mubr.msk.bf16.vlgmr.msra.gmra.mrb[124].mxu1 %vm687_vm1, %v7711_v29  ;;  %8970 = vmatpush3.bf16.msra.mxu0 %v9369_v28  ;;  %v6303_v28 = vrot.slane %v6301_v18, 1  ;;  %v9392_v29 = vld [vmem:[%s11037_s6 + $0xb8] sm:$0xff]  }
 0x209   : > { %8982 = vmatpush3.bf16.msra.mxu1 %v9370_v30  ;;  %8971 = vmatprep.subr.bf16.mxu0 %v9428_v1  ;;  %v9393_v30 = vld [vmem:[%s11037_s6 + $0xd8] sm:$0xff]  }
 0x20a   : > { %v3720_v34 = vpop.f32.mrb[72].mxu0  ;;  %8983 = vmatprep.subr.bf16.mxu1 %v9428_v1  ;;  %8977 = vmatprep.mubr.msk.bf16.mxu0 %vm9429_vm0, %v9428_v1 }
 0x20b   : > { %v3787_v35 = vpop.f32.mrb[72].mxu1  ;;  %v8643_v36 = vpop.f32.mrb[73].mxu0  ;;  %8989 = vmatprep.mubr.msk.bf16.mxu1 %vm9429_vm0, %v9428_v1 }
 0x20c   : > { %v3788_v37 = vadd.f32 %v3787_v35, %v3720_v34  ;;  %v8655_v38 = vpop.f32.mrb[73].mxu1  ;;  %v3723_v39 = vpop.f32.mrb[74].mxu0  ;;  %8972 = vmatpush3.bf16.msra.mxu0 %v9371_v31  ;;  %v6304_v31 = vor.u32 %v6303_v28, %v6299_v27  ;;  %v9396_v34 = vld [vmem:[%s11037_s6 + $0x100] sm:$0xff]   ;;  %v9397_v35 = vld [vmem:[%s11037_s6 + $0xe8] sm:$0xff]   ;;  %v9403_v36 = vld [vmem:[%s9640_s25 + $0x38] sm:$0x1f]  }
 0x20d   : > { %v3790_v43 = vpop.f32.mrb[74].mxu1  ;;  %8984 = vmatpush3.bf16.msra.mxu1 %v9372_v33  ;;  %v8644_v44 = vpop.f32.mrb[75].mxu0  ;;  %8973 = vmatprep.subr.bf16.mxu0 %v9428_v1  ;;  %v7790_v33 = vld [vmem:[%s9640_s25 + $0x38] sm:$0xf] }
 0x20e   : > { %v8656_v46 = vpop.f32.mrb[75].mxu1  ;;  %8985 = vmatprep.subr.bf16.mxu1 %v9428_v1 }
 0x20f   : > { %v6547_v46 = vshll.u32 %v9403_v36, 16 }
 0x210   : > { %8974 = vmatpush3.bf16.msra.mxu0 %v9373_v40 }
 0x211   : > { %8986 = vmatpush3.bf16.msra.mxu1 %v9374_v45  ;;  %8975 = vmatprep.subr.bf16.mxu0 %v9428_v1  ;;  %v9399_v45 = vld [vmem:[%s11037_s6 + $0xf0] sm:$0xff]  }
 0x212   : > { %8987 = vmatprep.subr.bf16.mxu1 %v9428_v1 }
 0x214   : > { %8976 = vmatpush3.bf16.msra.mxu0 %v9375_v47 }
 0x215   : > { %8988 = vmatpush3.bf16.msra.mxu1 %v9376_v50  ;;  %8993 = vmatprep.subr.bf16.mxu0 %v9428_v1  ;;  %v9400_v50 = vld [vmem:[%s11037_s6 + $0x110] sm:$0xff]  }
 0x216   : > { %9005 = vmatprep.subr.bf16.mxu1 %v9428_v1 }
 0x217   : > { %8978 = vmatmul.mubr.msk.bf16.vlgmr.msra.gmra.mrb[128].mxu0 %vm687_vm1, %v7710_v51 }
 0x218   : > { %8990 = vmatmul.mubr.msk.bf16.vlgmr.msra.gmra.mrb[128].mxu1 %vm687_vm1, %v6058_v52  ;;  %8994 = vmatpush3.bf16.msra.mxu0 %v9378_v53  ;;  %v9401_v52 = vld [vmem:[%s11037_s6 + $0xf8] sm:$0xff]   ;;  %v6545_v53 = vshrl.u32 %v9403_v36, 16 }
 0x219   : > { %9006 = vmatpush3.bf16.msra.mxu1 %v9379_v54  ;;  %8995 = vmatprep.subr.bf16.mxu0 %v9428_v1  ;;  %v6549_v54 = vrot.slane %v6547_v46, 1 }
 0x21a   : > { %v3876_v57 = vpop.f32.mrb[76].mxu0  ;;  %9007 = vmatprep.subr.bf16.mxu1 %v9428_v1  ;;  %9001 = vmatprep.mubr.msk.bf16.mxu0 %vm9429_vm0, %v9428_v1 }
 0x21b   : > { %v3882_v58 = vadd.f32 %v3876_v57, %v3788_v37  ;;  %v3954_v59 = vpop.f32.mrb[76].mxu1  ;;  %v8667_v60 = vpop.f32.mrb[77].mxu0  ;;  %9013 = vmatprep.mubr.msk.bf16.mxu1 %vm9429_vm0, %v9428_v1  ;;  %v9398_v37 = vld [vmem:[%s11037_s6 + $0x108] sm:$0xff]   ;;  %v6550_v57 = vor.u32 %v6549_v54, %v6545_v53 }
 0x21c   : > { %v8679_v61 = vpop.f32.mrb[77].mxu1  ;;  %v3879_v62 = vpop.f32.mrb[78].mxu0  ;;  %8996 = vmatpush3.bf16.msra.mxu0 %v9380_v55  ;;  %v9402_v55 = vld [vmem:[%s11037_s6 + $0x118] sm:$0xff]  }
 0x21d   : > { %v3960_v0 = vadd.f32 %v3954_v59, %v3882_v58  ;;  %v3957_v2 = vpop.f32.mrb[78].mxu1  ;;  %9008 = vmatpush3.bf16.msra.mxu1 %v9381_v56  ;;  %v8668_v3 = vpop.f32.mrb[79].mxu0  ;;  %8997 = vmatprep.subr.bf16.mxu0 %v9428_v1  ;;  %v7804_v56 = vld [vmem:[%s9691_s20 + $0x38] sm:$0xf]  ;;  %v11008_v59 = vld [vmem:[%s11038_s7] ss:$0 sm:$0xff] }
 0x21e   : > { %v8680_v5 = vpop.f32.mrb[79].mxu1  ;;  %9009 = vmatprep.subr.bf16.mxu1 %v9428_v1 }
 0x220   : > { %8998 = vmatpush3.bf16.msra.mxu0 %v9382_v63 }
 0x221   : > { %9010 = vmatpush3.bf16.msra.mxu1 %v9383_v4  ;;  %8999 = vmatprep.subr.bf16.mxu0 %v9428_v1 }
 0x222   : > { %9011 = vmatprep.subr.bf16.mxu1 %v9428_v1 }
 0x224   : > { %9000 = vmatpush3.bf16.msra.mxu0 %v9384_v20 }
 0x225   : > { %9012 = vmatpush3.bf16.msra.mxu1 %v9385_v6  ;;  %9017 = vmatprep.subr.bf16.mxu0 %v9428_v1 }
 0x226   : > { %9029 = vmatprep.subr.bf16.mxu1 %v9428_v1 }
 0x227   : > { %9002 = vmatmul.mubr.msk.bf16.vlgmr.msra.gmra.mrb[132].mxu0 %vm687_vm1, %v7746_v7 }
 0x228   : > { %9014 = vmatmul.mubr.msk.bf16.vlgmr.msra.gmra.mrb[132].mxu1 %vm687_vm1, %v7760_v9  ;;  %9018 = vmatpush3.bf16.msra.mxu0 %v9386_v8 }
 0x229   : > { %9030 = vmatpush3.bf16.msra.mxu1 %v9387_v10  ;;  %9019 = vmatprep.subr.bf16.mxu0 %v9428_v1 }
 0x22a   : > { %v4032_v14 = vpop.f32.mrb[80].mxu0  ;;  %9031 = vmatprep.subr.bf16.mxu1 %v9428_v1  ;;  %9025 = vmatprep.mubr.msk.bf16.mxu0 %vm9429_vm0, %v9428_v1 }
 0x22b   : > { %v4038_v15 = vadd.f32 %v4032_v14, %v3960_v0  ;;  %v4122_v16 = vpop.f32.mrb[80].mxu1  ;;  %v8691_v17 = vpop.f32.mrb[81].mxu0  ;;  %9037 = vmatprep.mubr.msk.bf16.mxu1 %vm9429_vm0, %v9428_v1 }
 0x22c   : > { %v8703_v19 = vpop.f32.mrb[81].mxu1  ;;  %v4035_v21 = vpop.f32.mrb[82].mxu0  ;;  %9020 = vmatpush3.bf16.msra.mxu0 %v9388_v12 }
 0x22d   : > { %v4128_v23 = vadd.f32 %v4122_v16, %v4038_v15  ;;  %v4125_v24 = vpop.f32.mrb[82].mxu1  ;;  %9032 = vmatpush3.bf16.msra.mxu1 %v9389_v13  ;;  %v8692_v25 = vpop.f32.mrb[83].mxu0  ;;  %9021 = vmatprep.subr.bf16.mxu0 %v9428_v1 }
 0x22e   : > { %v8704_v42 = vpop.f32.mrb[83].mxu1  ;;  %9033 = vmatprep.subr.bf16.mxu1 %v9428_v1 }
 0x230   : > { %9022 = vmatpush3.bf16.msra.mxu0 %v9390_v22 }
 0x231   : > { %9034 = vmatpush3.bf16.msra.mxu1 %v9391_v26  ;;  %9023 = vmatprep.subr.bf16.mxu0 %v9428_v1 }
 0x232   : > { %9035 = vmatprep.subr.bf16.mxu1 %v9428_v1 }
 0x234   : > { %9024 = vmatpush3.bf16.msra.mxu0 %v9392_v29 }
 0x235   : > { %9036 = vmatpush3.bf16.msra.mxu1 %v9393_v30  ;;  %9041 = vmatprep.subr.bf16.mxu0 %v9428_v1 }
 0x236   : > { %9053 = vmatprep.subr.bf16.mxu1 %v9428_v1 }
 0x237   : > { %9026 = vmatmul.mubr.msk.bf16.vlgmr.msra.gmra.mrb[136].mxu0 %vm687_vm1, %v6304_v31 }
 0x238   : > { %9038 = vmatmul.mubr.msk.bf16.vlgmr.msra.gmra.mrb[136].mxu1 %vm687_vm1, %v7790_v33  ;;  %9042 = vmatpush3.bf16.msra.mxu0 %v9395_v32 }
 0x239   : > { %9054 = vmatpush3.bf16.msra.mxu1 %v9396_v34  ;;  %9043 = vmatprep.subr.bf16.mxu0 %v9428_v1 }
 0x23a   : > { %v4200_v38 = vpop.f32.mrb[84].mxu0  ;;  %9055 = vmatprep.subr.bf16.mxu1 %v9428_v1  ;;  %9049 = vmatprep.mubr.msk.bf16.mxu0 %vm9429_vm0, %v9428_v1 }
 0x23b   : > { %v4206_v39 = vadd.f32 %v4200_v38, %v4128_v23  ;;  %v4278_v40 = vpop.f32.mrb[84].mxu1  ;;  %v8715_v41 = vpop.f32.mrb[85].mxu0  ;;  %9061 = vmatprep.mubr.msk.bf16.mxu1 %vm9429_vm0, %v9428_v1 }
 0x23c   : > { %v8727_v43 = vpop.f32.mrb[85].mxu1  ;;  %v4203_v44 = vpop.f32.mrb[86].mxu0  ;;  %9044 = vmatpush3.bf16.msra.mxu0 %v9397_v35 }
 0x23d   : > { %v4284_v47 = vadd.f32 %v4278_v40, %v4206_v39  ;;  %v4281_v48 = vpop.f32.mrb[86].mxu1  ;;  %9056 = vmatpush3.bf16.msra.mxu1 %v9398_v37  ;;  %v8716_v49 = vpop.f32.mrb[87].mxu0  ;;  %9045 = vmatprep.subr.bf16.mxu0 %v9428_v1 }
 0x23e   : > { %v8728_v51 = vpop.f32.mrb[87].mxu1  ;;  %9057 = vmatprep.subr.bf16.mxu1 %v9428_v1 }
 0x240   : > { %9046 = vmatpush3.bf16.msra.mxu0 %v9399_v45 }
 0x241   : > { %9058 = vmatpush3.bf16.msra.mxu1 %v9400_v50  ;;  %9047 = vmatprep.subr.bf16.mxu0 %v9428_v1 }
 0x242   : > { %9059 = vmatprep.subr.bf16.mxu1 %v9428_v1 }
 0x244   : > { %9048 = vmatpush3.bf16.msra.mxu0 %v9401_v52 }
 0x245   : > { %9060 = vmatpush3.bf16.msra.mxu1 %v9402_v55 }
 0x247   : > { %9050 = vmatmul.mubr.msk.bf16.vlgmr.msra.gmra.mrb[140].mxu0 %vm687_vm1, %v7804_v56 }
 0x248   : > { %9062 = vmatmul.mubr.msk.bf16.vlgmr.msra.gmra.mrb[140].mxu1 %vm687_vm1, %v6550_v57 }
 0x24a   : > { %v4368_v58 = vpop.f32.mrb[88].mxu0 }
 0x24b   : > { %v4374_v60 = vadd.f32 %v4368_v58, %v4284_v47  ;;  %v4468_v61 = vpop.f32.mrb[88].mxu1  ;;  %v8739_v62 = vpop.f32.mrb[89].mxu0 }
 0x24c   : > { %v8751_v63 = vpop.f32.mrb[89].mxu1  ;;  %v4371_v1 = vpop.f32.mrb[90].mxu0 }
 0x24d   : > { %v4382_v0 = vadd.f32 %v11008_v59, %v4374_v60  ;;  %v4471_v2 = vpop.f32.mrb[90].mxu1  ;;  %v8740_v3 = vpop.f32.mrb[91].mxu0 }
 0x24e   : > { %v8752_v4 = vpop.f32.mrb[91].mxu1 }
 0x24f   : > { %v4383_v5 = vmax.f32 %v4382_v0, 0.0 }
 0x251   : > { %v4384_v20 = vpack.c.bf16 %v4383_v5, %v4383_v5 }
 0x253   : > { %7457 = vst.msk [vmem:[%s10298_s24 + $0x10] sm:$0xf] %vm1393_vm2, %v4384_v20 }
 0x25a   : > { %v4535_v6 = vpop.f32.mrb[92].mxu0 }
 0x25b   : > { %v4536_v7 = vadd.f32 %v4535_v6, %v4468_v61  ;;  %v4624_v8 = vpop.f32.mrb[92].mxu1  ;;  %v8763_v9 = vpop.f32.mrb[93].mxu0 }
 0x25c   : > { %v8775_v10 = vpop.f32.mrb[93].mxu1  ;;  %v4538_v11 = vpop.f32.mrb[94].mxu0 }
 0x25d   : > { %v4630_v12 = vadd.f32 %v4624_v8, %v4536_v7  ;;  %v4627_v13 = vpop.f32.mrb[94].mxu1  ;;  %v8764_v14 = vpop.f32.mrb[95].mxu0 }
 0x25e   : > { %v8776_v15 = vpop.f32.mrb[95].mxu1 }
 0x26a   : > { %v4702_v16 = vpop.f32.mrb[96].mxu0 }
 0x26b   : > { %v4708_v17 = vadd.f32 %v4702_v16, %v4630_v12  ;;  %v4780_v18 = vpop.f32.mrb[96].mxu1  ;;  %v8787_v19 = vpop.f32.mrb[97].mxu0 }
 0x26c   : > { %v8799_v21 = vpop.f32.mrb[97].mxu1  ;;  %v4705_v22 = vpop.f32.mrb[98].mxu0 }
 0x26d   : > { %v4786_v23 = vadd.f32 %v4780_v18, %v4708_v17  ;;  %v4783_v24 = vpop.f32.mrb[98].mxu1  ;;  %v8788_v25 = vpop.f32.mrb[99].mxu0 }
 0x26e   : > { %v8800_v26 = vpop.f32.mrb[99].mxu1 }
 0x27a   : > { %v4870_v42 = vpop.f32.mrb[100].mxu0 }
 0x27b   : > { %v4876_v27 = vadd.f32 %v4870_v42, %v4786_v23  ;;  %v4948_v28 = vpop.f32.mrb[100].mxu1  ;;  %v8811_v29 = vpop.f32.mrb[101].mxu0 }
 0x27c   : > { %v8823_v30 = vpop.f32.mrb[101].mxu1  ;;  %v4873_v31 = vpop.f32.mrb[102].mxu0 }
 0x27d   : > { %v4954_v32 = vadd.f32 %v4948_v28, %v4876_v27  ;;  %v4951_v33 = vpop.f32.mrb[102].mxu1  ;;  %v8812_v34 = vpop.f32.mrb[103].mxu0 }
 0x27e   : > { %v8824_v35 = vpop.f32.mrb[103].mxu1 }
 0x28a   : > { %v5026_v36 = vpop.f32.mrb[104].mxu0 }
 0x28b   : > { %v5032_v37 = vadd.f32 %v5026_v36, %v4954_v32  ;;  %v5116_v38 = vpop.f32.mrb[104].mxu1  ;;  %v8835_v39 = vpop.f32.mrb[105].mxu0 }
 0x28c   : > { %v8847_v40 = vpop.f32.mrb[105].mxu1  ;;  %v5029_v41 = vpop.f32.mrb[106].mxu0 }
 0x28d   : > { %v5122_v43 = vadd.f32 %v5116_v38, %v5032_v37  ;;  %v5119_v44 = vpop.f32.mrb[106].mxu1  ;;  %v8836_v45 = vpop.f32.mrb[107].mxu0 }
 0x28e   : > { %v8848_v46 = vpop.f32.mrb[107].mxu1 }
 0x28f   : > { %v5130_v47 = vadd.f32 %v11008_v59, %v5122_v43 }
 0x291   : > { %v5131_v48 = vmax.f32 %v5130_v47, 0.0 }
 0x293   : > { %v5132_v49 = vpack.c.bf16 %v5131_v48, %v5131_v48 }
 0x295   : > { %7583 = vst.msk [vmem:[%s10298_s24 + $0x14] sm:$0xf] %vm1393_vm2, %v5132_v49 }
 0x29a   : > { %v5216_v50 = vpop.f32.mrb[108].mxu0 }
 0x29b   : > { %v5283_v51 = vpop.f32.mrb[108].mxu1  ;;  %v8859_v52 = vpop.f32.mrb[109].mxu0 }
 0x29c   : > { %v5284_v53 = vadd.f32 %v5283_v51, %v5216_v50  ;;  %v8871_v54 = vpop.f32.mrb[109].mxu1  ;;  %v5219_v55 = vpop.f32.mrb[110].mxu0 }
 0x29d   : > { %v5286_v56 = vpop.f32.mrb[110].mxu1  ;;  %v8860_v57 = vpop.f32.mrb[111].mxu0 }
 0x29e   : > { %v8872_v58 = vpop.f32.mrb[111].mxu1 }
 0x2aa   : > { %v5372_v60 = vpop.f32.mrb[112].mxu0 }
 0x2ab   : > { %v5378_v61 = vadd.f32 %v5372_v60, %v5284_v53  ;;  %v5450_v62 = vpop.f32.mrb[112].mxu1  ;;  %v8883_v63 = vpop.f32.mrb[113].mxu0 }
 0x2ac   : > { %v8895_v1 = vpop.f32.mrb[113].mxu1  ;;  %v5375_v0 = vpop.f32.mrb[114].mxu0 }
 0x2ad   : > { %v5456_v2 = vadd.f32 %v5450_v62, %v5378_v61  ;;  %v5453_v3 = vpop.f32.mrb[114].mxu1  ;;  %v8884_v4 = vpop.f32.mrb[115].mxu0 }
 0x2ae   : > { %v8896_v5 = vpop.f32.mrb[115].mxu1 }
 0x2ba   : > { %v5528_v20 = vpop.f32.mrb[116].mxu0 }
 0x2bb   : > { %v5534_v6 = vadd.f32 %v5528_v20, %v5456_v2  ;;  %v5618_v7 = vpop.f32.mrb[116].mxu1  ;;  %v8907_v8 = vpop.f32.mrb[117].mxu0 }
 0x2bc   : > { %v8919_v9 = vpop.f32.mrb[117].mxu1  ;;  %v5531_v10 = vpop.f32.mrb[118].mxu0 }
 0x2bd   : > { %v5624_v11 = vadd.f32 %v5618_v7, %v5534_v6  ;;  %v5621_v12 = vpop.f32.mrb[118].mxu1  ;;  %v8908_v13 = vpop.f32.mrb[119].mxu0 }
 0x2be   : > { %v8920_v14 = vpop.f32.mrb[119].mxu1 }
 0x2ca   : > { %v5696_v15 = vpop.f32.mrb[120].mxu0 }
 0x2cb   : > { %v5702_v16 = vadd.f32 %v5696_v15, %v5624_v11  ;;  %v5774_v17 = vpop.f32.mrb[120].mxu1  ;;  %v8931_v18 = vpop.f32.mrb[121].mxu0 }
 0x2cc   : > { %v8943_v19 = vpop.f32.mrb[121].mxu1  ;;  %v5699_v21 = vpop.f32.mrb[122].mxu0 }
 0x2cd   : > { %v5780_v22 = vadd.f32 %v5774_v17, %v5702_v16  ;;  %v5777_v23 = vpop.f32.mrb[122].mxu1  ;;  %v8932_v24 = vpop.f32.mrb[123].mxu0 }
 0x2ce   : > { %v8944_v25 = vpop.f32.mrb[123].mxu1 }
 0x2da   : > { %v5864_v26 = vpop.f32.mrb[124].mxu0 }
 0x2db   : > { %v5870_v42 = vadd.f32 %v5864_v26, %v5780_v22  ;;  %v5964_v27 = vpop.f32.mrb[124].mxu1  ;;  %v8955_v28 = vpop.f32.mrb[125].mxu0 }
 0x2dc   : > { %v8967_v29 = vpop.f32.mrb[125].mxu1  ;;  %v5867_v30 = vpop.f32.mrb[126].mxu0 }
 0x2dd   : > { %v5878_v31 = vadd.f32 %v11008_v59, %v5870_v42  ;;  %v5967_v32 = vpop.f32.mrb[126].mxu1  ;;  %v8956_v33 = vpop.f32.mrb[127].mxu0 }
 0x2de   : > { %v8968_v34 = vpop.f32.mrb[127].mxu1 }
 0x2df   : > { %v5879_v35 = vmax.f32 %v5878_v31, 0.0 }
 0x2e1   : > { %v5880_v36 = vpack.c.bf16 %v5879_v35, %v5879_v35 }
 0x2e3   : > { %7709 = vst.msk [vmem:[%s10298_s24 + $0x18] sm:$0xf] %vm1393_vm2, %v5880_v36 }
 0x2ea   : > { %v6031_v37 = vpop.f32.mrb[128].mxu0 }
 0x2eb   : > { %v6032_v38 = vadd.f32 %v6031_v37, %v5964_v27  ;;  %v6120_v39 = vpop.f32.mrb[128].mxu1  ;;  %v8979_v40 = vpop.f32.mrb[129].mxu0 }
 0x2ec   : > { %v8991_v41 = vpop.f32.mrb[129].mxu1  ;;  %v6034_v43 = vpop.f32.mrb[130].mxu0 }
 0x2ed   : > { %v6126_v44 = vadd.f32 %v6120_v39, %v6032_v38  ;;  %v6123_v45 = vpop.f32.mrb[130].mxu1  ;;  %v8980_v46 = vpop.f32.mrb[131].mxu0 }
 0x2ee   : > { %v8992_v47 = vpop.f32.mrb[131].mxu1 }
 0x2fa   : > { %v6198_v48 = vpop.f32.mrb[132].mxu0 }
 0x2fb   : > { %v6204_v49 = vadd.f32 %v6198_v48, %v6126_v44  ;;  %v6276_v50 = vpop.f32.mrb[132].mxu1  ;;  %v9003_v51 = vpop.f32.mrb[133].mxu0 }
 0x2fc   : > { %v9015_v52 = vpop.f32.mrb[133].mxu1  ;;  %v6201_v53 = vpop.f32.mrb[134].mxu0 }
 0x2fd   : > { %v6282_v54 = vadd.f32 %v6276_v50, %v6204_v49  ;;  %v6279_v55 = vpop.f32.mrb[134].mxu1  ;;  %v9004_v56 = vpop.f32.mrb[135].mxu0 }
 0x2fe   : > { %v9016_v57 = vpop.f32.mrb[135].mxu1 }
 0x30a   : > { %v6366_v58 = vpop.f32.mrb[136].mxu0 }
 0x30b   : > { %v6372_v60 = vadd.f32 %v6366_v58, %v6282_v54  ;;  %v6444_v61 = vpop.f32.mrb[136].mxu1  ;;  %v9027_v62 = vpop.f32.mrb[137].mxu0 }
 0x30c   : > { %v9039_v63 = vpop.f32.mrb[137].mxu1  ;;  %v6369_v1 = vpop.f32.mrb[138].mxu0 }
 0x30d   : > { %v6450_v0 = vadd.f32 %v6444_v61, %v6372_v60  ;;  %v6447_v2 = vpop.f32.mrb[138].mxu1  ;;  %v9028_v3 = vpop.f32.mrb[139].mxu0 }
 0x30e   : > { %v9040_v4 = vpop.f32.mrb[139].mxu1 }
 0x31a   : > { %v6522_v5 = vpop.f32.mrb[140].mxu0 }
 0x31b   : > { %v6528_v20 = vadd.f32 %v6522_v5, %v6450_v0  ;;  %v6612_v6 = vpop.f32.mrb[140].mxu1  ;;  %v9051_v7 = vpop.f32.mrb[141].mxu0 }
 0x31c   : > { %v9063_v8 = vpop.f32.mrb[141].mxu1  ;;  %v6525_v9 = vpop.f32.mrb[142].mxu0 }
 0x31d   : > { %v6618_v10 = vadd.f32 %v6612_v6, %v6528_v20  ;;  %v6615_v11 = vpop.f32.mrb[142].mxu1  ;;  %v9052_v12 = vpop.f32.mrb[143].mxu0 }
 0x31e   : > { %v9064_v13 = vpop.f32.mrb[143].mxu1 }
 0x31f   : > { %v6626_v14 = vadd.f32 %v11008_v59, %v6618_v10 }
 0x321   : > { %v6627_v15 = vmax.f32 %v6626_v14, 0.0 }
 0x323   : > { %v6628_v16 = vpack.c.bf16 %v6627_v15, %v6627_v15 }
 0x325   : > { %7835 = vst.msk [vmem:[%s10298_s24 + $0x1c] sm:$0xf] %vm1393_vm2, %v6628_v16 }
 0x326 PF: > { %s18_s29 = sadd.s32 1, %s9426_s29   ;;  %s11040_s27 = smov %s9422_s28 }
 0x327   : > { %p15_p5 = scmp.ge.s32.totalorder %s18_s29, 4   ;;  %s11041_s28 = smov %s11043_s30 }
 0x329   :  { %17 = sbr.rel (!%p15_p5) target bundleno = 2 (0x2), region = 154 }

</bundles_post_ra>
